<compile_context>
chip_gen: v7x
topology: tpu7x:2x2x1
jax: 0.10.0
libtpu: 0.0.40
codegen_flags: <defaults>
</compile_context>

<pallas_src>
import numpy as np

import jax
import jax.numpy as jnp
from jax.experimental import pallas as pl
from jax.experimental.pallas import tpu as pltpu


# --------------------- constant spatial operators (host, numpy) --------------------- #

def _spatial_operators(H, W):
    """0/1 matrices implementing dw-conv tap shifts (+zero pad), 2x2 pool gathers, 2x up."""
    def shift_mats(h, w):
        s = h * w
        yy, xx = np.divmod(np.arange(s), w)
        mats = np.zeros((9, s, s), np.float32)
        k = 0
        for dy in (-1, 0, 1):
            for dx in (-1, 0, 1):
                ys, xs = yy + dy, xx + dx
                valid = (ys >= 0) & (ys < h) & (xs >= 0) & (xs < w)
                src = (ys * w + xs)[valid]
                dst = np.arange(s)[valid]
                mats[k, src, dst] = 1.0
                k += 1
        return mats

    def pool_mats(h, w):
        ho, wo = h // 2, w // 2
        s, so = h * w, ho * wo
        yo, xo = np.divmod(np.arange(so), wo)
        mats = np.zeros((4, s, so), np.float32)
        for k, (dy, dx) in enumerate(((0, 0), (0, 1), (1, 0), (1, 1))):
            src = (2 * yo + dy) * w + (2 * xo + dx)
            mats[k, src, np.arange(so)] = 1.0
        return mats

    def up_mat(h, w):
        ho, wo = h // 2, w // 2
        s, so = h * w, ho * wo
        y, x = np.divmod(np.arange(s), w)
        src = (y // 2) * wo + (x // 2)
        m = np.zeros((so, s), np.float32)
        m[src, np.arange(s)] = 1.0
        return m

    return (shift_mats(H, W), shift_mats(H // 2, W // 2),
            pool_mats(H, W), up_mat(H, W))


# -------------------------------- fused Pallas kernel -------------------------------- #

def _unet_kernel(
    x_ref,                       # (1, Cin, S)
    m1_ref, m2_ref,              # (9, S, S), (9, S/4, S/4): dw tap shift+pad operators
    pool_ref, up_ref,            # (4, S, S/4) maxpool gathers, (S/4, S) nearest upsample
    e1dw_w, e1dw_b, e1pw_w, e1pw_b,
    e2dw_w, e2dw_b, e2pw_w, e2pw_b,
    ddw_wu, ddw_bu, ddw_ws, ddw_bs,
    dpw_wu, dpw_ws, dpw_b,
    opw_w, opw_b,
    o_ref,                       # (1, Cin, S)
):
    def dw(x, m_ref, w_ref, b_ref):
        # Depthwise 3x3 (zero pad 1):  sum_k (x * w_k) @ M_k, M_k = per-tap shift+mask.
        acc = jnp.zeros(x.shape, jnp.float32)
        for k in range(9):
            acc = acc + jnp.dot(x * w_ref[k], m_ref[k],
                                preferred_element_type=jnp.float32)
        return acc + b_ref[...]

    def pw(x, w_ref, b_ref, relu=True):
        # Pointwise 1x1: (Cout,Cin) @ (Cin,S) keeps the long S axis on lanes / MXU width.
        y = jnp.dot(w_ref[...], x, preferred_element_type=jnp.float32) + b_ref[...]
        return jnp.maximum(y, 0.0) if relu else y

    x = x_ref[0]                                                        # (Cin, S)

    # encoder level 1
    e1 = pw(dw(x, m1_ref, e1dw_w, e1dw_b), e1pw_w, e1pw_b)              # (f, S)

    # 2x2 max-pool: elementwise max over the 4 window-position gathers
    p = [jnp.dot(e1, pool_ref[k], preferred_element_type=jnp.float32) for k in range(4)]
    d = jnp.maximum(jnp.maximum(p[0], p[1]), jnp.maximum(p[2], p[3]))   # (f, S/4)

    # encoder level 2
    e2 = pw(dw(d, m2_ref, e2dw_w, e2dw_b), e2pw_w, e2pw_b)              # (2f, S/4)

    # nearest-neighbor 2x upsample
    u = jnp.dot(e2, up_ref[...], preferred_element_type=jnp.float32)    # (2f, S)

    # decoder on concat([u, e1]): the concat is never materialized -- the decoder's
    # depthwise/pointwise weights are split into the u-part and the skip(e1)-part.
    du = dw(u, m1_ref, ddw_wu, ddw_bu)                                  # (2f, S)
    ds = dw(e1, m1_ref, ddw_ws, ddw_bs)                                 # (f, S)
    d1 = (jnp.dot(dpw_wu[...], du, preferred_element_type=jnp.float32)
          + jnp.dot(dpw_ws[...], ds, preferred_element_type=jnp.float32)
          + dpw_b[...])
    d1 = jnp.maximum(d1, 0.0)                                           # (f, S)

    # output 1x1 head with GeneratorDepthWise's trailing nn.ReLU() fused in.
    o_ref[0] = pw(d1, opw_w, opw_b)                                     # (Cin, S)


# ------------------------------------ wrapper ---------------------------------------- #

def generator_depthwise_forward(params, x_nchw):
    """Forward pass. Input/output NCHW (PyTorch convention). One fused pallas_call."""
    N, C, H, W = x_nchw.shape
    f = params["enc1_pw_w"].shape[0]
    S = H * W

    m1_np, m2_np, pool_np, up_np = _spatial_operators(H, W)

    def dw_args(w, b):  # (C,3,3),(C,) -> per-tap per-channel scale (9,C,1) and bias (C,1)
        c = w.shape[0]
        return jnp.transpose(w.reshape(c, 9), (1, 0))[:, :, None], b[:, None]

    e1dw_w, e1dw_b = dw_args(params["enc1_dw_w"], params["enc1_dw_b"])
    e2dw_w, e2dw_b = dw_args(params["enc2_dw_w"], params["enc2_dw_b"])
    ddw_w, ddw_b = dw_args(params["dec1_dw_w"], params["dec1_dw_b"])

    operands = [
        x_nchw.reshape(N, C, S),                       # free reshape; no transpose needed
        jnp.asarray(m1_np), jnp.asarray(m2_np),
        jnp.asarray(pool_np), jnp.asarray(up_np),
        e1dw_w, e1dw_b, params["enc1_pw_w"], params["enc1_pw_b"][:, None],
        e2dw_w, e2dw_b, params["enc2_pw_w"], params["enc2_pw_b"][:, None],
        ddw_w[:, :2 * f], ddw_b[:2 * f], ddw_w[:, 2 * f:], ddw_b[2 * f:],
        params["dec1_pw_w"][:, :2 * f], params["dec1_pw_w"][:, 2 * f:],
        params["dec1_pw_b"][:, None],
        params["out_pw_w"], params["out_pw_b"][:, None],
    ]
    operands = [a.astype(jnp.float32) for a in operands]

    in_specs = [pl.BlockSpec((1, C, S), lambda n: (n, 0, 0))]
    for a in operands[1:]:
        zeros = (0,) * a.ndim
        in_specs.append(pl.BlockSpec(a.shape, lambda n, z=zeros: z))

    out = pl.pallas_call(
        _unet_kernel,
        out_shape=jax.ShapeDtypeStruct((N, C, S), jnp.float32),
        grid=(N,),
        in_specs=in_specs,
        out_specs=pl.BlockSpec((1, C, S), lambda n: (n, 0, 0)),
        compiler_params=pltpu.CompilerParams(
            dimension_semantics=("parallel",)),       # v7x: one batch element per TensorCore
    )(*operands)
    return out.reshape(N, C, H, W)


# ------------------------------ params & pure-JAX reference -------------------------- #

def init_params(key, cin=4, f=8):
    ks = jax.random.split(key, 14)
    s = 0.1
    dw = lambda k, c: s * jax.random.normal(k, (c, 3, 3), jnp.float32)
    pw = lambda k, co, ci: s * jax.random.normal(k, (co, ci), jnp.float32)
    b = lambda k, c: s * jax.random.normal(k, (c,), jnp.float32)
    return {
        "enc1_dw_w": dw(ks[0], cin), "enc1_dw_b": b(ks[1], cin),
        "enc1_pw_w": pw(ks[2], f, cin), "enc1_pw_b": b(ks[3], f),
        "enc2_dw_w": dw(ks[4], f), "enc2_dw_b": b(ks[5], f),
        "enc2_pw_w": pw(ks[6], 2 * f, f), "enc2_pw_b": b(ks[7], 2 * f),
        "dec1_dw_w": dw(ks[8], 3 * f), "dec1_dw_b": b(ks[9], 3 * f),
        "dec1_pw_w": pw(ks[10], f, 3 * f), "dec1_pw_b": b(ks[11], f),
        "out_pw_w": pw(ks[12], cin, f), "out_pw_b": b(ks[13], cin),
    }


def _ref_forward(params, x):
    """Pure-JAX reference (same math, no Pallas) for correctness checking."""
    hp = jax.lax.Precision.HIGHEST

    def dwconv(x, w, b):  # x: (N,C,H,W), w: (C,3,3), b: (C,)
        H, W = x.shape[2], x.shape[3]
        xp = jnp.pad(x, ((0, 0), (0, 0), (1, 1), (1, 1)))
        acc = jnp.zeros_like(x)
        for dy in range(3):
            for dx in range(3):
                acc = acc + xp[:, :, dy:dy + H, dx:dx + W] * w[None, :, dy, dx, None, None]
        return acc + b[None, :, None, None]

    def pwconv(x, w, b, relu):
        y = jnp.einsum("oc,nchw->nohw", w, x, precision=hp) + b[None, :, None, None]
        return jnp.maximum(y, 0.0) if relu else y

    e1 = pwconv(dwconv(x, params["enc1_dw_w"], params["enc1_dw_b"]),
                params["enc1_pw_w"], params["enc1_pw_b"], relu=True)
    N, C, H, W = e1.shape
    d = e1.reshape(N, C, H // 2, 2, W // 2, 2).max(axis=(3, 5))
    e2 = pwconv(dwconv(d, params["enc2_dw_w"], params["enc2_dw_b"]),
                params["enc2_pw_w"], params["enc2_pw_b"], relu=True)
    u = jnp.repeat(jnp.repeat(e2, 2, axis=2), 2, axis=3)
    cat = jnp.concatenate([u, e1], axis=1)
    d1 = pwconv(dwconv(cat, params["dec1_dw_w"], params["dec1_dw_b"]),
                params["dec1_pw_w"], params["dec1_pw_b"], relu=True)
    return pwconv(d1, params["out_pw_w"], params["out_pw_b"], relu=True)


# --------------------------------------- main ----------------------------------------- #

if __name__ == "__main__":
    key = jax.random.PRNGKey(0)
    k_params, k_input = jax.random.split(key)

    N, C, H, W = 2, 4, 16, 16
    params = init_params(k_params, cin=C, f=8)
    x = jax.random.normal(k_input, (N, C, H, W), jnp.float32)

    fwd = jax.jit(generator_depthwise_forward)
    y = fwd(params, x)
    jax.block_until_ready(y)

    y_ref = jax.jit(_ref_forward)(params, x)
    jax.block_until_ready(y_ref)

    assert y.shape == (N, C, H, W), y.shape
    assert bool(jnp.all(y >= 0.0)), "final ReLU violated"
    np.testing.assert_allclose(np.asarray(y), np.asarray(y_ref), rtol=2e-2, atol=2e-2)
    print("KERNEL_OK")
</pallas_src>

<mosaic_0001>
module attributes {stable_mosaic.version = 11 : i64} {
  func.func @_unet_kernel(%arg0: i32, %arg1: memref<1x4x256xf32, #tpu.memory_space<vmem>>, %arg2: memref<9x256x256xf32, #tpu.memory_space<vmem>>, %arg3: memref<9x64x64xf32, #tpu.memory_space<vmem>>, %arg4: memref<4x256x64xf32, #tpu.memory_space<vmem>>, %arg5: memref<64x256xf32, #tpu.memory_space<vmem>>, %arg6: memref<9x4x1xf32, #tpu.memory_space<vmem>>, %arg7: memref<4x1xf32, #tpu.memory_space<vmem>>, %arg8: memref<8x4xf32, #tpu.memory_space<vmem>>, %arg9: memref<8x1xf32, #tpu.memory_space<vmem>>, %arg10: memref<9x8x1xf32, #tpu.memory_space<vmem>>, %arg11: memref<8x1xf32, #tpu.memory_space<vmem>>, %arg12: memref<16x8xf32, #tpu.memory_space<vmem>>, %arg13: memref<16x1xf32, #tpu.memory_space<vmem>>, %arg14: memref<9x16x1xf32, #tpu.memory_space<vmem>>, %arg15: memref<16x1xf32, #tpu.memory_space<vmem>>, %arg16: memref<9x8x1xf32, #tpu.memory_space<vmem>>, %arg17: memref<8x1xf32, #tpu.memory_space<vmem>>, %arg18: memref<8x16xf32, #tpu.memory_space<vmem>>, %arg19: memref<8x8xf32, #tpu.memory_space<vmem>>, %arg20: memref<8x1xf32, #tpu.memory_space<vmem>>, %arg21: memref<4x8xf32, #tpu.memory_space<vmem>>, %arg22: memref<4x1xf32, #tpu.memory_space<vmem>>, %arg23: memref<1x4x256xf32, #tpu.memory_space<vmem>>) attributes {dimension_semantics = [#tpu.dimension_semantics<parallel>], iteration_bounds = array<i64: 2>, scalar_prefetch = 0 : i64, scratch_operands = 0 : i64, tpu.core_type = #tpu.core_type<tc>, window_params = [{transform_indices = @transform_0, window_bounds = array<i64: 1, 4, 256>}, {pipeline_mode = #tpu.pipeline_mode<synchronous>, transform_indices = @transform_1, window_bounds = array<i64: 9, 256, 256>}, {pipeline_mode = #tpu.pipeline_mode<synchronous>, transform_indices = @transform_2, window_bounds = array<i64: 9, 64, 64>}, {pipeline_mode = #tpu.pipeline_mode<synchronous>, transform_indices = @transform_3, window_bounds = array<i64: 4, 256, 64>}, {pipeline_mode = #tpu.pipeline_mode<synchronous>, transform_indices = @transform_4, window_bounds = array<i64: 64, 256>}, {pipeline_mode = #tpu.pipeline_mode<synchronous>, transform_indices = @transform_5, window_bounds = array<i64: 9, 4, 1>}, {pipeline_mode = #tpu.pipeline_mode<synchronous>, transform_indices = @transform_6, window_bounds = array<i64: 4, 1>}, {pipeline_mode = #tpu.pipeline_mode<synchronous>, transform_indices = @transform_7, window_bounds = array<i64: 8, 4>}, {pipeline_mode = #tpu.pipeline_mode<synchronous>, transform_indices = @transform_8, window_bounds = array<i64: 8, 1>}, {pipeline_mode = #tpu.pipeline_mode<synchronous>, transform_indices = @transform_9, window_bounds = array<i64: 9, 8, 1>}, {pipeline_mode = #tpu.pipeline_mode<synchronous>, transform_indices = @transform_10, window_bounds = array<i64: 8, 1>}, {pipeline_mode = #tpu.pipeline_mode<synchronous>, transform_indices = @transform_11, window_bounds = array<i64: 16, 8>}, {pipeline_mode = #tpu.pipeline_mode<synchronous>, transform_indices = @transform_12, window_bounds = array<i64: 16, 1>}, {pipeline_mode = #tpu.pipeline_mode<synchronous>, transform_indices = @transform_13, window_bounds = array<i64: 9, 16, 1>}, {pipeline_mode = #tpu.pipeline_mode<synchronous>, transform_indices = @transform_14, window_bounds = array<i64: 16, 1>}, {pipeline_mode = #tpu.pipeline_mode<synchronous>, transform_indices = @transform_15, window_bounds = array<i64: 9, 8, 1>}, {pipeline_mode = #tpu.pipeline_mode<synchronous>, transform_indices = @transform_16, window_bounds = array<i64: 8, 1>}, {pipeline_mode = #tpu.pipeline_mode<synchronous>, transform_indices = @transform_17, window_bounds = array<i64: 8, 16>}, {pipeline_mode = #tpu.pipeline_mode<synchronous>, transform_indices = @transform_18, window_bounds = array<i64: 8, 8>}, {pipeline_mode = #tpu.pipeline_mode<synchronous>, transform_indices = @transform_19, window_bounds = array<i64: 8, 1>}, {pipeline_mode = #tpu.pipeline_mode<synchronous>, transform_indices = @transform_20, window_bounds = array<i64: 4, 8>}, {pipeline_mode = #tpu.pipeline_mode<synchronous>, transform_indices = @transform_21, window_bounds = array<i64: 4, 1>}, {transform_indices = @transform_22, window_bounds = array<i64: 1, 4, 256>}]} {
    %c0 = arith.constant 0 : index
    %c0_0 = arith.constant 0 : index
    %c0_1 = arith.constant 0 : index
    %0 = vector.load %arg1[%c0, %c0_0, %c0_1] : memref<1x4x256xf32, #tpu.memory_space<vmem>>, vector<1x4x256xf32>
    %1 = vector.shape_cast %0 : vector<1x4x256xf32> to vector<4x256xf32>
    %cst = arith.constant 0.000000e+00 : f32
    %2 = vector.broadcast %cst : f32 to vector<4x256xf32>
    %c0_2 = arith.constant 0 : index
    %c0_3 = arith.constant 0 : index
    %c0_4 = arith.constant 0 : index
    %3 = vector.load %arg6[%c0_2, %c0_3, %c0_4] : memref<9x4x1xf32, #tpu.memory_space<vmem>>, vector<1x4x1xf32>
    %4 = vector.shape_cast %3 : vector<1x4x1xf32> to vector<4x1xf32>
    %5 = vector.broadcast %4 : vector<4x1xf32> to vector<4x256xf32>
    %6 = arith.mulf %1, %5 : vector<4x256xf32>
    %c0_5 = arith.constant 0 : index
    %c0_6 = arith.constant 0 : index
    %c0_7 = arith.constant 0 : index
    %7 = vector.load %arg2[%c0_5, %c0_6, %c0_7] : memref<9x256x256xf32, #tpu.memory_space<vmem>>, vector<1x256x256xf32>
    %8 = vector.shape_cast %7 : vector<1x256x256xf32> to vector<256x256xf32>
    %cst_8 = arith.constant dense<0.000000e+00> : vector<4x256xf32>
    %9 = tpu.matmul %6, %8, %cst_8 {dimension_numbers = #tpu.dot_dimension_numbers<[1], [0], [0], [1], [0, 0, 1, 1], [], []>} : vector<4x256xf32>, vector<256x256xf32>, vector<4x256xf32> -> vector<4x256xf32>
    %10 = arith.addf %2, %9 : vector<4x256xf32>
    %c1 = arith.constant 1 : index
    %c0_9 = arith.constant 0 : index
    %c0_10 = arith.constant 0 : index
    %11 = vector.load %arg6[%c1, %c0_9, %c0_10] : memref<9x4x1xf32, #tpu.memory_space<vmem>>, vector<1x4x1xf32>
    %12 = vector.shape_cast %11 : vector<1x4x1xf32> to vector<4x1xf32>
    %13 = vector.broadcast %12 : vector<4x1xf32> to vector<4x256xf32>
    %14 = arith.mulf %1, %13 : vector<4x256xf32>
    %c1_11 = arith.constant 1 : index
    %c0_12 = arith.constant 0 : index
    %c0_13 = arith.constant 0 : index
    %15 = vector.load %arg2[%c1_11, %c0_12, %c0_13] : memref<9x256x256xf32, #tpu.memory_space<vmem>>, vector<1x256x256xf32>
    %16 = vector.shape_cast %15 : vector<1x256x256xf32> to vector<256x256xf32>
    %cst_14 = arith.constant dense<0.000000e+00> : vector<4x256xf32>
    %17 = tpu.matmul %14, %16, %cst_14 {dimension_numbers = #tpu.dot_dimension_numbers<[1], [0], [0], [1], [0, 0, 1, 1], [], []>} : vector<4x256xf32>, vector<256x256xf32>, vector<4x256xf32> -> vector<4x256xf32>
    %18 = arith.addf %10, %17 : vector<4x256xf32>
    %c2 = arith.constant 2 : index
    %c0_15 = arith.constant 0 : index
    %c0_16 = arith.constant 0 : index
    %19 = vector.load %arg6[%c2, %c0_15, %c0_16] : memref<9x4x1xf32, #tpu.memory_space<vmem>>, vector<1x4x1xf32>
    %20 = vector.shape_cast %19 : vector<1x4x1xf32> to vector<4x1xf32>
    %21 = vector.broadcast %20 : vector<4x1xf32> to vector<4x256xf32>
    %22 = arith.mulf %1, %21 : vector<4x256xf32>
    %c2_17 = arith.constant 2 : index
    %c0_18 = arith.constant 0 : index
    %c0_19 = arith.constant 0 : index
    %23 = vector.load %arg2[%c2_17, %c0_18, %c0_19] : memref<9x256x256xf32, #tpu.memory_space<vmem>>, vector<1x256x256xf32>
    %24 = vector.shape_cast %23 : vector<1x256x256xf32> to vector<256x256xf32>
    %cst_20 = arith.constant dense<0.000000e+00> : vector<4x256xf32>
    %25 = tpu.matmul %22, %24, %cst_20 {dimension_numbers = #tpu.dot_dimension_numbers<[1], [0], [0], [1], [0, 0, 1, 1], [], []>} : vector<4x256xf32>, vector<256x256xf32>, vector<4x256xf32> -> vector<4x256xf32>
    %26 = arith.addf %18, %25 : vector<4x256xf32>
    %c3 = arith.constant 3 : index
    %c0_21 = arith.constant 0 : index
    %c0_22 = arith.constant 0 : index
    %27 = vector.load %arg6[%c3, %c0_21, %c0_22] : memref<9x4x1xf32, #tpu.memory_space<vmem>>, vector<1x4x1xf32>
    %28 = vector.shape_cast %27 : vector<1x4x1xf32> to vector<4x1xf32>
    %29 = vector.broadcast %28 : vector<4x1xf32> to vector<4x256xf32>
    %30 = arith.mulf %1, %29 : vector<4x256xf32>
    %c3_23 = arith.constant 3 : index
    %c0_24 = arith.constant 0 : index
    %c0_25 = arith.constant 0 : index
    %31 = vector.load %arg2[%c3_23, %c0_24, %c0_25] : memref<9x256x256xf32, #tpu.memory_space<vmem>>, vector<1x256x256xf32>
    %32 = vector.shape_cast %31 : vector<1x256x256xf32> to vector<256x256xf32>
    %cst_26 = arith.constant dense<0.000000e+00> : vector<4x256xf32>
    %33 = tpu.matmul %30, %32, %cst_26 {dimension_numbers = #tpu.dot_dimension_numbers<[1], [0], [0], [1], [0, 0, 1, 1], [], []>} : vector<4x256xf32>, vector<256x256xf32>, vector<4x256xf32> -> vector<4x256xf32>
    %34 = arith.addf %26, %33 : vector<4x256xf32>
    %c4 = arith.constant 4 : index
    %c0_27 = arith.constant 0 : index
    %c0_28 = arith.constant 0 : index
    %35 = vector.load %arg6[%c4, %c0_27, %c0_28] : memref<9x4x1xf32, #tpu.memory_space<vmem>>, vector<1x4x1xf32>
    %36 = vector.shape_cast %35 : vector<1x4x1xf32> to vector<4x1xf32>
    %37 = vector.broadcast %36 : vector<4x1xf32> to vector<4x256xf32>
    %38 = arith.mulf %1, %37 : vector<4x256xf32>
    %c4_29 = arith.constant 4 : index
    %c0_30 = arith.constant 0 : index
    %c0_31 = arith.constant 0 : index
    %39 = vector.load %arg2[%c4_29, %c0_30, %c0_31] : memref<9x256x256xf32, #tpu.memory_space<vmem>>, vector<1x256x256xf32>
    %40 = vector.shape_cast %39 : vector<1x256x256xf32> to vector<256x256xf32>
    %cst_32 = arith.constant dense<0.000000e+00> : vector<4x256xf32>
    %41 = tpu.matmul %38, %40, %cst_32 {dimension_numbers = #tpu.dot_dimension_numbers<[1], [0], [0], [1], [0, 0, 1, 1], [], []>} : vector<4x256xf32>, vector<256x256xf32>, vector<4x256xf32> -> vector<4x256xf32>
    %42 = arith.addf %34, %41 : vector<4x256xf32>
    %c5 = arith.constant 5 : index
    %c0_33 = arith.constant 0 : index
    %c0_34 = arith.constant 0 : index
    %43 = vector.load %arg6[%c5, %c0_33, %c0_34] : memref<9x4x1xf32, #tpu.memory_space<vmem>>, vector<1x4x1xf32>
    %44 = vector.shape_cast %43 : vector<1x4x1xf32> to vector<4x1xf32>
    %45 = vector.broadcast %44 : vector<4x1xf32> to vector<4x256xf32>
    %46 = arith.mulf %1, %45 : vector<4x256xf32>
    %c5_35 = arith.constant 5 : index
    %c0_36 = arith.constant 0 : index
    %c0_37 = arith.constant 0 : index
    %47 = vector.load %arg2[%c5_35, %c0_36, %c0_37] : memref<9x256x256xf32, #tpu.memory_space<vmem>>, vector<1x256x256xf32>
    %48 = vector.shape_cast %47 : vector<1x256x256xf32> to vector<256x256xf32>
    %cst_38 = arith.constant dense<0.000000e+00> : vector<4x256xf32>
    %49 = tpu.matmul %46, %48, %cst_38 {dimension_numbers = #tpu.dot_dimension_numbers<[1], [0], [0], [1], [0, 0, 1, 1], [], []>} : vector<4x256xf32>, vector<256x256xf32>, vector<4x256xf32> -> vector<4x256xf32>
    %50 = arith.addf %42, %49 : vector<4x256xf32>
    %c6 = arith.constant 6 : index
    %c0_39 = arith.constant 0 : index
    %c0_40 = arith.constant 0 : index
    %51 = vector.load %arg6[%c6, %c0_39, %c0_40] : memref<9x4x1xf32, #tpu.memory_space<vmem>>, vector<1x4x1xf32>
    %52 = vector.shape_cast %51 : vector<1x4x1xf32> to vector<4x1xf32>
    %53 = vector.broadcast %52 : vector<4x1xf32> to vector<4x256xf32>
    %54 = arith.mulf %1, %53 : vector<4x256xf32>
    %c6_41 = arith.constant 6 : index
    %c0_42 = arith.constant 0 : index
    %c0_43 = arith.constant 0 : index
    %55 = vector.load %arg2[%c6_41, %c0_42, %c0_43] : memref<9x256x256xf32, #tpu.memory_space<vmem>>, vector<1x256x256xf32>
    %56 = vector.shape_cast %55 : vector<1x256x256xf32> to vector<256x256xf32>
    %cst_44 = arith.constant dense<0.000000e+00> : vector<4x256xf32>
    %57 = tpu.matmul %54, %56, %cst_44 {dimension_numbers = #tpu.dot_dimension_numbers<[1], [0], [0], [1], [0, 0, 1, 1], [], []>} : vector<4x256xf32>, vector<256x256xf32>, vector<4x256xf32> -> vector<4x256xf32>
    %58 = arith.addf %50, %57 : vector<4x256xf32>
    %c7 = arith.constant 7 : index
    %c0_45 = arith.constant 0 : index
    %c0_46 = arith.constant 0 : index
    %59 = vector.load %arg6[%c7, %c0_45, %c0_46] : memref<9x4x1xf32, #tpu.memory_space<vmem>>, vector<1x4x1xf32>
    %60 = vector.shape_cast %59 : vector<1x4x1xf32> to vector<4x1xf32>
    %61 = vector.broadcast %60 : vector<4x1xf32> to vector<4x256xf32>
    %62 = arith.mulf %1, %61 : vector<4x256xf32>
    %c7_47 = arith.constant 7 : index
    %c0_48 = arith.constant 0 : index
    %c0_49 = arith.constant 0 : index
    %63 = vector.load %arg2[%c7_47, %c0_48, %c0_49] : memref<9x256x256xf32, #tpu.memory_space<vmem>>, vector<1x256x256xf32>
    %64 = vector.shape_cast %63 : vector<1x256x256xf32> to vector<256x256xf32>
    %cst_50 = arith.constant dense<0.000000e+00> : vector<4x256xf32>
    %65 = tpu.matmul %62, %64, %cst_50 {dimension_numbers = #tpu.dot_dimension_numbers<[1], [0], [0], [1], [0, 0, 1, 1], [], []>} : vector<4x256xf32>, vector<256x256xf32>, vector<4x256xf32> -> vector<4x256xf32>
    %66 = arith.addf %58, %65 : vector<4x256xf32>
    %c8 = arith.constant 8 : index
    %c0_51 = arith.constant 0 : index
    %c0_52 = arith.constant 0 : index
    %67 = vector.load %arg6[%c8, %c0_51, %c0_52] : memref<9x4x1xf32, #tpu.memory_space<vmem>>, vector<1x4x1xf32>
    %68 = vector.shape_cast %67 : vector<1x4x1xf32> to vector<4x1xf32>
    %69 = vector.broadcast %68 : vector<4x1xf32> to vector<4x256xf32>
    %70 = arith.mulf %1, %69 : vector<4x256xf32>
    %c8_53 = arith.constant 8 : index
    %c0_54 = arith.constant 0 : index
    %c0_55 = arith.constant 0 : index
    %71 = vector.load %arg2[%c8_53, %c0_54, %c0_55] : memref<9x256x256xf32, #tpu.memory_space<vmem>>, vector<1x256x256xf32>
    %72 = vector.shape_cast %71 : vector<1x256x256xf32> to vector<256x256xf32>
    %cst_56 = arith.constant dense<0.000000e+00> : vector<4x256xf32>
    %73 = tpu.matmul %70, %72, %cst_56 {dimension_numbers = #tpu.dot_dimension_numbers<[1], [0], [0], [1], [0, 0, 1, 1], [], []>} : vector<4x256xf32>, vector<256x256xf32>, vector<4x256xf32> -> vector<4x256xf32>
    %74 = arith.addf %66, %73 : vector<4x256xf32>
    %c0_57 = arith.constant 0 : index
    %c0_58 = arith.constant 0 : index
    %75 = vector.load %arg7[%c0_57, %c0_58] : memref<4x1xf32, #tpu.memory_space<vmem>>, vector<4x1xf32>
    %76 = vector.broadcast %75 : vector<4x1xf32> to vector<4x256xf32>
    %77 = arith.addf %74, %76 : vector<4x256xf32>
    %c0_59 = arith.constant 0 : index
    %c0_60 = arith.constant 0 : index
    %78 = vector.load %arg8[%c0_59, %c0_60] : memref<8x4xf32, #tpu.memory_space<vmem>>, vector<8x4xf32>
    %cst_61 = arith.constant dense<0.000000e+00> : vector<8x256xf32>
    %79 = tpu.matmul %78, %77, %cst_61 {dimension_numbers = #tpu.dot_dimension_numbers<[1], [0], [0], [1], [0, 0, 1, 1], [], []>} : vector<8x4xf32>, vector<4x256xf32>, vector<8x256xf32> -> vector<8x256xf32>
    %c0_62 = arith.constant 0 : index
    %c0_63 = arith.constant 0 : index
    %80 = vector.load %arg9[%c0_62, %c0_63] : memref<8x1xf32, #tpu.memory_space<vmem>>, vector<8x1xf32>
    %81 = vector.broadcast %80 : vector<8x1xf32> to vector<8x256xf32>
    %82 = arith.addf %79, %81 : vector<8x256xf32>
    %cst_64 = arith.constant 0.000000e+00 : f32
    %83 = vector.broadcast %cst_64 : f32 to vector<8x256xf32>
    %84 = arith.maximumf %82, %83 : vector<8x256xf32>
    %c0_65 = arith.constant 0 : index
    %c0_66 = arith.constant 0 : index
    %c0_67 = arith.constant 0 : index
    %85 = vector.load %arg4[%c0_65, %c0_66, %c0_67] : memref<4x256x64xf32, #tpu.memory_space<vmem>>, vector<1x256x64xf32>
    %86 = vector.shape_cast %85 : vector<1x256x64xf32> to vector<256x64xf32>
    %cst_68 = arith.constant dense<0.000000e+00> : vector<8x64xf32>
    %87 = tpu.matmul %84, %86, %cst_68 {dimension_numbers = #tpu.dot_dimension_numbers<[1], [0], [0], [1], [0, 0, 1, 1], [], []>} : vector<8x256xf32>, vector<256x64xf32>, vector<8x64xf32> -> vector<8x64xf32>
    %c1_69 = arith.constant 1 : index
    %c0_70 = arith.constant 0 : index
    %c0_71 = arith.constant 0 : index
    %88 = vector.load %arg4[%c1_69, %c0_70, %c0_71] : memref<4x256x64xf32, #tpu.memory_space<vmem>>, vector<1x256x64xf32>
    %89 = vector.shape_cast %88 : vector<1x256x64xf32> to vector<256x64xf32>
    %cst_72 = arith.constant dense<0.000000e+00> : vector<8x64xf32>
    %90 = tpu.matmul %84, %89, %cst_72 {dimension_numbers = #tpu.dot_dimension_numbers<[1], [0], [0], [1], [0, 0, 1, 1], [], []>} : vector<8x256xf32>, vector<256x64xf32>, vector<8x64xf32> -> vector<8x64xf32>
    %c2_73 = arith.constant 2 : index
    %c0_74 = arith.constant 0 : index
    %c0_75 = arith.constant 0 : index
    %91 = vector.load %arg4[%c2_73, %c0_74, %c0_75] : memref<4x256x64xf32, #tpu.memory_space<vmem>>, vector<1x256x64xf32>
    %92 = vector.shape_cast %91 : vector<1x256x64xf32> to vector<256x64xf32>
    %cst_76 = arith.constant dense<0.000000e+00> : vector<8x64xf32>
    %93 = tpu.matmul %84, %92, %cst_76 {dimension_numbers = #tpu.dot_dimension_numbers<[1], [0], [0], [1], [0, 0, 1, 1], [], []>} : vector<8x256xf32>, vector<256x64xf32>, vector<8x64xf32> -> vector<8x64xf32>
    %c3_77 = arith.constant 3 : index
    %c0_78 = arith.constant 0 : index
    %c0_79 = arith.constant 0 : index
    %94 = vector.load %arg4[%c3_77, %c0_78, %c0_79] : memref<4x256x64xf32, #tpu.memory_space<vmem>>, vector<1x256x64xf32>
    %95 = vector.shape_cast %94 : vector<1x256x64xf32> to vector<256x64xf32>
    %cst_80 = arith.constant dense<0.000000e+00> : vector<8x64xf32>
    %96 = tpu.matmul %84, %95, %cst_80 {dimension_numbers = #tpu.dot_dimension_numbers<[1], [0], [0], [1], [0, 0, 1, 1], [], []>} : vector<8x256xf32>, vector<256x64xf32>, vector<8x64xf32> -> vector<8x64xf32>
    %97 = arith.maximumf %87, %90 : vector<8x64xf32>
    %98 = arith.maximumf %93, %96 : vector<8x64xf32>
    %99 = arith.maximumf %97, %98 : vector<8x64xf32>
    %cst_81 = arith.constant 0.000000e+00 : f32
    %100 = vector.broadcast %cst_81 : f32 to vector<8x64xf32>
    %c0_82 = arith.constant 0 : index
    %c0_83 = arith.constant 0 : index
    %c0_84 = arith.constant 0 : index
    %101 = vector.load %arg10[%c0_82, %c0_83, %c0_84] : memref<9x8x1xf32, #tpu.memory_space<vmem>>, vector<1x8x1xf32>
    %102 = vector.shape_cast %101 : vector<1x8x1xf32> to vector<8x1xf32>
    %103 = vector.broadcast %102 : vector<8x1xf32> to vector<8x64xf32>
    %104 = arith.mulf %99, %103 : vector<8x64xf32>
    %c0_85 = arith.constant 0 : index
    %c0_86 = arith.constant 0 : index
    %c0_87 = arith.constant 0 : index
    %105 = vector.load %arg3[%c0_85, %c0_86, %c0_87] : memref<9x64x64xf32, #tpu.memory_space<vmem>>, vector<1x64x64xf32>
    %106 = vector.shape_cast %105 : vector<1x64x64xf32> to vector<64x64xf32>
    %cst_88 = arith.constant dense<0.000000e+00> : vector<8x64xf32>
    %107 = tpu.matmul %104, %106, %cst_88 {dimension_numbers = #tpu.dot_dimension_numbers<[1], [0], [0], [1], [0, 0, 1, 1], [], []>} : vector<8x64xf32>, vector<64x64xf32>, vector<8x64xf32> -> vector<8x64xf32>
    %108 = arith.addf %100, %107 : vector<8x64xf32>
    %c1_89 = arith.constant 1 : index
    %c0_90 = arith.constant 0 : index
    %c0_91 = arith.constant 0 : index
    %109 = vector.load %arg10[%c1_89, %c0_90, %c0_91] : memref<9x8x1xf32, #tpu.memory_space<vmem>>, vector<1x8x1xf32>
    %110 = vector.shape_cast %109 : vector<1x8x1xf32> to vector<8x1xf32>
    %111 = vector.broadcast %110 : vector<8x1xf32> to vector<8x64xf32>
    %112 = arith.mulf %99, %111 : vector<8x64xf32>
    %c1_92 = arith.constant 1 : index
    %c0_93 = arith.constant 0 : index
    %c0_94 = arith.constant 0 : index
    %113 = vector.load %arg3[%c1_92, %c0_93, %c0_94] : memref<9x64x64xf32, #tpu.memory_space<vmem>>, vector<1x64x64xf32>
    %114 = vector.shape_cast %113 : vector<1x64x64xf32> to vector<64x64xf32>
    %cst_95 = arith.constant dense<0.000000e+00> : vector<8x64xf32>
    %115 = tpu.matmul %112, %114, %cst_95 {dimension_numbers = #tpu.dot_dimension_numbers<[1], [0], [0], [1], [0, 0, 1, 1], [], []>} : vector<8x64xf32>, vector<64x64xf32>, vector<8x64xf32> -> vector<8x64xf32>
    %116 = arith.addf %108, %115 : vector<8x64xf32>
    %c2_96 = arith.constant 2 : index
    %c0_97 = arith.constant 0 : index
    %c0_98 = arith.constant 0 : index
    %117 = vector.load %arg10[%c2_96, %c0_97, %c0_98] : memref<9x8x1xf32, #tpu.memory_space<vmem>>, vector<1x8x1xf32>
    %118 = vector.shape_cast %117 : vector<1x8x1xf32> to vector<8x1xf32>
    %119 = vector.broadcast %118 : vector<8x1xf32> to vector<8x64xf32>
    %120 = arith.mulf %99, %119 : vector<8x64xf32>
    %c2_99 = arith.constant 2 : index
    %c0_100 = arith.constant 0 : index
    %c0_101 = arith.constant 0 : index
    %121 = vector.load %arg3[%c2_99, %c0_100, %c0_101] : memref<9x64x64xf32, #tpu.memory_space<vmem>>, vector<1x64x64xf32>
    %122 = vector.shape_cast %121 : vector<1x64x64xf32> to vector<64x64xf32>
    %cst_102 = arith.constant dense<0.000000e+00> : vector<8x64xf32>
    %123 = tpu.matmul %120, %122, %cst_102 {dimension_numbers = #tpu.dot_dimension_numbers<[1], [0], [0], [1], [0, 0, 1, 1], [], []>} : vector<8x64xf32>, vector<64x64xf32>, vector<8x64xf32> -> vector<8x64xf32>
    %124 = arith.addf %116, %123 : vector<8x64xf32>
    %c3_103 = arith.constant 3 : index
    %c0_104 = arith.constant 0 : index
    %c0_105 = arith.constant 0 : index
    %125 = vector.load %arg10[%c3_103, %c0_104, %c0_105] : memref<9x8x1xf32, #tpu.memory_space<vmem>>, vector<1x8x1xf32>
    %126 = vector.shape_cast %125 : vector<1x8x1xf32> to vector<8x1xf32>
    %127 = vector.broadcast %126 : vector<8x1xf32> to vector<8x64xf32>
    %128 = arith.mulf %99, %127 : vector<8x64xf32>
    %c3_106 = arith.constant 3 : index
    %c0_107 = arith.constant 0 : index
    %c0_108 = arith.constant 0 : index
    %129 = vector.load %arg3[%c3_106, %c0_107, %c0_108] : memref<9x64x64xf32, #tpu.memory_space<vmem>>, vector<1x64x64xf32>
    %130 = vector.shape_cast %129 : vector<1x64x64xf32> to vector<64x64xf32>
    %cst_109 = arith.constant dense<0.000000e+00> : vector<8x64xf32>
    %131 = tpu.matmul %128, %130, %cst_109 {dimension_numbers = #tpu.dot_dimension_numbers<[1], [0], [0], [1], [0, 0, 1, 1], [], []>} : vector<8x64xf32>, vector<64x64xf32>, vector<8x64xf32> -> vector<8x64xf32>
    %132 = arith.addf %124, %131 : vector<8x64xf32>
    %c4_110 = arith.constant 4 : index
    %c0_111 = arith.constant 0 : index
    %c0_112 = arith.constant 0 : index
    %133 = vector.load %arg10[%c4_110, %c0_111, %c0_112] : memref<9x8x1xf32, #tpu.memory_space<vmem>>, vector<1x8x1xf32>
    %134 = vector.shape_cast %133 : vector<1x8x1xf32> to vector<8x1xf32>
    %135 = vector.broadcast %134 : vector<8x1xf32> to vector<8x64xf32>
    %136 = arith.mulf %99, %135 : vector<8x64xf32>
    %c4_113 = arith.constant 4 : index
    %c0_114 = arith.constant 0 : index
    %c0_115 = arith.constant 0 : index
    %137 = vector.load %arg3[%c4_113, %c0_114, %c0_115] : memref<9x64x64xf32, #tpu.memory_space<vmem>>, vector<1x64x64xf32>
    %138 = vector.shape_cast %137 : vector<1x64x64xf32> to vector<64x64xf32>
    %cst_116 = arith.constant dense<0.000000e+00> : vector<8x64xf32>
    %139 = tpu.matmul %136, %138, %cst_116 {dimension_numbers = #tpu.dot_dimension_numbers<[1], [0], [0], [1], [0, 0, 1, 1], [], []>} : vector<8x64xf32>, vector<64x64xf32>, vector<8x64xf32> -> vector<8x64xf32>
    %140 = arith.addf %132, %139 : vector<8x64xf32>
    %c5_117 = arith.constant 5 : index
    %c0_118 = arith.constant 0 : index
    %c0_119 = arith.constant 0 : index
    %141 = vector.load %arg10[%c5_117, %c0_118, %c0_119] : memref<9x8x1xf32, #tpu.memory_space<vmem>>, vector<1x8x1xf32>
    %142 = vector.shape_cast %141 : vector<1x8x1xf32> to vector<8x1xf32>
    %143 = vector.broadcast %142 : vector<8x1xf32> to vector<8x64xf32>
    %144 = arith.mulf %99, %143 : vector<8x64xf32>
    %c5_120 = arith.constant 5 : index
    %c0_121 = arith.constant 0 : index
    %c0_122 = arith.constant 0 : index
    %145 = vector.load %arg3[%c5_120, %c0_121, %c0_122] : memref<9x64x64xf32, #tpu.memory_space<vmem>>, vector<1x64x64xf32>
    %146 = vector.shape_cast %145 : vector<1x64x64xf32> to vector<64x64xf32>
    %cst_123 = arith.constant dense<0.000000e+00> : vector<8x64xf32>
    %147 = tpu.matmul %144, %146, %cst_123 {dimension_numbers = #tpu.dot_dimension_numbers<[1], [0], [0], [1], [0, 0, 1, 1], [], []>} : vector<8x64xf32>, vector<64x64xf32>, vector<8x64xf32> -> vector<8x64xf32>
    %148 = arith.addf %140, %147 : vector<8x64xf32>
    %c6_124 = arith.constant 6 : index
    %c0_125 = arith.constant 0 : index
    %c0_126 = arith.constant 0 : index
    %149 = vector.load %arg10[%c6_124, %c0_125, %c0_126] : memref<9x8x1xf32, #tpu.memory_space<vmem>>, vector<1x8x1xf32>
    %150 = vector.shape_cast %149 : vector<1x8x1xf32> to vector<8x1xf32>
    %151 = vector.broadcast %150 : vector<8x1xf32> to vector<8x64xf32>
    %152 = arith.mulf %99, %151 : vector<8x64xf32>
    %c6_127 = arith.constant 6 : index
    %c0_128 = arith.constant 0 : index
    %c0_129 = arith.constant 0 : index
    %153 = vector.load %arg3[%c6_127, %c0_128, %c0_129] : memref<9x64x64xf32, #tpu.memory_space<vmem>>, vector<1x64x64xf32>
    %154 = vector.shape_cast %153 : vector<1x64x64xf32> to vector<64x64xf32>
    %cst_130 = arith.constant dense<0.000000e+00> : vector<8x64xf32>
    %155 = tpu.matmul %152, %154, %cst_130 {dimension_numbers = #tpu.dot_dimension_numbers<[1], [0], [0], [1], [0, 0, 1, 1], [], []>} : vector<8x64xf32>, vector<64x64xf32>, vector<8x64xf32> -> vector<8x64xf32>
    %156 = arith.addf %148, %155 : vector<8x64xf32>
    %c7_131 = arith.constant 7 : index
    %c0_132 = arith.constant 0 : index
    %c0_133 = arith.constant 0 : index
    %157 = vector.load %arg10[%c7_131, %c0_132, %c0_133] : memref<9x8x1xf32, #tpu.memory_space<vmem>>, vector<1x8x1xf32>
    %158 = vector.shape_cast %157 : vector<1x8x1xf32> to vector<8x1xf32>
    %159 = vector.broadcast %158 : vector<8x1xf32> to vector<8x64xf32>
    %160 = arith.mulf %99, %159 : vector<8x64xf32>
    %c7_134 = arith.constant 7 : index
    %c0_135 = arith.constant 0 : index
    %c0_136 = arith.constant 0 : index
    %161 = vector.load %arg3[%c7_134, %c0_135, %c0_136] : memref<9x64x64xf32, #tpu.memory_space<vmem>>, vector<1x64x64xf32>
    %162 = vector.shape_cast %161 : vector<1x64x64xf32> to vector<64x64xf32>
    %cst_137 = arith.constant dense<0.000000e+00> : vector<8x64xf32>
    %163 = tpu.matmul %160, %162, %cst_137 {dimension_numbers = #tpu.dot_dimension_numbers<[1], [0], [0], [1], [0, 0, 1, 1], [], []>} : vector<8x64xf32>, vector<64x64xf32>, vector<8x64xf32> -> vector<8x64xf32>
    %164 = arith.addf %156, %163 : vector<8x64xf32>
    %c8_138 = arith.constant 8 : index
    %c0_139 = arith.constant 0 : index
    %c0_140 = arith.constant 0 : index
    %165 = vector.load %arg10[%c8_138, %c0_139, %c0_140] : memref<9x8x1xf32, #tpu.memory_space<vmem>>, vector<1x8x1xf32>
    %166 = vector.shape_cast %165 : vector<1x8x1xf32> to vector<8x1xf32>
    %167 = vector.broadcast %166 : vector<8x1xf32> to vector<8x64xf32>
    %168 = arith.mulf %99, %167 : vector<8x64xf32>
    %c8_141 = arith.constant 8 : index
    %c0_142 = arith.constant 0 : index
    %c0_143 = arith.constant 0 : index
    %169 = vector.load %arg3[%c8_141, %c0_142, %c0_143] : memref<9x64x64xf32, #tpu.memory_space<vmem>>, vector<1x64x64xf32>
    %170 = vector.shape_cast %169 : vector<1x64x64xf32> to vector<64x64xf32>
    %cst_144 = arith.constant dense<0.000000e+00> : vector<8x64xf32>
    %171 = tpu.matmul %168, %170, %cst_144 {dimension_numbers = #tpu.dot_dimension_numbers<[1], [0], [0], [1], [0, 0, 1, 1], [], []>} : vector<8x64xf32>, vector<64x64xf32>, vector<8x64xf32> -> vector<8x64xf32>
    %172 = arith.addf %164, %171 : vector<8x64xf32>
    %c0_145 = arith.constant 0 : index
    %c0_146 = arith.constant 0 : index
    %173 = vector.load %arg11[%c0_145, %c0_146] : memref<8x1xf32, #tpu.memory_space<vmem>>, vector<8x1xf32>
    %174 = vector.broadcast %173 : vector<8x1xf32> to vector<8x64xf32>
    %175 = arith.addf %172, %174 : vector<8x64xf32>
    %c0_147 = arith.constant 0 : index
    %c0_148 = arith.constant 0 : index
    %176 = vector.load %arg12[%c0_147, %c0_148] : memref<16x8xf32, #tpu.memory_space<vmem>>, vector<16x8xf32>
    %cst_149 = arith.constant dense<0.000000e+00> : vector<16x64xf32>
    %177 = tpu.matmul %176, %175, %cst_149 {dimension_numbers = #tpu.dot_dimension_numbers<[1], [0], [0], [1], [0, 0, 1, 1], [], []>} : vector<16x8xf32>, vector<8x64xf32>, vector<16x64xf32> -> vector<16x64xf32>
    %c0_150 = arith.constant 0 : index
    %c0_151 = arith.constant 0 : index
    %178 = vector.load %arg13[%c0_150, %c0_151] : memref<16x1xf32, #tpu.memory_space<vmem>>, vector<16x1xf32>
    %179 = vector.broadcast %178 : vector<16x1xf32> to vector<16x64xf32>
    %180 = arith.addf %177, %179 : vector<16x64xf32>
    %cst_152 = arith.constant 0.000000e+00 : f32
    %181 = vector.broadcast %cst_152 : f32 to vector<16x64xf32>
    %182 = arith.maximumf %180, %181 : vector<16x64xf32>
    %c0_153 = arith.constant 0 : index
    %c0_154 = arith.constant 0 : index
    %183 = vector.load %arg5[%c0_153, %c0_154] : memref<64x256xf32, #tpu.memory_space<vmem>>, vector<64x256xf32>
    %cst_155 = arith.constant dense<0.000000e+00> : vector<16x256xf32>
    %184 = tpu.matmul %182, %183, %cst_155 {dimension_numbers = #tpu.dot_dimension_numbers<[1], [0], [0], [1], [0, 0, 1, 1], [], []>} : vector<16x64xf32>, vector<64x256xf32>, vector<16x256xf32> -> vector<16x256xf32>
    %cst_156 = arith.constant 0.000000e+00 : f32
    %185 = vector.broadcast %cst_156 : f32 to vector<16x256xf32>
    %c0_157 = arith.constant 0 : index
    %c0_158 = arith.constant 0 : index
    %c0_159 = arith.constant 0 : index
    %186 = vector.load %arg14[%c0_157, %c0_158, %c0_159] : memref<9x16x1xf32, #tpu.memory_space<vmem>>, vector<1x16x1xf32>
    %187 = vector.shape_cast %186 : vector<1x16x1xf32> to vector<16x1xf32>
    %188 = vector.broadcast %187 : vector<16x1xf32> to vector<16x256xf32>
    %189 = arith.mulf %184, %188 : vector<16x256xf32>
    %c0_160 = arith.constant 0 : index
    %c0_161 = arith.constant 0 : index
    %c0_162 = arith.constant 0 : index
    %190 = vector.load %arg2[%c0_160, %c0_161, %c0_162] : memref<9x256x256xf32, #tpu.memory_space<vmem>>, vector<1x256x256xf32>
    %191 = vector.shape_cast %190 : vector<1x256x256xf32> to vector<256x256xf32>
    %cst_163 = arith.constant dense<0.000000e+00> : vector<16x256xf32>
    %192 = tpu.matmul %189, %191, %cst_163 {dimension_numbers = #tpu.dot_dimension_numbers<[1], [0], [0], [1], [0, 0, 1, 1], [], []>} : vector<16x256xf32>, vector<256x256xf32>, vector<16x256xf32> -> vector<16x256xf32>
    %193 = arith.addf %185, %192 : vector<16x256xf32>
    %c1_164 = arith.constant 1 : index
    %c0_165 = arith.constant 0 : index
    %c0_166 = arith.constant 0 : index
    %194 = vector.load %arg14[%c1_164, %c0_165, %c0_166] : memref<9x16x1xf32, #tpu.memory_space<vmem>>, vector<1x16x1xf32>
    %195 = vector.shape_cast %194 : vector<1x16x1xf32> to vector<16x1xf32>
    %196 = vector.broadcast %195 : vector<16x1xf32> to vector<16x256xf32>
    %197 = arith.mulf %184, %196 : vector<16x256xf32>
    %c1_167 = arith.constant 1 : index
    %c0_168 = arith.constant 0 : index
    %c0_169 = arith.constant 0 : index
    %198 = vector.load %arg2[%c1_167, %c0_168, %c0_169] : memref<9x256x256xf32, #tpu.memory_space<vmem>>, vector<1x256x256xf32>
    %199 = vector.shape_cast %198 : vector<1x256x256xf32> to vector<256x256xf32>
    %cst_170 = arith.constant dense<0.000000e+00> : vector<16x256xf32>
    %200 = tpu.matmul %197, %199, %cst_170 {dimension_numbers = #tpu.dot_dimension_numbers<[1], [0], [0], [1], [0, 0, 1, 1], [], []>} : vector<16x256xf32>, vector<256x256xf32>, vector<16x256xf32> -> vector<16x256xf32>
    %201 = arith.addf %193, %200 : vector<16x256xf32>
    %c2_171 = arith.constant 2 : index
    %c0_172 = arith.constant 0 : index
    %c0_173 = arith.constant 0 : index
    %202 = vector.load %arg14[%c2_171, %c0_172, %c0_173] : memref<9x16x1xf32, #tpu.memory_space<vmem>>, vector<1x16x1xf32>
    %203 = vector.shape_cast %202 : vector<1x16x1xf32> to vector<16x1xf32>
    %204 = vector.broadcast %203 : vector<16x1xf32> to vector<16x256xf32>
    %205 = arith.mulf %184, %204 : vector<16x256xf32>
    %c2_174 = arith.constant 2 : index
    %c0_175 = arith.constant 0 : index
    %c0_176 = arith.constant 0 : index
    %206 = vector.load %arg2[%c2_174, %c0_175, %c0_176] : memref<9x256x256xf32, #tpu.memory_space<vmem>>, vector<1x256x256xf32>
    %207 = vector.shape_cast %206 : vector<1x256x256xf32> to vector<256x256xf32>
    %cst_177 = arith.constant dense<0.000000e+00> : vector<16x256xf32>
    %208 = tpu.matmul %205, %207, %cst_177 {dimension_numbers = #tpu.dot_dimension_numbers<[1], [0], [0], [1], [0, 0, 1, 1], [], []>} : vector<16x256xf32>, vector<256x256xf32>, vector<16x256xf32> -> vector<16x256xf32>
    %209 = arith.addf %201, %208 : vector<16x256xf32>
    %c3_178 = arith.constant 3 : index
    %c0_179 = arith.constant 0 : index
    %c0_180 = arith.constant 0 : index
    %210 = vector.load %arg14[%c3_178, %c0_179, %c0_180] : memref<9x16x1xf32, #tpu.memory_space<vmem>>, vector<1x16x1xf32>
    %211 = vector.shape_cast %210 : vector<1x16x1xf32> to vector<16x1xf32>
    %212 = vector.broadcast %211 : vector<16x1xf32> to vector<16x256xf32>
    %213 = arith.mulf %184, %212 : vector<16x256xf32>
    %c3_181 = arith.constant 3 : index
    %c0_182 = arith.constant 0 : index
    %c0_183 = arith.constant 0 : index
    %214 = vector.load %arg2[%c3_181, %c0_182, %c0_183] : memref<9x256x256xf32, #tpu.memory_space<vmem>>, vector<1x256x256xf32>
    %215 = vector.shape_cast %214 : vector<1x256x256xf32> to vector<256x256xf32>
    %cst_184 = arith.constant dense<0.000000e+00> : vector<16x256xf32>
    %216 = tpu.matmul %213, %215, %cst_184 {dimension_numbers = #tpu.dot_dimension_numbers<[1], [0], [0], [1], [0, 0, 1, 1], [], []>} : vector<16x256xf32>, vector<256x256xf32>, vector<16x256xf32> -> vector<16x256xf32>
    %217 = arith.addf %209, %216 : vector<16x256xf32>
    %c4_185 = arith.constant 4 : index
    %c0_186 = arith.constant 0 : index
    %c0_187 = arith.constant 0 : index
    %218 = vector.load %arg14[%c4_185, %c0_186, %c0_187] : memref<9x16x1xf32, #tpu.memory_space<vmem>>, vector<1x16x1xf32>
    %219 = vector.shape_cast %218 : vector<1x16x1xf32> to vector<16x1xf32>
    %220 = vector.broadcast %219 : vector<16x1xf32> to vector<16x256xf32>
    %221 = arith.mulf %184, %220 : vector<16x256xf32>
    %c4_188 = arith.constant 4 : index
    %c0_189 = arith.constant 0 : index
    %c0_190 = arith.constant 0 : index
    %222 = vector.load %arg2[%c4_188, %c0_189, %c0_190] : memref<9x256x256xf32, #tpu.memory_space<vmem>>, vector<1x256x256xf32>
    %223 = vector.shape_cast %222 : vector<1x256x256xf32> to vector<256x256xf32>
    %cst_191 = arith.constant dense<0.000000e+00> : vector<16x256xf32>
    %224 = tpu.matmul %221, %223, %cst_191 {dimension_numbers = #tpu.dot_dimension_numbers<[1], [0], [0], [1], [0, 0, 1, 1], [], []>} : vector<16x256xf32>, vector<256x256xf32>, vector<16x256xf32> -> vector<16x256xf32>
    %225 = arith.addf %217, %224 : vector<16x256xf32>
    %c5_192 = arith.constant 5 : index
    %c0_193 = arith.constant 0 : index
    %c0_194 = arith.constant 0 : index
    %226 = vector.load %arg14[%c5_192, %c0_193, %c0_194] : memref<9x16x1xf32, #tpu.memory_space<vmem>>, vector<1x16x1xf32>
    %227 = vector.shape_cast %226 : vector<1x16x1xf32> to vector<16x1xf32>
    %228 = vector.broadcast %227 : vector<16x1xf32> to vector<16x256xf32>
    %229 = arith.mulf %184, %228 : vector<16x256xf32>
    %c5_195 = arith.constant 5 : index
    %c0_196 = arith.constant 0 : index
    %c0_197 = arith.constant 0 : index
    %230 = vector.load %arg2[%c5_195, %c0_196, %c0_197] : memref<9x256x256xf32, #tpu.memory_space<vmem>>, vector<1x256x256xf32>
    %231 = vector.shape_cast %230 : vector<1x256x256xf32> to vector<256x256xf32>
    %cst_198 = arith.constant dense<0.000000e+00> : vector<16x256xf32>
    %232 = tpu.matmul %229, %231, %cst_198 {dimension_numbers = #tpu.dot_dimension_numbers<[1], [0], [0], [1], [0, 0, 1, 1], [], []>} : vector<16x256xf32>, vector<256x256xf32>, vector<16x256xf32> -> vector<16x256xf32>
    %233 = arith.addf %225, %232 : vector<16x256xf32>
    %c6_199 = arith.constant 6 : index
    %c0_200 = arith.constant 0 : index
    %c0_201 = arith.constant 0 : index
    %234 = vector.load %arg14[%c6_199, %c0_200, %c0_201] : memref<9x16x1xf32, #tpu.memory_space<vmem>>, vector<1x16x1xf32>
    %235 = vector.shape_cast %234 : vector<1x16x1xf32> to vector<16x1xf32>
    %236 = vector.broadcast %235 : vector<16x1xf32> to vector<16x256xf32>
    %237 = arith.mulf %184, %236 : vector<16x256xf32>
    %c6_202 = arith.constant 6 : index
    %c0_203 = arith.constant 0 : index
    %c0_204 = arith.constant 0 : index
    %238 = vector.load %arg2[%c6_202, %c0_203, %c0_204] : memref<9x256x256xf32, #tpu.memory_space<vmem>>, vector<1x256x256xf32>
    %239 = vector.shape_cast %238 : vector<1x256x256xf32> to vector<256x256xf32>
    %cst_205 = arith.constant dense<0.000000e+00> : vector<16x256xf32>
    %240 = tpu.matmul %237, %239, %cst_205 {dimension_numbers = #tpu.dot_dimension_numbers<[1], [0], [0], [1], [0, 0, 1, 1], [], []>} : vector<16x256xf32>, vector<256x256xf32>, vector<16x256xf32> -> vector<16x256xf32>
    %241 = arith.addf %233, %240 : vector<16x256xf32>
    %c7_206 = arith.constant 7 : index
    %c0_207 = arith.constant 0 : index
    %c0_208 = arith.constant 0 : index
    %242 = vector.load %arg14[%c7_206, %c0_207, %c0_208] : memref<9x16x1xf32, #tpu.memory_space<vmem>>, vector<1x16x1xf32>
    %243 = vector.shape_cast %242 : vector<1x16x1xf32> to vector<16x1xf32>
    %244 = vector.broadcast %243 : vector<16x1xf32> to vector<16x256xf32>
    %245 = arith.mulf %184, %244 : vector<16x256xf32>
    %c7_209 = arith.constant 7 : index
    %c0_210 = arith.constant 0 : index
    %c0_211 = arith.constant 0 : index
    %246 = vector.load %arg2[%c7_209, %c0_210, %c0_211] : memref<9x256x256xf32, #tpu.memory_space<vmem>>, vector<1x256x256xf32>
    %247 = vector.shape_cast %246 : vector<1x256x256xf32> to vector<256x256xf32>
    %cst_212 = arith.constant dense<0.000000e+00> : vector<16x256xf32>
    %248 = tpu.matmul %245, %247, %cst_212 {dimension_numbers = #tpu.dot_dimension_numbers<[1], [0], [0], [1], [0, 0, 1, 1], [], []>} : vector<16x256xf32>, vector<256x256xf32>, vector<16x256xf32> -> vector<16x256xf32>
    %249 = arith.addf %241, %248 : vector<16x256xf32>
    %c8_213 = arith.constant 8 : index
    %c0_214 = arith.constant 0 : index
    %c0_215 = arith.constant 0 : index
    %250 = vector.load %arg14[%c8_213, %c0_214, %c0_215] : memref<9x16x1xf32, #tpu.memory_space<vmem>>, vector<1x16x1xf32>
    %251 = vector.shape_cast %250 : vector<1x16x1xf32> to vector<16x1xf32>
    %252 = vector.broadcast %251 : vector<16x1xf32> to vector<16x256xf32>
    %253 = arith.mulf %184, %252 : vector<16x256xf32>
    %c8_216 = arith.constant 8 : index
    %c0_217 = arith.constant 0 : index
    %c0_218 = arith.constant 0 : index
    %254 = vector.load %arg2[%c8_216, %c0_217, %c0_218] : memref<9x256x256xf32, #tpu.memory_space<vmem>>, vector<1x256x256xf32>
    %255 = vector.shape_cast %254 : vector<1x256x256xf32> to vector<256x256xf32>
    %cst_219 = arith.constant dense<0.000000e+00> : vector<16x256xf32>
    %256 = tpu.matmul %253, %255, %cst_219 {dimension_numbers = #tpu.dot_dimension_numbers<[1], [0], [0], [1], [0, 0, 1, 1], [], []>} : vector<16x256xf32>, vector<256x256xf32>, vector<16x256xf32> -> vector<16x256xf32>
    %257 = arith.addf %249, %256 : vector<16x256xf32>
    %c0_220 = arith.constant 0 : index
    %c0_221 = arith.constant 0 : index
    %258 = vector.load %arg15[%c0_220, %c0_221] : memref<16x1xf32, #tpu.memory_space<vmem>>, vector<16x1xf32>
    %259 = vector.broadcast %258 : vector<16x1xf32> to vector<16x256xf32>
    %260 = arith.addf %257, %259 : vector<16x256xf32>
    %cst_222 = arith.constant 0.000000e+00 : f32
    %261 = vector.broadcast %cst_222 : f32 to vector<8x256xf32>
    %c0_223 = arith.constant 0 : index
    %c0_224 = arith.constant 0 : index
    %c0_225 = arith.constant 0 : index
    %262 = vector.load %arg16[%c0_223, %c0_224, %c0_225] : memref<9x8x1xf32, #tpu.memory_space<vmem>>, vector<1x8x1xf32>
    %263 = vector.shape_cast %262 : vector<1x8x1xf32> to vector<8x1xf32>
    %264 = vector.broadcast %263 : vector<8x1xf32> to vector<8x256xf32>
    %265 = arith.mulf %84, %264 : vector<8x256xf32>
    %c0_226 = arith.constant 0 : index
    %c0_227 = arith.constant 0 : index
    %c0_228 = arith.constant 0 : index
    %266 = vector.load %arg2[%c0_226, %c0_227, %c0_228] : memref<9x256x256xf32, #tpu.memory_space<vmem>>, vector<1x256x256xf32>
    %267 = vector.shape_cast %266 : vector<1x256x256xf32> to vector<256x256xf32>
    %cst_229 = arith.constant dense<0.000000e+00> : vector<8x256xf32>
    %268 = tpu.matmul %265, %267, %cst_229 {dimension_numbers = #tpu.dot_dimension_numbers<[1], [0], [0], [1], [0, 0, 1, 1], [], []>} : vector<8x256xf32>, vector<256x256xf32>, vector<8x256xf32> -> vector<8x256xf32>
    %269 = arith.addf %261, %268 : vector<8x256xf32>
    %c1_230 = arith.constant 1 : index
    %c0_231 = arith.constant 0 : index
    %c0_232 = arith.constant 0 : index
    %270 = vector.load %arg16[%c1_230, %c0_231, %c0_232] : memref<9x8x1xf32, #tpu.memory_space<vmem>>, vector<1x8x1xf32>
    %271 = vector.shape_cast %270 : vector<1x8x1xf32> to vector<8x1xf32>
    %272 = vector.broadcast %271 : vector<8x1xf32> to vector<8x256xf32>
    %273 = arith.mulf %84, %272 : vector<8x256xf32>
    %c1_233 = arith.constant 1 : index
    %c0_234 = arith.constant 0 : index
    %c0_235 = arith.constant 0 : index
    %274 = vector.load %arg2[%c1_233, %c0_234, %c0_235] : memref<9x256x256xf32, #tpu.memory_space<vmem>>, vector<1x256x256xf32>
    %275 = vector.shape_cast %274 : vector<1x256x256xf32> to vector<256x256xf32>
    %cst_236 = arith.constant dense<0.000000e+00> : vector<8x256xf32>
    %276 = tpu.matmul %273, %275, %cst_236 {dimension_numbers = #tpu.dot_dimension_numbers<[1], [0], [0], [1], [0, 0, 1, 1], [], []>} : vector<8x256xf32>, vector<256x256xf32>, vector<8x256xf32> -> vector<8x256xf32>
    %277 = arith.addf %269, %276 : vector<8x256xf32>
    %c2_237 = arith.constant 2 : index
    %c0_238 = arith.constant 0 : index
    %c0_239 = arith.constant 0 : index
    %278 = vector.load %arg16[%c2_237, %c0_238, %c0_239] : memref<9x8x1xf32, #tpu.memory_space<vmem>>, vector<1x8x1xf32>
    %279 = vector.shape_cast %278 : vector<1x8x1xf32> to vector<8x1xf32>
    %280 = vector.broadcast %279 : vector<8x1xf32> to vector<8x256xf32>
    %281 = arith.mulf %84, %280 : vector<8x256xf32>
    %c2_240 = arith.constant 2 : index
    %c0_241 = arith.constant 0 : index
    %c0_242 = arith.constant 0 : index
    %282 = vector.load %arg2[%c2_240, %c0_241, %c0_242] : memref<9x256x256xf32, #tpu.memory_space<vmem>>, vector<1x256x256xf32>
    %283 = vector.shape_cast %282 : vector<1x256x256xf32> to vector<256x256xf32>
    %cst_243 = arith.constant dense<0.000000e+00> : vector<8x256xf32>
    %284 = tpu.matmul %281, %283, %cst_243 {dimension_numbers = #tpu.dot_dimension_numbers<[1], [0], [0], [1], [0, 0, 1, 1], [], []>} : vector<8x256xf32>, vector<256x256xf32>, vector<8x256xf32> -> vector<8x256xf32>
    %285 = arith.addf %277, %284 : vector<8x256xf32>
    %c3_244 = arith.constant 3 : index
    %c0_245 = arith.constant 0 : index
    %c0_246 = arith.constant 0 : index
    %286 = vector.load %arg16[%c3_244, %c0_245, %c0_246] : memref<9x8x1xf32, #tpu.memory_space<vmem>>, vector<1x8x1xf32>
    %287 = vector.shape_cast %286 : vector<1x8x1xf32> to vector<8x1xf32>
    %288 = vector.broadcast %287 : vector<8x1xf32> to vector<8x256xf32>
    %289 = arith.mulf %84, %288 : vector<8x256xf32>
    %c3_247 = arith.constant 3 : index
    %c0_248 = arith.constant 0 : index
    %c0_249 = arith.constant 0 : index
    %290 = vector.load %arg2[%c3_247, %c0_248, %c0_249] : memref<9x256x256xf32, #tpu.memory_space<vmem>>, vector<1x256x256xf32>
    %291 = vector.shape_cast %290 : vector<1x256x256xf32> to vector<256x256xf32>
    %cst_250 = arith.constant dense<0.000000e+00> : vector<8x256xf32>
    %292 = tpu.matmul %289, %291, %cst_250 {dimension_numbers = #tpu.dot_dimension_numbers<[1], [0], [0], [1], [0, 0, 1, 1], [], []>} : vector<8x256xf32>, vector<256x256xf32>, vector<8x256xf32> -> vector<8x256xf32>
    %293 = arith.addf %285, %292 : vector<8x256xf32>
    %c4_251 = arith.constant 4 : index
    %c0_252 = arith.constant 0 : index
    %c0_253 = arith.constant 0 : index
    %294 = vector.load %arg16[%c4_251, %c0_252, %c0_253] : memref<9x8x1xf32, #tpu.memory_space<vmem>>, vector<1x8x1xf32>
    %295 = vector.shape_cast %294 : vector<1x8x1xf32> to vector<8x1xf32>
    %296 = vector.broadcast %295 : vector<8x1xf32> to vector<8x256xf32>
    %297 = arith.mulf %84, %296 : vector<8x256xf32>
    %c4_254 = arith.constant 4 : index
    %c0_255 = arith.constant 0 : index
    %c0_256 = arith.constant 0 : index
    %298 = vector.load %arg2[%c4_254, %c0_255, %c0_256] : memref<9x256x256xf32, #tpu.memory_space<vmem>>, vector<1x256x256xf32>
    %299 = vector.shape_cast %298 : vector<1x256x256xf32> to vector<256x256xf32>
    %cst_257 = arith.constant dense<0.000000e+00> : vector<8x256xf32>
    %300 = tpu.matmul %297, %299, %cst_257 {dimension_numbers = #tpu.dot_dimension_numbers<[1], [0], [0], [1], [0, 0, 1, 1], [], []>} : vector<8x256xf32>, vector<256x256xf32>, vector<8x256xf32> -> vector<8x256xf32>
    %301 = arith.addf %293, %300 : vector<8x256xf32>
    %c5_258 = arith.constant 5 : index
    %c0_259 = arith.constant 0 : index
    %c0_260 = arith.constant 0 : index
    %302 = vector.load %arg16[%c5_258, %c0_259, %c0_260] : memref<9x8x1xf32, #tpu.memory_space<vmem>>, vector<1x8x1xf32>
    %303 = vector.shape_cast %302 : vector<1x8x1xf32> to vector<8x1xf32>
    %304 = vector.broadcast %303 : vector<8x1xf32> to vector<8x256xf32>
    %305 = arith.mulf %84, %304 : vector<8x256xf32>
    %c5_261 = arith.constant 5 : index
    %c0_262 = arith.constant 0 : index
    %c0_263 = arith.constant 0 : index
    %306 = vector.load %arg2[%c5_261, %c0_262, %c0_263] : memref<9x256x256xf32, #tpu.memory_space<vmem>>, vector<1x256x256xf32>
    %307 = vector.shape_cast %306 : vector<1x256x256xf32> to vector<256x256xf32>
    %cst_264 = arith.constant dense<0.000000e+00> : vector<8x256xf32>
    %308 = tpu.matmul %305, %307, %cst_264 {dimension_numbers = #tpu.dot_dimension_numbers<[1], [0], [0], [1], [0, 0, 1, 1], [], []>} : vector<8x256xf32>, vector<256x256xf32>, vector<8x256xf32> -> vector<8x256xf32>
    %309 = arith.addf %301, %308 : vector<8x256xf32>
    %c6_265 = arith.constant 6 : index
    %c0_266 = arith.constant 0 : index
    %c0_267 = arith.constant 0 : index
    %310 = vector.load %arg16[%c6_265, %c0_266, %c0_267] : memref<9x8x1xf32, #tpu.memory_space<vmem>>, vector<1x8x1xf32>
    %311 = vector.shape_cast %310 : vector<1x8x1xf32> to vector<8x1xf32>
    %312 = vector.broadcast %311 : vector<8x1xf32> to vector<8x256xf32>
    %313 = arith.mulf %84, %312 : vector<8x256xf32>
    %c6_268 = arith.constant 6 : index
    %c0_269 = arith.constant 0 : index
    %c0_270 = arith.constant 0 : index
    %314 = vector.load %arg2[%c6_268, %c0_269, %c0_270] : memref<9x256x256xf32, #tpu.memory_space<vmem>>, vector<1x256x256xf32>
    %315 = vector.shape_cast %314 : vector<1x256x256xf32> to vector<256x256xf32>
    %cst_271 = arith.constant dense<0.000000e+00> : vector<8x256xf32>
    %316 = tpu.matmul %313, %315, %cst_271 {dimension_numbers = #tpu.dot_dimension_numbers<[1], [0], [0], [1], [0, 0, 1, 1], [], []>} : vector<8x256xf32>, vector<256x256xf32>, vector<8x256xf32> -> vector<8x256xf32>
    %317 = arith.addf %309, %316 : vector<8x256xf32>
    %c7_272 = arith.constant 7 : index
    %c0_273 = arith.constant 0 : index
    %c0_274 = arith.constant 0 : index
    %318 = vector.load %arg16[%c7_272, %c0_273, %c0_274] : memref<9x8x1xf32, #tpu.memory_space<vmem>>, vector<1x8x1xf32>
    %319 = vector.shape_cast %318 : vector<1x8x1xf32> to vector<8x1xf32>
    %320 = vector.broadcast %319 : vector<8x1xf32> to vector<8x256xf32>
    %321 = arith.mulf %84, %320 : vector<8x256xf32>
    %c7_275 = arith.constant 7 : index
    %c0_276 = arith.constant 0 : index
    %c0_277 = arith.constant 0 : index
    %322 = vector.load %arg2[%c7_275, %c0_276, %c0_277] : memref<9x256x256xf32, #tpu.memory_space<vmem>>, vector<1x256x256xf32>
    %323 = vector.shape_cast %322 : vector<1x256x256xf32> to vector<256x256xf32>
    %cst_278 = arith.constant dense<0.000000e+00> : vector<8x256xf32>
    %324 = tpu.matmul %321, %323, %cst_278 {dimension_numbers = #tpu.dot_dimension_numbers<[1], [0], [0], [1], [0, 0, 1, 1], [], []>} : vector<8x256xf32>, vector<256x256xf32>, vector<8x256xf32> -> vector<8x256xf32>
    %325 = arith.addf %317, %324 : vector<8x256xf32>
    %c8_279 = arith.constant 8 : index
    %c0_280 = arith.constant 0 : index
    %c0_281 = arith.constant 0 : index
    %326 = vector.load %arg16[%c8_279, %c0_280, %c0_281] : memref<9x8x1xf32, #tpu.memory_space<vmem>>, vector<1x8x1xf32>
    %327 = vector.shape_cast %326 : vector<1x8x1xf32> to vector<8x1xf32>
    %328 = vector.broadcast %327 : vector<8x1xf32> to vector<8x256xf32>
    %329 = arith.mulf %84, %328 : vector<8x256xf32>
    %c8_282 = arith.constant 8 : index
    %c0_283 = arith.constant 0 : index
    %c0_284 = arith.constant 0 : index
    %330 = vector.load %arg2[%c8_282, %c0_283, %c0_284] : memref<9x256x256xf32, #tpu.memory_space<vmem>>, vector<1x256x256xf32>
    %331 = vector.shape_cast %330 : vector<1x256x256xf32> to vector<256x256xf32>
    %cst_285 = arith.constant dense<0.000000e+00> : vector<8x256xf32>
    %332 = tpu.matmul %329, %331, %cst_285 {dimension_numbers = #tpu.dot_dimension_numbers<[1], [0], [0], [1], [0, 0, 1, 1], [], []>} : vector<8x256xf32>, vector<256x256xf32>, vector<8x256xf32> -> vector<8x256xf32>
    %333 = arith.addf %325, %332 : vector<8x256xf32>
    %c0_286 = arith.constant 0 : index
    %c0_287 = arith.constant 0 : index
    %334 = vector.load %arg17[%c0_286, %c0_287] : memref<8x1xf32, #tpu.memory_space<vmem>>, vector<8x1xf32>
    %335 = vector.broadcast %334 : vector<8x1xf32> to vector<8x256xf32>
    %336 = arith.addf %333, %335 : vector<8x256xf32>
    %c0_288 = arith.constant 0 : index
    %c0_289 = arith.constant 0 : index
    %337 = vector.load %arg18[%c0_288, %c0_289] : memref<8x16xf32, #tpu.memory_space<vmem>>, vector<8x16xf32>
    %cst_290 = arith.constant dense<0.000000e+00> : vector<8x256xf32>
    %338 = tpu.matmul %337, %260, %cst_290 {dimension_numbers = #tpu.dot_dimension_numbers<[1], [0], [0], [1], [0, 0, 1, 1], [], []>} : vector<8x16xf32>, vector<16x256xf32>, vector<8x256xf32> -> vector<8x256xf32>
    %c0_291 = arith.constant 0 : index
    %c0_292 = arith.constant 0 : index
    %339 = vector.load %arg19[%c0_291, %c0_292] : memref<8x8xf32, #tpu.memory_space<vmem>>, vector<8x8xf32>
    %cst_293 = arith.constant dense<0.000000e+00> : vector<8x256xf32>
    %340 = tpu.matmul %339, %336, %cst_293 {dimension_numbers = #tpu.dot_dimension_numbers<[1], [0], [0], [1], [0, 0, 1, 1], [], []>} : vector<8x8xf32>, vector<8x256xf32>, vector<8x256xf32> -> vector<8x256xf32>
    %341 = arith.addf %338, %340 : vector<8x256xf32>
    %c0_294 = arith.constant 0 : index
    %c0_295 = arith.constant 0 : index
    %342 = vector.load %arg20[%c0_294, %c0_295] : memref<8x1xf32, #tpu.memory_space<vmem>>, vector<8x1xf32>
    %343 = vector.broadcast %342 : vector<8x1xf32> to vector<8x256xf32>
    %344 = arith.addf %341, %343 : vector<8x256xf32>
    %cst_296 = arith.constant 0.000000e+00 : f32
    %345 = vector.broadcast %cst_296 : f32 to vector<8x256xf32>
    %346 = arith.maximumf %344, %345 : vector<8x256xf32>
    %c0_297 = arith.constant 0 : index
    %c0_298 = arith.constant 0 : index
    %347 = vector.load %arg21[%c0_297, %c0_298] : memref<4x8xf32, #tpu.memory_space<vmem>>, vector<4x8xf32>
    %cst_299 = arith.constant dense<0.000000e+00> : vector<4x256xf32>
    %348 = tpu.matmul %347, %346, %cst_299 {dimension_numbers = #tpu.dot_dimension_numbers<[1], [0], [0], [1], [0, 0, 1, 1], [], []>} : vector<4x8xf32>, vector<8x256xf32>, vector<4x256xf32> -> vector<4x256xf32>
    %c0_300 = arith.constant 0 : index
    %c0_301 = arith.constant 0 : index
    %349 = vector.load %arg22[%c0_300, %c0_301] : memref<4x1xf32, #tpu.memory_space<vmem>>, vector<4x1xf32>
    %350 = vector.broadcast %349 : vector<4x1xf32> to vector<4x256xf32>
    %351 = arith.addf %348, %350 : vector<4x256xf32>
    %cst_302 = arith.constant 0.000000e+00 : f32
    %352 = vector.broadcast %cst_302 : f32 to vector<4x256xf32>
    %353 = arith.maximumf %351, %352 : vector<4x256xf32>
    %c0_303 = arith.constant 0 : index
    %c0_304 = arith.constant 0 : index
    %c0_305 = arith.constant 0 : index
    %354 = vector.load %arg23[%c0_303, %c0_304, %c0_305] : memref<1x4x256xf32, #tpu.memory_space<vmem>>, vector<1x4x256xf32>
    %355 = vector.shape_cast %354 : vector<1x4x256xf32> to vector<4x256xf32>
    %356 = vector.shape_cast %353 : vector<4x256xf32> to vector<1x4x256xf32>
    tpu.vector_store %arg23[%c0_303, %c0_304, %c0_305], %356 {strides = array<i32>} : memref<1x4x256xf32, #tpu.memory_space<vmem>>, vector<1x4x256xf32>,
    return
  }
  func.func @transform_0(%arg0: i32) -> (i32, i32, i32) {
    %c0_i32 = arith.constant 0 : i32
    %c0_i32_0 = arith.constant 0 : i32
    %c0_i32_1 = arith.constant 0 : i32
    return %arg0, %c0_i32, %c0_i32_0 : i32, i32, i32
  }
  func.func @transform_1(%arg0: i32) -> (i32, i32, i32) {
    %c0_i32 = arith.constant 0 : i32
    %c0_i32_0 = arith.constant 0 : i32
    %c0_i32_1 = arith.constant 0 : i32
    %c0_i32_2 = arith.constant 0 : i32
    return %c0_i32, %c0_i32_0, %c0_i32_1 : i32, i32, i32
  }
  func.func @transform_2(%arg0: i32) -> (i32, i32, i32) {
    %c0_i32 = arith.constant 0 : i32
    %c0_i32_0 = arith.constant 0 : i32
    %c0_i32_1 = arith.constant 0 : i32
    %c0_i32_2 = arith.constant 0 : i32
    return %c0_i32, %c0_i32_0, %c0_i32_1 : i32, i32, i32
  }
  func.func @transform_3(%arg0: i32) -> (i32, i32, i32) {
    %c0_i32 = arith.constant 0 : i32
    %c0_i32_0 = arith.constant 0 : i32
    %c0_i32_1 = arith.constant 0 : i32
    %c0_i32_2 = arith.constant 0 : i32
    return %c0_i32, %c0_i32_0, %c0_i32_1 : i32, i32, i32
  }
  func.func @transform_4(%arg0: i32) -> (i32, i32) {
    %c0_i32 = arith.constant 0 : i32
    %c0_i32_0 = arith.constant 0 : i32
    %c0_i32_1 = arith.constant 0 : i32
    return %c0_i32, %c0_i32_0 : i32, i32
  }
  func.func @transform_5(%arg0: i32) -> (i32, i32, i32) {
    %c0_i32 = arith.constant 0 : i32
    %c0_i32_0 = arith.constant 0 : i32
    %c0_i32_1 = arith.constant 0 : i32
    %c0_i32_2 = arith.constant 0 : i32
    return %c0_i32, %c0_i32_0, %c0_i32_1 : i32, i32, i32
  }
  func.func @transform_6(%arg0: i32) -> (i32, i32) {
    %c0_i32 = arith.constant 0 : i32
    %c0_i32_0 = arith.constant 0 : i32
    %c0_i32_1 = arith.constant 0 : i32
    return %c0_i32, %c0_i32_0 : i32, i32
  }
  func.func @transform_7(%arg0: i32) -> (i32, i32) {
    %c0_i32 = arith.constant 0 : i32
    %c0_i32_0 = arith.constant 0 : i32
    %c0_i32_1 = arith.constant 0 : i32
    return %c0_i32, %c0_i32_0 : i32, i32
  }
  func.func @transform_8(%arg0: i32) -> (i32, i32) {
    %c0_i32 = arith.constant 0 : i32
    %c0_i32_0 = arith.constant 0 : i32
    %c0_i32_1 = arith.constant 0 : i32
    return %c0_i32, %c0_i32_0 : i32, i32
  }
  func.func @transform_9(%arg0: i32) -> (i32, i32, i32) {
    %c0_i32 = arith.constant 0 : i32
    %c0_i32_0 = arith.constant 0 : i32
    %c0_i32_1 = arith.constant 0 : i32
    %c0_i32_2 = arith.constant 0 : i32
    return %c0_i32, %c0_i32_0, %c0_i32_1 : i32, i32, i32
  }
  func.func @transform_10(%arg0: i32) -> (i32, i32) {
    %c0_i32 = arith.constant 0 : i32
    %c0_i32_0 = arith.constant 0 : i32
    %c0_i32_1 = arith.constant 0 : i32
    return %c0_i32, %c0_i32_0 : i32, i32
  }
  func.func @transform_11(%arg0: i32) -> (i32, i32) {
    %c0_i32 = arith.constant 0 : i32
    %c0_i32_0 = arith.constant 0 : i32
    %c0_i32_1 = arith.constant 0 : i32
    return %c0_i32, %c0_i32_0 : i32, i32
  }
  func.func @transform_12(%arg0: i32) -> (i32, i32) {
    %c0_i32 = arith.constant 0 : i32
    %c0_i32_0 = arith.constant 0 : i32
    %c0_i32_1 = arith.constant 0 : i32
    return %c0_i32, %c0_i32_0 : i32, i32
  }
  func.func @transform_13(%arg0: i32) -> (i32, i32, i32) {
    %c0_i32 = arith.constant 0 : i32
    %c0_i32_0 = arith.constant 0 : i32
    %c0_i32_1 = arith.constant 0 : i32
    %c0_i32_2 = arith.constant 0 : i32
    return %c0_i32, %c0_i32_0, %c0_i32_1 : i32, i32, i32
  }
  func.func @transform_14(%arg0: i32) -> (i32, i32) {
    %c0_i32 = arith.constant 0 : i32
    %c0_i32_0 = arith.constant 0 : i32
    %c0_i32_1 = arith.constant 0 : i32
    return %c0_i32, %c0_i32_0 : i32, i32
  }
  func.func @transform_15(%arg0: i32) -> (i32, i32, i32) {
    %c0_i32 = arith.constant 0 : i32
    %c0_i32_0 = arith.constant 0 : i32
    %c0_i32_1 = arith.constant 0 : i32
    %c0_i32_2 = arith.constant 0 : i32
    return %c0_i32, %c0_i32_0, %c0_i32_1 : i32, i32, i32
  }
  func.func @transform_16(%arg0: i32) -> (i32, i32) {
    %c0_i32 = arith.constant 0 : i32
    %c0_i32_0 = arith.constant 0 : i32
    %c0_i32_1 = arith.constant 0 : i32
    return %c0_i32, %c0_i32_0 : i32, i32
  }
  func.func @transform_17(%arg0: i32) -> (i32, i32) {
    %c0_i32 = arith.constant 0 : i32
    %c0_i32_0 = arith.constant 0 : i32
    %c0_i32_1 = arith.constant 0 : i32
    return %c0_i32, %c0_i32_0 : i32, i32
  }
  func.func @transform_18(%arg0: i32) -> (i32, i32) {
    %c0_i32 = arith.constant 0 : i32
    %c0_i32_0 = arith.constant 0 : i32
    %c0_i32_1 = arith.constant 0 : i32
    return %c0_i32, %c0_i32_0 : i32, i32
  }
  func.func @transform_19(%arg0: i32) -> (i32, i32) {
    %c0_i32 = arith.constant 0 : i32
    %c0_i32_0 = arith.constant 0 : i32
    %c0_i32_1 = arith.constant 0 : i32
    return %c0_i32, %c0_i32_0 : i32, i32
  }
  func.func @transform_20(%arg0: i32) -> (i32, i32) {
    %c0_i32 = arith.constant 0 : i32
    %c0_i32_0 = arith.constant 0 : i32
    %c0_i32_1 = arith.constant 0 : i32
    return %c0_i32, %c0_i32_0 : i32, i32
  }
  func.func @transform_21(%arg0: i32) -> (i32, i32) {
    %c0_i32 = arith.constant 0 : i32
    %c0_i32_0 = arith.constant 0 : i32
    %c0_i32_1 = arith.constant 0 : i32
    return %c0_i32, %c0_i32_0 : i32, i32
  }
  func.func @transform_22(%arg0: i32) -> (i32, i32, i32) {
    %c0_i32 = arith.constant 0 : i32
    %c0_i32_0 = arith.constant 0 : i32
    %c0_i32_1 = arith.constant 0 : i32
    return %arg0, %c0_i32, %c0_i32_0 : i32, i32, i32
  }
}

</mosaic_0001>

<bundles_post_ra>
// kernel: generator_depthwise_forward.1
= control target key start
LH: loop header
LB: loop body
LE: loop exit
PB: predicated region body
PF: predicated region fallthrough
CT: control target
= control target key end

     0   :  { %s10806_s0 = inlined_call_operand.vmem [shape: f32[2,4,256], index: 0, kind: input, shape index: {}]   ;;  %s10807_s1 = inlined_call_operand.hbm [shape: f32[9,256,256], index: 1, kind: input, shape index: {}]   ;;  %s10808_s2 = inlined_call_operand.hbm [shape: f32[9,64,64], index: 2, kind: input, shape index: {}]   ;;  %s10809_s3 = inlined_call_operand.hbm [shape: f32[4,256,64], index: 3, kind: input, shape index: {}]   ;;  %s10810_s4 = inlined_call_operand.hbm [shape: f32[64,256], index: 4, kind: input, shape index: {}]   ;;  %s10811_s5 = inlined_call_operand.vmem [shape: f32[9,4,1], index: 5, kind: input, shape index: {}]   ;;  %s10812_s6 = inlined_call_operand.vmem [shape: f32[4,1], index: 6, kind: input, shape index: {}]   ;;  %s10813_s7 = inlined_call_operand.vmem [shape: f32[8,4], index: 7, kind: input, shape index: {}]   ;;  %s10814_s8 = inlined_call_operand.vmem [shape: f32[8,1], index: 8, kind: input, shape index: {}]   ;;  %s10815_s9 = inlined_call_operand.vmem [shape: f32[9,8,1], index: 9, kind: input, shape index: {}]   ;;  %s10816_s10 = inlined_call_operand.vmem [shape: f32[8,1], index: 10, kind: input, shape index: {}]   ;;  %s10817_s11 = inlined_call_operand.vmem [shape: f32[16,8], index: 11, kind: input, shape index: {}]   ;;  %s10818_s12 = inlined_call_operand.vmem [shape: f32[16,1], index: 12, kind: input, shape index: {}]   ;;  %s10819_s13 = inlined_call_operand.vmem [shape: f32[9,16,1], index: 13, kind: input, shape index: {}]   ;;  %s10820_s14 = inlined_call_operand.vmem [shape: f32[16,1], index: 14, kind: input, shape index: {}]   ;;  %s10821_s15 = inlined_call_operand.vmem [shape: f32[9,8,1], index: 15, kind: input, shape index: {}]   ;;  %s10822_s16 = inlined_call_operand.vmem [shape: f32[8,1], index: 16, kind: input, shape index: {}]   ;;  %s10823_s17 = inlined_call_operand.hbm [shape: f32[8,16], index: 17, kind: input, shape index: {}]   ;;  %s10824_s18 = inlined_call_operand.vmem [shape: f32[8,8], index: 18, kind: input, shape index: {}]   ;;  %s10825_s19 = inlined_call_operand.vmem [shape: f32[8,1], index: 19, kind: input, shape index: {}]   ;;  %s10826_s20 = inlined_call_operand.hbm [shape: f32[4,8], index: 20, kind: input, shape index: {}]   ;;  %s10827_s21 = inlined_call_operand.vmem [shape: f32[4,1], index: 21, kind: input, shape index: {}]   ;;  %s10828_s22 = inlined_call_operand.vmem [shape: f32[2,4,256], index: 22, kind: output, shape index: {}]  }
   0x1   :  { %11368 = sst [smem:[#allocation293_spill]] %s10806_s0 }
   0x2   :  { %11369 = sst [smem:[#allocation294_spill]] %s10807_s1 }
   0x3   :  { %11370 = sst [smem:[#allocation295_spill]] %s10808_s2 }
   0x4   :  { %11371 = sst [smem:[#allocation296_spill]] %s10809_s3 }
   0x5   :  { %11372 = sst [smem:[#allocation297_spill]] %s10810_s4 }
   0x6   :  { %11373 = sst [smem:[#allocation298_spill]] %s10811_s5 }
   0x7   :  { %11374 = sst [smem:[#allocation299_spill]] %s10812_s6 }
   0x8   :  { %11375 = sst [smem:[#allocation300_spill]] %s10813_s7 }
   0x9   :  { %11376 = sst [smem:[#allocation301_spill]] %s10817_s11 }
   0xa   :  { %11377 = sst [smem:[#allocation302_spill]] %s10824_s18 }
   0xb   :  { %11378 = sst [smem:[#allocation303_spill]] %s10827_s21 }
   0xc   :  { %11379 = sst [smem:[#allocation304_spill]] %s10828_s22 }
   0xd   :  { %27 = vsyncpa [#allocation3], 0 }
   0xe   :  { %28 = vsyncpa [#allocation5], 0 }
   0xf   :  { %29 = vsyncpa [#allocation8], 0 }
  0x10   :  { %30 = vsyncpa [#allocation11], 0  ;;  %s8630_s3 = smov 0  }
  0x11 LB: > { %11380 = sst [smem:[#allocation16_spill]] %s8498_s3  ;;  %s8500_s28 = smov [#allocation4]   ;;  %s8498_s3 = sphi %s8630_s3, %s36_s3  }
  0x12   : > { %s559_s29 = sshll.u32 %s8500_s28, 4  ;;  %s8636_s30 = sadd.s32 4294967295, %s8498_s3   ;;  %s8641_s29 = int_to_ptr.vmem [resolvable:$true] %s559_s29 }
  0x13   : > { %p5696_p0 = scmp.ge.s32.totalorder %s8498_s3, 1  ;;  %p534_p1 = scmp.lt.s32.totalorder %s8498_s3, 3 }
  0x14   : > { %p10840_p2 = scmp.eq.s32.totalorder %s8636_s30, 0  ;;  %s8501_s23 = smov [#allocation7]  }
  0x15   : > { %p8643_p3 = pnand %p5696_p0, %p534_p1  ;;  %s585_s1 = sshll.u32 %s8501_s23, 4  ;;  %s8655_s1 = int_to_ptr.vmem [resolvable:$true] %s585_s1 }
  0x16   : > { %s8502_s5 = smov [#allocation2]   ;;  %s11383_s26 = sld [smem:[#allocation295_spill]] }
  0x17   : > { %s11381_s4 = scalar_select %p8643_p3, 1, 0 }
  0x18   : > { %p8252_p4 = pneg %p8643_p3  ;;  %s546_s24 = sshll.u32 %s8502_s5, 4  ;;  %s8657_s24 = int_to_ptr.vmem [resolvable:$true] %s546_s24 }
  0x1a   : > { %p8651_p5 = pnand %p10840_p2, %p8252_p4 }
  0x1c   : > { %s8308_s2 = scalar_lea.hbm %s11383_s26, 9216  ;;  %p8667_p7 = pneg %p8651_p5 }
  0x1d   : > { %p8309_p6 = scmp.ne.s32.totalorder %s11383_s26, %s8308_s2  ;;  %p8315_p10 = scmp.lt.u32.totalorder %s8308_s2, %s11383_s26 }
  0x1f   : > { %p8311_p8 = pnand %p8667_p7, %p8309_p6 }
  0x21   : > { %p8312_p9 = pneg %p8311_p8 }
  0x23   : > { %p8317_p11 = pnand %p8315_p10, %p8312_p9 }
  0x25   : > { %8320 = shalt.err (!%p8317_p11)
}
  0x26   : > { %s8321_s6 = scalar_lea.vmem %s8641_s29, 9216  ;;  %p8329_p1 = scmp.lt.s32.totalorder %s8641_s29, %s8641_s29 }
  0x27   : > { %p8322_p12 = scmp.ne.s32.totalorder %s8641_s29, %s8321_s6  ;;  %p8330_p4 = scmp.lt.s32.totalorder %s8321_s6, %s8321_s6 }
  0x29   : > { %p8324_p13 = pnand %p8322_p12, %p8667_p7  ;;  %p8331_p6 = por %p8330_p4, %p8329_p1 }
  0x2b   : > { %p8325_p0 = pneg %p8324_p13 }
  0x2d   : > { %p8332_p8 = pnand %p8331_p6, %p8325_p0 }
  0x2f   : > { %8335 = shalt.err (!%p8332_p8)
}
  0x30   : > { %s10836_s25 = smov 128   ;;  %s10837_s2 = smov 8  }
  0x31   : > { %8258 = dma.hbm_to_vmem [thread:$0]  (!%p8651_p5), %s11383_s26, 9216, %s8641_s29, [#allocation5], %s10836_s25, %s10836_s25, %s10837_s2  }
  0x32   : > { %s11385_s22 = sld [smem:[#allocation297_spill]] }
  0x38   : > { %s8336_s6 = scalar_lea.hbm %s11385_s22, 2048 }
  0x39   : > { %p8337_p9 = scmp.ne.s32.totalorder %s11385_s22, %s8336_s6  ;;  %p8343_p12 = scmp.lt.u32.totalorder %s8336_s6, %s11385_s22 }
  0x3b   : > { %p8339_p10 = pnand %p8337_p9, %p8667_p7 }
  0x3d   : > { %p8340_p11 = pneg %p8339_p10 }
  0x3f   : > { %p8345_p13 = pnand %p8343_p12, %p8340_p11 }
  0x41   : > { %8348 = shalt.err (!%p8345_p13)
}
  0x42   : > { %s8349_s29 = scalar_lea.vmem %s8655_s1, 2048  ;;  %p8357_p6 = scmp.lt.s32.totalorder %s8655_s1, %s8655_s1 }
  0x43   : > { %p8350_p0 = scmp.ne.s32.totalorder %s8655_s1, %s8349_s29  ;;  %p8358_p8 = scmp.lt.s32.totalorder %s8349_s29, %s8349_s29 }
  0x45   : > { %p8352_p1 = pnand %p8350_p0, %p8667_p7  ;;  %p8359_p9 = por %p8358_p8, %p8357_p6 }
  0x47   : > { %p8353_p4 = pneg %p8352_p1 }
  0x49   : > { %p8360_p10 = pnand %p8359_p9, %p8353_p4 }
  0x4b   : > { %8363 = shalt.err (!%p8360_p10)
}
  0x4c   : > { %s8505_s11 = smov 256   ;;  %s8506_s7 = smov 16  }
  0x4d   : > { %8264 = dma.hbm_to_vmem [thread:$0]  (!%p8651_p5), %s11385_s22, 2048, %s8655_s1, [#allocation8], %s8505_s11, %s8505_s11, %s8506_s7  }
  0x4e   : > { %s11386_s23 = sld [smem:[#allocation294_spill]] }
  0x54   : > { %s8364_s5 = scalar_lea.hbm %s11386_s23, 73728 }
  0x55   : > { %p8365_p11 = scmp.ne.s32.totalorder %s11386_s23, %s8364_s5  ;;  %p8371_p0 = scmp.lt.u32.totalorder %s8364_s5, %s11386_s23 }
  0x57   : > { %p8367_p12 = pnand %p8365_p11, %p8667_p7 }
  0x59   : > { %p8368_p13 = pneg %p8367_p12 }
  0x5b   : > { %p8373_p1 = pnand %p8371_p0, %p8368_p13 }
  0x5d   : > { %8376 = shalt.err (!%p8373_p1)
}
  0x5e   : > { %s8377_s1 = scalar_lea.vmem %s8657_s24, 73728  ;;  %p8385_p9 = scmp.lt.s32.totalorder %s8657_s24, %s8657_s24 }
  0x5f   : > { %p8378_p4 = scmp.ne.s32.totalorder %s8657_s24, %s8377_s1  ;;  %p8386_p10 = scmp.lt.s32.totalorder %s8377_s1, %s8377_s1 }
  0x61   : > { %p8380_p6 = pnand %p8378_p4, %p8667_p7  ;;  %p8387_p11 = por %p8386_p10, %p8385_p9 }
  0x63   : > { %p8381_p8 = pneg %p8380_p6 }
  0x65   : > { %p8388_p12 = pnand %p8387_p11, %p8381_p8 }
  0x67   : > { %8391 = shalt.err (!%p8388_p12)
}
  0x68   : > { %8255 = dma.hbm_to_vmem [thread:$0]  (!%p8651_p5), %s11386_s23, 73728, %s8657_s24, [#allocation3], %s8505_s11, %s8505_s11, %s8506_s7  }
  0x69   : > { %s8507_s18 = smov [#allocation6]   ;;  %s8508_s27 = smov [#allocation9]  }
  0x6a   : > { %s572_s21 = sshll.u32 %s8507_s18, 4  ;;  %s635_s28 = sshll.u32 %s8508_s27, 4  ;;  %s573_s21 = int_to_ptr.vmem [resolvable:$true] %s572_s21  ;;  %s8737_s28 = int_to_ptr.vmem [resolvable:$true] %s635_s28 }
  0x6b   : > { %s11387_s29 = sld [smem:[#allocation296_spill]] }
  0x71   : > { %s8392_s1 = scalar_lea.hbm %s11387_s29, 16384 }
  0x72   : > { %p8393_p13 = scmp.ne.s32.totalorder %s11387_s29, %s8392_s1  ;;  %p8399_p4 = scmp.lt.u32.totalorder %s8392_s1, %s11387_s29 }
  0x74   : > { %p8395_p0 = pnand %p8393_p13, %p8667_p7 }
  0x76   : > { %p8396_p1 = pneg %p8395_p0 }
  0x78   : > { %p8401_p6 = pnand %p8399_p4, %p8396_p1 }
  0x7a   : > { %8404 = shalt.err (!%p8401_p6)
}
  0x7b   : > { %s8405_s11 = scalar_lea.vmem %s573_s21, 16384  ;;  %p8413_p11 = scmp.lt.s32.totalorder %s573_s21, %s573_s21 }
  0x7c   : > { %p8406_p8 = scmp.ne.s32.totalorder %s573_s21, %s8405_s11  ;;  %p8414_p12 = scmp.lt.s32.totalorder %s8405_s11, %s8405_s11 }
  0x7e   : > { %p8408_p9 = pnand %p8406_p8, %p8667_p7  ;;  %p8415_p2 = por %p8414_p12, %p8413_p11 }
  0x80   : > { %p8409_p10 = pneg %p8408_p9 }
  0x82   : > { %p8416_p3 = pnand %p8415_p2, %p8409_p10 }
  0x84   : > { %8419 = shalt.err (!%p8416_p3)
}
  0x85   : > { %s11388_s22 = smov 8   ;;  %s11389_s26 = smov 128  }
  0x86   : > { %8261 = dma.hbm_to_vmem [thread:$0]  (!%p8651_p5), %s11387_s29, 16384, %s573_s21, [#allocation5], %s11389_s26, %s11389_s26, %s11388_s22  }
  0x87   : > { %s8420_s5 = scalar_lea.hbm %s10823_s17, 128 }
  0x88   : > { %p8421_p13 = scmp.ne.s32.totalorder %s10823_s17, %s8420_s5  ;;  %p8427_p0 = scmp.lt.u32.totalorder %s8420_s5, %s10823_s17 }
  0x8a   : > { %p8423_p2 = pnand %p8421_p13, %p8667_p7 }
  0x8c   : > { %p8424_p3 = pneg %p8423_p2 }
  0x8e   : > { %p8429_p1 = pnand %p8427_p0, %p8424_p3 }
  0x90   : > { %8432 = shalt.err (!%p8429_p1)
}
  0x91   : > { %s8433_s21 = scalar_lea.vmem %s8737_s28, 128  ;;  %p8441_p9 = scmp.lt.s32.totalorder %s8737_s28, %s8737_s28 }
  0x92   : > { %p8434_p4 = scmp.ne.s32.totalorder %s8737_s28, %s8433_s21  ;;  %p8442_p10 = scmp.lt.s32.totalorder %s8433_s21, %s8433_s21 }
  0x94   : > { %p8436_p6 = pnand %p8434_p4, %p8667_p7  ;;  %p8443_p11 = por %p8442_p10, %p8441_p9 }
  0x96   : > { %p8437_p8 = pneg %p8436_p6 }
  0x98   : > { %p8444_p12 = pnand %p8443_p11, %p8437_p8 }
  0x9a   : > { %8447 = shalt.err (!%p8444_p12)
}
  0x9b   : > { %8267 = dma.hbm_to_vmem [thread:$0]  (!%p8651_p5), %s10823_s17, 128, %s8737_s28, [#allocation8]  }
  0x9c   : > { %s8509_s26 = smov [#allocation10]   ;;  %s8448_s27 = scalar_lea.hbm %s10826_s20, 64 }
  0x9d   : > { %s652_s7 = sshll.u32 %s8509_s26, 4  ;;  %p8449_p13 = scmp.ne.s32.totalorder %s10826_s20, %s8448_s27  ;;  %s653_s7 = int_to_ptr.vmem [resolvable:$true] %s652_s7 }
  0x9e   : > { %p8455_p0 = scmp.lt.u32.totalorder %s8448_s27, %s10826_s20 }
  0x9f   : > { %p8451_p2 = pnand %p8449_p13, %p8667_p7 }
  0xa1   : > { %p8452_p3 = pneg %p8451_p2 }
  0xa3   : > { %p8457_p1 = pnand %p8455_p0, %p8452_p3 }
  0xa5   : > { %8460 = shalt.err (!%p8457_p1)
}
  0xa6   : > { %s8461_s28 = scalar_lea.vmem %s653_s7, 64  ;;  %p8469_p9 = scmp.lt.s32.totalorder %s653_s7, %s653_s7 }
  0xa7   : > { %p8462_p4 = scmp.ne.s32.totalorder %s653_s7, %s8461_s28  ;;  %p8470_p10 = scmp.lt.s32.totalorder %s8461_s28, %s8461_s28 }
  0xa9   : > { %p8464_p6 = pnand %p8462_p4, %p8667_p7  ;;  %p8471_p11 = por %p8470_p10, %p8469_p9 }
  0xab   : > { %p8465_p8 = pneg %p8464_p6 }
  0xad   : > { %p8472_p12 = pnand %p8471_p11, %p8465_p8 }
  0xaf   : > { %8475 = shalt.err (!%p8472_p12)
}
  0xb0   : > { %8270 = dma.hbm_to_vmem [thread:$0]  (!%p8651_p5), %s10826_s20, 64, %s653_s7, [#allocation11]  }
  0xb1   : > { %p11390_p13 = scmp.ne.s32.totalorder %s11381_s4, 0 }
  0xb3   : > { %676 = sbr.rel (%p11390_p13) target bundleno = 3434 (0xd6a), region = 108 }
  0xba   : > { %p11391_p2 = scmp.eq.s32.totalorder %s8636_s30, 0 }
  0xbc   : > { %8481 = dma.done.wait (%p11391_p2), [#allocation3], 73728   ;;  %p11392_p7 = pmov %p11391_p2 }
  0xbd   : > { %p11393_p3 = pmov %p11391_p2 }
  0xbe   : > { %8483 = vsyncadd (%p11392_p7), [#allocation3], 4294893568 }
  0xbf   : > { %8485 = dma.done.wait (%p11393_p3), [#allocation5], 25600   ;;  %p11394_p0 = pmov %p11391_p2 }
  0xc1   : > { %8487 = vsyncadd (%p11394_p0), [#allocation5], 4294941696  ;;  %p11395_p1 = pmov %p11394_p0 }
  0xc2   : > { %p11396_p5 = pmov %p11394_p0 }
  0xc3   : > { %8489 = dma.done.wait (%p11395_p1), [#allocation8], 2176  }
  0xc4   : > { %8491 = vsyncadd (%p11396_p5), [#allocation8], 4294965120  ;;  %p11397_p4 = pmov %p11394_p0 }
  0xc5   : > { %p11398_p6 = pmov %p11394_p0 }
  0xc6   : > { %8493 = dma.done.wait (%p11397_p4), [#allocation11], 64  }
  0xc7   : > { %8495 = vsyncadd (%p11398_p6), [#allocation11], 4294967232  ;;  %v8510_v0 = vmov 0   ;;  %s11399_s0 = sld [smem:[#allocation298_spill]]  ;;  %v1092_v8 = vld [vmem:[#allocation2 + $0x408] sm:$0xff]  ;;  %v1094_v9 = vld [vmem:[#allocation2 + $0x418] sm:$0xff] }
  0xc8   : > { %8306 = vset.pattern.permute.xlu0 %v8510_v0  ;;  %8307 = vset.pattern.permute.xlu1 %v8510_v0  ;;  %v1091_v10 = vld [vmem:[#allocation2 + $0x400] sm:$0xff]  ;;  %v8843_v12 = vpack.c.bf16 %v1094_v9, %v1092_v8  ;;  %v1093_v13 = vld [vmem:[#allocation2 + $0x410] sm:$0xff]  ;;  %v1096_v15 = vld [vmem:[#allocation2 + $0x428] sm:$0xff]  ;;  %s11405_s26 = sld [smem:[#allocation299_spill]]  ;;  %s11454_s21 = sld [smem:[#allocation303_spill]]  ;;  %vm2186_vm0 = vcmask 1043456  }
  0xc9   : > { %v8845_v14 = vpack.c.bf16 %v1093_v13, %v1091_v10  ;;  %v1098_v16 = vld [vmem:[#allocation2 + $0x438] sm:$0xff]  ;;  %v1095_v17 = vld [vmem:[#allocation2 + $0x420] sm:$0xff]  ;;  %v1097_v19 = vld [vmem:[#allocation2 + $0x430] sm:$0xff]  ;;  %p758_p8 = scmp.lt.s32.totalorder %s8636_s30, 1  ;;  %s11455_s22 = sld [smem:[#allocation293_spill]]  ;;  %vm2182_vm1 = vcmask 31744  }
  0xca   : > { %11400 = vst [vmem:[#allocation17_spill] sm:$0xff] %v8843_v12  ;;  %6307 = vmatprep.subr.bf16.mxu0 %v8843_v12  ;;  %v8848_v18 = vpack.c.bf16 %v1098_v16, %v1096_v15  ;;  %v8854_v21 = vpack.c.bf16 %v1097_v19, %v1095_v17  ;;  %v1100_v22 = vld [vmem:[#allocation2 + $0x448] sm:$0xff]  ;;  %v1102_v23 = vld [vmem:[#allocation2 + $0x458] sm:$0xff]  ;;  %v1099_v25 = vld [vmem:[#allocation2 + $0x440] sm:$0xff]  ;;  %s11677_s18 = sld [smem:[#allocation300_spill]]  ;;  %vm8514_vm2 = vmmov 0  }
  0xcb   : > { %11401 = vst [vmem:[#allocation18_spill] sm:$0xff] %v8845_v14  ;;  %6309 = vmatpush1.bf16.msra.mxu0 %v8845_v14  ;;  %v8857_v24 = vpack.c.bf16 %v1102_v23, %v1100_v22  ;;  %v1101_v26 = vld [vmem:[#allocation2 + $0x450] sm:$0xff]  ;;  %v1104_v28 = vld [vmem:[#allocation2 + $0x468] sm:$0xff]  ;;  %v1106_v29 = vld [vmem:[#allocation2 + $0x478] sm:$0xff]  ;;  %s12199_s30 = smov (!%p758_p8, %s8636_s30), 1  ;;  %vm2712_vm3 = vcmask 523264  }
  0xcc   : > { %11402 = vst [vmem:[#allocation19_spill] sm:$0xff] %v8848_v18  ;;  %11403 = vst [vmem:[#allocation20_spill] sm:$0xff] %v8854_v21  ;;  %6311 = vmatprep.subr.bf16.mxu0 %v8848_v18  ;;  %v2176_v30 = vld [vmem:[%s10814_s8] sm:$0xff]  ;;  %v8866_v31 = vpack.c.bf16 %v1101_v26, %v1099_v25  ;;  %v8869_v32 = vpack.c.bf16 %v1106_v29, %v1104_v28  ;;  %v1105_v34 = vld [vmem:[#allocation2 + $0x470] sm:$0xff]  ;;  %s5776_s3 = sshll.u32 %s12199_s30, 3  ;;  %s11928_s6 = sld [smem:[#allocation301_spill]] }
  0xcd   : > { %v5716_v1 = vld [vmem:[%s11399_s0 + $0x8] sm:$0xf]  ;;  %v5717_v2 = vld [vmem:[%s11399_s0 + $0xc] sm:$0xf]  ;;  %v5718_v3 = vld [vmem:[%s11399_s0 + $0x10] sm:$0xf] }
  0xce   : > { %1079 = vperm.xlu0 %8306, %v5716_v1   ;;  %1391 = vperm.xlu1 %8307, %v5718_v3   ;;  %v5719_v4 = vld [vmem:[%s11399_s0 + $0x14] sm:$0xf]  ;;  %v5720_v5 = vld [vmem:[%s11399_s0 + $0x18] sm:$0xf]  ;;  %v5715_v6 = vld [vmem:[%s11399_s0 + $0x4] sm:$0xf] }
  0xcf   : > { %v5721_v7 = vld [vmem:[%s11399_s0 + $0x1c] sm:$0xf]  ;;  %v769_v11 = vld [vmem:[%s11399_s0] sm:$0xf]  ;;  %11404 = vst [vmem:[#allocation21_spill] sm:$0xff] %v8857_v24  ;;  %6313 = vmatpush1.bf16.msra.mxu0 %v8854_v21  ;;  %11406 = vst [vmem:[#allocation22_spill] sm:$0xff] %v8866_v31 }
  0xd0   : > { %v5722_v20 = vld [vmem:[%s11399_s0 + $0x20] sm:$0xf]  ;;  %6315 = vmatprep.subr.bf16.mxu0 %v8857_v24  ;;  %11407 = vst [vmem:[#allocation23_spill] sm:$0xff] %v8869_v32  ;;  %v5726_v35 = vld [vmem:[%s10815_s9 + $0x8] sm:$0xff]  ;;  %v1110_v37 = vld [vmem:[#allocation2 + $0x498] sm:$0xff]  ;;  %vm3517_vm4 = vcmask 64512  }
  0xd1   : > { %v2167_v27 = vld [vmem:[%s11405_s26] sm:$0xf]  ;;  %v1108_v36 = vld [vmem:[#allocation2 + $0x488] sm:$0xff]  ;;  %v1109_v42 = vld [vmem:[#allocation2 + $0x490] sm:$0xff]  ;;  %s762_s26 = scalar_lea.vmem %s11455_s22, %s5776_s3  ;;  %vm5406_vm5 = vcmask 130048   ;;  %s12196_s22 = sld [smem:[#allocation304_spill]] }
  0xd2   : > { %1235 = vperm.xlu0 %8306, %v5717_v2   ;;  %1547 = vperm.xlu1 %8307, %v5719_v4   ;;  %v1103_v33 = vld [vmem:[#allocation2 + $0x460] sm:$0xff]  ;;  %v8881_v40 = vpack.c.bf16 %v1110_v37, %v1108_v36  ;;  %v5729_v43 = vld [vmem:[%s10815_s9 + $0x10] sm:$0xff]  ;;  %v1112_v44 = vld [vmem:[#allocation2 + $0x4a8] sm:$0xff] }
  0xd3   : > { %v2680_v38 = vld [vmem:[%s10815_s9] sm:$0xff]  ;;  %6317 = vmatpush1.bf16.msra.mxu0 %v8866_v31  ;;  %v8878_v39 = vpack.c.bf16 %v1105_v34, %v1103_v33  ;;  %v1114_v45 = vld [vmem:[#allocation2 + $0x4b8] sm:$0xff]  ;;  %v1113_v50 = vld [vmem:[#allocation2 + $0x4b0] sm:$0xff] }
  0xd4   : > { %6319 = vmatprep.subr.bf16.mxu0 %v8869_v32  ;;  %11409 = vst [vmem:[#allocation25_spill] sm:$0xff] %v8881_v40  ;;  %v1107_v41 = vld [vmem:[#allocation2 + $0x480] sm:$0xff]  ;;  %v5731_v46 = vld [vmem:[%s10815_s9 + $0x18] sm:$0xff]  ;;  %v8893_v48 = vpack.c.bf16 %v1114_v45, %v1112_v44  ;;  %v1116_v52 = vld [vmem:[#allocation2 + $0x4c8] sm:$0xff] }
  0xd5   : > { %11408 = vst [vmem:[#allocation24_spill] sm:$0xff] %v8878_v39  ;;  %v8890_v47 = vpack.c.bf16 %v1109_v42, %v1107_v41  ;;  %v1111_v49 = vld [vmem:[#allocation2 + $0x4a0] sm:$0xff]  ;;  %v1118_v53 = vld [vmem:[#allocation2 + $0x4d8] sm:$0xff]  ;;  %v5735_v54 = vld [vmem:[%s10815_s9 + $0x28] sm:$0xff] }
  0xd6   : > { %1703 = vperm.xlu0 %8306, %v5720_v5   ;;  %851 = vperm.xlu1 %8307, %v5715_v6   ;;  %11411 = vst [vmem:[#allocation27_spill] sm:$0xff] %v8893_v48  ;;  %v5733_v51 = vld [vmem:[%s10815_s9 + $0x20] sm:$0xff]  ;;  %v8902_v55 = vpack.c.bf16 %v1113_v50, %v1111_v49  ;;  %v8905_v56 = vpack.c.bf16 %v1118_v53, %v1116_v52  ;;  %v1117_v58 = vld [vmem:[#allocation2 + $0x4d0] sm:$0xff]  ;;  %v1120_v60 = vld [vmem:[#allocation2 + $0x4e8] sm:$0xff] }
  0xd7   : > { %6321 = vmatpush1.bf16.msra.mxu0 %v8878_v39  ;;  %11410 = vst [vmem:[#allocation26_spill] sm:$0xff] %v8890_v47  ;;  %v1115_v57 = vld [vmem:[#allocation2 + $0x4c0] sm:$0xff]  ;;  %v5737_v59 = vld [vmem:[%s10815_s9 + $0x30] sm:$0xff]  ;;  %v1122_v61 = vld [vmem:[#allocation2 + $0x4f8] sm:$0xff] }
  0xd8   : > { %6323 = vmatprep.subr.bf16.mxu0 %v8881_v40  ;;  %11412 = vst [vmem:[#allocation28_spill] sm:$0xff] %v8902_v55  ;;  %11413 = vst [vmem:[#allocation29_spill] sm:$0xff] %v8905_v56  ;;  %v5739_v62 = vld [vmem:[%s10815_s9 + $0x38] sm:$0xff]  ;;  %v8914_v63 = vpack.c.bf16 %v1117_v58, %v1115_v57  ;;  %v8917_v0 = vpack.c.bf16 %v1122_v61, %v1120_v60  ;;  %v1119_v1 = vld [vmem:[#allocation2 + $0x4e0] sm:$0xff] }
  0xd9   : > { %v1121_v2 = vld [vmem:[#allocation2 + $0x4f0] sm:$0xff]  ;;  %v5741_v3 = vld [vmem:[%s10815_s9 + $0x40] sm:$0xff]  ;;  %v1124_v4 = vld [vmem:[#allocation2 + $0x508] sm:$0xff] }
  0xda   : > { %1859 = vperm.xlu0 %8306, %v5721_v7   ;;  %772 = vperm.xlu1 %8307, %v769_v11   ;;  %11414 = vst [vmem:[#allocation30_spill] sm:$0xff] %v8914_v63  ;;  %11415 = vst [vmem:[#allocation31_spill] sm:$0xff] %v8917_v0  ;;  %v1126_v5 = vld [vmem:[#allocation2 + $0x518] sm:$0xff]  ;;  %v3496_v6 = vld [vmem:[%s10816_s10] sm:$0xff]  ;;  %v8929_v8 = vpack.c.bf16 %v1121_v2, %v1119_v1 }
  0xdb   : > { %6325 = vmatpush1.bf16.msra.mxu0 %v8890_v47  ;;  %v3505_v7 = vld [vmem:[%s10818_s12] sm:$0xff]  ;;  %v8932_v10 = vpack.c.bf16 %v1126_v5, %v1124_v4  ;;  %v1125_v11 = vld [vmem:[#allocation2 + $0x510] sm:$0xff]  ;;  %v1128_v13 = vld [vmem:[#allocation2 + $0x528] sm:$0xff] }
  0xdc   : > { %6327 = vmatprep.subr.bf16.mxu0 %v8893_v48  ;;  %11416 = vst [vmem:[#allocation32_spill] sm:$0xff] %v8929_v8  ;;  %v1123_v9 = vld [vmem:[#allocation2 + $0x500] sm:$0xff]  ;;  %v1130_v15 = vld [vmem:[#allocation2 + $0x538] sm:$0xff]  ;;  %v864_v16 = vld [vmem:[#allocation2 + $0x208] sm:$0xff] }
  0xdd   : > { %11417 = vst [vmem:[#allocation33_spill] sm:$0xff] %v8932_v10  ;;  %v866_v17 = vld [vmem:[#allocation2 + $0x218] sm:$0xff]  ;;  %v863_v19 = vld [vmem:[#allocation2 + $0x200] sm:$0xff]  ;;  %v865_v23 = vld [vmem:[#allocation2 + $0x210] sm:$0xff]  ;;  %v8943_v26 = vpack.c.bf16 %v1125_v11, %v1123_v9  ;;  %v8948_v33 = vpack.c.bf16 %v1130_v15, %v1128_v13 }
  0xde   : > { %2015 = vperm.xlu0 %8306, %v5722_v20   ;;  %2170 = vperm.xlu1 %8307, %v2167_v27   ;;  %v3506_v20 = vld [vmem:[%s10818_s12 + $0x8] sm:$0xff]  ;;  %v8937_v22 = vpack.c.bf16 %v866_v17, %v864_v16  ;;  %v5747_v25 = vld [vmem:[%s10819_s13 + $0x10] sm:$0xff]  ;;  %v1127_v27 = vld [vmem:[#allocation2 + $0x520] sm:$0xff]  ;;  %v8945_v28 = vpack.c.bf16 %v865_v23, %v863_v19 }
  0xdf   : > { %6329 = vmatpush1.bf16.msra.mxu0 %v8902_v55  ;;  %11418 = vst [vmem:[#allocation34_spill] sm:$0xff] %v8943_v26  ;;  %v868_v29 = vld [vmem:[#allocation2 + $0x228] sm:$0xff]  ;;  %11419 = vst [vmem:[#allocation35_spill] sm:$0xff] %v8948_v33  ;;  %v1129_v34 = vld [vmem:[#allocation2 + $0x530] sm:$0xff] }
  0xe0   : > { %6331 = vmatprep.subr.bf16.mxu0 %v8905_v56  ;;  %v867_v36 = vld [vmem:[#allocation2 + $0x220] sm:$0xff]  ;;  %v869_v37 = vld [vmem:[#allocation2 + $0x230] sm:$0xff]  ;;  %v1134_v41 = vld [vmem:[#allocation2 + $0x558] sm:$0xff]  ;;  %6179 = vmatprep.subr.bf16.mxu1 %v8937_v22 }
  0xe1   : > { %v872_v42 = vld [vmem:[#allocation2 + $0x248] sm:$0xff]  ;;  %6181 = vmatpush1.bf16.msra.mxu1 %v8945_v28  ;;  %v8957_v44 = vpack.c.bf16 %v869_v37, %v867_v36  ;;  %v874_v45 = vld [vmem:[#allocation2 + $0x258] sm:$0xff]  ;;  %v1131_v49 = vld [vmem:[#allocation2 + $0x540] sm:$0xff] }
  0xe2   : > { %2179 = vperm.xlu0 %8306, %v2176_v30   ;;  %2699 = vperm.xlu1 %8307, %v5726_v35   ;;  %v870_v30 = vld [vmem:[#allocation2 + $0x238] sm:$0xff]  ;;  %v8963_v50 = vpack.c.bf16 %v874_v45, %v872_v42  ;;  %v873_v52 = vld [vmem:[#allocation2 + $0x250] sm:$0xff]  ;;  %v876_v57 = vld [vmem:[#allocation2 + $0x268] sm:$0xff] }
  0xe3   : > { %6333 = vmatpush1.bf16.msra.mxu0 %v8914_v63  ;;  %v8950_v35 = vpack.c.bf16 %v870_v30, %v868_v29  ;;  %v878_v58 = vld [vmem:[#allocation2 + $0x278] sm:$0xff]  ;;  %v1136_v60 = vld [vmem:[#allocation2 + $0x568] sm:$0xff]  ;;  %v875_v5 = vld [vmem:[#allocation2 + $0x260] sm:$0xff] }
  0xe4   : > { %6335 = vmatprep.subr.bf16.mxu0 %v8917_v0  ;;  %v1138_v61 = vld [vmem:[#allocation2 + $0x578] sm:$0xff]  ;;  %v8981_v4 = vpack.c.bf16 %v878_v58, %v876_v57  ;;  %v1137_v9 = vld [vmem:[#allocation2 + $0x570] sm:$0xff]  ;;  %v880_v11 = vld [vmem:[#allocation2 + $0x288] sm:$0xff] }
  0xe5   : > { %6183 = vmatprep.subr.bf16.mxu1 %v8950_v35  ;;  %v882_v13 = vld [vmem:[#allocation2 + $0x298] sm:$0xff]  ;;  %v4589_v15 = vld [vmem:[%s10821_s15] sm:$0xff]  ;;  %v1140_v16 = vld [vmem:[#allocation2 + $0x588] sm:$0xff] }
  0xe6   : > { %2683 = vperm.xlu0 %8306, %v2680_v38   ;;  %2863 = vperm.xlu1 %8307, %v5729_v43   ;;  %v1132_v38 = vld [vmem:[#allocation2 + $0x548] sm:$0xff]  ;;  %v1142_v17 = vld [vmem:[#allocation2 + $0x598] sm:$0xff]  ;;  %v879_v29 = vld [vmem:[#allocation2 + $0x280] sm:$0xff] }
  0xe7   : > { %6337 = vmatpush1.bf16.msra.mxu0 %v8929_v8  ;;  %v5763_v43 = vld [vmem:[%s10821_s15 + $0x8] sm:$0xff]  ;;  %v8966_v53 = vpack.c.bf16 %v1134_v41, %v1132_v38  ;;  %6185 = vmatpush1.bf16.msra.mxu1 %v8957_v44  ;;  %v881_v30 = vld [vmem:[#allocation2 + $0x290] sm:$0xff]  ;;  %v886_v38 = vld [vmem:[#allocation2 + $0x2b8] sm:$0xff] }
  0xe8   : > { %6339 = vmatprep.subr.bf16.mxu0 %v8932_v10  ;;  %6187 = vmatprep.subr.bf16.mxu1 %v8963_v50  ;;  %v3701_v19 = vld [vmem:[%s10819_s13 + $0x8] sm:$0xff]  ;;  %v1141_v36 = vld [vmem:[#allocation2 + $0x590] sm:$0xff]  ;;  %v5749_v41 = vld [vmem:[%s10819_s13 + $0x20] sm:$0xff] }
  0xe9   : > { %11421 = vst [vmem:[#allocation37_spill] sm:$0xff] %v8966_v53  ;;  %v884_v37 = vld [vmem:[#allocation2 + $0x2a8] sm:$0xff]  ;;  %v5764_v45 = vld [vmem:[%s10821_s15 + $0x10] sm:$0xff]  ;;  %v883_v57 = vld [vmem:[#allocation2 + $0x2a0] sm:$0xff] }
  0xea   : > { %2954 = vperm.xlu0 %8306, %v5731_v46   ;;  %3045 = vperm.xlu1 %8307, %v5733_v51   ;;  %v8960_v46 = vpack.c.bf16 %v1129_v34, %v1127_v27  ;;  %v871_v51 = vld [vmem:[#allocation2 + $0x240] sm:$0xff]  ;;  %v8999_v27 = vpack.c.bf16 %v882_v13, %v880_v11  ;;  %v9002_v34 = vpack.c.bf16 %v1142_v17, %v1140_v16  ;;  %v1144_v42 = vld [vmem:[#allocation2 + $0x5a8] sm:$0xff]  ;;  %v885_v58 = vld [vmem:[#allocation2 + $0x2b0] sm:$0xff] }
  0xeb   : > { %6341 = vmatpush1.bf16.msra.mxu0 %v8943_v26  ;;  %v8975_v1 = vpack.c.bf16 %v873_v52, %v871_v51  ;;  %v1143_v52 = vld [vmem:[#allocation2 + $0x5a0] sm:$0xff]  ;;  %v9029_v11 = vpack.c.bf16 %v885_v58, %v883_v57  ;;  %v1253_v63 = vld [vmem:[#allocation2 + $0x630] sm:$0xff]  ;;  %v1256_v55 = vld [vmem:[#allocation2 + $0x648] sm:$0xff] }
  0xec   : > { %11420 = vst [vmem:[#allocation36_spill] sm:$0xff] %v8960_v46  ;;  %6343 = vmatprep.subr.bf16.mxu0 %v8948_v33  ;;  %11425 = vst [vmem:[#allocation41_spill] sm:$0xff] %v9002_v34  ;;  %v887_v17 = vld [vmem:[#allocation2 + $0x2c0] sm:$0xff]  ;;  %v785_v40 = vld [vmem:[#allocation2 + $0x10] sm:$0xff] }
  0xed   : > { %6189 = vmatpush1.bf16.msra.mxu1 %v8975_v1  ;;  %v891_v58 = vld [vmem:[#allocation2 + $0x2e0] sm:$0xff]  ;;  %v790_v39 = vld [vmem:[#allocation2 + $0x38] sm:$0xff]  ;;  %v1261_v32 = vld [vmem:[#allocation2 + $0x670] sm:$0xff] }
  0xee   : > { %3136 = vperm.xlu0 %8306, %v5735_v54   ;;  %3227 = vperm.xlu1 %8307, %v5737_v59   ;;  %v1133_v54 = vld [vmem:[#allocation2 + $0x550] sm:$0xff]  ;;  %v5748_v59 = vld [vmem:[%s10819_s13 + $0x18] sm:$0xff]  ;;  %v1264_v24 = vld [vmem:[#allocation2 + $0x688] sm:$0xff] }
  0xef   : > { %6345 = vmatpush1.bf16.msra.mxu0 %v8960_v46  ;;  %v8978_v2 = vpack.c.bf16 %v1133_v54, %v1131_v49  ;;  %6191 = vmatprep.subr.bf16.mxu1 %v8981_v4  ;;  %v9011_v49 = vpack.c.bf16 %v881_v30, %v879_v29  ;;  %v9017_v54 = vpack.c.bf16 %v886_v38, %v884_v37  ;;  %v1149_v29 = vld [vmem:[#allocation2 + $0x5d0] sm:$0xff]  ;;  %v892_v30 = vld [vmem:[#allocation2 + $0x2e8] sm:$0xff]  ;;  %v5765_v37 = vld [vmem:[%s10821_s15 + $0x18] sm:$0xff] }
  0xf0   : > { %6347 = vmatprep.subr.bf16.mxu0 %v8966_v53  ;;  %v1152_v38 = vld [vmem:[#allocation2 + $0x5e8] sm:$0xff]  ;;  %v787_v18 = vld [vmem:[#allocation2 + $0x20] sm:$0xff]  ;;  %v1273_v12 = vld [vmem:[#allocation2 + $0x6d0] sm:$0xff] }
  0xf1   : > { %11422 = vst [vmem:[#allocation38_spill] sm:$0xff] %v8978_v2  ;;  %v792_v14 = vld [vmem:[#allocation2 + $0x48] sm:$0xff] }
  0xf2   : > { %3318 = vperm.xlu0 %8306, %v5739_v62   ;;  %3409 = vperm.xlu1 %8307, %v5741_v3   ;;  %v3700_v62 = vld [vmem:[%s10819_s13] sm:$0xff] }
  0xf3   : > { %v1135_v3 = vld [vmem:[#allocation2 + $0x560] sm:$0xff]  ;;  %6349 = vmatpush1.bf16.msra.mxu0 %v8978_v2  ;;  %v1249_v2 = vld [vmem:[#allocation2 + $0x610] sm:$0xff] }
  0xf4   : > { %v8996_v23 = vpack.c.bf16 %v1137_v9, %v1135_v3  ;;  %v5750_v3 = vld [vmem:[%s10819_s13 + $0x28] sm:$0xff]  ;;  %v5751_v9 = vld [vmem:[%s10819_s13 + $0x30] sm:$0xff] }
  0xf6   : > { %3499 = vperm.xlu0 %8306, %v3496_v6   ;;  %3509 = vperm.xlu1 %8307, %v3505_v7   ;;  %v877_v6 = vld [vmem:[#allocation2 + $0x270] sm:$0xff]  ;;  %v8984_v7 = vpack.c.bf16 %v1138_v61, %v1136_v60  ;;  %11424 = vst [vmem:[#allocation40_spill] sm:$0xff] %v8996_v23  ;;  %v888_v61 = vld [vmem:[#allocation2 + $0x2c8] sm:$0xff] }
  0xf7   : > { %v1145_v60 = vld [vmem:[#allocation2 + $0x5b0] sm:$0xff] }
  0xf8   : > { %11423 = vst [vmem:[#allocation39_spill] sm:$0xff] %v8984_v7  ;;  %6351 = vmatprep.subr.bf16.mxu0 %v8984_v7  ;;  %v9032_v13 = vpack.c.bf16 %v1145_v60, %v1143_v52  ;;  %v1151_v52 = vld [vmem:[#allocation2 + $0x5e0] sm:$0xff]  ;;  %v893_v60 = vld [vmem:[#allocation2 + $0x2f0] sm:$0xff]  ;;  %v786_v7 = vld [vmem:[#allocation2 + $0x18] sm:$0xff] }
  0xf9   : > { %6353 = vmatpush1.bf16.msra.mxu0 %v8996_v23  ;;  %v784_v23 = vld [vmem:[#allocation2 + $0x8] sm:$0xff] }
  0xfa   : > { %3514 = vperm.xlu0 %8306, %v3506_v20   ;;  %3721 = vperm.xlu1 %8307, %v5747_v25   ;;  %v8993_v20 = vpack.c.bf16 %v877_v6, %v875_v5  ;;  %v1139_v25 = vld [vmem:[#allocation2 + $0x580] sm:$0xff]  ;;  %v1148_v5 = vld [vmem:[#allocation2 + $0x5c8] sm:$0xff]  ;;  %v1150_v6 = vld [vmem:[#allocation2 + $0x5d8] sm:$0xff]  ;;  %11428 = vst [vmem:[#allocation44_spill] sm:$0xff] %v9032_v13 }
  0xfb   : > { %v9014_v51 = vpack.c.bf16 %v1141_v36, %v1139_v25  ;;  %6355 = vmatprep.subr.bf16.mxu0 %v9002_v34  ;;  %v9038_v25 = vpack.c.bf16 %v1150_v6, %v1148_v5  ;;  %v894_v36 = vld [vmem:[#allocation2 + $0x2f8] sm:$0xff]  ;;  %v5753_v6 = vld [vmem:[%s10819_s13 + $0x40] sm:$0xff] }
  0xfc   : > { %6193 = vmatpush1.bf16.msra.mxu1 %v8993_v20  ;;  %v9053_v57 = vpack.c.bf16 %v894_v36, %v892_v30  ;;  %v898_v5 = vld [vmem:[#allocation2 + $0x318] sm:$0xff]  ;;  %v895_v36 = vld [vmem:[#allocation2 + $0x300] sm:$0xff] }
  0xfd   : > { %11426 = vst [vmem:[#allocation42_spill] sm:$0xff] %v9014_v51  ;;  %6195 = vmatprep.subr.bf16.mxu1 %v8999_v27  ;;  %6357 = vmatpush1.bf16.msra.mxu0 %v9014_v51  ;;  %11429 = vst [vmem:[#allocation45_spill] sm:$0xff] %v9038_v25  ;;  %v924_v51 = vld [vmem:[#allocation2 + $0x3e8] sm:$0xff]  ;;  %v926_v34 = vld [vmem:[#allocation2 + $0x3f8] sm:$0xff] }
  0xfe   : > { %4601 = vperm.xlu0 %8306, %v5763_v43   ;;  %3726 = vperm.xlu1 %8307, %v5748_v59   ;;  %v1146_v43 = vld [vmem:[#allocation2 + $0x5b8] sm:$0xff]  ;;  %11432 = vst [vmem:[#allocation48_spill] sm:$0xff] %v9053_v57 }
  0xff   : > { %v9020_v59 = vpack.c.bf16 %v1146_v43, %v1144_v42  ;;  %v5752_v42 = vld [vmem:[%s10819_s13 + $0x38] sm:$0xff] }
 0x100   : > { %6197 = vmatpush1.bf16.msra.mxu1 %v9011_v49 }
 0x101   : > { %11427 = vst [vmem:[#allocation43_spill] sm:$0xff] %v9020_v59  ;;  %6199 = vmatprep.subr.bf16.mxu1 %v9017_v54  ;;  %6359 = vmatprep.subr.bf16.mxu0 %v9020_v59  ;;  %v922_v59 = vld [vmem:[#allocation2 + $0x3d8] sm:$0xff] }
 0x102   : > { %3704 = vperm.xlu0 %8306, %v3700_v62   ;;  %4592 = vperm.xlu1 %8307, %v4589_v15   ;;  %v890_v62 = vld [vmem:[#allocation2 + $0x2d8] sm:$0xff]  ;;  %v1147_v15 = vld [vmem:[#allocation2 + $0x5c0] sm:$0xff] }
 0x103   : > { %v9035_v16 = vpack.c.bf16 %v890_v62, %v888_v61  ;;  %6361 = vmatpush1.bf16.msra.mxu0 %v9032_v13  ;;  %v1153_v62 = vld [vmem:[#allocation2 + $0x5f0] sm:$0xff]  ;;  %v920_v13 = vld [vmem:[#allocation2 + $0x3c8] sm:$0xff] }
 0x104   : > { %6201 = vmatpush1.bf16.msra.mxu1 %v9029_v11  ;;  %6363 = vmatprep.subr.bf16.mxu0 %v9038_v25  ;;  %v918_v25 = vld [vmem:[#allocation2 + $0x3b8] sm:$0xff] }
 0x105   : > { %6203 = vmatprep.subr.bf16.mxu1 %v9035_v16 }
 0x106   : > { %3709 = vperm.xlu0 %8306, %v3701_v19   ;;  %3892 = vperm.xlu1 %8307, %v5749_v41   ;;  %v889_v19 = vld [vmem:[#allocation2 + $0x2d0] sm:$0xff]  ;;  %v1154_v41 = vld [vmem:[#allocation2 + $0x5f8] sm:$0xff] }
 0x107   : > { %v9047_v43 = vpack.c.bf16 %v889_v19, %v887_v17  ;;  %v9056_v61 = vpack.c.bf16 %v1154_v41, %v1152_v38  ;;  %v9062_v17 = vpack.c.bf16 %v893_v60, %v891_v58  ;;  %v5766_v19 = vld [vmem:[%s10821_s15 + $0x20] sm:$0xff]  ;;  %v900_v41 = vld [vmem:[#allocation2 + $0x328] sm:$0xff]  ;;  %v5755_v60 = vld [vmem:[%s10819_s13 + $0x50] sm:$0xff] }
 0x108   : > { %v5754_v58 = vld [vmem:[%s10819_s13 + $0x48] sm:$0xff] }
 0x109   : > { %11430 = vst [vmem:[#allocation46_spill] sm:$0xff] %v9047_v43  ;;  %11433 = vst [vmem:[#allocation49_spill] sm:$0xff] %v9056_v61  ;;  %6205 = vmatpush1.bf16.msra.mxu1 %v9047_v43 }
 0x10a   : > { %4752 = vperm.xlu0 %8306, %v5764_v45   ;;  %3897 = vperm.xlu1 %8307, %v5750_v3   ;;  %v9050_v45 = vpack.c.bf16 %v1149_v29, %v1147_v15  ;;  %v896_v3 = vld [vmem:[#allocation2 + $0x308] sm:$0xff]  ;;  %v1250_v15 = vld [vmem:[#allocation2 + $0x618] sm:$0xff]  ;;  %11434 = vst [vmem:[#allocation50_spill] sm:$0xff] %v9062_v17  ;;  %v9068_v29 = vpack.c.bf16 %v1153_v62, %v1151_v52 }
 0x10b   : > { %6207 = vmatprep.subr.bf16.mxu1 %v9053_v57  ;;  %v9071_v30 = vpack.c.bf16 %v898_v5, %v896_v3  ;;  %v899_v3 = vld [vmem:[#allocation2 + $0x320] sm:$0xff]  ;;  %v901_v5 = vld [vmem:[#allocation2 + $0x330] sm:$0xff] }
 0x10c   : > { %11431 = vst [vmem:[#allocation47_spill] sm:$0xff] %v9050_v45  ;;  %6365 = vmatpush1.bf16.msra.mxu0 %v9050_v45  ;;  %11435 = vst [vmem:[#allocation51_spill] sm:$0xff] %v9068_v29  ;;  %v916_v45 = vld [vmem:[#allocation2 + $0x3a8] sm:$0xff] }
 0x10d   : > { %11436 = vst [vmem:[#allocation52_spill] sm:$0xff] %v9071_v30  ;;  %6367 = vmatprep.subr.bf16.mxu0 %v9056_v61  ;;  %6209 = vmatpush1.bf16.msra.mxu1 %v9062_v17  ;;  %v914_v61 = vld [vmem:[#allocation2 + $0x398] sm:$0xff] }
 0x10e   : > { %3990 = vperm.xlu0 %8306, %v5751_v9   ;;  %4834 = vperm.xlu1 %8307, %v5765_v37   ;;  %v1248_v9 = vld [vmem:[#allocation2 + $0x608] sm:$0xff]  ;;  %v897_v37 = vld [vmem:[#allocation2 + $0x310] sm:$0xff] }
 0x10f   : > { %v9074_v38 = vpack.c.bf16 %v1250_v15, %v1248_v9  ;;  %v9080_v52 = vpack.c.bf16 %v897_v37, %v895_v36  ;;  %6211 = vmatprep.subr.bf16.mxu1 %v9071_v30  ;;  %v906_v9 = vld [vmem:[#allocation2 + $0x358] sm:$0xff]  ;;  %v5767_v15 = vld [vmem:[%s10821_s15 + $0x28] sm:$0xff] }
 0x110   : > { %6369 = vmatpush1.bf16.msra.mxu0 %v9068_v29  ;;  %v5756_v36 = vld [vmem:[%s10819_s13 + $0x58] sm:$0xff]  ;;  %v912_v29 = vld [vmem:[#allocation2 + $0x388] sm:$0xff] }
 0x111   : > { %11437 = vst [vmem:[#allocation53_spill] sm:$0xff] %v9074_v38  ;;  %11438 = vst [vmem:[#allocation54_spill] sm:$0xff] %v9080_v52  ;;  %6371 = vmatprep.subr.bf16.mxu0 %v9074_v38  ;;  %6213 = vmatpush1.bf16.msra.mxu1 %v9080_v52  ;;  %v910_v38 = vld [vmem:[#allocation2 + $0x378] sm:$0xff] }
 0x112   : > { %3995 = vperm.xlu0 %8306, %v5752_v42   ;;  %4088 = vperm.xlu1 %8307, %v5753_v6   ;;  %v902_v42 = vld [vmem:[#allocation2 + $0x338] sm:$0xff]  ;;  %v904_v6 = vld [vmem:[#allocation2 + $0x348] sm:$0xff] }
 0x113   : > { %v9087_v62 = vpack.c.bf16 %v902_v42, %v900_v41  ;;  %v9100_v37 = vpack.c.bf16 %v906_v9, %v904_v6  ;;  %v903_v41 = vld [vmem:[#allocation2 + $0x340] sm:$0xff]  ;;  %v905_v42 = vld [vmem:[#allocation2 + $0x350] sm:$0xff] }
 0x114   : > { %v907_v9 = vld [vmem:[#allocation2 + $0x360] sm:$0xff] }
 0x115   : > { %11439 = vst [vmem:[#allocation55_spill] sm:$0xff] %v9087_v62  ;;  %6215 = vmatprep.subr.bf16.mxu1 %v9087_v62  ;;  %11441 = vst [vmem:[#allocation57_spill] sm:$0xff] %v9100_v37 }
 0x116   : > { %4916 = vperm.xlu0 %8306, %v5766_v19   ;;  %4093 = vperm.xlu1 %8307, %v5754_v58   ;;  %v9094_v19 = vpack.c.bf16 %v901_v5, %v899_v3  ;;  %v908_v58 = vld [vmem:[#allocation2 + $0x368] sm:$0xff]  ;;  %v9106_v3 = vpack.c.bf16 %v905_v42, %v903_v41  ;;  %v5768_v5 = vld [vmem:[%s10821_s15 + $0x30] sm:$0xff] }
 0x117   : > { %v9112_v6 = vpack.c.bf16 %v910_v38, %v908_v58  ;;  %v5759_v42 = vld [vmem:[%s10819_s13 + $0x70] sm:$0xff]  ;;  %v9124_v38 = vpack.c.bf16 %v914_v61, %v912_v29  ;;  %v911_v58 = vld [vmem:[#allocation2 + $0x380] sm:$0xff]  ;;  %v9136_v61 = vpack.c.bf16 %v918_v25, %v916_v45  ;;  %v9148_v25 = vpack.c.bf16 %v922_v59, %v920_v13 }
 0x118   : > { %11440 = vst [vmem:[#allocation56_spill] sm:$0xff] %v9094_v19  ;;  %6217 = vmatpush1.bf16.msra.mxu1 %v9094_v19  ;;  %11442 = vst [vmem:[#allocation58_spill] sm:$0xff] %v9106_v3  ;;  %v915_v29 = vld [vmem:[#allocation2 + $0x3a0] sm:$0xff]  ;;  %v9160_v59 = vpack.c.bf16 %v926_v34, %v924_v51  ;;  %v4574_v34 = vld [vmem:[%s10820_s14 + $0x8] sm:$0xff]  ;;  %v9172_v51 = vpack.c.bf16 %v786_v7, %v784_v23  ;;  %v777_v23 = vlaneseq }
 0x119   : > { %6219 = vmatprep.subr.bf16.mxu1 %v9100_v37  ;;  %11443 = vst [vmem:[#allocation59_spill] sm:$0xff] %v9112_v6  ;;  %11445 = vst [vmem:[#allocation61_spill] sm:$0xff] %v9124_v38  ;;  %v919_v45 = vld [vmem:[#allocation2 + $0x3c0] sm:$0xff] }
 0x11a   : > { %4186 = vperm.xlu0 %8306, %v5755_v60   ;;  %4998 = vperm.xlu1 %8307, %v5767_v15   ;;  %v5757_v60 = vld [vmem:[%s10819_s13 + $0x60] sm:$0xff]  ;;  %v909_v15 = vld [vmem:[#allocation2 + $0x370] sm:$0xff]  ;;  %11447 = vst [vmem:[#allocation63_spill] sm:$0xff] %v9136_v61  ;;  %11449 = vst [vmem:[#allocation65_spill] sm:$0xff] %v9148_v25 }
 0x11b   : > { %v9118_v41 = vpack.c.bf16 %v909_v15, %v907_v9  ;;  %v5760_v15 = vld [vmem:[%s10819_s13 + $0x78] sm:$0xff]  ;;  %11451 = vst [vmem:[#allocation67_spill] sm:$0xff] %v9160_v59  ;;  %v923_v13 = vld [vmem:[#allocation2 + $0x3e0] sm:$0xff]  ;;  %11453 = vst [vmem:[#allocation69_spill] sm:$0xff] %v9172_v51 }
 0x11c   : > { %6221 = vmatpush1.bf16.msra.mxu1 %v9106_v3 }
 0x11d   : > { %11444 = vst [vmem:[#allocation60_spill] sm:$0xff] %v9118_v41  ;;  %6223 = vmatprep.subr.bf16.mxu1 %v9112_v6 }
 0x11e   : > { %4191 = vperm.xlu0 %8306, %v5756_v36   ;;  %4284 = vperm.xlu1 %8307, %v5757_v60   ;;  %v5758_v36 = vld [vmem:[%s10819_s13 + $0x68] sm:$0xff]  ;;  %v913_v60 = vld [vmem:[#allocation2 + $0x390] sm:$0xff] }
 0x11f   : > { %v9130_v9 = vpack.c.bf16 %v913_v60, %v911_v58  ;;  %v5770_v60 = vld [vmem:[%s10821_s15 + $0x40] sm:$0xff] }
 0x120   : > { %6225 = vmatpush1.bf16.msra.mxu1 %v9118_v41 }
 0x121   : > { %11446 = vst [vmem:[#allocation62_spill] sm:$0xff] %v9130_v9  ;;  %6227 = vmatprep.subr.bf16.mxu1 %v9124_v38 }
 0x122   : > { %5080 = vperm.xlu0 %8306, %v5768_v5   ;;  %4289 = vperm.xlu1 %8307, %v5758_v36   ;;  %v5769_v5 = vld [vmem:[%s10821_s15 + $0x38] sm:$0xff]  ;;  %v917_v36 = vld [vmem:[#allocation2 + $0x3b0] sm:$0xff] }
 0x123   : > { %v9142_v58 = vpack.c.bf16 %v917_v36, %v915_v29  ;;  %v5322_v36 = vld [vmem:[%s10822_s16] sm:$0xff] }
 0x124   : > { %6229 = vmatpush1.bf16.msra.mxu1 %v9130_v9 }
 0x125   : > { %11448 = vst [vmem:[#allocation64_spill] sm:$0xff] %v9142_v58  ;;  %6231 = vmatprep.subr.bf16.mxu1 %v9136_v61 }
 0x126   : > { %4382 = vperm.xlu0 %8306, %v5759_v42   ;;  %5162 = vperm.xlu1 %8307, %v5769_v5   ;;  %v5761_v42 = vld [vmem:[%s10819_s13 + $0x80] sm:$0xff]  ;;  %v921_v5 = vld [vmem:[#allocation2 + $0x3d0] sm:$0xff] }
 0x127   : > { %v9154_v29 = vpack.c.bf16 %v921_v5, %v919_v45  ;;  %v5481_v5 = vld [vmem:[%s10825_s19] sm:$0xff] }
 0x128   : > { %6233 = vmatpush1.bf16.msra.mxu1 %v9142_v58 }
 0x129   : > { %11450 = vst [vmem:[#allocation66_spill] sm:$0xff] %v9154_v29  ;;  %6235 = vmatprep.subr.bf16.mxu1 %v9148_v25 }
 0x12a   : > { %4387 = vperm.xlu0 %8306, %v5760_v15   ;;  %4480 = vperm.xlu1 %8307, %v5761_v42   ;;  %v5762_v15 = vld [vmem:[%s10819_s13 + $0x88] sm:$0xff]  ;;  %v925_v42 = vld [vmem:[#allocation2 + $0x3f0] sm:$0xff] }
 0x12b   : > { %v9166_v45 = vpack.c.bf16 %v925_v42, %v923_v13  ;;  %v778_v42 = vshrl.u32 %v777_v23, 7  ;;  %v1254_v23 = vld [vmem:[#allocation2 + $0x638] sm:$0xff] }
 0x12c   : > { %6237 = vmatpush1.bf16.msra.mxu1 %v9154_v29 }
 0x12d   : > { %11452 = vst [vmem:[#allocation68_spill] sm:$0xff] %v9166_v45  ;;  %6239 = vmatprep.subr.bf16.mxu1 %v9160_v59 }
 0x12e   : > { %5244 = vperm.xlu0 %8306, %v5770_v60   ;;  %4485 = vperm.xlu1 %8307, %v5762_v15   ;;  %v4573_v60 = vld [vmem:[%s10820_s14] sm:$0xff] }
 0x12f   : > { %v5492_v15 = vld [vmem:[%s11454_s21] sm:$0xf]  ;;  %s12195_s21 = sld [smem:[#allocation302_spill]] }
 0x130   : > { %6241 = vmatpush1.bf16.msra.mxu1 %v9166_v45 }
 0x131   : > { %6243 = vmatprep.subr.bf16.mxu1 %v9172_v51 }
 0x132   : > { %5325 = vperm.xlu0 %8306, %v5322_v36   ;;  %4577 = vperm.xlu1 %8307, %v4573_v60   ;;  %v8511_v36 = vmov 839922192  }
 0x133   : > { %v775_v7 = vunpack.c.l.s4 %v8511_v36  ;;  %v1247_v36 = vld [vmem:[#allocation2 + $0x600] sm:$0xff] }
 0x134   : > { %v9200_v10 = vpack.c.bf16 %v1249_v2, %v1247_v36 }
 0x135   : > { %v776_v13 = vunpack.c.0.s8 %v775_v7  ;;  %v1252_v7 = vld [vmem:[#allocation2 + $0x628] sm:$0xff] }
 0x136   : > { %4582 = vperm.xlu0 %8306, %v4574_v34   ;;  %5484 = vperm.xlu1 %8307, %v5481_v5   ;;  %v9194_v5 = vld [vmem:[%s762_s26] sm:$0xff]  ;;  %11456 = vst [vmem:[#allocation70_spill] sm:$0xff] %v9200_v10  ;;  %v9205_v0 = vpack.c.bf16 %v1254_v23, %v1252_v7  ;;  %s767_s26 = scalar_lea.vmem %s12196_s22, %s5776_s3 }
 0x137   : > { %v9187_v60 = vsub.s32 %v776_v13, %v778_v42 }
 0x138   : > { %11457 = vst [vmem:[#allocation71_spill] sm:$0xff] %v9205_v0 }
 0x13a   : > { %5495 = vperm.xlu0 %8306, %v5492_v15  }
 0x14d   : > { %v1080_v34 = vpop.permute.xlu0 %1079  ;;  %v1392_v53 = vpop.permute.xlu1 %1391 }
 0x14e   : > { %v1087_v15 = vrot.slane %v1080_v34, %v9187_v60  ;;  %v1399_v13 = vrot.slane %v1392_v53, %v9187_v60  ;;  %v1251_v34 = vld [vmem:[#allocation2 + $0x620] sm:$0xff]  ;;  %v1258_v53 = vld [vmem:[#allocation2 + $0x658] sm:$0xff] }
 0x14f   : > { %v9215_v7 = vpack.c.bf16 %v1253_v63, %v1251_v34  ;;  %v783_v34 = vld [vmem:[#allocation2] sm:$0xff] }
 0x150   : > { %v1089_v46 = vmul.f32 %v1087_v15, %v9194_v5  ;;  %v9203_v8 = vmul.f32 %v1399_v13, %v9194_v5 }
 0x151   : > { %v1236_v42 = vpop.permute.xlu0 %1235  ;;  %v1548_v56 = vpop.permute.xlu1 %1547  ;;  %11458 = vst [vmem:[#allocation72_spill] sm:$0xff] %v9215_v7 }
 0x152   : > { %v1243_v33 = vrot.slane %v1236_v42, %v9187_v60  ;;  %v1156_v26 = vcombine.high %v1089_v46, %v1089_v46  ;;  %v1555_v48 = vrot.slane %v1548_v56, %v9187_v60  ;;  %v1257_v56 = vld [vmem:[#allocation2 + $0x650] sm:$0xff] }
 0x154   : > { %v9208_v15 = vmul.f32 %v1243_v33, %v9194_v5  ;;  %1222 = vmatprep.mubr.f32.mxu0 %v1156_v26  ;;  %v9218_v23 = vmul.f32 %v1555_v48, %v9194_v5  ;;  %v9221_v26 = vpack.c.bf16 %v1258_v53, %v1256_v55  ;;  %v1255_v33 = vld [vmem:[#allocation2 + $0x640] sm:$0xff] }
 0x155   : > { %v1704_v42 = vpop.permute.xlu0 %1703  ;;  %1223 = vmatmul.mubr.f32.vlgmr.msra.gmra.mrb[0].mxu0 %v1089_v46  ;;  %v852_v13 = vpop.permute.xlu1 %851  ;;  %v9229_v55 = vpack.c.bf16 %v1257_v56, %v1255_v33  ;;  %v9239_v56 = vpack.c.bf16 %v785_v40, %v783_v34 }
 0x156   : > { %v1711_v2 = vrot.slane %v1704_v42, %v9187_v60  ;;  %6373 = vmatpush1.bf16.msra.mxu0 %v9200_v10  ;;  %v1312_v36 = vcombine.high %v9208_v15, %v9208_v15  ;;  %11459 = vst [vmem:[#allocation73_spill] sm:$0xff] %v9221_v26  ;;  %v1260_v42 = vld [vmem:[#allocation2 + $0x668] sm:$0xff]  ;;  %v1262_v10 = vld [vmem:[#allocation2 + $0x678] sm:$0xff]  ;;  %v859_v47 = vrot.slane %v852_v13, %v9187_v60 }
 0x157   : > { %6375 = vmatprep.subr.bf16.mxu0 %v9205_v0  ;;  %11460 = vst [vmem:[#allocation74_spill] sm:$0xff] %v9229_v55  ;;  %v788_v0 = vld [vmem:[#allocation2 + $0x28] sm:$0xff]  ;;  %11462 = vst [vmem:[#allocation76_spill] sm:$0xff] %v9239_v56 }
 0x158   : > { %v9224_v46 = vmul.f32 %v1711_v2, %v9194_v5  ;;  %1378 = vmatprep.mubr.f32.mxu0 %v1312_v36  ;;  %v861_v53 = vmul.f32 %v859_v47, %v9194_v5  ;;  %v9233_v2 = vpack.c.bf16 %v1262_v10, %v1260_v42  ;;  %v1259_v36 = vld [vmem:[#allocation2 + $0x660] sm:$0xff]  ;;  %v9241_v21 = vpack.c.bf16 %v790_v39, %v788_v0  ;;  %v1265_v0 = vld [vmem:[#allocation2 + $0x690] sm:$0xff] }
 0x159   : > { %v1860_v63 = vpop.permute.xlu0 %1859  ;;  %v773_v13 = vpop.permute.xlu1 %772  ;;  %v9245_v42 = vpack.c.bf16 %v1261_v32, %v1259_v36  ;;  %v1263_v39 = vld [vmem:[#allocation2 + $0x680] sm:$0xff] }
 0x15a   : > { %v1867_v48 = vrot.slane %v1860_v63, %v9187_v60  ;;  %6377 = vmatpush1.bf16.msra.mxu0 %v9215_v7  ;;  %11461 = vst [vmem:[#allocation75_spill] sm:$0xff] %v9233_v2  ;;  %v1266_v63 = vld [vmem:[#allocation2 + $0x698] sm:$0xff]  ;;  %v780_v7 = vrot.slane %v773_v13, %v9187_v60  ;;  %v928_v33 = vcombine.high %v861_v53, %v861_v53  ;;  %11463 = vst [vmem:[#allocation77_spill] sm:$0xff] %v9241_v21 }
 0x15b   : > { %6379 = vmatprep.subr.bf16.mxu0 %v9221_v26  ;;  %v789_v26 = vld [vmem:[#allocation2 + $0x30] sm:$0xff]  ;;  %11464 = vst [vmem:[#allocation78_spill] sm:$0xff] %v9245_v42  ;;  %v794_v13 = vld [vmem:[#allocation2 + $0x58] sm:$0xff]  ;;  %v9251_v40 = vpack.c.bf16 %v1266_v63, %v1264_v24  ;;  %v791_v24 = vld [vmem:[#allocation2 + $0x40] sm:$0xff] }
 0x15c   : > { %v9236_v31 = vmul.f32 %v1867_v48, %v9194_v5  ;;  %v9248_v48 = vmul.f32 %v780_v7, %v9194_v5  ;;  %994 = vmatprep.mubr.f32.mxu1 %v928_v33  ;;  %v9257_v32 = vpack.c.bf16 %v789_v26, %v787_v18  ;;  %v9262_v36 = vpack.c.bf16 %v794_v13, %v792_v14  ;;  %v793_v63 = vld [vmem:[#allocation2 + $0x50] sm:$0xff]  ;;  %v798_v33 = vld [vmem:[#allocation2 + $0x78] sm:$0xff]  ;;  %v1267_v26 = vld [vmem:[#allocation2 + $0x6a0] sm:$0xff] }
 0x15d   : > { %v2016_v47 = vpop.permute.xlu0 %2015  ;;  %11465 = vst [vmem:[#allocation79_spill] sm:$0xff] %v9251_v40  ;;  %995 = vmatmul.mubr.f32.vlgmr.msra.gmra.mrb[0].mxu1 %v861_v53  ;;  %v9265_v53 = vpack.c.bf16 %v1265_v0, %v1263_v39  ;;  %v9271_v14 = vpack.c.bf16 %v793_v63, %v791_v24  ;;  %v795_v39 = vld [vmem:[#allocation2 + $0x60] sm:$0xff]  ;;  %v797_v0 = vld [vmem:[#allocation2 + $0x70] sm:$0xff]  ;;  %v1276_v24 = vld [vmem:[#allocation2 + $0x6e8] sm:$0xff] }
 0x15e   : > { %v2023_v10 = vrot.slane %v2016_v47, %v9187_v60  ;;  %6381 = vmatpush1.bf16.msra.mxu0 %v9229_v55  ;;  %v1268_v60 = vld [vmem:[#allocation2 + $0x6a8] sm:$0xff]  ;;  %v1270_v47 = vld [vmem:[#allocation2 + $0x6b8] sm:$0xff]  ;;  %6245 = vmatpush1.bf16.msra.mxu1 %v9239_v56  ;;  %11466 = vst [vmem:[#allocation80_spill] sm:$0xff] %v9257_v32  ;;  %v1002_v7 = vcombine.high %v9248_v48, %v9248_v48  ;;  %11467 = vst [vmem:[#allocation81_spill] sm:$0xff] %v9262_v36 }
 0x15f   : > { %6383 = vmatprep.subr.bf16.mxu0 %v9233_v2  ;;  %6247 = vmatprep.subr.bf16.mxu1 %v9241_v21  ;;  %11468 = vst [vmem:[#allocation82_spill] sm:$0xff] %v9265_v53  ;;  %v9268_v18 = vpack.c.bf16 %v1270_v47, %v1268_v60  ;;  %v1272_v2 = vld [vmem:[#allocation2 + $0x6c8] sm:$0xff]  ;;  %v1274_v55 = vld [vmem:[#allocation2 + $0x6d8] sm:$0xff]  ;;  %11470 = vst [vmem:[#allocation84_spill] sm:$0xff] %v9271_v14 }
 0x160   : > { %v9254_v34 = vmul.f32 %v2023_v10, %v9194_v5  ;;  %v796_v5 = vld [vmem:[#allocation2 + $0x68] sm:$0xff]  ;;  %1068 = vmatprep.mubr.f32.mxu1 %v1002_v7  ;;  %v1269_v10 = vld [vmem:[#allocation2 + $0x6b0] sm:$0xff]  ;;  %v802_v47 = vld [vmem:[#allocation2 + $0x98] sm:$0xff] }
 0x161   : > { %11469 = vst [vmem:[#allocation83_spill] sm:$0xff] %v9268_v18  ;;  %v9274_v13 = vpack.c.bf16 %v798_v33, %v796_v5  ;;  %v9277_v7 = vpack.c.bf16 %v1269_v10, %v1267_v26  ;;  %v800_v60 = vld [vmem:[#allocation2 + $0x88] sm:$0xff]  ;;  %v1278_v63 = vld [vmem:[#allocation2 + $0x6f8] sm:$0xff]  ;;  %v9283_v5 = vpack.c.bf16 %v797_v0, %v795_v39  ;;  %v799_v26 = vld [vmem:[#allocation2 + $0x80] sm:$0xff] }
 0x162   : > { %6385 = vmatpush1.bf16.msra.mxu0 %v9245_v42  ;;  %6249 = vmatpush1.bf16.msra.mxu1 %v9257_v32  ;;  %v1271_v42 = vld [vmem:[#allocation2 + $0x6c0] sm:$0xff]  ;;  %v9286_v33 = vpack.c.bf16 %v802_v47, %v800_v60  ;;  %v801_v10 = vld [vmem:[#allocation2 + $0x90] sm:$0xff]  ;;  %v1280_v39 = vld [vmem:[#allocation2 + $0x708] sm:$0xff] }
 0x163   : > { %6387 = vmatprep.subr.bf16.mxu0 %v9251_v40  ;;  %6251 = vmatprep.subr.bf16.mxu1 %v9262_v36  ;;  %11471 = vst [vmem:[#allocation85_spill] sm:$0xff] %v9274_v13  ;;  %11472 = vst [vmem:[#allocation86_spill] sm:$0xff] %v9277_v7  ;;  %v9280_v40 = vpack.c.bf16 %v1274_v55, %v1272_v2  ;;  %v804_v55 = vld [vmem:[#allocation2 + $0xa8] sm:$0xff]  ;;  %v806_v2 = vld [vmem:[#allocation2 + $0xb8] sm:$0xff]  ;;  %v9295_v60 = vpack.c.bf16 %v801_v10, %v799_v26 }
 0x164   : > { %11474 = vst [vmem:[#allocation88_spill] sm:$0xff] %v9283_v5  ;;  %11475 = vst [vmem:[#allocation89_spill] sm:$0xff] %v9286_v33  ;;  %v1275_v36 = vld [vmem:[#allocation2 + $0x6e0] sm:$0xff]  ;;  %v1282_v0 = vld [vmem:[#allocation2 + $0x718] sm:$0xff]  ;;  %v9298_v47 = vpack.c.bf16 %v806_v2, %v804_v55 }
 0x165   : > { %11473 = vst [vmem:[#allocation87_spill] sm:$0xff] %v9280_v40  ;;  %11478 = vst [vmem:[#allocation92_spill] sm:$0xff] %v9295_v60  ;;  %v1284_v26 = vld [vmem:[#allocation2 + $0x728] sm:$0xff]  ;;  %v1286_v10 = vld [vmem:[#allocation2 + $0x738] sm:$0xff] }
 0x166   : > { %6389 = vmatpush1.bf16.msra.mxu0 %v9265_v53  ;;  %6253 = vmatpush1.bf16.msra.mxu1 %v9271_v14  ;;  %v9289_v53 = vpack.c.bf16 %v1273_v12, %v1271_v42  ;;  %v1277_v14 = vld [vmem:[#allocation2 + $0x6f0] sm:$0xff]  ;;  %11479 = vst [vmem:[#allocation93_spill] sm:$0xff] %v9298_v47  ;;  %v803_v12 = vld [vmem:[#allocation2 + $0xa0] sm:$0xff] }
 0x167   : > { %6391 = vmatprep.subr.bf16.mxu0 %v9268_v18  ;;  %6255 = vmatprep.subr.bf16.mxu1 %v9274_v13  ;;  %v9292_v18 = vpack.c.bf16 %v1278_v63, %v1276_v24  ;;  %v805_v42 = vld [vmem:[#allocation2 + $0xb0] sm:$0xff]  ;;  %v808_v24 = vld [vmem:[#allocation2 + $0xc8] sm:$0xff]  ;;  %v810_v63 = vld [vmem:[#allocation2 + $0xd8] sm:$0xff] }
 0x168   : > { %11476 = vst [vmem:[#allocation90_spill] sm:$0xff] %v9289_v53  ;;  %v1279_v13 = vld [vmem:[#allocation2 + $0x700] sm:$0xff]  ;;  %v9307_v55 = vpack.c.bf16 %v805_v42, %v803_v12  ;;  %v9310_v2 = vpack.c.bf16 %v810_v63, %v808_v24  ;;  %v1288_v12 = vld [vmem:[#allocation2 + $0x748] sm:$0xff]  ;;  %v1290_v42 = vld [vmem:[#allocation2 + $0x758] sm:$0xff] }
 0x169   : > { %11477 = vst [vmem:[#allocation91_spill] sm:$0xff] %v9292_v18 }
 0x16a   : > { %6393 = vmatpush1.bf16.msra.mxu0 %v9277_v7  ;;  %6257 = vmatpush1.bf16.msra.mxu1 %v9283_v5  ;;  %v9301_v7 = vpack.c.bf16 %v1277_v14, %v1275_v36  ;;  %v1281_v5 = vld [vmem:[#allocation2 + $0x710] sm:$0xff]  ;;  %11482 = vst [vmem:[#allocation96_spill] sm:$0xff] %v9307_v55  ;;  %11483 = vst [vmem:[#allocation97_spill] sm:$0xff] %v9310_v2  ;;  %v807_v36 = vld [vmem:[#allocation2 + $0xc0] sm:$0xff] }
 0x16b   : > { %6395 = vmatprep.subr.bf16.mxu0 %v9280_v40  ;;  %6259 = vmatprep.subr.bf16.mxu1 %v9286_v33  ;;  %v9304_v40 = vpack.c.bf16 %v1282_v0, %v1280_v39  ;;  %v809_v14 = vld [vmem:[#allocation2 + $0xd0] sm:$0xff]  ;;  %v812_v39 = vld [vmem:[#allocation2 + $0xe8] sm:$0xff]  ;;  %v814_v0 = vld [vmem:[#allocation2 + $0xf8] sm:$0xff] }
 0x16c   : > { %11480 = vst [vmem:[#allocation94_spill] sm:$0xff] %v9301_v7  ;;  %v1283_v33 = vld [vmem:[#allocation2 + $0x720] sm:$0xff]  ;;  %v9319_v24 = vpack.c.bf16 %v809_v14, %v807_v36  ;;  %v9322_v63 = vpack.c.bf16 %v814_v0, %v812_v39  ;;  %v1292_v36 = vld [vmem:[#allocation2 + $0x768] sm:$0xff]  ;;  %v1294_v14 = vld [vmem:[#allocation2 + $0x778] sm:$0xff] }
 0x16d   : > { %11481 = vst [vmem:[#allocation95_spill] sm:$0xff] %v9304_v40 }
 0x16e   : > { %6397 = vmatpush1.bf16.msra.mxu0 %v9289_v53  ;;  %6261 = vmatpush1.bf16.msra.mxu1 %v9295_v60  ;;  %v9313_v53 = vpack.c.bf16 %v1281_v5, %v1279_v13  ;;  %v1285_v60 = vld [vmem:[#allocation2 + $0x730] sm:$0xff]  ;;  %11486 = vst [vmem:[#allocation100_spill] sm:$0xff] %v9319_v24  ;;  %11487 = vst [vmem:[#allocation101_spill] sm:$0xff] %v9322_v63  ;;  %v811_v13 = vld [vmem:[#allocation2 + $0xe0] sm:$0xff] }
 0x16f   : > { %6399 = vmatprep.subr.bf16.mxu0 %v9292_v18  ;;  %6263 = vmatprep.subr.bf16.mxu1 %v9298_v47  ;;  %v9316_v18 = vpack.c.bf16 %v1286_v10, %v1284_v26  ;;  %v813_v5 = vld [vmem:[#allocation2 + $0xf0] sm:$0xff]  ;;  %v816_v26 = vld [vmem:[#allocation2 + $0x108] sm:$0xff]  ;;  %v818_v10 = vld [vmem:[#allocation2 + $0x118] sm:$0xff] }
 0x170   : > { %11484 = vst [vmem:[#allocation98_spill] sm:$0xff] %v9313_v53  ;;  %v1287_v47 = vld [vmem:[#allocation2 + $0x740] sm:$0xff]  ;;  %v9331_v39 = vpack.c.bf16 %v813_v5, %v811_v13  ;;  %v9334_v0 = vpack.c.bf16 %v818_v10, %v816_v26  ;;  %v1296_v13 = vld [vmem:[#allocation2 + $0x788] sm:$0xff]  ;;  %v1298_v5 = vld [vmem:[#allocation2 + $0x798] sm:$0xff] }
 0x171   : > { %11485 = vst [vmem:[#allocation99_spill] sm:$0xff] %v9316_v18 }
 0x172   : > { %6401 = vmatpush1.bf16.msra.mxu0 %v9301_v7  ;;  %6265 = vmatpush1.bf16.msra.mxu1 %v9307_v55  ;;  %v9325_v7 = vpack.c.bf16 %v1285_v60, %v1283_v33  ;;  %v1289_v55 = vld [vmem:[#allocation2 + $0x750] sm:$0xff]  ;;  %11490 = vst [vmem:[#allocation104_spill] sm:$0xff] %v9331_v39  ;;  %11491 = vst [vmem:[#allocation105_spill] sm:$0xff] %v9334_v0  ;;  %v815_v33 = vld [vmem:[#allocation2 + $0x100] sm:$0xff] }
 0x173   : > { %6403 = vmatprep.subr.bf16.mxu0 %v9304_v40  ;;  %6267 = vmatprep.subr.bf16.mxu1 %v9310_v2  ;;  %v9328_v40 = vpack.c.bf16 %v1290_v42, %v1288_v12  ;;  %v817_v60 = vld [vmem:[#allocation2 + $0x110] sm:$0xff]  ;;  %v820_v12 = vld [vmem:[#allocation2 + $0x128] sm:$0xff]  ;;  %v822_v42 = vld [vmem:[#allocation2 + $0x138] sm:$0xff] }
 0x174   : > { %11488 = vst [vmem:[#allocation102_spill] sm:$0xff] %v9325_v7  ;;  %v1291_v2 = vld [vmem:[#allocation2 + $0x760] sm:$0xff]  ;;  %v9343_v26 = vpack.c.bf16 %v817_v60, %v815_v33  ;;  %v9346_v10 = vpack.c.bf16 %v822_v42, %v820_v12  ;;  %v1300_v33 = vld [vmem:[#allocation2 + $0x7a8] sm:$0xff]  ;;  %v1302_v60 = vld [vmem:[#allocation2 + $0x7b8] sm:$0xff] }
 0x175   : > { %11489 = vst [vmem:[#allocation103_spill] sm:$0xff] %v9328_v40 }
 0x176   : > { %6405 = vmatpush1.bf16.msra.mxu0 %v9313_v53  ;;  %6269 = vmatpush1.bf16.msra.mxu1 %v9319_v24  ;;  %v9337_v53 = vpack.c.bf16 %v1289_v55, %v1287_v47  ;;  %v1293_v24 = vld [vmem:[#allocation2 + $0x770] sm:$0xff]  ;;  %11494 = vst [vmem:[#allocation108_spill] sm:$0xff] %v9343_v26  ;;  %11495 = vst [vmem:[#allocation109_spill] sm:$0xff] %v9346_v10  ;;  %v819_v47 = vld [vmem:[#allocation2 + $0x120] sm:$0xff] }
 0x177   : > { %6407 = vmatprep.subr.bf16.mxu0 %v9316_v18  ;;  %6271 = vmatprep.subr.bf16.mxu1 %v9322_v63  ;;  %v9340_v18 = vpack.c.bf16 %v1294_v14, %v1292_v36  ;;  %v821_v55 = vld [vmem:[#allocation2 + $0x130] sm:$0xff]  ;;  %v824_v36 = vld [vmem:[#allocation2 + $0x148] sm:$0xff]  ;;  %v826_v14 = vld [vmem:[#allocation2 + $0x158] sm:$0xff] }
 0x178   : > { %11492 = vst [vmem:[#allocation106_spill] sm:$0xff] %v9337_v53  ;;  %v1295_v63 = vld [vmem:[#allocation2 + $0x780] sm:$0xff]  ;;  %v9355_v12 = vpack.c.bf16 %v821_v55, %v819_v47  ;;  %v9358_v42 = vpack.c.bf16 %v826_v14, %v824_v36  ;;  %v1304_v47 = vld [vmem:[#allocation2 + $0x7c8] sm:$0xff]  ;;  %v1306_v55 = vld [vmem:[#allocation2 + $0x7d8] sm:$0xff] }
 0x179   : > { %11493 = vst [vmem:[#allocation107_spill] sm:$0xff] %v9340_v18 }
 0x17a   : > { %6409 = vmatpush1.bf16.msra.mxu0 %v9325_v7  ;;  %6273 = vmatpush1.bf16.msra.mxu1 %v9331_v39  ;;  %v9349_v7 = vpack.c.bf16 %v1293_v24, %v1291_v2  ;;  %v1297_v39 = vld [vmem:[#allocation2 + $0x790] sm:$0xff]  ;;  %11498 = vst [vmem:[#allocation112_spill] sm:$0xff] %v9355_v12  ;;  %11499 = vst [vmem:[#allocation113_spill] sm:$0xff] %v9358_v42  ;;  %v823_v2 = vld [vmem:[#allocation2 + $0x140] sm:$0xff] }
 0x17b   : > { %6411 = vmatprep.subr.bf16.mxu0 %v9328_v40  ;;  %6275 = vmatprep.subr.bf16.mxu1 %v9334_v0  ;;  %v9352_v40 = vpack.c.bf16 %v1298_v5, %v1296_v13  ;;  %v825_v24 = vld [vmem:[#allocation2 + $0x150] sm:$0xff]  ;;  %v828_v13 = vld [vmem:[#allocation2 + $0x168] sm:$0xff]  ;;  %v830_v5 = vld [vmem:[#allocation2 + $0x178] sm:$0xff] }
 0x17c   : > { %11496 = vst [vmem:[#allocation110_spill] sm:$0xff] %v9349_v7  ;;  %v1299_v0 = vld [vmem:[#allocation2 + $0x7a0] sm:$0xff]  ;;  %v9367_v36 = vpack.c.bf16 %v825_v24, %v823_v2  ;;  %v9370_v14 = vpack.c.bf16 %v830_v5, %v828_v13  ;;  %v1308_v2 = vld [vmem:[#allocation2 + $0x7e8] sm:$0xff]  ;;  %v1310_v24 = vld [vmem:[#allocation2 + $0x7f8] sm:$0xff] }
 0x17d   : > { %11497 = vst [vmem:[#allocation111_spill] sm:$0xff] %v9352_v40 }
 0x17e   : > { %6413 = vmatpush1.bf16.msra.mxu0 %v9337_v53  ;;  %6277 = vmatpush1.bf16.msra.mxu1 %v9343_v26  ;;  %v9361_v53 = vpack.c.bf16 %v1297_v39, %v1295_v63  ;;  %v1301_v26 = vld [vmem:[#allocation2 + $0x7b0] sm:$0xff]  ;;  %11502 = vst [vmem:[#allocation116_spill] sm:$0xff] %v9367_v36  ;;  %11503 = vst [vmem:[#allocation117_spill] sm:$0xff] %v9370_v14  ;;  %v827_v63 = vld [vmem:[#allocation2 + $0x160] sm:$0xff] }
 0x17f   : > { %6415 = vmatprep.subr.bf16.mxu0 %v9340_v18  ;;  %6279 = vmatprep.subr.bf16.mxu1 %v9346_v10  ;;  %v9364_v18 = vpack.c.bf16 %v1302_v60, %v1300_v33  ;;  %v829_v39 = vld [vmem:[#allocation2 + $0x170] sm:$0xff]  ;;  %v832_v33 = vld [vmem:[#allocation2 + $0x188] sm:$0xff]  ;;  %v834_v60 = vld [vmem:[#allocation2 + $0x198] sm:$0xff] }
 0x180   : > { %11500 = vst [vmem:[#allocation114_spill] sm:$0xff] %v9361_v53  ;;  %v1303_v10 = vld [vmem:[#allocation2 + $0x7c0] sm:$0xff]  ;;  %v9379_v13 = vpack.c.bf16 %v829_v39, %v827_v63  ;;  %v9382_v5 = vpack.c.bf16 %v834_v60, %v832_v33  ;;  %v1404_v63 = vld [vmem:[#allocation2 + $0x808] sm:$0xff]  ;;  %v1406_v39 = vld [vmem:[#allocation2 + $0x818] sm:$0xff] }
 0x181   : > { %11501 = vst [vmem:[#allocation115_spill] sm:$0xff] %v9364_v18 }
 0x182   : > { %6417 = vmatpush1.bf16.msra.mxu0 %v9349_v7  ;;  %6281 = vmatpush1.bf16.msra.mxu1 %v9355_v12  ;;  %v9373_v7 = vpack.c.bf16 %v1301_v26, %v1299_v0  ;;  %v1305_v12 = vld [vmem:[#allocation2 + $0x7d0] sm:$0xff]  ;;  %11506 = vst [vmem:[#allocation120_spill] sm:$0xff] %v9379_v13  ;;  %11507 = vst [vmem:[#allocation121_spill] sm:$0xff] %v9382_v5  ;;  %v831_v0 = vld [vmem:[#allocation2 + $0x180] sm:$0xff] }
 0x183   : > { %6419 = vmatprep.subr.bf16.mxu0 %v9352_v40  ;;  %6283 = vmatprep.subr.bf16.mxu1 %v9358_v42  ;;  %v9376_v40 = vpack.c.bf16 %v1306_v55, %v1304_v47  ;;  %v833_v26 = vld [vmem:[#allocation2 + $0x190] sm:$0xff]  ;;  %v836_v47 = vld [vmem:[#allocation2 + $0x1a8] sm:$0xff]  ;;  %v838_v55 = vld [vmem:[#allocation2 + $0x1b8] sm:$0xff] }
 0x184   : > { %11504 = vst [vmem:[#allocation118_spill] sm:$0xff] %v9373_v7  ;;  %v1307_v42 = vld [vmem:[#allocation2 + $0x7e0] sm:$0xff]  ;;  %v9391_v33 = vpack.c.bf16 %v833_v26, %v831_v0  ;;  %v9394_v60 = vpack.c.bf16 %v838_v55, %v836_v47  ;;  %v1408_v0 = vld [vmem:[#allocation2 + $0x828] sm:$0xff]  ;;  %v1410_v26 = vld [vmem:[#allocation2 + $0x838] sm:$0xff] }
 0x185   : > { %11505 = vst [vmem:[#allocation119_spill] sm:$0xff] %v9376_v40 }
 0x186   : > { %6421 = vmatpush1.bf16.msra.mxu0 %v9361_v53  ;;  %6285 = vmatpush1.bf16.msra.mxu1 %v9367_v36  ;;  %v9385_v53 = vpack.c.bf16 %v1305_v12, %v1303_v10  ;;  %v1309_v36 = vld [vmem:[#allocation2 + $0x7f0] sm:$0xff]  ;;  %11510 = vst [vmem:[#allocation124_spill] sm:$0xff] %v9391_v33  ;;  %11511 = vst [vmem:[#allocation125_spill] sm:$0xff] %v9394_v60  ;;  %v835_v10 = vld [vmem:[#allocation2 + $0x1a0] sm:$0xff] }
 0x187   : > { %6423 = vmatprep.subr.bf16.mxu0 %v9364_v18  ;;  %6287 = vmatprep.subr.bf16.mxu1 %v9370_v14  ;;  %v9388_v18 = vpack.c.bf16 %v1310_v24, %v1308_v2  ;;  %v837_v12 = vld [vmem:[#allocation2 + $0x1b0] sm:$0xff]  ;;  %v840_v2 = vld [vmem:[#allocation2 + $0x1c8] sm:$0xff]  ;;  %v842_v24 = vld [vmem:[#allocation2 + $0x1d8] sm:$0xff] }
 0x188   : > { %11508 = vst [vmem:[#allocation122_spill] sm:$0xff] %v9385_v53  ;;  %v1403_v14 = vld [vmem:[#allocation2 + $0x800] sm:$0xff]  ;;  %v9403_v47 = vpack.c.bf16 %v837_v12, %v835_v10  ;;  %v9406_v55 = vpack.c.bf16 %v842_v24, %v840_v2  ;;  %v1409_v12 = vld [vmem:[#allocation2 + $0x830] sm:$0xff]  ;;  %v1414_v2 = vld [vmem:[#allocation2 + $0x858] sm:$0xff] }
 0x189   : > { %11509 = vst [vmem:[#allocation123_spill] sm:$0xff] %v9388_v18  ;;  %v1407_v10 = vld [vmem:[#allocation2 + $0x820] sm:$0xff] }
 0x18a   : > { %6425 = vmatpush1.bf16.msra.mxu0 %v9373_v7  ;;  %6289 = vmatpush1.bf16.msra.mxu1 %v9379_v13  ;;  %v9397_v7 = vpack.c.bf16 %v1309_v36, %v1307_v42  ;;  %v1405_v13 = vld [vmem:[#allocation2 + $0x810] sm:$0xff]  ;;  %11514 = vst [vmem:[#allocation128_spill] sm:$0xff] %v9403_v47  ;;  %v839_v42 = vld [vmem:[#allocation2 + $0x1c0] sm:$0xff] }
 0x18b   : > { %6427 = vmatprep.subr.bf16.mxu0 %v9376_v40  ;;  %6291 = vmatprep.subr.bf16.mxu1 %v9382_v5  ;;  %v9400_v40 = vpack.c.bf16 %v1406_v39, %v1404_v63  ;;  %v841_v36 = vld [vmem:[#allocation2 + $0x1d0] sm:$0xff]  ;;  %v844_v63 = vld [vmem:[#allocation2 + $0x1e8] sm:$0xff]  ;;  %v846_v39 = vld [vmem:[#allocation2 + $0x1f8] sm:$0xff] }
 0x18c   : > { %11512 = vst [vmem:[#allocation126_spill] sm:$0xff] %v9397_v7  ;;  %v9417_v24 = vpack.c.bf16 %v841_v36, %v839_v42  ;;  %v1413_v42 = vld [vmem:[#allocation2 + $0x850] sm:$0xff]  ;;  %v1416_v36 = vld [vmem:[#allocation2 + $0x868] sm:$0xff] }
 0x18d   : > { %11513 = vst [vmem:[#allocation127_spill] sm:$0xff] %v9400_v40 }
 0x18e   : > { %6429 = vmatpush1.bf16.msra.mxu0 %v9385_v53  ;;  %6293 = vmatpush1.bf16.msra.mxu1 %v9391_v33  ;;  %v9409_v53 = vpack.c.bf16 %v1405_v13, %v1403_v14  ;;  %v9414_v33 = vpack.c.bf16 %v1410_v26, %v1408_v0  ;;  %11517 = vst [vmem:[#allocation131_spill] sm:$0xff] %v9417_v24  ;;  %v843_v13 = vld [vmem:[#allocation2 + $0x1e0] sm:$0xff] }
 0x18f   : > { %6431 = vmatprep.subr.bf16.mxu0 %v9388_v18  ;;  %6295 = vmatprep.subr.bf16.mxu1 %v9394_v60  ;;  %v1468_v18 = vcombine.high %v9203_v8, %v9203_v8  ;;  %v1412_v60 = vld [vmem:[#allocation2 + $0x848] sm:$0xff]  ;;  %v9421_v14 = vpack.c.bf16 %v846_v39, %v844_v63  ;;  %v9424_v0 = vpack.c.bf16 %v1409_v12, %v1407_v10  ;;  %v1417_v39 = vld [vmem:[#allocation2 + $0x870] sm:$0xff]  ;;  %v1422_v12 = vld [vmem:[#allocation2 + $0x898] sm:$0xff] }
 0x190   : > { %11515 = vst [vmem:[#allocation129_spill] sm:$0xff] %v9409_v53  ;;  %11516 = vst [vmem:[#allocation130_spill] sm:$0xff] %v9414_v33  ;;  %v9427_v26 = vpack.c.bf16 %v1414_v2, %v1412_v60  ;;  %v1415_v60 = vld [vmem:[#allocation2 + $0x860] sm:$0xff]  ;;  %v1420_v10 = vld [vmem:[#allocation2 + $0x888] sm:$0xff] }
 0x191   : > { %11518 = vst [vmem:[#allocation132_spill] sm:$0xff] %v9421_v14  ;;  %11519 = vst [vmem:[#allocation133_spill] sm:$0xff] %v9424_v0  ;;  %v9444_v2 = vpack.c.bf16 %v1422_v12, %v1420_v10  ;;  %v1427_v12 = vld [vmem:[#allocation2 + $0x8c0] sm:$0xff] }
 0x192   : > { %6433 = vmatpush1.bf16.msra.mxu0 %v9397_v7  ;;  %6297 = vmatpush1.bf16.msra.mxu1 %v9403_v47  ;;  %v845_v7 = vld [vmem:[#allocation2 + $0x1f0] sm:$0xff]  ;;  %11520 = vst [vmem:[#allocation134_spill] sm:$0xff] %v9427_v26  ;;  %v1418_v47 = vld [vmem:[#allocation2 + $0x878] sm:$0xff] }
 0x193   : > { %6435 = vmatprep.subr.bf16.mxu0 %v9400_v40  ;;  %6299 = vmatprep.subr.bf16.mxu1 %v9406_v55  ;;  %v1411_v40 = vld [vmem:[#allocation2 + $0x840] sm:$0xff]  ;;  %11525 = vst [vmem:[#allocation139_spill] sm:$0xff] %v9444_v2 }
 0x194   : > { %v9434_v63 = vpack.c.bf16 %v1413_v42, %v1411_v40  ;;  %v1419_v40 = vld [vmem:[#allocation2 + $0x880] sm:$0xff]  ;;  %v1426_v42 = vld [vmem:[#allocation2 + $0x8b8] sm:$0xff] }
 0x195   : > { %1379 = vmatmul.mubr.f32.vlgmr.msra.gmra.mrb[0].mxu0 %v9208_v15  ;;  %v9430_v15 = vpack.c.bf16 %v845_v7, %v843_v13  ;;  %v9441_v7 = vpack.c.bf16 %v1417_v39, %v1415_v60  ;;  %v1421_v13 = vld [vmem:[#allocation2 + $0x890] sm:$0xff]  ;;  %v1423_v60 = vld [vmem:[#allocation2 + $0x8a0] sm:$0xff] }
 0x196   : > { %6437 = vmatpush1.bf16.msra.mxu0 %v9409_v53  ;;  %1534 = vmatprep.mubr.f32.mxu0 %v1468_v18  ;;  %11522 = vst [vmem:[#allocation136_spill] sm:$0xff] %v9434_v63  ;;  %v9437_v18 = vpack.c.bf16 %v1418_v47, %v1416_v36  ;;  %v1424_v47 = vld [vmem:[#allocation2 + $0x8a8] sm:$0xff]  ;;  %v9448_v36 = vpack.c.bf16 %v1421_v13, %v1419_v40  ;;  %v1425_v39 = vld [vmem:[#allocation2 + $0x8b0] sm:$0xff]  ;;  %v1434_v13 = vld [vmem:[#allocation2 + $0x8f8] sm:$0xff] }
 0x197   : > { %6439 = vmatprep.subr.bf16.mxu0 %v9414_v33  ;;  %6301 = vmatpush1.bf16.msra.mxu1 %v9417_v24  ;;  %11521 = vst [vmem:[#allocation135_spill] sm:$0xff] %v9430_v15  ;;  %11524 = vst [vmem:[#allocation138_spill] sm:$0xff] %v9441_v7  ;;  %v9454_v10 = vpack.c.bf16 %v1425_v39, %v1423_v60  ;;  %v1432_v40 = vld [vmem:[#allocation2 + $0x8e8] sm:$0xff]  ;;  %v1438_v39 = vld [vmem:[#allocation2 + $0x918] sm:$0xff] }
 0x198   : > { %6303 = vmatprep.subr.bf16.mxu1 %v9421_v14  ;;  %11523 = vst [vmem:[#allocation137_spill] sm:$0xff] %v9437_v18  ;;  %11526 = vst [vmem:[#allocation140_spill] sm:$0xff] %v9448_v36  ;;  %v1436_v60 = vld [vmem:[#allocation2 + $0x908] sm:$0xff] }
 0x199   : > { %11528 = vst [vmem:[#allocation142_spill] sm:$0xff] %v9454_v10 }
 0x19a   : > { %6441 = vmatpush1.bf16.msra.mxu0 %v9424_v0 }
 0x19b   : > { %6443 = vmatprep.subr.bf16.mxu0 %v9427_v26  ;;  %6305 = vmatpush1.bf16.msra.mxu1 %v9430_v15  ;;  %v9451_v26 = vpack.c.bf16 %v1426_v42, %v1424_v47  ;;  %v9463_v42 = vpack.c.bf16 %v1434_v13, %v1432_v40 }
 0x19d   : > { %11527 = vst [vmem:[#allocation141_spill] sm:$0xff] %v9451_v26  ;;  %11531 = vst [vmem:[#allocation145_spill] sm:$0xff] %v9463_v42 }
 0x19e   : > { %6445 = vmatpush1.bf16.msra.mxu0 %v9434_v63  ;;  %1069 = vmatmul.mubr.f32.vlgmr.msra.gmra.mrb[0].mxu1 %v9248_v48  ;;  %v1428_v63 = vld [vmem:[#allocation2 + $0x8c8] sm:$0xff] }
 0x19f   : > { %6447 = vmatprep.subr.bf16.mxu0 %v9437_v18  ;;  %v1430_v18 = vld [vmem:[#allocation2 + $0x8d8] sm:$0xff] }
 0x1a0   : > { %v9457_v48 = vpack.c.bf16 %v1430_v18, %v1428_v63  ;;  %v9469_v18 = vpack.c.bf16 %v1438_v39, %v1436_v60 }
 0x1a2   : > { %6449 = vmatpush1.bf16.msra.mxu0 %v9441_v7  ;;  %11529 = vst [vmem:[#allocation143_spill] sm:$0xff] %v9457_v48  ;;  %v1429_v7 = vld [vmem:[#allocation2 + $0x8d0] sm:$0xff]  ;;  %11533 = vst [vmem:[#allocation147_spill] sm:$0xff] %v9469_v18 }
 0x1a3   : > { %6451 = vmatprep.subr.bf16.mxu0 %v9444_v2  ;;  %v9460_v47 = vpack.c.bf16 %v1429_v7, %v1427_v12  ;;  %v1431_v2 = vld [vmem:[#allocation2 + $0x8e0] sm:$0xff]  ;;  %v1440_v7 = vld [vmem:[#allocation2 + $0x928] sm:$0xff]  ;;  %v1442_v12 = vld [vmem:[#allocation2 + $0x938] sm:$0xff] }
 0x1a4   : > { %v9475_v13 = vpack.c.bf16 %v1442_v12, %v1440_v7 }
 0x1a5   : > { %11530 = vst [vmem:[#allocation144_spill] sm:$0xff] %v9460_v47 }
 0x1a6   : > { %6453 = vmatpush1.bf16.msra.mxu0 %v9448_v36  ;;  %v1433_v36 = vld [vmem:[#allocation2 + $0x8f0] sm:$0xff]  ;;  %11535 = vst [vmem:[#allocation149_spill] sm:$0xff] %v9475_v13 }
 0x1a7   : > { %6455 = vmatprep.subr.bf16.mxu0 %v9451_v26  ;;  %v9466_v63 = vpack.c.bf16 %v1433_v36, %v1431_v2  ;;  %v1435_v26 = vld [vmem:[#allocation2 + $0x900] sm:$0xff]  ;;  %v1444_v2 = vld [vmem:[#allocation2 + $0x948] sm:$0xff]  ;;  %v1446_v36 = vld [vmem:[#allocation2 + $0x958] sm:$0xff] }
 0x1a8   : > { %v9481_v39 = vpack.c.bf16 %v1446_v36, %v1444_v2 }
 0x1a9   : > { %11532 = vst [vmem:[#allocation146_spill] sm:$0xff] %v9466_v63 }
 0x1aa   : > { %6457 = vmatpush1.bf16.msra.mxu0 %v9454_v10  ;;  %v1437_v10 = vld [vmem:[#allocation2 + $0x910] sm:$0xff]  ;;  %11537 = vst [vmem:[#allocation151_spill] sm:$0xff] %v9481_v39 }
 0x1ab   : > { %6459 = vmatprep.subr.bf16.mxu0 %v9457_v48  ;;  %v9472_v40 = vpack.c.bf16 %v1437_v10, %v1435_v26  ;;  %v1439_v48 = vld [vmem:[#allocation2 + $0x920] sm:$0xff]  ;;  %v1448_v26 = vld [vmem:[#allocation2 + $0x968] sm:$0xff]  ;;  %v1450_v10 = vld [vmem:[#allocation2 + $0x978] sm:$0xff] }
 0x1ac   : > { %v9487_v12 = vpack.c.bf16 %v1450_v10, %v1448_v26 }
 0x1ad   : > { %11534 = vst [vmem:[#allocation148_spill] sm:$0xff] %v9472_v40 }
 0x1ae   : > { %6461 = vmatpush1.bf16.msra.mxu0 %v9460_v47  ;;  %v1441_v47 = vld [vmem:[#allocation2 + $0x930] sm:$0xff]  ;;  %11539 = vst [vmem:[#allocation153_spill] sm:$0xff] %v9487_v12 }
 0x1af   : > { %6463 = vmatprep.subr.bf16.mxu0 %v9463_v42  ;;  %v9478_v60 = vpack.c.bf16 %v1441_v47, %v1439_v48  ;;  %v1443_v42 = vld [vmem:[#allocation2 + $0x940] sm:$0xff]  ;;  %v1452_v48 = vld [vmem:[#allocation2 + $0x988] sm:$0xff]  ;;  %v1454_v47 = vld [vmem:[#allocation2 + $0x998] sm:$0xff] }
 0x1b0   : > { %v9493_v36 = vpack.c.bf16 %v1454_v47, %v1452_v48 }
 0x1b1   : > { %11536 = vst [vmem:[#allocation150_spill] sm:$0xff] %v9478_v60 }
 0x1b2   : > { %6465 = vmatpush1.bf16.msra.mxu0 %v9466_v63  ;;  %v1445_v63 = vld [vmem:[#allocation2 + $0x950] sm:$0xff]  ;;  %11541 = vst [vmem:[#allocation155_spill] sm:$0xff] %v9493_v36 }
 0x1b3   : > { %6467 = vmatprep.subr.bf16.mxu0 %v9469_v18  ;;  %v9484_v7 = vpack.c.bf16 %v1445_v63, %v1443_v42  ;;  %v1447_v18 = vld [vmem:[#allocation2 + $0x960] sm:$0xff]  ;;  %v1456_v42 = vld [vmem:[#allocation2 + $0x9a8] sm:$0xff]  ;;  %v1458_v63 = vld [vmem:[#allocation2 + $0x9b8] sm:$0xff] }
 0x1b4   : > { %v9499_v10 = vpack.c.bf16 %v1458_v63, %v1456_v42 }
 0x1b5   : > { %11538 = vst [vmem:[#allocation152_spill] sm:$0xff] %v9484_v7 }
 0x1b6   : > { %6469 = vmatpush1.bf16.msra.mxu0 %v9472_v40  ;;  %v1449_v40 = vld [vmem:[#allocation2 + $0x970] sm:$0xff]  ;;  %11543 = vst [vmem:[#allocation157_spill] sm:$0xff] %v9499_v10 }
 0x1b7   : > { %6471 = vmatprep.subr.bf16.mxu0 %v9475_v13  ;;  %v9490_v2 = vpack.c.bf16 %v1449_v40, %v1447_v18  ;;  %v1451_v13 = vld [vmem:[#allocation2 + $0x980] sm:$0xff]  ;;  %v1460_v18 = vld [vmem:[#allocation2 + $0x9c8] sm:$0xff]  ;;  %v1462_v40 = vld [vmem:[#allocation2 + $0x9d8] sm:$0xff] }
 0x1b8   : > { %v9505_v47 = vpack.c.bf16 %v1462_v40, %v1460_v18 }
 0x1b9   : > { %11540 = vst [vmem:[#allocation154_spill] sm:$0xff] %v9490_v2 }
 0x1ba   : > { %6473 = vmatpush1.bf16.msra.mxu0 %v9478_v60  ;;  %v1453_v60 = vld [vmem:[#allocation2 + $0x990] sm:$0xff]  ;;  %11545 = vst [vmem:[#allocation159_spill] sm:$0xff] %v9505_v47 }
 0x1bb   : > { %6475 = vmatprep.subr.bf16.mxu0 %v9481_v39  ;;  %v9496_v26 = vpack.c.bf16 %v1453_v60, %v1451_v13  ;;  %v1455_v39 = vld [vmem:[#allocation2 + $0x9a0] sm:$0xff]  ;;  %v1464_v13 = vld [vmem:[#allocation2 + $0x9e8] sm:$0xff]  ;;  %v1466_v60 = vld [vmem:[#allocation2 + $0x9f8] sm:$0xff] }
 0x1bc   : > { %v9511_v63 = vpack.c.bf16 %v1466_v60, %v1464_v13  ;;  %v1624_v60 = vcombine.high %v9218_v23, %v9218_v23 }
 0x1bd   : > { %11542 = vst [vmem:[#allocation156_spill] sm:$0xff] %v9496_v26 }
 0x1be   : > { %6477 = vmatpush1.bf16.msra.mxu0 %v9484_v7  ;;  %v1457_v7 = vld [vmem:[#allocation2 + $0x9b0] sm:$0xff]  ;;  %11547 = vst [vmem:[#allocation161_spill] sm:$0xff] %v9511_v63 }
 0x1bf   : > { %6479 = vmatprep.subr.bf16.mxu0 %v9487_v12  ;;  %v9502_v48 = vpack.c.bf16 %v1457_v7, %v1455_v39  ;;  %v1459_v12 = vld [vmem:[#allocation2 + $0x9c0] sm:$0xff]  ;;  %v1560_v39 = vld [vmem:[#allocation2 + $0xa08] sm:$0xff]  ;;  %v1562_v7 = vld [vmem:[#allocation2 + $0xa18] sm:$0xff] }
 0x1c0   : > { %v9517_v40 = vpack.c.bf16 %v1562_v7, %v1560_v39  ;;  %v1570_v39 = vld [vmem:[#allocation2 + $0xa58] sm:$0xff] }
 0x1c1   : > { %11544 = vst [vmem:[#allocation158_spill] sm:$0xff] %v9502_v48 }
 0x1c2   : > { %6481 = vmatpush1.bf16.msra.mxu0 %v9490_v2  ;;  %v1461_v2 = vld [vmem:[#allocation2 + $0x9d0] sm:$0xff]  ;;  %11549 = vst [vmem:[#allocation163_spill] sm:$0xff] %v9517_v40 }
 0x1c3   : > { %6483 = vmatprep.subr.bf16.mxu0 %v9493_v36  ;;  %v9508_v42 = vpack.c.bf16 %v1461_v2, %v1459_v12  ;;  %v1463_v36 = vld [vmem:[#allocation2 + $0x9e0] sm:$0xff]  ;;  %v1564_v12 = vld [vmem:[#allocation2 + $0xa28] sm:$0xff]  ;;  %v1566_v2 = vld [vmem:[#allocation2 + $0xa38] sm:$0xff] }
 0x1c5   : > { %11546 = vst [vmem:[#allocation160_spill] sm:$0xff] %v9508_v42 }
 0x1c6   : > { %6485 = vmatpush1.bf16.msra.mxu0 %v9496_v26  ;;  %v1465_v26 = vld [vmem:[#allocation2 + $0x9f0] sm:$0xff] }
 0x1c7   : > { %6487 = vmatprep.subr.bf16.mxu0 %v9499_v10  ;;  %v9514_v18 = vpack.c.bf16 %v1465_v26, %v1463_v36  ;;  %v1559_v10 = vld [vmem:[#allocation2 + $0xa00] sm:$0xff]  ;;  %v1565_v26 = vld [vmem:[#allocation2 + $0xa30] sm:$0xff] }
 0x1c8   : > { %v1563_v36 = vld [vmem:[#allocation2 + $0xa20] sm:$0xff] }
 0x1c9   : > { %11548 = vst [vmem:[#allocation162_spill] sm:$0xff] %v9514_v18  ;;  %v9529_v7 = vpack.c.bf16 %v1565_v26, %v1563_v36  ;;  %v1576_v36 = vld [vmem:[#allocation2 + $0xa88] sm:$0xff]  ;;  %v1578_v26 = vld [vmem:[#allocation2 + $0xa98] sm:$0xff] }
 0x1ca   : > { %6489 = vmatpush1.bf16.msra.mxu0 %v9502_v48  ;;  %v1561_v48 = vld [vmem:[#allocation2 + $0xa10] sm:$0xff] }
 0x1cb   : > { %6491 = vmatprep.subr.bf16.mxu0 %v9505_v47  ;;  %v9520_v13 = vpack.c.bf16 %v1561_v48, %v1559_v10  ;;  %11552 = vst [vmem:[#allocation166_spill] sm:$0xff] %v9529_v7  ;;  %v1567_v48 = vld [vmem:[#allocation2 + $0xa40] sm:$0xff] }
 0x1cd   : > { %11550 = vst [vmem:[#allocation164_spill] sm:$0xff] %v9520_v13 }
 0x1ce   : > { %6493 = vmatpush1.bf16.msra.mxu0 %v9508_v42  ;;  %v9525_v42 = vpack.c.bf16 %v1566_v2, %v1564_v12  ;;  %v1574_v12 = vld [vmem:[#allocation2 + $0xa78] sm:$0xff] }
 0x1cf   : > { %6495 = vmatprep.subr.bf16.mxu0 %v9511_v63  ;;  %v1568_v63 = vld [vmem:[#allocation2 + $0xa48] sm:$0xff] }
 0x1d0   : > { %11551 = vst [vmem:[#allocation165_spill] sm:$0xff] %v9525_v42  ;;  %v9532_v10 = vpack.c.bf16 %v1570_v39, %v1568_v63  ;;  %v9544_v39 = vpack.c.bf16 %v1578_v26, %v1576_v36 }
 0x1d2   : > { %6497 = vmatpush1.bf16.msra.mxu0 %v9514_v18  ;;  %11553 = vst [vmem:[#allocation167_spill] sm:$0xff] %v9532_v10  ;;  %v1569_v18 = vld [vmem:[#allocation2 + $0xa50] sm:$0xff]  ;;  %11557 = vst [vmem:[#allocation171_spill] sm:$0xff] %v9544_v39 }
 0x1d3   : > { %6499 = vmatprep.subr.bf16.mxu0 %v9517_v40  ;;  %v1572_v40 = vld [vmem:[#allocation2 + $0xa68] sm:$0xff]  ;;  %v9535_v2 = vpack.c.bf16 %v1569_v18, %v1567_v48  ;;  %v1582_v48 = vld [vmem:[#allocation2 + $0xab8] sm:$0xff] }
 0x1d4   : > { %v1580_v18 = vld [vmem:[#allocation2 + $0xaa8] sm:$0xff] }
 0x1d5   : > { %1535 = vmatmul.mubr.f32.vlgmr.msra.gmra.mrb[0].mxu0 %v9203_v8  ;;  %11554 = vst [vmem:[#allocation168_spill] sm:$0xff] %v9535_v2  ;;  %v9538_v8 = vpack.c.bf16 %v1574_v12, %v1572_v40  ;;  %v9550_v12 = vpack.c.bf16 %v1582_v48, %v1580_v18 }
 0x1d6   : > { %6501 = vmatpush1.bf16.msra.mxu0 %v9520_v13  ;;  %1690 = vmatprep.mubr.f32.mxu0 %v1624_v60  ;;  %v1571_v13 = vld [vmem:[#allocation2 + $0xa60] sm:$0xff]  ;;  %v1573_v60 = vld [vmem:[#allocation2 + $0xa70] sm:$0xff] }
 0x1d7   : > { %6503 = vmatprep.subr.bf16.mxu0 %v9525_v42  ;;  %11555 = vst [vmem:[#allocation169_spill] sm:$0xff] %v9538_v8  ;;  %v9541_v63 = vpack.c.bf16 %v1573_v60, %v1571_v13  ;;  %v1575_v42 = vld [vmem:[#allocation2 + $0xa80] sm:$0xff]  ;;  %11559 = vst [vmem:[#allocation173_spill] sm:$0xff] %v9550_v12  ;;  %v1584_v13 = vld [vmem:[#allocation2 + $0xac8] sm:$0xff] }
 0x1d8   : > { %v1586_v60 = vld [vmem:[#allocation2 + $0xad8] sm:$0xff] }
 0x1d9   : > { %11556 = vst [vmem:[#allocation170_spill] sm:$0xff] %v9541_v63  ;;  %v9556_v26 = vpack.c.bf16 %v1586_v60, %v1584_v13 }
 0x1da   : > { %6505 = vmatpush1.bf16.msra.mxu0 %v9529_v7  ;;  %v1577_v7 = vld [vmem:[#allocation2 + $0xa90] sm:$0xff] }
 0x1db   : > { %6507 = vmatprep.subr.bf16.mxu0 %v9532_v10  ;;  %v9547_v40 = vpack.c.bf16 %v1577_v7, %v1575_v42  ;;  %v1579_v10 = vld [vmem:[#allocation2 + $0xaa0] sm:$0xff]  ;;  %11561 = vst [vmem:[#allocation175_spill] sm:$0xff] %v9556_v26  ;;  %v1588_v42 = vld [vmem:[#allocation2 + $0xae8] sm:$0xff]  ;;  %v1590_v7 = vld [vmem:[#allocation2 + $0xaf8] sm:$0xff] }
 0x1dc   : > { %v9562_v48 = vpack.c.bf16 %v1590_v7, %v1588_v42 }
 0x1dd   : > { %11558 = vst [vmem:[#allocation172_spill] sm:$0xff] %v9547_v40 }
 0x1de   : > { %6509 = vmatpush1.bf16.msra.mxu0 %v9535_v2  ;;  %v1581_v2 = vld [vmem:[#allocation2 + $0xab0] sm:$0xff]  ;;  %11563 = vst [vmem:[#allocation177_spill] sm:$0xff] %v9562_v48 }
 0x1df   : > { %6511 = vmatprep.subr.bf16.mxu0 %v9538_v8  ;;  %v9553_v36 = vpack.c.bf16 %v1581_v2, %v1579_v10  ;;  %v1583_v8 = vld [vmem:[#allocation2 + $0xac0] sm:$0xff]  ;;  %v1592_v10 = vld [vmem:[#allocation2 + $0xb08] sm:$0xff]  ;;  %v1594_v2 = vld [vmem:[#allocation2 + $0xb18] sm:$0xff] }
 0x1e0   : > { %v9568_v60 = vpack.c.bf16 %v1594_v2, %v1592_v10 }
 0x1e1   : > { %11560 = vst [vmem:[#allocation174_spill] sm:$0xff] %v9553_v36 }
 0x1e2   : > { %6513 = vmatpush1.bf16.msra.mxu0 %v9541_v63  ;;  %v1585_v63 = vld [vmem:[#allocation2 + $0xad0] sm:$0xff]  ;;  %11565 = vst [vmem:[#allocation179_spill] sm:$0xff] %v9568_v60 }
 0x1e3   : > { %6515 = vmatprep.subr.bf16.mxu0 %v9544_v39  ;;  %v9559_v18 = vpack.c.bf16 %v1585_v63, %v1583_v8  ;;  %v1587_v39 = vld [vmem:[#allocation2 + $0xae0] sm:$0xff]  ;;  %v1596_v8 = vld [vmem:[#allocation2 + $0xb28] sm:$0xff]  ;;  %v1598_v63 = vld [vmem:[#allocation2 + $0xb38] sm:$0xff] }
 0x1e4   : > { %v9574_v7 = vpack.c.bf16 %v1598_v63, %v1596_v8 }
 0x1e5   : > { %11562 = vst [vmem:[#allocation176_spill] sm:$0xff] %v9559_v18 }
 0x1e6   : > { %6517 = vmatpush1.bf16.msra.mxu0 %v9547_v40  ;;  %v1589_v40 = vld [vmem:[#allocation2 + $0xaf0] sm:$0xff]  ;;  %11567 = vst [vmem:[#allocation181_spill] sm:$0xff] %v9574_v7 }
 0x1e7   : > { %6519 = vmatprep.subr.bf16.mxu0 %v9550_v12  ;;  %v9565_v13 = vpack.c.bf16 %v1589_v40, %v1587_v39  ;;  %v1591_v12 = vld [vmem:[#allocation2 + $0xb00] sm:$0xff]  ;;  %v1600_v39 = vld [vmem:[#allocation2 + $0xb48] sm:$0xff]  ;;  %v1602_v40 = vld [vmem:[#allocation2 + $0xb58] sm:$0xff] }
 0x1e8   : > { %v9580_v2 = vpack.c.bf16 %v1602_v40, %v1600_v39 }
 0x1e9   : > { %11564 = vst [vmem:[#allocation178_spill] sm:$0xff] %v9565_v13 }
 0x1ea   : > { %6521 = vmatpush1.bf16.msra.mxu0 %v9553_v36  ;;  %v1593_v36 = vld [vmem:[#allocation2 + $0xb10] sm:$0xff]  ;;  %11569 = vst [vmem:[#allocation183_spill] sm:$0xff] %v9580_v2 }
 0x1eb   : > { %6523 = vmatprep.subr.bf16.mxu0 %v9556_v26  ;;  %v9571_v42 = vpack.c.bf16 %v1593_v36, %v1591_v12  ;;  %v1595_v26 = vld [vmem:[#allocation2 + $0xb20] sm:$0xff]  ;;  %v1604_v12 = vld [vmem:[#allocation2 + $0xb68] sm:$0xff]  ;;  %v1606_v36 = vld [vmem:[#allocation2 + $0xb78] sm:$0xff] }
 0x1ec   : > { %v9586_v63 = vpack.c.bf16 %v1606_v36, %v1604_v12 }
 0x1ed   : > { %11566 = vst [vmem:[#allocation180_spill] sm:$0xff] %v9571_v42 }
 0x1ee   : > { %6525 = vmatpush1.bf16.msra.mxu0 %v9559_v18  ;;  %v1597_v18 = vld [vmem:[#allocation2 + $0xb30] sm:$0xff]  ;;  %11571 = vst [vmem:[#allocation185_spill] sm:$0xff] %v9586_v63 }
 0x1ef   : > { %6527 = vmatprep.subr.bf16.mxu0 %v9562_v48  ;;  %v9577_v10 = vpack.c.bf16 %v1597_v18, %v1595_v26  ;;  %v1599_v48 = vld [vmem:[#allocation2 + $0xb40] sm:$0xff]  ;;  %v1608_v26 = vld [vmem:[#allocation2 + $0xb88] sm:$0xff]  ;;  %v1610_v18 = vld [vmem:[#allocation2 + $0xb98] sm:$0xff] }
 0x1f0   : > { %v9592_v40 = vpack.c.bf16 %v1610_v18, %v1608_v26 }
 0x1f1   : > { %11568 = vst [vmem:[#allocation182_spill] sm:$0xff] %v9577_v10 }
 0x1f2   : > { %6529 = vmatpush1.bf16.msra.mxu0 %v9565_v13  ;;  %v1601_v13 = vld [vmem:[#allocation2 + $0xb50] sm:$0xff]  ;;  %11573 = vst [vmem:[#allocation187_spill] sm:$0xff] %v9592_v40 }
 0x1f3   : > { %6531 = vmatprep.subr.bf16.mxu0 %v9568_v60  ;;  %v9583_v8 = vpack.c.bf16 %v1601_v13, %v1599_v48  ;;  %v1603_v60 = vld [vmem:[#allocation2 + $0xb60] sm:$0xff]  ;;  %v1612_v48 = vld [vmem:[#allocation2 + $0xba8] sm:$0xff]  ;;  %v1614_v13 = vld [vmem:[#allocation2 + $0xbb8] sm:$0xff] }
 0x1f4   : > { %v9598_v36 = vpack.c.bf16 %v1614_v13, %v1612_v48 }
 0x1f5   : > { %11570 = vst [vmem:[#allocation184_spill] sm:$0xff] %v9583_v8 }
 0x1f6   : > { %6533 = vmatpush1.bf16.msra.mxu0 %v9571_v42  ;;  %v1605_v42 = vld [vmem:[#allocation2 + $0xb70] sm:$0xff]  ;;  %11575 = vst [vmem:[#allocation189_spill] sm:$0xff] %v9598_v36 }
 0x1f7   : > { %6535 = vmatprep.subr.bf16.mxu0 %v9574_v7  ;;  %v9589_v39 = vpack.c.bf16 %v1605_v42, %v1603_v60  ;;  %v1607_v7 = vld [vmem:[#allocation2 + $0xb80] sm:$0xff]  ;;  %v1616_v60 = vld [vmem:[#allocation2 + $0xbc8] sm:$0xff]  ;;  %v1618_v42 = vld [vmem:[#allocation2 + $0xbd8] sm:$0xff] }
 0x1f8   : > { %v9604_v18 = vpack.c.bf16 %v1618_v42, %v1616_v60 }
 0x1f9   : > { %11572 = vst [vmem:[#allocation186_spill] sm:$0xff] %v9589_v39 }
 0x1fa   : > { %6537 = vmatpush1.bf16.msra.mxu0 %v9577_v10  ;;  %v1609_v10 = vld [vmem:[#allocation2 + $0xb90] sm:$0xff]  ;;  %11577 = vst [vmem:[#allocation191_spill] sm:$0xff] %v9604_v18 }
 0x1fb   : > { %6539 = vmatprep.subr.bf16.mxu0 %v9580_v2  ;;  %v9595_v12 = vpack.c.bf16 %v1609_v10, %v1607_v7  ;;  %v1611_v2 = vld [vmem:[#allocation2 + $0xba0] sm:$0xff]  ;;  %v1620_v7 = vld [vmem:[#allocation2 + $0xbe8] sm:$0xff]  ;;  %v1622_v10 = vld [vmem:[#allocation2 + $0xbf8] sm:$0xff] }
 0x1fc   : > { %v9610_v13 = vpack.c.bf16 %v1622_v10, %v1620_v7 }
 0x1fd   : > { %11574 = vst [vmem:[#allocation188_spill] sm:$0xff] %v9595_v12 }
 0x1fe   : > { %6541 = vmatpush1.bf16.msra.mxu0 %v9583_v8  ;;  %v1613_v8 = vld [vmem:[#allocation2 + $0xbb0] sm:$0xff]  ;;  %11579 = vst [vmem:[#allocation193_spill] sm:$0xff] %v9610_v13 }
 0x1ff   : > { %6543 = vmatprep.subr.bf16.mxu0 %v9586_v63  ;;  %v9601_v26 = vpack.c.bf16 %v1613_v8, %v1611_v2  ;;  %v1615_v63 = vld [vmem:[#allocation2 + $0xbc0] sm:$0xff]  ;;  %v1716_v2 = vld [vmem:[#allocation2 + $0xc08] sm:$0xff]  ;;  %v1718_v8 = vld [vmem:[#allocation2 + $0xc18] sm:$0xff] }
 0x200   : > { %v9616_v42 = vpack.c.bf16 %v1718_v8, %v1716_v2  ;;  %v1726_v2 = vld [vmem:[#allocation2 + $0xc58] sm:$0xff] }
 0x201   : > { %11576 = vst [vmem:[#allocation190_spill] sm:$0xff] %v9601_v26 }
 0x202   : > { %6545 = vmatpush1.bf16.msra.mxu0 %v9589_v39  ;;  %v1617_v39 = vld [vmem:[#allocation2 + $0xbd0] sm:$0xff]  ;;  %11581 = vst [vmem:[#allocation195_spill] sm:$0xff] %v9616_v42 }
 0x203   : > { %6547 = vmatprep.subr.bf16.mxu0 %v9592_v40  ;;  %v9607_v48 = vpack.c.bf16 %v1617_v39, %v1615_v63  ;;  %v1619_v40 = vld [vmem:[#allocation2 + $0xbe0] sm:$0xff]  ;;  %v1720_v63 = vld [vmem:[#allocation2 + $0xc28] sm:$0xff]  ;;  %v1722_v39 = vld [vmem:[#allocation2 + $0xc38] sm:$0xff] }
 0x204   : > { %v9622_v10 = vpack.c.bf16 %v1722_v39, %v1720_v63  ;;  %v1725_v63 = vld [vmem:[#allocation2 + $0xc50] sm:$0xff]  ;;  %v1728_v39 = vld [vmem:[#allocation2 + $0xc68] sm:$0xff] }
 0x205   : > { %11578 = vst [vmem:[#allocation192_spill] sm:$0xff] %v9607_v48 }
 0x206   : > { %6549 = vmatpush1.bf16.msra.mxu0 %v9595_v12  ;;  %v1621_v12 = vld [vmem:[#allocation2 + $0xbf0] sm:$0xff]  ;;  %11583 = vst [vmem:[#allocation197_spill] sm:$0xff] %v9622_v10 }
 0x207   : > { %6551 = vmatprep.subr.bf16.mxu0 %v9598_v36  ;;  %v9613_v60 = vpack.c.bf16 %v1621_v12, %v1619_v40  ;;  %v1715_v36 = vld [vmem:[#allocation2 + $0xc00] sm:$0xff]  ;;  %v1780_v40 = vcombine.high %v9224_v46, %v9224_v46  ;;  %v1724_v12 = vld [vmem:[#allocation2 + $0xc48] sm:$0xff] }
 0x209   : > { %11580 = vst [vmem:[#allocation194_spill] sm:$0xff] %v9613_v60 }
 0x20a   : > { %6553 = vmatpush1.bf16.msra.mxu0 %v9601_v26  ;;  %v1717_v26 = vld [vmem:[#allocation2 + $0xc10] sm:$0xff] }
 0x20b   : > { %6555 = vmatprep.subr.bf16.mxu0 %v9604_v18  ;;  %v9619_v7 = vpack.c.bf16 %v1717_v26, %v1715_v36  ;;  %v1719_v18 = vld [vmem:[#allocation2 + $0xc20] sm:$0xff]  ;;  %v9631_v36 = vpack.c.bf16 %v1726_v2, %v1724_v12 }
 0x20c   : > { %v1723_v26 = vld [vmem:[#allocation2 + $0xc40] sm:$0xff] }
 0x20d   : > { %11582 = vst [vmem:[#allocation196_spill] sm:$0xff] %v9619_v7  ;;  %11585 = vst [vmem:[#allocation199_spill] sm:$0xff] %v9631_v36 }
 0x20e   : > { %6557 = vmatpush1.bf16.msra.mxu0 %v9607_v48  ;;  %v1721_v48 = vld [vmem:[#allocation2 + $0xc30] sm:$0xff] }
 0x20f   : > { %6559 = vmatprep.subr.bf16.mxu0 %v9610_v13  ;;  %v9628_v8 = vpack.c.bf16 %v1721_v48, %v1719_v18  ;;  %v1732_v18 = vld [vmem:[#allocation2 + $0xc88] sm:$0xff]  ;;  %v1734_v48 = vld [vmem:[#allocation2 + $0xc98] sm:$0xff]  ;;  %v1915_v13 = vld [vmem:[#allocation2 + $0xf60] sm:$0xff] }
 0x210   : > { %v9643_v2 = vpack.c.bf16 %v1734_v48, %v1732_v18 }
 0x211   : > { %11584 = vst [vmem:[#allocation198_spill] sm:$0xff] %v9628_v8 }
 0x212   : > { %6561 = vmatpush1.bf16.msra.mxu0 %v9613_v60  ;;  %v9634_v60 = vpack.c.bf16 %v1725_v63, %v1723_v26  ;;  %11589 = vst [vmem:[#allocation203_spill] sm:$0xff] %v9643_v2  ;;  %v1736_v26 = vld [vmem:[#allocation2 + $0xca8] sm:$0xff]  ;;  %v1738_v63 = vld [vmem:[#allocation2 + $0xcb8] sm:$0xff] }
 0x213   : > { %6563 = vmatprep.subr.bf16.mxu0 %v9616_v42  ;;  %v1730_v42 = vld [vmem:[#allocation2 + $0xc78] sm:$0xff] }
 0x214   : > { %11586 = vst [vmem:[#allocation200_spill] sm:$0xff] %v9634_v60 }
 0x215   : > { %1691 = vmatmul.mubr.f32.vlgmr.msra.gmra.mrb[0].mxu0 %v9218_v23  ;;  %v9637_v23 = vpack.c.bf16 %v1730_v42, %v1728_v39  ;;  %v9649_v39 = vpack.c.bf16 %v1738_v63, %v1736_v26 }
 0x216   : > { %6565 = vmatpush1.bf16.msra.mxu0 %v9619_v7  ;;  %1846 = vmatprep.mubr.f32.mxu0 %v1780_v40  ;;  %v1727_v7 = vld [vmem:[#allocation2 + $0xc60] sm:$0xff]  ;;  %v1729_v40 = vld [vmem:[#allocation2 + $0xc70] sm:$0xff] }
 0x217   : > { %6567 = vmatprep.subr.bf16.mxu0 %v9622_v10  ;;  %11587 = vst [vmem:[#allocation201_spill] sm:$0xff] %v9637_v23  ;;  %v9640_v12 = vpack.c.bf16 %v1729_v40, %v1727_v7  ;;  %v1731_v10 = vld [vmem:[#allocation2 + $0xc80] sm:$0xff]  ;;  %11591 = vst [vmem:[#allocation205_spill] sm:$0xff] %v9649_v39  ;;  %v1740_v7 = vld [vmem:[#allocation2 + $0xcc8] sm:$0xff] }
 0x218   : > { %v1742_v40 = vld [vmem:[#allocation2 + $0xcd8] sm:$0xff] }
 0x219   : > { %11588 = vst [vmem:[#allocation202_spill] sm:$0xff] %v9640_v12  ;;  %v9655_v48 = vpack.c.bf16 %v1742_v40, %v1740_v7 }
 0x21a   : > { %6569 = vmatpush1.bf16.msra.mxu0 %v9628_v8  ;;  %v1733_v8 = vld [vmem:[#allocation2 + $0xc90] sm:$0xff] }
 0x21b   : > { %6571 = vmatprep.subr.bf16.mxu0 %v9631_v36  ;;  %v9646_v42 = vpack.c.bf16 %v1733_v8, %v1731_v10  ;;  %v1735_v36 = vld [vmem:[#allocation2 + $0xca0] sm:$0xff]  ;;  %11593 = vst [vmem:[#allocation207_spill] sm:$0xff] %v9655_v48  ;;  %v1744_v10 = vld [vmem:[#allocation2 + $0xce8] sm:$0xff]  ;;  %v1746_v8 = vld [vmem:[#allocation2 + $0xcf8] sm:$0xff] }
 0x21c   : > { %v9661_v63 = vpack.c.bf16 %v1746_v8, %v1744_v10 }
 0x21d   : > { %11590 = vst [vmem:[#allocation204_spill] sm:$0xff] %v9646_v42 }
 0x21e   : > { %6573 = vmatpush1.bf16.msra.mxu0 %v9634_v60  ;;  %v1737_v60 = vld [vmem:[#allocation2 + $0xcb0] sm:$0xff]  ;;  %11595 = vst [vmem:[#allocation209_spill] sm:$0xff] %v9661_v63 }
 0x21f   : > { %6575 = vmatprep.subr.bf16.mxu0 %v9637_v23  ;;  %v9652_v18 = vpack.c.bf16 %v1737_v60, %v1735_v36  ;;  %v1739_v23 = vld [vmem:[#allocation2 + $0xcc0] sm:$0xff]  ;;  %v1748_v60 = vld [vmem:[#allocation2 + $0xd08] sm:$0xff]  ;;  %v1750_v36 = vld [vmem:[#allocation2 + $0xd18] sm:$0xff] }
 0x220   : > { %v9667_v40 = vpack.c.bf16 %v1750_v36, %v1748_v60 }
 0x221   : > { %11592 = vst [vmem:[#allocation206_spill] sm:$0xff] %v9652_v18 }
 0x222   : > { %6577 = vmatpush1.bf16.msra.mxu0 %v9640_v12  ;;  %v1741_v12 = vld [vmem:[#allocation2 + $0xcd0] sm:$0xff]  ;;  %11597 = vst [vmem:[#allocation211_spill] sm:$0xff] %v9667_v40 }
 0x223   : > { %6579 = vmatprep.subr.bf16.mxu0 %v9643_v2  ;;  %v9658_v26 = vpack.c.bf16 %v1741_v12, %v1739_v23  ;;  %v1743_v2 = vld [vmem:[#allocation2 + $0xce0] sm:$0xff]  ;;  %v1752_v23 = vld [vmem:[#allocation2 + $0xd28] sm:$0xff]  ;;  %v1754_v12 = vld [vmem:[#allocation2 + $0xd38] sm:$0xff] }
 0x224   : > { %v9673_v8 = vpack.c.bf16 %v1754_v12, %v1752_v23 }
 0x225   : > { %11594 = vst [vmem:[#allocation208_spill] sm:$0xff] %v9658_v26 }
 0x226   : > { %6581 = vmatpush1.bf16.msra.mxu0 %v9646_v42  ;;  %v1745_v42 = vld [vmem:[#allocation2 + $0xcf0] sm:$0xff]  ;;  %11599 = vst [vmem:[#allocation213_spill] sm:$0xff] %v9673_v8 }
 0x227   : > { %6583 = vmatprep.subr.bf16.mxu0 %v9649_v39  ;;  %v9664_v7 = vpack.c.bf16 %v1745_v42, %v1743_v2  ;;  %v1747_v39 = vld [vmem:[#allocation2 + $0xd00] sm:$0xff]  ;;  %v1756_v2 = vld [vmem:[#allocation2 + $0xd48] sm:$0xff]  ;;  %v1758_v42 = vld [vmem:[#allocation2 + $0xd58] sm:$0xff] }
 0x228   : > { %v9679_v36 = vpack.c.bf16 %v1758_v42, %v1756_v2 }
 0x229   : > { %11596 = vst [vmem:[#allocation210_spill] sm:$0xff] %v9664_v7 }
 0x22a   : > { %6585 = vmatpush1.bf16.msra.mxu0 %v9652_v18  ;;  %v1749_v18 = vld [vmem:[#allocation2 + $0xd10] sm:$0xff]  ;;  %11601 = vst [vmem:[#allocation215_spill] sm:$0xff] %v9679_v36 }
 0x22b   : > { %6587 = vmatprep.subr.bf16.mxu0 %v9655_v48  ;;  %v9670_v10 = vpack.c.bf16 %v1749_v18, %v1747_v39  ;;  %v1751_v48 = vld [vmem:[#allocation2 + $0xd20] sm:$0xff]  ;;  %v1760_v39 = vld [vmem:[#allocation2 + $0xd68] sm:$0xff]  ;;  %v1762_v18 = vld [vmem:[#allocation2 + $0xd78] sm:$0xff] }
 0x22c   : > { %v9685_v12 = vpack.c.bf16 %v1762_v18, %v1760_v39 }
 0x22d   : > { %11598 = vst [vmem:[#allocation212_spill] sm:$0xff] %v9670_v10 }
 0x22e   : > { %6589 = vmatpush1.bf16.msra.mxu0 %v9658_v26  ;;  %v1753_v26 = vld [vmem:[#allocation2 + $0xd30] sm:$0xff]  ;;  %11603 = vst [vmem:[#allocation217_spill] sm:$0xff] %v9685_v12 }
 0x22f   : > { %6591 = vmatprep.subr.bf16.mxu0 %v9661_v63  ;;  %v9676_v60 = vpack.c.bf16 %v1753_v26, %v1751_v48  ;;  %v1755_v63 = vld [vmem:[#allocation2 + $0xd40] sm:$0xff]  ;;  %v1764_v48 = vld [vmem:[#allocation2 + $0xd88] sm:$0xff]  ;;  %v1766_v26 = vld [vmem:[#allocation2 + $0xd98] sm:$0xff] }
 0x230   : > { %v9691_v42 = vpack.c.bf16 %v1766_v26, %v1764_v48 }
 0x231   : > { %11600 = vst [vmem:[#allocation214_spill] sm:$0xff] %v9676_v60 }
 0x232   : > { %6593 = vmatpush1.bf16.msra.mxu0 %v9664_v7  ;;  %v1757_v7 = vld [vmem:[#allocation2 + $0xd50] sm:$0xff]  ;;  %11605 = vst [vmem:[#allocation219_spill] sm:$0xff] %v9691_v42 }
 0x233   : > { %6595 = vmatprep.subr.bf16.mxu0 %v9667_v40  ;;  %v9682_v23 = vpack.c.bf16 %v1757_v7, %v1755_v63  ;;  %v1759_v40 = vld [vmem:[#allocation2 + $0xd60] sm:$0xff]  ;;  %v1768_v63 = vld [vmem:[#allocation2 + $0xda8] sm:$0xff]  ;;  %v1770_v7 = vld [vmem:[#allocation2 + $0xdb8] sm:$0xff] }
 0x234   : > { %v9697_v18 = vpack.c.bf16 %v1770_v7, %v1768_v63 }
 0x235   : > { %11602 = vst [vmem:[#allocation216_spill] sm:$0xff] %v9682_v23 }
 0x236   : > { %6597 = vmatpush1.bf16.msra.mxu0 %v9670_v10  ;;  %v1761_v10 = vld [vmem:[#allocation2 + $0xd70] sm:$0xff]  ;;  %11607 = vst [vmem:[#allocation221_spill] sm:$0xff] %v9697_v18 }
 0x237   : > { %6599 = vmatprep.subr.bf16.mxu0 %v9673_v8  ;;  %v9688_v2 = vpack.c.bf16 %v1761_v10, %v1759_v40  ;;  %v1763_v8 = vld [vmem:[#allocation2 + $0xd80] sm:$0xff]  ;;  %v1772_v40 = vld [vmem:[#allocation2 + $0xdc8] sm:$0xff]  ;;  %v1774_v10 = vld [vmem:[#allocation2 + $0xdd8] sm:$0xff] }
 0x238   : > { %v9703_v26 = vpack.c.bf16 %v1774_v10, %v1772_v40 }
 0x239   : > { %11604 = vst [vmem:[#allocation218_spill] sm:$0xff] %v9688_v2 }
 0x23a   : > { %6601 = vmatpush1.bf16.msra.mxu0 %v9676_v60  ;;  %v1765_v60 = vld [vmem:[#allocation2 + $0xd90] sm:$0xff]  ;;  %11609 = vst [vmem:[#allocation223_spill] sm:$0xff] %v9703_v26 }
 0x23b   : > { %6603 = vmatprep.subr.bf16.mxu0 %v9679_v36  ;;  %v9694_v39 = vpack.c.bf16 %v1765_v60, %v1763_v8  ;;  %v1767_v36 = vld [vmem:[#allocation2 + $0xda0] sm:$0xff]  ;;  %v1776_v8 = vld [vmem:[#allocation2 + $0xde8] sm:$0xff]  ;;  %v1778_v60 = vld [vmem:[#allocation2 + $0xdf8] sm:$0xff] }
 0x23c   : > { %v9709_v7 = vpack.c.bf16 %v1778_v60, %v1776_v8 }
 0x23d   : > { %11606 = vst [vmem:[#allocation220_spill] sm:$0xff] %v9694_v39 }
 0x23e   : > { %6605 = vmatpush1.bf16.msra.mxu0 %v9682_v23  ;;  %v1769_v23 = vld [vmem:[#allocation2 + $0xdb0] sm:$0xff]  ;;  %11611 = vst [vmem:[#allocation225_spill] sm:$0xff] %v9709_v7 }
 0x23f   : > { %6607 = vmatprep.subr.bf16.mxu0 %v9685_v12  ;;  %v9700_v48 = vpack.c.bf16 %v1769_v23, %v1767_v36  ;;  %v1771_v12 = vld [vmem:[#allocation2 + $0xdc0] sm:$0xff]  ;;  %v1872_v36 = vld [vmem:[#allocation2 + $0xe08] sm:$0xff]  ;;  %v1874_v23 = vld [vmem:[#allocation2 + $0xe18] sm:$0xff] }
 0x240   : > { %v9715_v10 = vpack.c.bf16 %v1874_v23, %v1872_v36  ;;  %v1882_v36 = vld [vmem:[#allocation2 + $0xe58] sm:$0xff] }
 0x241   : > { %11608 = vst [vmem:[#allocation222_spill] sm:$0xff] %v9700_v48 }
 0x242   : > { %6609 = vmatpush1.bf16.msra.mxu0 %v9688_v2  ;;  %v1773_v2 = vld [vmem:[#allocation2 + $0xdd0] sm:$0xff]  ;;  %11613 = vst [vmem:[#allocation227_spill] sm:$0xff] %v9715_v10 }
 0x243   : > { %6611 = vmatprep.subr.bf16.mxu0 %v9691_v42  ;;  %v9706_v63 = vpack.c.bf16 %v1773_v2, %v1771_v12  ;;  %v1775_v42 = vld [vmem:[#allocation2 + $0xde0] sm:$0xff]  ;;  %v1876_v12 = vld [vmem:[#allocation2 + $0xe28] sm:$0xff]  ;;  %v1878_v2 = vld [vmem:[#allocation2 + $0xe38] sm:$0xff] }
 0x244   : > { %v9721_v60 = vpack.c.bf16 %v1878_v2, %v1876_v12  ;;  %v1881_v12 = vld [vmem:[#allocation2 + $0xe50] sm:$0xff]  ;;  %v1884_v2 = vld [vmem:[#allocation2 + $0xe68] sm:$0xff] }
 0x245   : > { %11610 = vst [vmem:[#allocation224_spill] sm:$0xff] %v9706_v63 }
 0x246   : > { %6613 = vmatpush1.bf16.msra.mxu0 %v9694_v39  ;;  %v1777_v39 = vld [vmem:[#allocation2 + $0xdf0] sm:$0xff]  ;;  %11615 = vst [vmem:[#allocation229_spill] sm:$0xff] %v9721_v60 }
 0x247   : > { %6615 = vmatprep.subr.bf16.mxu0 %v9697_v18  ;;  %v9712_v40 = vpack.c.bf16 %v1777_v39, %v1775_v42  ;;  %v1871_v18 = vld [vmem:[#allocation2 + $0xe00] sm:$0xff]  ;;  %v1936_v42 = vcombine.high %v9236_v31, %v9236_v31  ;;  %v1880_v39 = vld [vmem:[#allocation2 + $0xe48] sm:$0xff] }
 0x249   : > { %11612 = vst [vmem:[#allocation226_spill] sm:$0xff] %v9712_v40 }
 0x24a   : > { %6617 = vmatpush1.bf16.msra.mxu0 %v9700_v48  ;;  %v1873_v48 = vld [vmem:[#allocation2 + $0xe10] sm:$0xff] }
 0x24b   : > { %6619 = vmatprep.subr.bf16.mxu0 %v9703_v26  ;;  %v9718_v8 = vpack.c.bf16 %v1873_v48, %v1871_v18  ;;  %v1875_v26 = vld [vmem:[#allocation2 + $0xe20] sm:$0xff]  ;;  %v9730_v18 = vpack.c.bf16 %v1882_v36, %v1880_v39 }
 0x24c   : > { %v1879_v48 = vld [vmem:[#allocation2 + $0xe40] sm:$0xff] }
 0x24d   : > { %11614 = vst [vmem:[#allocation228_spill] sm:$0xff] %v9718_v8  ;;  %11617 = vst [vmem:[#allocation231_spill] sm:$0xff] %v9730_v18 }
 0x24e   : > { %6621 = vmatpush1.bf16.msra.mxu0 %v9706_v63  ;;  %v1877_v63 = vld [vmem:[#allocation2 + $0xe30] sm:$0xff] }
 0x24f   : > { %6623 = vmatprep.subr.bf16.mxu0 %v9709_v7  ;;  %v9727_v23 = vpack.c.bf16 %v1877_v63, %v1875_v26  ;;  %v1888_v26 = vld [vmem:[#allocation2 + $0xe88] sm:$0xff]  ;;  %v1890_v63 = vld [vmem:[#allocation2 + $0xe98] sm:$0xff] }
 0x250   : > { %v9742_v36 = vpack.c.bf16 %v1890_v63, %v1888_v26  ;;  %v1916_v7 = vld [vmem:[#allocation2 + $0xf68] sm:$0xff] }
 0x251   : > { %11616 = vst [vmem:[#allocation230_spill] sm:$0xff] %v9727_v23 }
 0x252   : > { %6625 = vmatpush1.bf16.msra.mxu0 %v9712_v40  ;;  %v9733_v40 = vpack.c.bf16 %v1881_v12, %v1879_v48  ;;  %11621 = vst [vmem:[#allocation235_spill] sm:$0xff] %v9742_v36  ;;  %v1892_v48 = vld [vmem:[#allocation2 + $0xea8] sm:$0xff]  ;;  %v1894_v12 = vld [vmem:[#allocation2 + $0xeb8] sm:$0xff] }
 0x253   : > { %6627 = vmatprep.subr.bf16.mxu0 %v9715_v10  ;;  %v1886_v10 = vld [vmem:[#allocation2 + $0xe78] sm:$0xff] }
 0x254   : > { %11618 = vst [vmem:[#allocation232_spill] sm:$0xff] %v9733_v40 }
 0x255   : > { %1847 = vmatmul.mubr.f32.vlgmr.msra.gmra.mrb[0].mxu0 %v9224_v46  ;;  %v9736_v46 = vpack.c.bf16 %v1886_v10, %v1884_v2  ;;  %v9748_v2 = vpack.c.bf16 %v1894_v12, %v1892_v48 }
 0x256   : > { %6629 = vmatpush1.bf16.msra.mxu0 %v9718_v8  ;;  %2002 = vmatprep.mubr.f32.mxu0 %v1936_v42  ;;  %v1883_v8 = vld [vmem:[#allocation2 + $0xe60] sm:$0xff]  ;;  %v1885_v42 = vld [vmem:[#allocation2 + $0xe70] sm:$0xff] }
 0x257   : > { %6631 = vmatprep.subr.bf16.mxu0 %v9721_v60  ;;  %11619 = vst [vmem:[#allocation233_spill] sm:$0xff] %v9736_v46  ;;  %v9739_v39 = vpack.c.bf16 %v1885_v42, %v1883_v8  ;;  %v1887_v60 = vld [vmem:[#allocation2 + $0xe80] sm:$0xff]  ;;  %11623 = vst [vmem:[#allocation237_spill] sm:$0xff] %v9748_v2  ;;  %v1896_v8 = vld [vmem:[#allocation2 + $0xec8] sm:$0xff] }
 0x258   : > { %v1898_v42 = vld [vmem:[#allocation2 + $0xed8] sm:$0xff] }
 0x259   : > { %11620 = vst [vmem:[#allocation234_spill] sm:$0xff] %v9739_v39  ;;  %v9754_v63 = vpack.c.bf16 %v1898_v42, %v1896_v8 }
 0x25a   : > { %6633 = vmatpush1.bf16.msra.mxu0 %v9727_v23  ;;  %v1889_v23 = vld [vmem:[#allocation2 + $0xe90] sm:$0xff] }
 0x25b   : > { %6635 = vmatprep.subr.bf16.mxu0 %v9730_v18  ;;  %v9745_v10 = vpack.c.bf16 %v1889_v23, %v1887_v60  ;;  %v1891_v18 = vld [vmem:[#allocation2 + $0xea0] sm:$0xff]  ;;  %11625 = vst [vmem:[#allocation239_spill] sm:$0xff] %v9754_v63  ;;  %v1900_v60 = vld [vmem:[#allocation2 + $0xee8] sm:$0xff]  ;;  %v1902_v23 = vld [vmem:[#allocation2 + $0xef8] sm:$0xff] }
 0x25c   : > { %v9760_v12 = vpack.c.bf16 %v1902_v23, %v1900_v60 }
 0x25d   : > { %11622 = vst [vmem:[#allocation236_spill] sm:$0xff] %v9745_v10 }
 0x25e   : > { %6637 = vmatpush1.bf16.msra.mxu0 %v9733_v40  ;;  %v1893_v40 = vld [vmem:[#allocation2 + $0xeb0] sm:$0xff]  ;;  %11627 = vst [vmem:[#allocation241_spill] sm:$0xff] %v9760_v12 }
 0x25f   : > { %6639 = vmatprep.subr.bf16.mxu0 %v9736_v46  ;;  %v9751_v26 = vpack.c.bf16 %v1893_v40, %v1891_v18  ;;  %v1895_v46 = vld [vmem:[#allocation2 + $0xec0] sm:$0xff]  ;;  %v1904_v40 = vld [vmem:[#allocation2 + $0xf08] sm:$0xff]  ;;  %v1906_v18 = vld [vmem:[#allocation2 + $0xf18] sm:$0xff] }
 0x260   : > { %v9766_v42 = vpack.c.bf16 %v1906_v18, %v1904_v40  ;;  %v1912_v40 = vld [vmem:[#allocation2 + $0xf48] sm:$0xff]  ;;  %v1914_v18 = vld [vmem:[#allocation2 + $0xf58] sm:$0xff] }
 0x261   : > { %11624 = vst [vmem:[#allocation238_spill] sm:$0xff] %v9751_v26 }
 0x262   : > { %6641 = vmatpush1.bf16.msra.mxu0 %v9739_v39  ;;  %v1897_v39 = vld [vmem:[#allocation2 + $0xed0] sm:$0xff]  ;;  %11629 = vst [vmem:[#allocation243_spill] sm:$0xff] %v9766_v42 }
 0x263   : > { %6643 = vmatprep.subr.bf16.mxu0 %v9742_v36  ;;  %v9757_v48 = vpack.c.bf16 %v1897_v39, %v1895_v46  ;;  %v1899_v36 = vld [vmem:[#allocation2 + $0xee0] sm:$0xff]  ;;  %v1908_v46 = vld [vmem:[#allocation2 + $0xf28] sm:$0xff]  ;;  %v1910_v39 = vld [vmem:[#allocation2 + $0xf38] sm:$0xff] }
 0x265   : > { %11626 = vst [vmem:[#allocation240_spill] sm:$0xff] %v9757_v48 }
 0x266   : > { %6645 = vmatpush1.bf16.msra.mxu0 %v9745_v10  ;;  %v1901_v10 = vld [vmem:[#allocation2 + $0xef0] sm:$0xff] }
 0x267   : > { %6647 = vmatprep.subr.bf16.mxu0 %v9748_v2  ;;  %v9763_v8 = vpack.c.bf16 %v1901_v10, %v1899_v36  ;;  %v1903_v2 = vld [vmem:[#allocation2 + $0xf00] sm:$0xff]  ;;  %v1909_v10 = vld [vmem:[#allocation2 + $0xf30] sm:$0xff] }
 0x268   : > { %v1907_v36 = vld [vmem:[#allocation2 + $0xf20] sm:$0xff] }
 0x269   : > { %11628 = vst [vmem:[#allocation242_spill] sm:$0xff] %v9763_v8 }
 0x26a   : > { %6649 = vmatpush1.bf16.msra.mxu0 %v9751_v26  ;;  %v1905_v26 = vld [vmem:[#allocation2 + $0xf10] sm:$0xff] }
 0x26b   : > { %6651 = vmatprep.subr.bf16.mxu0 %v9754_v63  ;;  %v9769_v60 = vpack.c.bf16 %v1905_v26, %v1903_v2  ;;  %v9774_v63 = vpack.c.bf16 %v1910_v39, %v1908_v46  ;;  %v9782_v2 = vpack.c.bf16 %v1914_v18, %v1912_v40  ;;  %v1911_v26 = vld [vmem:[#allocation2 + $0xf40] sm:$0xff] }
 0x26d   : > { %11630 = vst [vmem:[#allocation244_spill] sm:$0xff] %v9769_v60  ;;  %11631 = vst [vmem:[#allocation245_spill] sm:$0xff] %v9774_v63 }
 0x26e   : > { %6653 = vmatpush1.bf16.msra.mxu0 %v9757_v48  ;;  %11633 = vst [vmem:[#allocation247_spill] sm:$0xff] %v9782_v2 }
 0x26f   : > { %6655 = vmatprep.subr.bf16.mxu0 %v9760_v12  ;;  %v9779_v12 = vpack.c.bf16 %v1909_v10, %v1907_v36  ;;  %v1920_v36 = vld [vmem:[#allocation2 + $0xf88] sm:$0xff]  ;;  %v1922_v10 = vld [vmem:[#allocation2 + $0xf98] sm:$0xff] }
 0x270   : > { %v9794_v18 = vpack.c.bf16 %v1922_v10, %v1920_v36 }
 0x271   : > { %v9771_v23 = vpop.f32.mrb[0].mxu1  ;;  %11632 = vst [vmem:[#allocation246_spill] sm:$0xff] %v9779_v12 }
 0x272   : > { %6657 = vmatpush1.bf16.msra.mxu0 %v9763_v8  ;;  %v9776_v48 = vpop.f32.mrb[1].mxu1  ;;  %v1913_v8 = vld [vmem:[#allocation2 + $0xf50] sm:$0xff]  ;;  %11637 = vst [vmem:[#allocation251_spill] sm:$0xff] %v9794_v18 }
 0x273   : > { %6659 = vmatprep.subr.bf16.mxu0 %v9766_v42  ;;  %v1918_v42 = vld [vmem:[#allocation2 + $0xf78] sm:$0xff]  ;;  %v9785_v46 = vpack.c.bf16 %v1913_v8, %v1911_v26  ;;  %v1924_v8 = vld [vmem:[#allocation2 + $0xfa8] sm:$0xff] }
 0x274   : > { %v9788_v39 = vpack.c.bf16 %v1918_v42, %v1916_v7  ;;  %v1926_v26 = vld [vmem:[#allocation2 + $0xfb8] sm:$0xff] }
 0x275   : > { %11634 = vst [vmem:[#allocation248_spill] sm:$0xff] %v9785_v46  ;;  %v9800_v42 = vpack.c.bf16 %v1926_v26, %v1924_v8 }
 0x276   : > { %6661 = vmatpush1.bf16.msra.mxu0 %v9769_v60  ;;  %11635 = vst [vmem:[#allocation249_spill] sm:$0xff] %v9788_v39  ;;  %v1917_v60 = vld [vmem:[#allocation2 + $0xf70] sm:$0xff] }
 0x277   : > { %6663 = vmatprep.subr.bf16.mxu0 %v9774_v63  ;;  %v9791_v40 = vpack.c.bf16 %v1917_v60, %v1915_v13  ;;  %v1919_v63 = vld [vmem:[#allocation2 + $0xf80] sm:$0xff]  ;;  %11639 = vst [vmem:[#allocation253_spill] sm:$0xff] %v9800_v42  ;;  %v1928_v13 = vld [vmem:[#allocation2 + $0xfc8] sm:$0xff]  ;;  %v1930_v60 = vld [vmem:[#allocation2 + $0xfd8] sm:$0xff] }
 0x278   : > { %v9806_v10 = vpack.c.bf16 %v1930_v60, %v1928_v13 }
 0x279   : > { %11636 = vst [vmem:[#allocation250_spill] sm:$0xff] %v9791_v40 }
 0x27a   : > { %6665 = vmatpush1.bf16.msra.mxu0 %v9779_v12  ;;  %v1921_v12 = vld [vmem:[#allocation2 + $0xf90] sm:$0xff]  ;;  %11641 = vst [vmem:[#allocation255_spill] sm:$0xff] %v9806_v10 }
 0x27b   : > { %6667 = vmatprep.subr.bf16.mxu0 %v9782_v2  ;;  %v9797_v7 = vpack.c.bf16 %v1921_v12, %v1919_v63  ;;  %v1923_v2 = vld [vmem:[#allocation2 + $0xfa0] sm:$0xff]  ;;  %v1932_v63 = vld [vmem:[#allocation2 + $0xfe8] sm:$0xff]  ;;  %v1934_v12 = vld [vmem:[#allocation2 + $0xff8] sm:$0xff] }
 0x27c   : > { %v9812_v26 = vpack.c.bf16 %v1934_v12, %v1932_v63 }
 0x27d   : > { %11638 = vst [vmem:[#allocation252_spill] sm:$0xff] %v9797_v7 }
 0x27e   : > { %6669 = vmatpush1.bf16.msra.mxu0 %v9785_v46  ;;  %v1925_v46 = vld [vmem:[#allocation2 + $0xfb0] sm:$0xff]  ;;  %11643 = vst [vmem:[#allocation257_spill] sm:$0xff] %v9812_v26 }
 0x27f   : > { %6671 = vmatprep.subr.bf16.mxu0 %v9788_v39  ;;  %v9803_v36 = vpack.c.bf16 %v1925_v46, %v1923_v2  ;;  %v1927_v39 = vld [vmem:[#allocation2 + $0xfc0] sm:$0xff]  ;;  %v2028_v2 = vld [vmem:[#allocation2 + $0x1008] sm:$0xff]  ;;  %v2030_v46 = vld [vmem:[#allocation2 + $0x1018] sm:$0xff] }
 0x280   : > { %v9818_v60 = vpack.c.bf16 %v2030_v46, %v2028_v2  ;;  %v2038_v2 = vld [vmem:[#allocation2 + $0x1058] sm:$0xff] }
 0x281   : > { %11640 = vst [vmem:[#allocation254_spill] sm:$0xff] %v9803_v36 }
 0x282   : > { %6673 = vmatpush1.bf16.msra.mxu0 %v9791_v40  ;;  %v1929_v40 = vld [vmem:[#allocation2 + $0xfd0] sm:$0xff]  ;;  %11645 = vst [vmem:[#allocation259_spill] sm:$0xff] %v9818_v60 }
 0x283   : > { %6675 = vmatprep.subr.bf16.mxu0 %v9794_v18  ;;  %v9809_v8 = vpack.c.bf16 %v1929_v40, %v1927_v39  ;;  %v1931_v18 = vld [vmem:[#allocation2 + $0xfe0] sm:$0xff]  ;;  %v2032_v39 = vld [vmem:[#allocation2 + $0x1028] sm:$0xff]  ;;  %v2034_v40 = vld [vmem:[#allocation2 + $0x1038] sm:$0xff] }
 0x284   : > { %v9824_v12 = vpack.c.bf16 %v2034_v40, %v2032_v39  ;;  %v2037_v39 = vld [vmem:[#allocation2 + $0x1050] sm:$0xff]  ;;  %v2040_v40 = vld [vmem:[#allocation2 + $0x1068] sm:$0xff] }
 0x285   : > { %11642 = vst [vmem:[#allocation256_spill] sm:$0xff] %v9809_v8 }
 0x286   : > { %6677 = vmatpush1.bf16.msra.mxu0 %v9797_v7  ;;  %v1933_v7 = vld [vmem:[#allocation2 + $0xff0] sm:$0xff]  ;;  %11647 = vst [vmem:[#allocation261_spill] sm:$0xff] %v9824_v12 }
 0x287   : > { %6679 = vmatprep.subr.bf16.mxu0 %v9800_v42  ;;  %v9815_v13 = vpack.c.bf16 %v1933_v7, %v1931_v18  ;;  %v2027_v42 = vld [vmem:[#allocation2 + $0x1000] sm:$0xff]  ;;  %v2092_v18 = vcombine.high %v9254_v34, %v9254_v34  ;;  %v2036_v7 = vld [vmem:[#allocation2 + $0x1048] sm:$0xff] }
 0x289   : > { %11644 = vst [vmem:[#allocation258_spill] sm:$0xff] %v9815_v13 }
 0x28a   : > { %6681 = vmatpush1.bf16.msra.mxu0 %v9803_v36  ;;  %v2029_v36 = vld [vmem:[#allocation2 + $0x1010] sm:$0xff] }
 0x28b   : > { %6683 = vmatprep.subr.bf16.mxu0 %v9806_v10  ;;  %v9821_v63 = vpack.c.bf16 %v2029_v36, %v2027_v42  ;;  %v2031_v10 = vld [vmem:[#allocation2 + $0x1020] sm:$0xff]  ;;  %v9833_v42 = vpack.c.bf16 %v2038_v2, %v2036_v7 }
 0x28c   : > { %v2035_v36 = vld [vmem:[#allocation2 + $0x1040] sm:$0xff] }
 0x28d   : > { %11646 = vst [vmem:[#allocation260_spill] sm:$0xff] %v9821_v63  ;;  %11649 = vst [vmem:[#allocation263_spill] sm:$0xff] %v9833_v42 }
 0x28e   : > { %6685 = vmatpush1.bf16.msra.mxu0 %v9809_v8  ;;  %v2033_v8 = vld [vmem:[#allocation2 + $0x1030] sm:$0xff] }
 0x28f   : > { %6687 = vmatprep.subr.bf16.mxu0 %v9812_v26  ;;  %v9830_v46 = vpack.c.bf16 %v2033_v8, %v2031_v10  ;;  %v2044_v10 = vld [vmem:[#allocation2 + $0x1088] sm:$0xff]  ;;  %v2046_v8 = vld [vmem:[#allocation2 + $0x1098] sm:$0xff] }
 0x290   : > { %v9845_v2 = vpack.c.bf16 %v2046_v8, %v2044_v10 }
 0x291   : > { %11648 = vst [vmem:[#allocation262_spill] sm:$0xff] %v9830_v46 }
 0x292   : > { %6689 = vmatpush1.bf16.msra.mxu0 %v9815_v13  ;;  %v9836_v13 = vpack.c.bf16 %v2037_v39, %v2035_v36  ;;  %11653 = vst [vmem:[#allocation267_spill] sm:$0xff] %v9845_v2  ;;  %v2048_v36 = vld [vmem:[#allocation2 + $0x10a8] sm:$0xff]  ;;  %v2050_v39 = vld [vmem:[#allocation2 + $0x10b8] sm:$0xff] }
 0x293   : > { %6691 = vmatprep.subr.bf16.mxu0 %v9818_v60  ;;  %v2042_v60 = vld [vmem:[#allocation2 + $0x1078] sm:$0xff] }
 0x294   : > { %11650 = vst [vmem:[#allocation264_spill] sm:$0xff] %v9836_v13 }
 0x295   : > { %2003 = vmatmul.mubr.f32.vlgmr.msra.gmra.mrb[0].mxu0 %v9236_v31  ;;  %v9839_v31 = vpack.c.bf16 %v2042_v60, %v2040_v40  ;;  %v9851_v40 = vpack.c.bf16 %v2050_v39, %v2048_v36 }
 0x296   : > { %6693 = vmatpush1.bf16.msra.mxu0 %v9821_v63  ;;  %2158 = vmatprep.mubr.f32.mxu0 %v2092_v18  ;;  %v2039_v63 = vld [vmem:[#allocation2 + $0x1060] sm:$0xff]  ;;  %v2041_v18 = vld [vmem:[#allocation2 + $0x1070] sm:$0xff] }
 0x297   : > { %6695 = vmatprep.subr.bf16.mxu0 %v9824_v12  ;;  %11651 = vst [vmem:[#allocation265_spill] sm:$0xff] %v9839_v31  ;;  %v9842_v7 = vpack.c.bf16 %v2041_v18, %v2039_v63  ;;  %v2043_v12 = vld [vmem:[#allocation2 + $0x1080] sm:$0xff]  ;;  %11655 = vst [vmem:[#allocation269_spill] sm:$0xff] %v9851_v40  ;;  %v2052_v63 = vld [vmem:[#allocation2 + $0x10c8] sm:$0xff] }
 0x298   : > { %v2054_v18 = vld [vmem:[#allocation2 + $0x10d8] sm:$0xff] }
 0x299   : > { %11652 = vst [vmem:[#allocation266_spill] sm:$0xff] %v9842_v7  ;;  %v9857_v8 = vpack.c.bf16 %v2054_v18, %v2052_v63 }
 0x29a   : > { %6697 = vmatpush1.bf16.msra.mxu0 %v9830_v46  ;;  %v2045_v46 = vld [vmem:[#allocation2 + $0x1090] sm:$0xff] }
 0x29b   : > { %6699 = vmatprep.subr.bf16.mxu0 %v9833_v42  ;;  %v9848_v60 = vpack.c.bf16 %v2045_v46, %v2043_v12  ;;  %v2047_v42 = vld [vmem:[#allocation2 + $0x10a0] sm:$0xff]  ;;  %11657 = vst [vmem:[#allocation271_spill] sm:$0xff] %v9857_v8  ;;  %v2056_v12 = vld [vmem:[#allocation2 + $0x10e8] sm:$0xff]  ;;  %v2058_v46 = vld [vmem:[#allocation2 + $0x10f8] sm:$0xff] }
 0x29c   : > { %v9863_v39 = vpack.c.bf16 %v2058_v46, %v2056_v12 }
 0x29d   : > { %11654 = vst [vmem:[#allocation268_spill] sm:$0xff] %v9848_v60 }
 0x29e   : > { %6701 = vmatpush1.bf16.msra.mxu0 %v9836_v13  ;;  %v2049_v13 = vld [vmem:[#allocation2 + $0x10b0] sm:$0xff]  ;;  %11659 = vst [vmem:[#allocation273_spill] sm:$0xff] %v9863_v39 }
 0x29f   : > { %6703 = vmatprep.subr.bf16.mxu0 %v9839_v31  ;;  %v9854_v10 = vpack.c.bf16 %v2049_v13, %v2047_v42  ;;  %v2051_v31 = vld [vmem:[#allocation2 + $0x10c0] sm:$0xff]  ;;  %v2060_v13 = vld [vmem:[#allocation2 + $0x1108] sm:$0xff]  ;;  %v2062_v42 = vld [vmem:[#allocation2 + $0x1118] sm:$0xff] }
 0x2a0   : > { %v9869_v18 = vpack.c.bf16 %v2062_v42, %v2060_v13 }
 0x2a1   : > { %11656 = vst [vmem:[#allocation270_spill] sm:$0xff] %v9854_v10 }
 0x2a2   : > { %6705 = vmatpush1.bf16.msra.mxu0 %v9842_v7  ;;  %v2053_v7 = vld [vmem:[#allocation2 + $0x10d0] sm:$0xff]  ;;  %11661 = vst [vmem:[#allocation275_spill] sm:$0xff] %v9869_v18 }
 0x2a3   : > { %6707 = vmatprep.subr.bf16.mxu0 %v9845_v2  ;;  %v9860_v36 = vpack.c.bf16 %v2053_v7, %v2051_v31  ;;  %v2055_v2 = vld [vmem:[#allocation2 + $0x10e0] sm:$0xff]  ;;  %v2064_v31 = vld [vmem:[#allocation2 + $0x1128] sm:$0xff]  ;;  %v2066_v7 = vld [vmem:[#allocation2 + $0x1138] sm:$0xff] }
 0x2a4   : > { %v9875_v46 = vpack.c.bf16 %v2066_v7, %v2064_v31 }
 0x2a5   : > { %11658 = vst [vmem:[#allocation272_spill] sm:$0xff] %v9860_v36 }
 0x2a6   : > { %6709 = vmatpush1.bf16.msra.mxu0 %v9848_v60  ;;  %v2057_v60 = vld [vmem:[#allocation2 + $0x10f0] sm:$0xff]  ;;  %11663 = vst [vmem:[#allocation277_spill] sm:$0xff] %v9875_v46 }
 0x2a7   : > { %6711 = vmatprep.subr.bf16.mxu0 %v9851_v40  ;;  %v9866_v63 = vpack.c.bf16 %v2057_v60, %v2055_v2  ;;  %v2059_v40 = vld [vmem:[#allocation2 + $0x1100] sm:$0xff]  ;;  %v2068_v2 = vld [vmem:[#allocation2 + $0x1148] sm:$0xff]  ;;  %v2070_v60 = vld [vmem:[#allocation2 + $0x1158] sm:$0xff] }
 0x2a8   : > { %v9881_v42 = vpack.c.bf16 %v2070_v60, %v2068_v2 }
 0x2a9   : > { %11660 = vst [vmem:[#allocation274_spill] sm:$0xff] %v9866_v63 }
 0x2aa   : > { %6713 = vmatpush1.bf16.msra.mxu0 %v9854_v10  ;;  %v2061_v10 = vld [vmem:[#allocation2 + $0x1110] sm:$0xff]  ;;  %11665 = vst [vmem:[#allocation279_spill] sm:$0xff] %v9881_v42 }
 0x2ab   : > { %6715 = vmatprep.subr.bf16.mxu0 %v9857_v8  ;;  %v9872_v12 = vpack.c.bf16 %v2061_v10, %v2059_v40  ;;  %v2063_v8 = vld [vmem:[#allocation2 + $0x1120] sm:$0xff]  ;;  %v2072_v40 = vld [vmem:[#allocation2 + $0x1168] sm:$0xff]  ;;  %v2074_v10 = vld [vmem:[#allocation2 + $0x1178] sm:$0xff] }
 0x2ac   : > { %v9887_v7 = vpack.c.bf16 %v2074_v10, %v2072_v40 }
 0x2ad   : > { %11662 = vst [vmem:[#allocation276_spill] sm:$0xff] %v9872_v12 }
 0x2ae   : > { %6717 = vmatpush1.bf16.msra.mxu0 %v9860_v36  ;;  %v2065_v36 = vld [vmem:[#allocation2 + $0x1130] sm:$0xff]  ;;  %11667 = vst [vmem:[#allocation281_spill] sm:$0xff] %v9887_v7 }
 0x2af   : > { %6719 = vmatprep.subr.bf16.mxu0 %v9863_v39  ;;  %v9878_v13 = vpack.c.bf16 %v2065_v36, %v2063_v8  ;;  %v2067_v39 = vld [vmem:[#allocation2 + $0x1140] sm:$0xff]  ;;  %v2076_v8 = vld [vmem:[#allocation2 + $0x1188] sm:$0xff]  ;;  %v2078_v36 = vld [vmem:[#allocation2 + $0x1198] sm:$0xff] }
 0x2b0   : > { %v9893_v60 = vpack.c.bf16 %v2078_v36, %v2076_v8 }
 0x2b1   : > { %11664 = vst [vmem:[#allocation278_spill] sm:$0xff] %v9878_v13 }
 0x2b2   : > { %6721 = vmatpush1.bf16.msra.mxu0 %v9866_v63  ;;  %v2069_v63 = vld [vmem:[#allocation2 + $0x1150] sm:$0xff]  ;;  %11669 = vst [vmem:[#allocation283_spill] sm:$0xff] %v9893_v60 }
 0x2b3   : > { %6723 = vmatprep.subr.bf16.mxu0 %v9869_v18  ;;  %v9884_v31 = vpack.c.bf16 %v2069_v63, %v2067_v39  ;;  %v2071_v18 = vld [vmem:[#allocation2 + $0x1160] sm:$0xff]  ;;  %v2080_v39 = vld [vmem:[#allocation2 + $0x11a8] sm:$0xff]  ;;  %v2082_v63 = vld [vmem:[#allocation2 + $0x11b8] sm:$0xff] }
 0x2b4   : > { %v9899_v10 = vpack.c.bf16 %v2082_v63, %v2080_v39 }
 0x2b5   : > { %11666 = vst [vmem:[#allocation280_spill] sm:$0xff] %v9884_v31 }
 0x2b6   : > { %6725 = vmatpush1.bf16.msra.mxu0 %v9872_v12  ;;  %v2073_v12 = vld [vmem:[#allocation2 + $0x1170] sm:$0xff]  ;;  %11671 = vst [vmem:[#allocation285_spill] sm:$0xff] %v9899_v10 }
 0x2b7   : > { %6727 = vmatprep.subr.bf16.mxu0 %v9875_v46  ;;  %v9890_v2 = vpack.c.bf16 %v2073_v12, %v2071_v18  ;;  %v2075_v46 = vld [vmem:[#allocation2 + $0x1180] sm:$0xff]  ;;  %v2084_v18 = vld [vmem:[#allocation2 + $0x11c8] sm:$0xff]  ;;  %v2086_v12 = vld [vmem:[#allocation2 + $0x11d8] sm:$0xff] }
 0x2b8   : > { %v9905_v36 = vpack.c.bf16 %v2086_v12, %v2084_v18  ;;  %v2266_v12 = vld [vmem:[#allocation6] sm:$0xff] }
 0x2b9   : > { %11668 = vst [vmem:[#allocation282_spill] sm:$0xff] %v9890_v2 }
 0x2ba   : > { %6729 = vmatpush1.bf16.msra.mxu0 %v9878_v13  ;;  %v2077_v13 = vld [vmem:[#allocation2 + $0x1190] sm:$0xff]  ;;  %11673 = vst [vmem:[#allocation287_spill] sm:$0xff] %v9905_v36 }
 0x2bb   : > { %6731 = vmatprep.subr.bf16.mxu0 %v9881_v42  ;;  %v9896_v40 = vpack.c.bf16 %v2077_v13, %v2075_v46  ;;  %v2079_v42 = vld [vmem:[#allocation2 + $0x11a0] sm:$0xff]  ;;  %v2088_v46 = vld [vmem:[#allocation2 + $0x11e8] sm:$0xff]  ;;  %v2090_v13 = vld [vmem:[#allocation2 + $0x11f8] sm:$0xff] }
 0x2bc   : > { %v9911_v63 = vpack.c.bf16 %v2090_v13, %v2088_v46  ;;  %v2267_v46 = vld [vmem:[#allocation6 + $0x8] sm:$0xff]  ;;  %v2171_v13 = vpop.permute.xlu1 %2170 }
 0x2bd   : > { %11670 = vst [vmem:[#allocation284_spill] sm:$0xff] %v9896_v40 }
 0x2be   : > { %6733 = vmatpush1.bf16.msra.mxu0 %v9884_v31  ;;  %v2081_v31 = vld [vmem:[#allocation2 + $0x11b0] sm:$0xff]  ;;  %11675 = vst [vmem:[#allocation289_spill] sm:$0xff] %v9911_v63 }
 0x2bf   : > { %6735 = vmatprep.subr.bf16.mxu0 %v9887_v7  ;;  %v9902_v8 = vpack.c.bf16 %v2081_v31, %v2079_v42  ;;  %v2083_v7 = vld [vmem:[#allocation2 + $0x11c0] sm:$0xff] }
 0x2c1   : > { %11672 = vst [vmem:[#allocation286_spill] sm:$0xff] %v9902_v8 }
 0x2c2   : > { %6737 = vmatpush1.bf16.msra.mxu0 %v9890_v2  ;;  %v2085_v2 = vld [vmem:[#allocation2 + $0x11d0] sm:$0xff] }
 0x2c3   : > { %6739 = vmatprep.subr.bf16.mxu0 %v9893_v60  ;;  %v9908_v39 = vpack.c.bf16 %v2085_v2, %v2083_v7  ;;  %v2087_v60 = vld [vmem:[#allocation2 + $0x11e0] sm:$0xff] }
 0x2c5   : > { %11674 = vst [vmem:[#allocation288_spill] sm:$0xff] %v9908_v39 }
 0x2c6   : > { %6741 = vmatpush1.bf16.msra.mxu0 %v9896_v40  ;;  %v2089_v40 = vld [vmem:[#allocation2 + $0x11f0] sm:$0xff] }
 0x2c7   : > { %6743 = vmatprep.subr.bf16.mxu0 %v9899_v10  ;;  %v9914_v42 = vpack.c.bf16 %v2089_v40, %v2087_v60  ;;  %v2282_v60 = vld [vmem:[#allocation6 + $0x80] sm:$0xff]  ;;  %v2283_v40 = vld [vmem:[#allocation6 + $0x88] sm:$0xff] }
 0x2c9   : > { %11676 = vst [vmem:[#allocation290_spill] sm:$0xff] %v9914_v42 }
 0x2ca   : > { %6745 = vmatpush1.bf16.msra.mxu0 %v9902_v8 }
 0x2cb   : > { %6747 = vmatprep.subr.bf16.mxu0 %v9905_v36 }
 0x2ce   : > { %6749 = vmatpush1.bf16.msra.mxu0 %v9908_v39 }
 0x2cf   : > { %6751 = vmatprep.subr.bf16.mxu0 %v9911_v63 }
 0x2d2   : > { %6753 = vmatpush1.bf16.msra.mxu0 %v9914_v42 }
 0x2d3   : > { %7583 = vmatprep.subr.bf16.mxu0 %v8937_v22 }
 0x2d5   : > { %2159 = vmatmul.mubr.f32.vlgmr.msra.gmra.mrb[0].mxu0 %v9254_v34  ;;  %v11319_v34 = vmov 0.0  }
 0x2d6   : > { %7585 = vmatpush1.bf16.msra.mxu0 %v8945_v28  ;;  %2257 = vmatprep.mubr.f32.mxu1 %v11319_v34  ;;  %v2175_v34 = vld [vmem:[%s11677_s18] sm:$0xff] }
 0x2d7   : > { %7587 = vmatprep.subr.bf16.mxu0 %v8950_v35 }
 0x2da   : > { %7589 = vmatpush1.bf16.msra.mxu0 %v8957_v44 }
 0x2db   : > { %7591 = vmatprep.subr.bf16.mxu0 %v8963_v50 }
 0x2de   : > { %7593 = vmatpush1.bf16.msra.mxu0 %v8975_v1 }
 0x2df   : > { %7595 = vmatprep.subr.bf16.mxu0 %v8981_v4 }
 0x2e2   : > { %7597 = vmatpush1.bf16.msra.mxu0 %v8993_v20 }
 0x2e3   : > { %7599 = vmatprep.subr.bf16.mxu0 %v8999_v27 }
 0x2e6   : > { %7601 = vmatpush1.bf16.msra.mxu0 %v9011_v49 }
 0x2e7   : > { %7603 = vmatprep.subr.bf16.mxu0 %v9017_v54 }
 0x2ea   : > { %7605 = vmatpush1.bf16.msra.mxu0 %v9029_v11 }
 0x2eb   : > { %7607 = vmatprep.subr.bf16.mxu0 %v9035_v16 }
 0x2ee   : > { %7609 = vmatpush1.bf16.msra.mxu0 %v9047_v43  ;;  %v2396_v43 = vld [vmem:[#allocation6 + $0x1d8] sm:$0xff] }
 0x2ef   : > { %7611 = vmatprep.subr.bf16.mxu0 %v9053_v57  ;;  %v2390_v57 = vld [vmem:[#allocation6 + $0x1a8] sm:$0xff] }
 0x2f2   : > { %7613 = vmatpush1.bf16.msra.mxu0 %v9062_v17  ;;  %v2389_v17 = vld [vmem:[#allocation6 + $0x1a0] sm:$0xff] }
 0x2f3   : > { %7615 = vmatprep.subr.bf16.mxu0 %v9071_v30  ;;  %v2372_v30 = vld [vmem:[#allocation6 + $0x118] sm:$0xff] }
 0x2f6   : > { %7617 = vmatpush1.bf16.msra.mxu0 %v9080_v52 }
 0x2f7   : > { %7619 = vmatprep.subr.bf16.mxu0 %v9087_v62 }
 0x2fa   : > { %7621 = vmatpush1.bf16.msra.mxu0 %v9094_v19 }
 0x2fb   : > { %7623 = vmatprep.subr.bf16.mxu0 %v9100_v37 }
 0x2fe   : > { %7625 = vmatpush1.bf16.msra.mxu0 %v9106_v3 }
 0x2ff   : > { %7627 = vmatprep.subr.bf16.mxu0 %v9112_v6  ;;  %v2388_v6 = vld [vmem:[#allocation6 + $0x198] sm:$0xff] }
 0x302   : > { %7629 = vmatpush1.bf16.msra.mxu0 %v9118_v41  ;;  %v2387_v41 = vld [vmem:[#allocation6 + $0x190] sm:$0xff] }
 0x303   : > { %7631 = vmatprep.subr.bf16.mxu0 %v9124_v38  ;;  %v6790_v52 = vpack.c.bf16 %v2388_v6, %v2387_v41  ;;  %v6794_v41 = vpack.c.bf16 %v2390_v57, %v2389_v17  ;;  %v11680_v57 = vld [vmem:[#allocation81_spill] sm:$0xff] }
 0x306   : > { %7633 = vmatpush1.bf16.msra.mxu0 %v9130_v9 }
 0x307   : > { %7635 = vmatprep.subr.bf16.mxu0 %v9136_v61  ;;  %v2269_v61 = vld [vmem:[#allocation6 + $0x18] sm:$0xff] }
 0x30a   : > { %7637 = vmatpush1.bf16.msra.mxu0 %v9142_v58  ;;  %v2268_v58 = vld [vmem:[#allocation6 + $0x10] sm:$0xff] }
 0x30b   : > { %7639 = vmatprep.subr.bf16.mxu0 %v9148_v25  ;;  %v6754_v25 = vpack.c.bf16 %v2283_v40, %v2282_v60  ;;  %v6760_v9 = vpack.c.bf16 %v2269_v61, %v2268_v58  ;;  %v2271_v40 = vld [vmem:[#allocation6 + $0x28] sm:$0xff]  ;;  %v2292_v58 = vld [vmem:[#allocation6 + $0xd0] sm:$0xff] }
 0x30c   : > { %v2275_v61 = vld [vmem:[#allocation6 + $0x48] sm:$0xff] }
 0x30e   : > { %7641 = vmatpush1.bf16.msra.mxu0 %v9154_v29  ;;  %v2285_v29 = vld [vmem:[#allocation6 + $0x98] sm:$0xff] }
 0x30f   : > { %7643 = vmatprep.subr.bf16.mxu0 %v9160_v59  ;;  %v2284_v59 = vld [vmem:[#allocation6 + $0x90] sm:$0xff] }
 0x312   : > { %7645 = vmatpush1.bf16.msra.mxu0 %v9166_v45 }
 0x313   : > { %7647 = vmatprep.subr.bf16.mxu0 %v9172_v51 }
 0x3a8   : > { %v2160_v31 = vpop.f32.mrb[0].mxu0 }
 0x3a9   : > { %v8162_v7 = vadd.f32 %v2160_v31, %v9771_v23  ;;  %v2162_v2 = vpop.f32.mrb[1].mxu0  ;;  %v6756_v23 = vpack.c.bf16 %v2267_v46, %v2266_v12  ;;  %v6758_v31 = vpack.c.bf16 %v2285_v29, %v2284_v59  ;;  %v2272_v29 = vld [vmem:[#allocation6 + $0x30] sm:$0xff]  ;;  %v2273_v59 = vld [vmem:[#allocation6 + $0x38] sm:$0xff]  ;;  %v2290_v12 = vld [vmem:[#allocation6 + $0xc0] sm:$0xff] }
 0x3aa   : > { %v8163_v18 = vadd.f32 %v2162_v2, %v9776_v48  ;;  %v2286_v48 = vld [vmem:[#allocation6 + $0xa0] sm:$0xff]  ;;  %v2287_v2 = vld [vmem:[#allocation6 + $0xa8] sm:$0xff]  ;;  %v6768_v46 = vpack.c.bf16 %v2273_v59, %v2272_v29  ;;  %v2296_v29 = vld [vmem:[#allocation6 + $0xf0] sm:$0xff] }
 0x3ab   : > { %v2173_v51 = vadd.f32 %v8162_v7, %v2171_v13  ;;  %v6762_v60 = vpack.c.bf16 %v2287_v2, %v2286_v48  ;;  %v2270_v7 = vld [vmem:[#allocation6 + $0x20] sm:$0xff]  ;;  %v2277_v2 = vld [vmem:[#allocation6 + $0x58] sm:$0xff] }
 0x3ac   : > { %v2174_v45 = vadd.f32 %v8163_v18, %v2171_v13  ;;  %v2288_v18 = vld [vmem:[#allocation6 + $0xb0] sm:$0xff]  ;;  %v2289_v13 = vld [vmem:[#allocation6 + $0xb8] sm:$0xff]  ;;  %v6764_v38 = vpack.c.bf16 %v2271_v40, %v2270_v7  ;;  %v2295_v7 = vld [vmem:[#allocation6 + $0xe8] sm:$0xff] }
 0x3ad   : > { %v2297_v59 = vld [vmem:[#allocation6 + $0xf8] sm:$0xff] }
 0x3ae   : > { %5723 = vmatprep.subr.msk.mxu1 %vm2186_vm0, %v2174_v45  ;;  %v6766_v45 = vpack.c.bf16 %v2289_v13, %v2288_v18  ;;  %v2279_v13 = vld [vmem:[#allocation6 + $0x68] sm:$0xff] }
 0x3af   : > { %5724 = vmatpush1.msk.msra.mxu1 %vm2186_vm0, %v2173_v51  ;;  %v2291_v51 = vld [vmem:[#allocation6 + $0xc8] sm:$0xff] }
 0x3b0   : > { %5725 = vmatmul.mubr.msk.f32.vlgmr.msra.gmra.mrb[2].mxu1 %vm2182_vm1, %v2175_v34  ;;  %6755 = vmatprep.subr.bf16.mxu1 %v6754_v25  ;;  %v6770_v25 = vpack.c.bf16 %v2291_v51, %v2290_v12  ;;  %v2274_v34 = vld [vmem:[#allocation6 + $0x40] sm:$0xff]  ;;  %v6782_v12 = vpack.c.bf16 %v2297_v59, %v2296_v29  ;;  %v2280_v51 = vld [vmem:[#allocation6 + $0x70] sm:$0xff] }
 0x3b1   : > { %6757 = vmatpush3.bf16.msra.mxu1 %v6756_v23  ;;  %v2293_v23 = vld [vmem:[#allocation6 + $0xd8] sm:$0xff] }
 0x3b2   : > { %6759 = vmatprep.subr.bf16.mxu1 %v6758_v31  ;;  %v6772_v31 = vpack.c.bf16 %v2275_v61, %v2274_v34  ;;  %v6774_v48 = vpack.c.bf16 %v2293_v23, %v2292_v58  ;;  %v2385_v34 = vld [vmem:[#allocation6 + $0x180] sm:$0xff]  ;;  %v2386_v61 = vld [vmem:[#allocation6 + $0x188] sm:$0xff]  ;;  %v9958_v23 = vpop.permute.xlu1 %2699 }
 0x3b3   : > { %v6786_v58 = vpack.c.bf16 %v2386_v61, %v2385_v34  ;;  %v2370_v34 = vld [vmem:[#allocation6 + $0x108] sm:$0xff] }
 0x3b5   : > { %6761 = vmatpush3.bf16.msra.mxu1 %v6760_v9  ;;  %v2276_v9 = vld [vmem:[#allocation6 + $0x50] sm:$0xff] }
 0x3b6   : > { %6763 = vmatprep.subr.bf16.mxu1 %v6762_v60  ;;  %v2294_v60 = vld [vmem:[#allocation6 + $0xe0] sm:$0xff]  ;;  %v6776_v40 = vpack.c.bf16 %v2277_v2, %v2276_v9 }
 0x3b7   : > { %v6778_v18 = vpack.c.bf16 %v2295_v7, %v2294_v60 }
 0x3b9   : > { %6765 = vmatpush3.bf16.msra.mxu1 %v6764_v38  ;;  %v2278_v38 = vld [vmem:[#allocation6 + $0x60] sm:$0xff] }
 0x3ba   : > { %6767 = vmatprep.subr.bf16.mxu1 %v6766_v45  ;;  %v6780_v45 = vpack.c.bf16 %v2279_v13, %v2278_v38 }
 0x3bd   : > { %6769 = vmatpush3.bf16.msra.mxu1 %v6768_v46  ;;  %v2281_v46 = vld [vmem:[#allocation6 + $0x78] sm:$0xff] }
 0x3be   : > { %6771 = vmatprep.subr.bf16.mxu1 %v6770_v25  ;;  %v6784_v25 = vpack.c.bf16 %v2281_v46, %v2280_v51 }
 0x3c1   : > { %6773 = vmatpush3.bf16.msra.mxu1 %v6772_v31  ;;  %v2180_v31 = vpop.permute.xlu0 %2179 }
 0x3c2   : > { %6775 = vmatprep.subr.bf16.mxu1 %v6774_v48  ;;  %v9960_v48 = vpop.permute.xlu1 %2863 }
 0x3c5   : > { %6777 = vmatpush3.bf16.msra.mxu1 %v6776_v40  ;;  %v9962_v9 = vpop.permute.xlu0 %2683 }
 0x3c6   : > { %6779 = vmatprep.subr.bf16.mxu1 %v6778_v18  ;;  %v9964_v2 = vpop.permute.xlu1 %3045 }
 0x3c9   : > { %6781 = vmatpush3.bf16.msra.mxu1 %v6780_v45  ;;  %v9966_v60 = vpop.permute.xlu0 %2954 }
 0x3ca   : > { %6783 = vmatprep.subr.bf16.mxu1 %v6782_v12  ;;  %v9968_v7 = vpop.permute.xlu1 %3227 }
 0x3cd   : > { %6785 = vmatpush3.bf16.msra.mxu1 %v6784_v25  ;;  %v9970_v40 = vpop.permute.xlu0 %3136  ;;  %v2369_v25 = vld [vmem:[#allocation6 + $0x100] sm:$0xff] }
 0x3ce   : > { %6787 = vmatprep.subr.bf16.mxu1 %v6786_v58  ;;  %v9972_v18 = vpop.permute.xlu1 %3409  ;;  %v6788_v19 = vpack.c.bf16 %v2370_v34, %v2369_v25  ;;  %v2373_v25 = vld [vmem:[#allocation6 + $0x120] sm:$0xff]  ;;  %v2374_v34 = vld [vmem:[#allocation6 + $0x128] sm:$0xff] }
 0x3d1   : > { %v9974_v38 = vpop.permute.xlu0 %3318 }
 0x3d2   : > { %v9976_v13 = vpop.permute.xlu1 %3509 }
 0x3d5   : > { %v9978_v45 = vpop.permute.xlu0 %3499 }
 0x3d6   : > { %v9980_v29 = vpop.permute.xlu1 %3721 }
 0x3d7   : > { %11678 = vst [vmem:[#allocation291_spill] sm:$0xff] %v9980_v29  ;;  %v2371_v29 = vld [vmem:[#allocation6 + $0x110] sm:$0xff] }
 0x3d9   : > { %v9982_v59 = vpop.permute.xlu0 %3514 }
 0x3da   : > { %v9984_v61 = vpop.permute.xlu1 %3726 }
 0x3db   : > { %11679 = vst [vmem:[#allocation292_spill] sm:$0xff] %v9984_v61  ;;  %v2392_v61 = vld [vmem:[#allocation6 + $0x1b8] sm:$0xff] }
 0x3dd   : > { %v4602_v62 = vpop.permute.xlu0 %4601 }
 0x483   : > { %v2259_v12 = vpop.f32.mrb[2].mxu1 }
 0x484   : > { %v2260_v51 = vadd.f32 %v2259_v12, %v2180_v31  ;;  %v2261_v46 = vpop.f32.mrb[3].mxu1 }
 0x485   : > { %v2262_v58 = vadd.f32 %v2261_v46, %v2180_v31  ;;  %v9993_v31 = vpop.permute.xlu1 %4592  ;;  %v6792_v46 = vpack.c.bf16 %v2372_v30, %v2371_v29  ;;  %v2393_v29 = vld [vmem:[#allocation6 + $0x1c0] sm:$0xff] }
 0x486   : > { %v9986_v3 = vmax.f32 %v2260_v51, 0.0 }
 0x487   : > { %v9988_v37 = vmax.f32 %v2262_v58, 0.0  ;;  %v2391_v58 = vld [vmem:[#allocation6 + $0x1b0] sm:$0xff] }
 0x488   : > { %v4604_v51 = vmul.f32 %v4602_v62, %v9986_v3  ;;  %v6798_v30 = vpack.c.bf16 %v2392_v61, %v2391_v58  ;;  %v11682_v61 = vld [vmem:[#allocation85_spill] sm:$0xff]  ;;  %v2380_v58 = vld [vmem:[#allocation6 + $0x158] sm:$0xff] }
 0x489   : > { %2362 = vmatprep.mubr.f32.mxu1 %v9988_v37  ;;  %v4605_v12 = vmul.f32 %v4602_v62, %v9988_v37  ;;  %v4596_v6 = vmul.f32 %v9993_v31, %v9988_v37  ;;  %v2375_v62 = vld [vmem:[#allocation6 + $0x130] sm:$0xff] }
 0x48a   : > { %2363 = vmatmul.mubr.f32.vlgmr.msra.gmra.mrb[4].mxu1 %v9986_v3 }
 0x48b   : > { %6789 = vmatpush3.bf16.msra.mxu1 %v6788_v19  ;;  %2465 = vmatprep.mubr.f32.mxu1 %v9988_v37  ;;  %v6796_v19 = vpack.c.bf16 %v2374_v34, %v2373_v25  ;;  %v2379_v34 = vld [vmem:[#allocation6 + $0x150] sm:$0xff] }
 0x48c   : > { %4670 = vmatprep.mubr.f32.mxu0 %v4605_v12  ;;  %6791 = vmatprep.subr.bf16.mxu1 %v6790_v52  ;;  %v2376_v52 = vld [vmem:[#allocation6 + $0x138] sm:$0xff]  ;;  %v2394_v12 = vld [vmem:[#allocation6 + $0x1c8] sm:$0xff] }
 0x48d   : > { %4671 = vmatmul.mubr.f32.vlgmr.msra.gmra.mrb[2].mxu0 %v4604_v51  ;;  %v6800_v17 = vpack.c.bf16 %v2376_v52, %v2375_v62  ;;  %v6802_v51 = vpack.c.bf16 %v2394_v12, %v2393_v29  ;;  %v6808_v62 = vpack.c.bf16 %v2380_v58, %v2379_v34  ;;  %v2381_v29 = vld [vmem:[#allocation6 + $0x160] sm:$0xff]  ;;  %v2382_v12 = vld [vmem:[#allocation6 + $0x168] sm:$0xff] }
 0x48e   : > { %7649 = vmatpush1.bf16.msra.mxu0 %v9239_v56  ;;  %4741 = vmatprep.mubr.f32.mxu0 %v4596_v6  ;;  %v2377_v56 = vld [vmem:[#allocation6 + $0x140] sm:$0xff]  ;;  %v2378_v6 = vld [vmem:[#allocation6 + $0x148] sm:$0xff] }
 0x48f   : > { %6793 = vmatpush3.bf16.msra.mxu1 %v6792_v46  ;;  %7651 = vmatprep.subr.bf16.mxu0 %v9241_v21  ;;  %v2395_v46 = vld [vmem:[#allocation6 + $0x1d0] sm:$0xff]  ;;  %v11681_v21 = vld [vmem:[#allocation84_spill] sm:$0xff] }
 0x490   : > { %6795 = vmatprep.subr.bf16.mxu1 %v6794_v41  ;;  %v6804_v41 = vpack.c.bf16 %v2378_v6, %v2377_v56  ;;  %v6806_v25 = vpack.c.bf16 %v2396_v43, %v2395_v46  ;;  %v11686_v43 = vld [vmem:[#allocation93_spill] sm:$0xff]  ;;  %v6812_v56 = vpack.c.bf16 %v2382_v12, %v2381_v29  ;;  %v2384_v46 = vld [vmem:[#allocation6 + $0x178] sm:$0xff]  ;;  %v2472_v58 = vld [vmem:[#allocation6 + $0x200] sm:$0xff] }
 0x491   : > { %v2383_v6 = vld [vmem:[#allocation6 + $0x170] sm:$0xff] }
 0x492   : > { %7653 = vmatpush1.bf16.msra.mxu0 %v9257_v32  ;;  %v2398_v32 = vld [vmem:[#allocation6 + $0x1e8] sm:$0xff]  ;;  %v2474_v12 = vld [vmem:[#allocation6 + $0x210] sm:$0xff] }
 0x493   : > { %6797 = vmatpush3.bf16.msra.mxu1 %v6796_v19  ;;  %7655 = vmatprep.subr.bf16.mxu0 %v11680_v57  ;;  %v2397_v19 = vld [vmem:[#allocation6 + $0x1e0] sm:$0xff] }
 0x494   : > { %6799 = vmatprep.subr.bf16.mxu1 %v6798_v30  ;;  %v11683_v57 = vld [vmem:[#allocation88_spill] sm:$0xff]  ;;  %v11684_v30 = vld [vmem:[#allocation89_spill] sm:$0xff]  ;;  %v6810_v52 = vpack.c.bf16 %v2398_v32, %v2397_v19 }
 0x495   : > { %v11688_v32 = vld [vmem:[#allocation97_spill] sm:$0xff] }
 0x496   : > { %7657 = vmatpush1.bf16.msra.mxu0 %v11681_v21  ;;  %v2400_v21 = vld [vmem:[#allocation6 + $0x1f8] sm:$0xff]  ;;  %v2473_v19 = vld [vmem:[#allocation6 + $0x208] sm:$0xff] }
 0x497   : > { %6801 = vmatpush3.bf16.msra.mxu1 %v6800_v17  ;;  %7659 = vmatprep.subr.bf16.mxu0 %v11682_v61  ;;  %v2399_v17 = vld [vmem:[#allocation6 + $0x1f0] sm:$0xff]  ;;  %v11685_v61 = vld [vmem:[#allocation92_spill] sm:$0xff] }
 0x498   : > { %6803 = vmatprep.subr.bf16.mxu1 %v6802_v51  ;;  %v6814_v51 = vpack.c.bf16 %v2400_v21, %v2399_v17  ;;  %v11690_v21 = vld [vmem:[#allocation101_spill] sm:$0xff]  ;;  %v2475_v17 = vld [vmem:[#allocation6 + $0x218] sm:$0xff] }
 0x49a   : > { %7661 = vmatpush1.bf16.msra.mxu0 %v11683_v57  ;;  %v2489_v57 = vld [vmem:[#allocation6 + $0x288] sm:$0xff] }
 0x49b   : > { %6805 = vmatpush3.bf16.msra.mxu1 %v6804_v41  ;;  %7663 = vmatprep.subr.bf16.mxu0 %v11684_v30  ;;  %v2488_v41 = vld [vmem:[#allocation6 + $0x280] sm:$0xff] }
 0x49c   : > { %6807 = vmatprep.subr.bf16.mxu1 %v6806_v25  ;;  %v11687_v30 = vld [vmem:[#allocation96_spill] sm:$0xff]  ;;  %v6816_v25 = vpack.c.bf16 %v2384_v46, %v2383_v6  ;;  %v6818_v34 = vpack.c.bf16 %v2489_v57, %v2488_v41  ;;  %v6824_v57 = vpack.c.bf16 %v2475_v17, %v2474_v12 }
 0x49d   : > { %v2476_v46 = vld [vmem:[#allocation6 + $0x220] sm:$0xff]  ;;  %v2477_v41 = vld [vmem:[#allocation6 + $0x228] sm:$0xff] }
 0x49e   : > { %7665 = vmatpush1.bf16.msra.mxu0 %v11685_v61  ;;  %v2491_v61 = vld [vmem:[#allocation6 + $0x298] sm:$0xff]  ;;  %v2497_v12 = vld [vmem:[#allocation6 + $0x2c8] sm:$0xff] }
 0x49f   : > { %6809 = vmatpush3.bf16.msra.mxu1 %v6808_v62  ;;  %7667 = vmatprep.subr.bf16.mxu0 %v11686_v43  ;;  %v2490_v62 = vld [vmem:[#allocation6 + $0x290] sm:$0xff]  ;;  %v11689_v43 = vld [vmem:[#allocation100_spill] sm:$0xff] }
 0x4a0   : > { %6811 = vmatprep.subr.bf16.mxu1 %v6810_v52  ;;  %v6820_v52 = vpack.c.bf16 %v2473_v19, %v2472_v58  ;;  %v6822_v29 = vpack.c.bf16 %v2491_v61, %v2490_v62  ;;  %v2495_v61 = vld [vmem:[#allocation6 + $0x2b8] sm:$0xff]  ;;  %v11694_v58 = vld [vmem:[#allocation109_spill] sm:$0xff]  ;;  %v6828_v19 = vpack.c.bf16 %v2477_v41, %v2476_v46  ;;  %v11695_v17 = vld [vmem:[#allocation112_spill] sm:$0xff] }
 0x4a2   : > { %7669 = vmatpush1.bf16.msra.mxu0 %v11687_v30  ;;  %v2493_v30 = vld [vmem:[#allocation6 + $0x2a8] sm:$0xff] }
 0x4a3   : > { %6813 = vmatpush3.bf16.msra.mxu1 %v6812_v56  ;;  %7671 = vmatprep.subr.bf16.mxu0 %v11688_v32  ;;  %v2492_v56 = vld [vmem:[#allocation6 + $0x2a0] sm:$0xff] }
 0x4a4   : > { %6815 = vmatprep.subr.bf16.mxu1 %v6814_v51  ;;  %v11691_v32 = vld [vmem:[#allocation104_spill] sm:$0xff]  ;;  %v11692_v51 = vld [vmem:[#allocation105_spill] sm:$0xff]  ;;  %v6826_v6 = vpack.c.bf16 %v2493_v30, %v2492_v56 }
 0x4a5   : > { %v11696_v30 = vld [vmem:[#allocation113_spill] sm:$0xff] }
 0x4a6   : > { %7673 = vmatpush1.bf16.msra.mxu0 %v11689_v43  ;;  %v2499_v43 = vld [vmem:[#allocation6 + $0x2d8] sm:$0xff] }
 0x4a7   : > { %6817 = vmatpush3.bf16.msra.mxu1 %v6816_v25  ;;  %7675 = vmatprep.subr.bf16.mxu0 %v11690_v21  ;;  %v2494_v25 = vld [vmem:[#allocation6 + $0x2b0] sm:$0xff]  ;;  %v2496_v21 = vld [vmem:[#allocation6 + $0x2c0] sm:$0xff] }
 0x4a8   : > { %6819 = vmatprep.subr.bf16.mxu1 %v6818_v34  ;;  %v11693_v34 = vld [vmem:[#allocation108_spill] sm:$0xff]  ;;  %v6830_v62 = vpack.c.bf16 %v2495_v61, %v2494_v25  ;;  %v6834_v56 = vpack.c.bf16 %v2497_v12, %v2496_v21  ;;  %v2482_v25 = vld [vmem:[#allocation6 + $0x250] sm:$0xff]  ;;  %v2483_v61 = vld [vmem:[#allocation6 + $0x258] sm:$0xff] }
 0x4a9   : > { %v2502_v12 = vld [vmem:[#allocation6 + $0x2f0] sm:$0xff] }
 0x4aa   : > { %7677 = vmatpush1.bf16.msra.mxu0 %v11691_v32  ;;  %2466 = vmatmul.mubr.f32.vlgmr.msra.gmra.mrb[6].mxu1 %v9986_v3  ;;  %v2479_v32 = vld [vmem:[#allocation6 + $0x238] sm:$0xff] }
 0x4ab   : > { %6821 = vmatpush3.bf16.msra.mxu1 %v6820_v52  ;;  %2568 = vmatprep.mubr.f32.mxu1 %v9988_v37  ;;  %v2478_v52 = vld [vmem:[#allocation6 + $0x230] sm:$0xff] }
 0x4ac   : > { %7679 = vmatprep.subr.bf16.mxu0 %v11692_v51  ;;  %6823 = vmatprep.subr.bf16.mxu1 %v6822_v29  ;;  %v6832_v29 = vpack.c.bf16 %v2479_v32, %v2478_v52  ;;  %v2480_v51 = vld [vmem:[#allocation6 + $0x240] sm:$0xff]  ;;  %v6840_v32 = vpack.c.bf16 %v2483_v61, %v2482_v25  ;;  %v2485_v52 = vld [vmem:[#allocation6 + $0x268] sm:$0xff] }
 0x4ad   : > { %v2592_v25 = vld [vmem:[#allocation6 + $0x388] sm:$0xff] }
 0x4ae   : > { %7681 = vmatpush1.bf16.msra.mxu0 %v11693_v34  ;;  %v2481_v34 = vld [vmem:[#allocation6 + $0x248] sm:$0xff] }
 0x4af   : > { %6825 = vmatpush3.bf16.msra.mxu1 %v6824_v57  ;;  %7683 = vmatprep.subr.bf16.mxu0 %v11694_v58  ;;  %v2498_v57 = vld [vmem:[#allocation6 + $0x2d0] sm:$0xff]  ;;  %v11697_v58 = vld [vmem:[#allocation116_spill] sm:$0xff]  ;;  %v6836_v46 = vpack.c.bf16 %v2481_v34, %v2480_v51  ;;  %v10026_v51 = vpop.permute.xlu0 %3704 }
 0x4b0   : > { %6827 = vmatprep.subr.bf16.mxu1 %v6826_v6  ;;  %v11698_v6 = vld [vmem:[#allocation117_spill] sm:$0xff]  ;;  %v6838_v41 = vpack.c.bf16 %v2499_v43, %v2498_v57 }
 0x4b1   : > { %v11701_v43 = vld [vmem:[#allocation125_spill] sm:$0xff] }
 0x4b2   : > { %7685 = vmatpush1.bf16.msra.mxu0 %v11695_v17  ;;  %v2501_v17 = vld [vmem:[#allocation6 + $0x2e8] sm:$0xff]  ;;  %v2486_v57 = vld [vmem:[#allocation6 + $0x270] sm:$0xff] }
 0x4b3   : > { %6829 = vmatpush3.bf16.msra.mxu1 %v6828_v19  ;;  %7687 = vmatprep.subr.bf16.mxu0 %v11696_v30  ;;  %v2500_v19 = vld [vmem:[#allocation6 + $0x2e0] sm:$0xff] }
 0x4b4   : > { %6831 = vmatprep.subr.bf16.mxu1 %v6830_v62  ;;  %v11699_v30 = vld [vmem:[#allocation120_spill] sm:$0xff]  ;;  %v6842_v21 = vpack.c.bf16 %v2501_v17, %v2500_v19 }
 0x4b5   : > { %v2484_v62 = vld [vmem:[#allocation6 + $0x260] sm:$0xff] }
 0x4b6   : > { %7689 = vmatpush1.bf16.msra.mxu0 %v11697_v58  ;;  %v6844_v34 = vpack.c.bf16 %v2485_v52, %v2484_v62  ;;  %v2575_v19 = vld [vmem:[#allocation6 + $0x300] sm:$0xff]  ;;  %v2594_v62 = vld [vmem:[#allocation6 + $0x398] sm:$0xff] }
 0x4b7   : > { %6833 = vmatpush3.bf16.msra.mxu1 %v6832_v29  ;;  %7691 = vmatprep.subr.bf16.mxu0 %v11698_v6  ;;  %v2503_v29 = vld [vmem:[#allocation6 + $0x2f8] sm:$0xff]  ;;  %v11700_v6 = vld [vmem:[#allocation124_spill] sm:$0xff] }
 0x4b8   : > { %6835 = vmatprep.subr.bf16.mxu1 %v6834_v56  ;;  %v6846_v56 = vpack.c.bf16 %v2503_v29, %v2502_v12  ;;  %v2577_v12 = vld [vmem:[#allocation6 + $0x310] sm:$0xff]  ;;  %v2578_v29 = vld [vmem:[#allocation6 + $0x318] sm:$0xff] }
 0x4ba   : > { %7693 = vmatpush1.bf16.msra.mxu0 %v11699_v30 }
 0x4bb   : > { %6837 = vmatpush3.bf16.msra.mxu1 %v6836_v46  ;;  %7695 = vmatprep.subr.bf16.mxu0 %v9382_v5  ;;  %v2487_v46 = vld [vmem:[#allocation6 + $0x278] sm:$0xff]  ;;  %v2591_v5 = vld [vmem:[#allocation6 + $0x380] sm:$0xff] }
 0x4bc   : > { %6839 = vmatprep.subr.bf16.mxu1 %v6838_v41  ;;  %v11702_v41 = vld [vmem:[#allocation128_spill] sm:$0xff]  ;;  %v6848_v17 = vpack.c.bf16 %v2487_v46, %v2486_v57  ;;  %v6850_v61 = vpack.c.bf16 %v2592_v25, %v2591_v5  ;;  %v6856_v46 = vpack.c.bf16 %v2578_v29, %v2577_v12  ;;  %v2581_v29 = vld [vmem:[#allocation6 + $0x330] sm:$0xff] }
 0x4bd   : > { %v2596_v57 = vld [vmem:[#allocation6 + $0x3a8] sm:$0xff] }
 0x4be   : > { %7697 = vmatpush1.bf16.msra.mxu0 %v11700_v6  ;;  %v2576_v6 = vld [vmem:[#allocation6 + $0x308] sm:$0xff] }
 0x4bf   : > { %6841 = vmatpush3.bf16.msra.mxu1 %v6840_v32  ;;  %7699 = vmatprep.subr.bf16.mxu0 %v11701_v43  ;;  %v10031_v32 = vpop.permute.xlu0 %3709  ;;  %v2593_v43 = vld [vmem:[#allocation6 + $0x390] sm:$0xff] }
 0x4c0   : > { %6843 = vmatprep.subr.bf16.mxu1 %v6842_v21  ;;  %11703 = vst [vmem:[#allocation116_spill] sm:$0xff] %v10031_v32  ;;  %v6852_v21 = vpack.c.bf16 %v2576_v6, %v2575_v19  ;;  %v6854_v52 = vpack.c.bf16 %v2594_v62, %v2593_v43  ;;  %v11704_v6 = vld [vmem:[#allocation17_spill] sm:$0xff]  ;;  %v2598_v62 = vld [vmem:[#allocation6 + $0x3b8] sm:$0xff] }
 0x4c1   : > { %v2597_v19 = vld [vmem:[#allocation6 + $0x3b0] sm:$0xff] }
 0x4c2   : > { %7701 = vmatpush1.bf16.msra.mxu0 %v11702_v41  ;;  %v11705_v32 = vld [vmem:[#allocation18_spill] sm:$0xff]  ;;  %v6862_v12 = vpack.c.bf16 %v2598_v62, %v2597_v19 }
 0x4c3   : > { %6845 = vmatpush3.bf16.msra.mxu1 %v6844_v34  ;;  %7703 = vmatprep.subr.bf16.mxu0 %v9406_v55  ;;  %v2595_v34 = vld [vmem:[#allocation6 + $0x3a0] sm:$0xff]  ;;  %v10037_v5 = vpop.permute.xlu0 %4752  ;;  %v2585_v19 = vld [vmem:[#allocation6 + $0x350] sm:$0xff]  ;;  %v2586_v62 = vld [vmem:[#allocation6 + $0x358] sm:$0xff] }
 0x4c4   : > { %6847 = vmatprep.subr.bf16.mxu1 %v6846_v56  ;;  %v4595_v56 = vmul.f32 %v9993_v31, %v9986_v3  ;;  %v4756_v43 = vmul.f32 %v10037_v5, %v9988_v37  ;;  %v6858_v25 = vpack.c.bf16 %v2596_v57, %v2595_v34  ;;  %v11708_v34 = vld [vmem:[#allocation21_spill] sm:$0xff] }
 0x4c6   : > { %7705 = vmatpush1.bf16.msra.mxu0 %v9417_v24  ;;  %v2602_v24 = vld [vmem:[#allocation6 + $0x3d8] sm:$0xff] }
 0x4c7   : > { %6849 = vmatpush3.bf16.msra.mxu1 %v6848_v17  ;;  %7707 = vmatprep.subr.bf16.mxu0 %v9421_v14  ;;  %v2579_v17 = vld [vmem:[#allocation6 + $0x320] sm:$0xff]  ;;  %v2600_v14 = vld [vmem:[#allocation6 + $0x3c8] sm:$0xff] }
 0x4c8   : > { %6851 = vmatprep.subr.bf16.mxu1 %v6850_v61  ;;  %v2580_v61 = vld [vmem:[#allocation6 + $0x328] sm:$0xff] }
 0x4c9   : > { %v6860_v31 = vpack.c.bf16 %v2580_v61, %v2579_v17 }
 0x4ca   : > { %7709 = vmatpush1.bf16.msra.mxu0 %v9430_v15  ;;  %2569 = vmatmul.mubr.f32.vlgmr.msra.gmra.mrb[8].mxu1 %v9986_v3  ;;  %v2599_v15 = vld [vmem:[#allocation6 + $0x3c0] sm:$0xff] }
 0x4cb   : > { %6853 = vmatpush3.bf16.msra.mxu1 %v6852_v21  ;;  %2671 = vmatprep.mubr.f32.mxu1 %v9988_v37  ;;  %v11706_v21 = vld [vmem:[#allocation19_spill] sm:$0xff] }
 0x4cc   : > { %7711 = vmatprep.subr.bf16.mxu0 %v11704_v6  ;;  %6855 = vmatprep.subr.bf16.mxu1 %v6854_v52  ;;  %v2582_v6 = vld [vmem:[#allocation6 + $0x338] sm:$0xff]  ;;  %v11707_v52 = vld [vmem:[#allocation20_spill] sm:$0xff] }
 0x4cd   : > { %4742 = vmatmul.mubr.f32.vlgmr.msra.gmra.mrb[2].mxu0 %v4595_v56  ;;  %v6864_v57 = vpack.c.bf16 %v2582_v6, %v2581_v29  ;;  %v6866_v56 = vpack.c.bf16 %v2600_v14, %v2599_v15  ;;  %v11712_v14 = vld [vmem:[#allocation25_spill] sm:$0xff]  ;;  %v6872_v15 = vpack.c.bf16 %v2586_v62, %v2585_v19  ;;  %v11718_v62 = vld [vmem:[#allocation31_spill] sm:$0xff] }
 0x4ce   : > { %7713 = vmatpush1.bf16.msra.mxu0 %v11705_v32  ;;  %4821 = vmatprep.mubr.f32.mxu0 %v4756_v43  ;;  %v2583_v32 = vld [vmem:[#allocation6 + $0x340] sm:$0xff]  ;;  %v2584_v43 = vld [vmem:[#allocation6 + $0x348] sm:$0xff] }
 0x4cf   : > { %6857 = vmatpush3.bf16.msra.mxu1 %v6856_v46  ;;  %7715 = vmatprep.subr.bf16.mxu0 %v11706_v21  ;;  %v2601_v46 = vld [vmem:[#allocation6 + $0x3d0] sm:$0xff]  ;;  %v6868_v17 = vpack.c.bf16 %v2584_v43, %v2583_v32  ;;  %v2588_v29 = vld [vmem:[#allocation6 + $0x368] sm:$0xff] }
 0x4d0   : > { %6859 = vmatprep.subr.bf16.mxu1 %v6858_v25  ;;  %v11709_v21 = vld [vmem:[#allocation22_spill] sm:$0xff]  ;;  %v11710_v25 = vld [vmem:[#allocation23_spill] sm:$0xff]  ;;  %v6870_v61 = vpack.c.bf16 %v2602_v24, %v2601_v46  ;;  %v11716_v19 = vld [vmem:[#allocation29_spill] sm:$0xff] }
 0x4d1   : > { %v11714_v24 = vld [vmem:[#allocation27_spill] sm:$0xff]  ;;  %v2589_v43 = vld [vmem:[#allocation6 + $0x370] sm:$0xff] }
 0x4d2   : > { %7717 = vmatpush1.bf16.msra.mxu0 %v11707_v52  ;;  %v2604_v52 = vld [vmem:[#allocation6 + $0x3e8] sm:$0xff]  ;;  %v2590_v46 = vld [vmem:[#allocation6 + $0x378] sm:$0xff] }
 0x4d3   : > { %6861 = vmatpush3.bf16.msra.mxu1 %v6860_v31  ;;  %7719 = vmatprep.subr.bf16.mxu0 %v11708_v34  ;;  %v2603_v31 = vld [vmem:[#allocation6 + $0x3e0] sm:$0xff] }
 0x4d4   : > { %6863 = vmatprep.subr.bf16.mxu1 %v6862_v12  ;;  %v11711_v34 = vld [vmem:[#allocation24_spill] sm:$0xff]  ;;  %v6874_v6 = vpack.c.bf16 %v2604_v52, %v2603_v31  ;;  %v6880_v52 = vpack.c.bf16 %v2590_v46, %v2589_v43  ;;  %v11728_v43 = vld [vmem:[#allocation41_spill] sm:$0xff]  ;;  %v11729_v46 = vld [vmem:[#allocation42_spill] sm:$0xff] }
 0x4d5   : > { %v2587_v12 = vld [vmem:[#allocation6 + $0x360] sm:$0xff] }
 0x4d6   : > { %7721 = vmatpush1.bf16.msra.mxu0 %v11709_v21  ;;  %v2606_v21 = vld [vmem:[#allocation6 + $0x3f8] sm:$0xff]  ;;  %v6876_v32 = vpack.c.bf16 %v2588_v29, %v2587_v12  ;;  %v11719_v31 = vld [vmem:[#allocation32_spill] sm:$0xff]  ;;  %v11724_v29 = vld [vmem:[#allocation37_spill] sm:$0xff] }
 0x4d7   : > { %6865 = vmatpush3.bf16.msra.mxu1 %v6864_v57  ;;  %7723 = vmatprep.subr.bf16.mxu0 %v11710_v25  ;;  %v2605_v57 = vld [vmem:[#allocation6 + $0x3f0] sm:$0xff]  ;;  %v11723_v12 = vld [vmem:[#allocation36_spill] sm:$0xff] }
 0x4d8   : > { %6867 = vmatprep.subr.bf16.mxu1 %v6866_v56  ;;  %v11713_v25 = vld [vmem:[#allocation26_spill] sm:$0xff]  ;;  %v6878_v56 = vpack.c.bf16 %v2606_v21, %v2605_v57 }
 0x4d9   : > { %v11721_v21 = vld [vmem:[#allocation34_spill] sm:$0xff] }
 0x4da   : > { %7725 = vmatpush1.bf16.msra.mxu0 %v11711_v34  ;;  %v11725_v57 = vld [vmem:[#allocation38_spill] sm:$0xff] }
 0x4db   : > { %6869 = vmatpush3.bf16.msra.mxu1 %v6868_v17  ;;  %7727 = vmatprep.subr.bf16.mxu0 %v11712_v14  ;;  %v11715_v17 = vld [vmem:[#allocation28_spill] sm:$0xff] }
 0x4dc   : > { %6871 = vmatprep.subr.bf16.mxu1 %v6870_v61  ;;  %v11717_v61 = vld [vmem:[#allocation30_spill] sm:$0xff] }
 0x4de   : > { %7729 = vmatpush1.bf16.msra.mxu0 %v11713_v25 }
 0x4df   : > { %6873 = vmatpush3.bf16.msra.mxu1 %v6872_v15  ;;  %7731 = vmatprep.subr.bf16.mxu0 %v11714_v24  ;;  %v11720_v15 = vld [vmem:[#allocation33_spill] sm:$0xff] }
 0x4e0   : > { %6875 = vmatprep.subr.bf16.mxu1 %v6874_v6  ;;  %v11722_v6 = vld [vmem:[#allocation35_spill] sm:$0xff] }
 0x4e2   : > { %7733 = vmatpush1.bf16.msra.mxu0 %v11715_v17 }
 0x4e3   : > { %6877 = vmatpush3.bf16.msra.mxu1 %v6876_v32  ;;  %7735 = vmatprep.subr.bf16.mxu0 %v11716_v19  ;;  %v11726_v32 = vld [vmem:[#allocation39_spill] sm:$0xff] }
 0x4e4   : > { %6879 = vmatprep.subr.bf16.mxu1 %v6878_v56  ;;  %v11727_v56 = vld [vmem:[#allocation40_spill] sm:$0xff] }
 0x4e6   : > { %7737 = vmatpush1.bf16.msra.mxu0 %v11717_v61  ;;  %v2710_v61 = vld [vmem:[#allocation4 + $0x70] sm:$0xff] }
 0x4e7   : > { %6881 = vmatpush3.bf16.msra.mxu1 %v6880_v52  ;;  %7739 = vmatprep.subr.bf16.mxu0 %v11718_v62  ;;  %v10071_v52 = vpop.permute.xlu1 %3892  ;;  %v11758_v62 = vld [vmem:[#allocation106_spill] sm:$0xff] }
 0x4ea   : > { %7741 = vmatpush1.bf16.msra.mxu0 %v11719_v31  ;;  %2672 = vmatmul.mubr.f32.vlgmr.msra.gmra.mrb[10].mxu1 %v9986_v3  ;;  %v11746_v31 = vld [vmem:[#allocation82_spill] sm:$0xff] }
 0x4eb   : > { %7743 = vmatprep.subr.bf16.mxu0 %v11720_v15  ;;  %v11730_v15 = vld [vmem:[#allocation43_spill] sm:$0xff] }
 0x4ee   : > { %7745 = vmatpush1.bf16.msra.mxu0 %v11721_v21  ;;  %v11731_v21 = vld [vmem:[#allocation44_spill] sm:$0xff] }
 0x4ef   : > { %7747 = vmatprep.subr.bf16.mxu0 %v11722_v6  ;;  %v11732_v6 = vld [vmem:[#allocation45_spill] sm:$0xff] }
 0x4f2   : > { %7749 = vmatpush1.bf16.msra.mxu0 %v11723_v12  ;;  %v10076_v12 = vpop.permute.xlu1 %3897 }
 0x4f3   : > { %7751 = vmatprep.subr.bf16.mxu0 %v11724_v29  ;;  %11733 = vst [vmem:[#allocation120_spill] sm:$0xff] %v10076_v12  ;;  %v11734_v29 = vld [vmem:[#allocation47_spill] sm:$0xff] }
 0x4f4   : > { %v11739_v12 = vld [vmem:[#allocation71_spill] sm:$0xff] }
 0x4f6   : > { %7753 = vmatpush1.bf16.msra.mxu0 %v11725_v57  ;;  %v11735_v57 = vld [vmem:[#allocation49_spill] sm:$0xff] }
 0x4f7   : > { %7755 = vmatprep.subr.bf16.mxu0 %v11726_v32  ;;  %v11736_v32 = vld [vmem:[#allocation51_spill] sm:$0xff] }
 0x4fa   : > { %7757 = vmatpush1.bf16.msra.mxu0 %v11727_v56  ;;  %v10081_v56 = vpop.permute.xlu1 %4834 }
 0x4fb   : > { %7759 = vmatprep.subr.bf16.mxu0 %v11728_v43  ;;  %v11737_v43 = vld [vmem:[#allocation53_spill] sm:$0xff] }
 0x4fe   : > { %7761 = vmatpush1.bf16.msra.mxu0 %v11729_v46  ;;  %v4755_v46 = vmul.f32 %v10037_v5, %v9986_v3  ;;  %v11744_v5 = vld [vmem:[#allocation78_spill] sm:$0xff] }
 0x4ff   : > { %7763 = vmatprep.subr.bf16.mxu0 %v11730_v15  ;;  %v11743_v15 = vld [vmem:[#allocation75_spill] sm:$0xff] }
 0x502   : > { %7765 = vmatpush1.bf16.msra.mxu0 %v11731_v21  ;;  %v4838_v21 = vmul.f32 %v10081_v56, %v9988_v37 }
 0x503   : > { %7767 = vmatprep.subr.bf16.mxu0 %v11732_v6  ;;  %v11738_v6 = vld [vmem:[#allocation70_spill] sm:$0xff] }
 0x506   : > { %7769 = vmatpush1.bf16.msra.mxu0 %v11734_v29  ;;  %v11740_v29 = vld [vmem:[#allocation72_spill] sm:$0xff] }
 0x507   : > { %7771 = vmatprep.subr.bf16.mxu0 %v11735_v57  ;;  %v11741_v57 = vld [vmem:[#allocation73_spill] sm:$0xff] }
 0x50a   : > { %7773 = vmatpush1.bf16.msra.mxu0 %v11736_v32  ;;  %v11742_v32 = vld [vmem:[#allocation74_spill] sm:$0xff] }
 0x50b   : > { %7775 = vmatprep.subr.bf16.mxu0 %v11737_v43  ;;  %v11745_v43 = vld [vmem:[#allocation79_spill] sm:$0xff] }
 0x50d   : > { %4822 = vmatmul.mubr.f32.vlgmr.msra.gmra.mrb[2].mxu0 %v4755_v46  ;;  %v11747_v46 = vld [vmem:[#allocation83_spill] sm:$0xff] }
 0x50e   : > { %7777 = vmatpush1.bf16.msra.mxu0 %v11738_v6  ;;  %4903 = vmatprep.mubr.f32.mxu0 %v4838_v21  ;;  %v11748_v6 = vld [vmem:[#allocation86_spill] sm:$0xff]  ;;  %v11749_v21 = vld [vmem:[#allocation87_spill] sm:$0xff] }
 0x50f   : > { %7779 = vmatprep.subr.bf16.mxu0 %v11739_v12  ;;  %v11750_v12 = vld [vmem:[#allocation90_spill] sm:$0xff] }
 0x512   : > { %7781 = vmatpush1.bf16.msra.mxu0 %v11740_v29  ;;  %v11751_v29 = vld [vmem:[#allocation91_spill] sm:$0xff] }
 0x513   : > { %7783 = vmatprep.subr.bf16.mxu0 %v11741_v57  ;;  %v11752_v57 = vld [vmem:[#allocation94_spill] sm:$0xff] }
 0x516   : > { %7785 = vmatpush1.bf16.msra.mxu0 %v11742_v32  ;;  %v11753_v32 = vld [vmem:[#allocation95_spill] sm:$0xff] }
 0x517   : > { %7787 = vmatprep.subr.bf16.mxu0 %v11743_v15  ;;  %v11754_v15 = vld [vmem:[#allocation98_spill] sm:$0xff] }
 0x51a   : > { %7789 = vmatpush1.bf16.msra.mxu0 %v11744_v5  ;;  %v11755_v5 = vld [vmem:[#allocation99_spill] sm:$0xff] }
 0x51b   : > { %7791 = vmatprep.subr.bf16.mxu0 %v11745_v43  ;;  %v11756_v43 = vld [vmem:[#allocation102_spill] sm:$0xff] }
 0x51e   : > { %7793 = vmatpush1.bf16.msra.mxu0 %v11746_v31  ;;  %v11757_v31 = vld [vmem:[#allocation103_spill] sm:$0xff] }
 0x51f   : > { %7795 = vmatprep.subr.bf16.mxu0 %v11747_v46  ;;  %v2704_v46 = vld [vmem:[#allocation4 + $0x40] sm:$0xff] }
 0x522   : > { %7797 = vmatpush1.bf16.msra.mxu0 %v11748_v6  ;;  %v2705_v6 = vld [vmem:[#allocation4 + $0x48] sm:$0xff] }
 0x523   : > { %7799 = vmatprep.subr.bf16.mxu0 %v11749_v21  ;;  %v6883_v21 = vpack.c.bf16 %v2705_v6, %v2704_v46  ;;  %v2709_v6 = vld [vmem:[#allocation4 + $0x68] sm:$0xff]  ;;  %v11762_v46 = vld [vmem:[#allocation114_spill] sm:$0xff] }
 0x526   : > { %7801 = vmatpush1.bf16.msra.mxu0 %v11750_v12  ;;  %v11759_v12 = vld [vmem:[#allocation107_spill] sm:$0xff] }
 0x527   : > { %7803 = vmatprep.subr.bf16.mxu0 %v11751_v29  ;;  %v11347_v29 = vmov 0.0|0.0  }
 0x528   : > { %6882 = vmatprep.subr.bf16.mxu1 %v11347_v29 }
 0x529   : > { %6884 = vmatpush3.bf16.msra.mxu1 %v6883_v21  ;;  %v11764_v21 = vld [vmem:[#allocation115_spill] sm:$0xff] }
 0x52a   : > { %7805 = vmatpush1.bf16.msra.mxu0 %v11752_v57  ;;  %6885 = vmatprep.subr.bf16.mxu1 %v11347_v29  ;;  %v11761_v57 = vld [vmem:[#allocation111_spill] sm:$0xff] }
 0x52b   : > { %7807 = vmatprep.subr.bf16.mxu0 %v11753_v32  ;;  %v2707_v32 = vld [vmem:[#allocation4 + $0x58] sm:$0xff] }
 0x52e   : > { %7809 = vmatpush1.bf16.msra.mxu0 %v11754_v15  ;;  %v2706_v15 = vld [vmem:[#allocation4 + $0x50] sm:$0xff] }
 0x52f   : > { %7811 = vmatprep.subr.bf16.mxu0 %v11755_v5  ;;  %v11760_v5 = vld [vmem:[#allocation110_spill] sm:$0xff] }
 0x532   : > { %7813 = vmatpush1.bf16.msra.mxu0 %v11756_v43  ;;  %v6886_v43 = vpack.c.bf16 %v2707_v32, %v2706_v15  ;;  %v11765_v15 = vld [vmem:[#allocation118_spill] sm:$0xff] }
 0x533   : > { %7815 = vmatprep.subr.bf16.mxu0 %v11757_v31  ;;  %v10116_v31 = vpop.permute.xlu0 %3990 }
 0x534   : > { %6887 = vmatpush3.bf16.msra.mxu1 %v6886_v43  ;;  %11763 = vst [vmem:[#allocation128_spill] sm:$0xff] %v10116_v31  ;;  %v11766_v43 = vld [vmem:[#allocation119_spill] sm:$0xff]  ;;  %v11830_v31 = vld [vmem:[#allocation190_spill] sm:$0xff] }
 0x535   : > { %6888 = vmatprep.subr.bf16.mxu1 %v11347_v29 }
 0x536   : > { %7817 = vmatpush1.bf16.msra.mxu0 %v11758_v62  ;;  %v2708_v62 = vld [vmem:[#allocation4 + $0x60] sm:$0xff] }
 0x537   : > { %7819 = vmatprep.subr.bf16.mxu0 %v11759_v12  ;;  %v6889_v12 = vpack.c.bf16 %v2709_v6, %v2708_v62  ;;  %v11768_v62 = vld [vmem:[#allocation122_spill] sm:$0xff]  ;;  %v11769_v6 = vld [vmem:[#allocation123_spill] sm:$0xff] }
 0x539   : > { %6890 = vmatpush3.bf16.msra.mxu1 %v6889_v12  ;;  %v11770_v12 = vmov 0.0  }
 0x53a   : > { %7821 = vmatpush1.bf16.msra.mxu0 %v11760_v5  ;;  %6891 = vmatprep.subr.bf16.mxu1 %v11347_v29  ;;  %v2711_v5 = vld [vmem:[#allocation4 + $0x78] sm:$0xff] }
 0x53b   : > { %7823 = vmatprep.subr.bf16.mxu0 %v11761_v57  ;;  %v6892_v32 = vpack.c.bf16 %v2711_v5, %v2710_v61  ;;  %v10122_v57 = vpop.permute.xlu0 %3995  ;;  %6018 = vmatprep.mubr.msk.f32.mxu1 %vm8514_vm2, %v11770_v12  ;;  %v4837_v61 = vmul.f32 %v10081_v56, %v9986_v3  ;;  %v11772_v5 = vld [vmem:[#allocation127_spill] sm:$0xff] }
 0x53c   : > { %11767 = vst [vmem:[#allocation24_spill] sm:$0xff] %v10122_v57  ;;  %v11774_v57 = vld [vmem:[#allocation136_spill] sm:$0xff]  ;;  %v11777_v56 = vld [vmem:[#allocation139_spill] sm:$0xff] }
 0x53d   : > { %6893 = vmatpush3.bf16.msra.mxu1 %v6892_v32 }
 0x53e   : > { %7825 = vmatpush1.bf16.msra.mxu0 %v11762_v46  ;;  %6894 = vmatprep.subr.bf16.mxu1 %v11347_v29  ;;  %v11773_v29 = vld [vmem:[#allocation134_spill] sm:$0xff] }
 0x53f   : > { %7827 = vmatprep.subr.bf16.mxu0 %v11764_v21  ;;  %v11771_v21 = vld [vmem:[#allocation126_spill] sm:$0xff]  ;;  %v4917_v46 = vpop.permute.xlu0 %4916 }
 0x540   : > { %v4920_v32 = vmul.f32 %v4917_v46, %v9988_v37 }
 0x542   : > { %7829 = vmatpush1.bf16.msra.mxu0 %v11765_v15  ;;  %v2687_v15 = vld [vmem:[#allocation4] sm:$0xff] }
 0x543   : > { %7831 = vmatprep.subr.bf16.mxu0 %v11766_v43  ;;  %v10161_v43 = vpop.permute.xlu1 %4088 }
 0x544   : > { %11795 = vst [vmem:[#allocation25_spill] sm:$0xff] %v10161_v43  ;;  %v4919_v43 = vmul.f32 %v4917_v46, %v9986_v3  ;;  %v11810_v46 = vld [vmem:[#allocation171_spill] sm:$0xff] }
 0x546   : > { %7833 = vmatpush1.bf16.msra.mxu0 %v11768_v62  ;;  %v11778_v62 = vld [vmem:[#allocation140_spill] sm:$0xff] }
 0x547   : > { %7835 = vmatprep.subr.bf16.mxu0 %v11769_v6  ;;  %v11776_v6 = vld [vmem:[#allocation138_spill] sm:$0xff] }
 0x54a   : > { %7837 = vmatpush1.bf16.msra.mxu0 %v11771_v21  ;;  %v11775_v21 = vld [vmem:[#allocation137_spill] sm:$0xff] }
 0x54b   : > { %7839 = vmatprep.subr.bf16.mxu0 %v11772_v5 }
 0x54d   : > { %4904 = vmatmul.mubr.f32.vlgmr.msra.gmra.mrb[2].mxu0 %v4837_v61 }
 0x54e   : > { %7841 = vmatpush1.bf16.msra.mxu0 %v9409_v53  ;;  %4985 = vmatprep.mubr.f32.mxu0 %v4920_v32  ;;  %v11779_v32 = vld [vmem:[#allocation141_spill] sm:$0xff] }
 0x54f   : > { %7843 = vmatprep.subr.bf16.mxu0 %v9414_v33  ;;  %v11780_v33 = vld [vmem:[#allocation142_spill] sm:$0xff] }
 0x552   : > { %7845 = vmatpush1.bf16.msra.mxu0 %v9424_v0  ;;  %v11781_v0 = vld [vmem:[#allocation143_spill] sm:$0xff] }
 0x553   : > { %7847 = vmatprep.subr.bf16.mxu0 %v11773_v29  ;;  %v11782_v29 = vld [vmem:[#allocation144_spill] sm:$0xff] }
 0x556   : > { %7849 = vmatpush1.bf16.msra.mxu0 %v11774_v57  ;;  %v11783_v57 = vld [vmem:[#allocation145_spill] sm:$0xff] }
 0x557   : > { %7851 = vmatprep.subr.bf16.mxu0 %v11775_v21  ;;  %v11784_v21 = vld [vmem:[#allocation146_spill] sm:$0xff] }
 0x55a   : > { %7853 = vmatpush1.bf16.msra.mxu0 %v11776_v6  ;;  %v11785_v6 = vld [vmem:[#allocation147_spill] sm:$0xff] }
 0x55b   : > { %7855 = vmatprep.subr.bf16.mxu0 %v11777_v56  ;;  %v11786_v56 = vld [vmem:[#allocation148_spill] sm:$0xff] }
 0x55d   : > { %v5810_v5 = vpop.f32.mrb[4].mxu1 }
 0x55e   : > { %7857 = vmatpush1.bf16.msra.mxu0 %v11778_v62  ;;  %v5811_v61 = vpop.f32.mrb[5].mxu1  ;;  %v11787_v62 = vld [vmem:[#allocation149_spill] sm:$0xff] }
 0x55f   : > { %v10143_v53 = vadd.f32 %v5811_v61, %v5810_v5  ;;  %7859 = vmatprep.subr.bf16.mxu0 %v11779_v32  ;;  %v11788_v5 = vld [vmem:[#allocation150_spill] sm:$0xff]  ;;  %v11789_v61 = vld [vmem:[#allocation151_spill] sm:$0xff]  ;;  %v11790_v32 = vld [vmem:[#allocation152_spill] sm:$0xff] }
 0x562   : > { %7861 = vmatpush1.bf16.msra.mxu0 %v11780_v33  ;;  %v11791_v33 = vld [vmem:[#allocation153_spill] sm:$0xff] }
 0x563   : > { %7863 = vmatprep.subr.bf16.mxu0 %v11781_v0  ;;  %v11792_v0 = vld [vmem:[#allocation154_spill] sm:$0xff] }
 0x566   : > { %7865 = vmatpush1.bf16.msra.mxu0 %v11782_v29  ;;  %v11793_v29 = vld [vmem:[#allocation155_spill] sm:$0xff] }
 0x567   : > { %7867 = vmatprep.subr.bf16.mxu0 %v11783_v57 }
 0x56a   : > { %7869 = vmatpush1.bf16.msra.mxu0 %v11784_v21  ;;  %v11794_v21 = vld [vmem:[#allocation156_spill] sm:$0xff] }
 0x56b   : > { %7871 = vmatprep.subr.bf16.mxu0 %v11785_v6 }
 0x56e   : > { %7873 = vmatpush1.bf16.msra.mxu0 %v11786_v56 }
 0x56f   : > { %7875 = vmatprep.subr.bf16.mxu0 %v11787_v62  ;;  %v11796_v62 = vld [vmem:[#allocation157_spill] sm:$0xff] }
 0x572   : > { %7877 = vmatpush1.bf16.msra.mxu0 %v11788_v5 }
 0x573   : > { %7879 = vmatprep.subr.bf16.mxu0 %v11789_v61  ;;  %v11797_v61 = vld [vmem:[#allocation158_spill] sm:$0xff] }
 0x576   : > { %7881 = vmatpush1.bf16.msra.mxu0 %v11790_v32  ;;  %v11801_v32 = vld [vmem:[#allocation162_spill] sm:$0xff] }
 0x577   : > { %7883 = vmatprep.subr.bf16.mxu0 %v11791_v33  ;;  %v10167_v33 = vpop.permute.xlu1 %4093 }
 0x578   : > { %11798 = vst [vmem:[#allocation26_spill] sm:$0xff] %v10167_v33  ;;  %v11805_v33 = vld [vmem:[#allocation166_spill] sm:$0xff] }
 0x57a   : > { %7885 = vmatpush1.bf16.msra.mxu0 %v11792_v0  ;;  %v11799_v0 = vld [vmem:[#allocation160_spill] sm:$0xff] }
 0x57b   : > { %7887 = vmatprep.subr.bf16.mxu0 %v11793_v29  ;;  %v11800_v29 = vld [vmem:[#allocation161_spill] sm:$0xff] }
 0x57d   : > { %v5845_v57 = vpop.f32.mrb[6].mxu1 }
 0x57e   : > { %7889 = vmatpush1.bf16.msra.mxu0 %v11794_v21  ;;  %v5846_v6 = vpop.f32.mrb[7].mxu1  ;;  %v4999_v21 = vpop.permute.xlu1 %4998 }
 0x57f   : > { %v5847_v56 = vadd.f32 %v5846_v6, %v5845_v57  ;;  %7891 = vmatprep.subr.bf16.mxu0 %v11796_v62  ;;  %v11802_v57 = vld [vmem:[#allocation163_spill] sm:$0xff]  ;;  %v5002_v6 = vmul.f32 %v4999_v21, %v9988_v37  ;;  %v11820_v62 = vld [vmem:[#allocation181_spill] sm:$0xff] }
 0x581   : > { %v2677_v5 = vmax.f32 %v10143_v53, %v5847_v56  ;;  %v11803_v53 = vld [vmem:[#allocation164_spill] sm:$0xff]  ;;  %v11804_v56 = vld [vmem:[#allocation165_spill] sm:$0xff] }
 0x582   : > { %7893 = vmatpush1.bf16.msra.mxu0 %v11797_v61  ;;  %v11811_v61 = vld [vmem:[#allocation172_spill] sm:$0xff] }
 0x583   : > { %7895 = vmatprep.subr.bf16.mxu0 %v9505_v47  ;;  %v11809_v47 = vld [vmem:[#allocation170_spill] sm:$0xff] }
 0x586   : > { %7897 = vmatpush1.bf16.msra.mxu0 %v11799_v0  ;;  %v11806_v0 = vld [vmem:[#allocation167_spill] sm:$0xff] }
 0x587   : > { %7899 = vmatprep.subr.bf16.mxu0 %v11800_v29  ;;  %v11807_v29 = vld [vmem:[#allocation168_spill] sm:$0xff] }
 0x58a   : > { %7901 = vmatpush1.bf16.msra.mxu0 %v11801_v32  ;;  %v11808_v32 = vld [vmem:[#allocation169_spill] sm:$0xff] }
 0x58b   : > { %7903 = vmatprep.subr.bf16.mxu0 %v11802_v57 }
 0x58d   : > { %4986 = vmatmul.mubr.f32.vlgmr.msra.gmra.mrb[2].mxu0 %v4919_v43 }
 0x58e   : > { %7905 = vmatpush1.bf16.msra.mxu0 %v11803_v53  ;;  %5067 = vmatprep.mubr.f32.mxu0 %v5002_v6  ;;  %v11812_v6 = vld [vmem:[#allocation173_spill] sm:$0xff] }
 0x58f   : > { %7907 = vmatprep.subr.bf16.mxu0 %v11804_v56  ;;  %v11813_v56 = vld [vmem:[#allocation174_spill] sm:$0xff] }
 0x592   : > { %7909 = vmatpush1.bf16.msra.mxu0 %v11805_v33  ;;  %v11814_v33 = vld [vmem:[#allocation175_spill] sm:$0xff] }
 0x593   : > { %7911 = vmatprep.subr.bf16.mxu0 %v11806_v0  ;;  %v11815_v0 = vld [vmem:[#allocation176_spill] sm:$0xff] }
 0x596   : > { %7913 = vmatpush1.bf16.msra.mxu0 %v11807_v29  ;;  %v11816_v29 = vld [vmem:[#allocation177_spill] sm:$0xff] }
 0x597   : > { %7915 = vmatprep.subr.bf16.mxu0 %v11808_v32  ;;  %v11817_v32 = vld [vmem:[#allocation178_spill] sm:$0xff] }
 0x59a   : > { %7917 = vmatpush1.bf16.msra.mxu0 %v11809_v47  ;;  %v11818_v47 = vld [vmem:[#allocation179_spill] sm:$0xff] }
 0x59b   : > { %7919 = vmatprep.subr.bf16.mxu0 %v11810_v46  ;;  %v11819_v46 = vld [vmem:[#allocation180_spill] sm:$0xff] }
 0x59d   : > { %v5880_v57 = vpop.f32.mrb[8].mxu1 }
 0x59e   : > { %7921 = vmatpush1.bf16.msra.mxu0 %v11811_v61  ;;  %v5881_v43 = vpop.f32.mrb[9].mxu1  ;;  %v11821_v61 = vld [vmem:[#allocation182_spill] sm:$0xff] }
 0x59f   : > { %v5882_v53 = vadd.f32 %v5881_v43, %v5880_v57  ;;  %7923 = vmatprep.subr.bf16.mxu0 %v11812_v6  ;;  %v11822_v57 = vld [vmem:[#allocation183_spill] sm:$0xff]  ;;  %v11823_v43 = vld [vmem:[#allocation184_spill] sm:$0xff]  ;;  %v10200_v6 = vpop.permute.xlu0 %4186 }
 0x5a0   : > { %11828 = vst [vmem:[#allocation27_spill] sm:$0xff] %v10200_v6  ;;  %v2689_v6 = vld [vmem:[#allocation4 + $0x10] sm:$0xff] }
 0x5a2   : > { %7925 = vmatpush1.bf16.msra.mxu0 %v11813_v56  ;;  %v11824_v56 = vld [vmem:[#allocation185_spill] sm:$0xff] }
 0x5a3   : > { %7927 = vmatprep.subr.bf16.mxu0 %v11814_v33  ;;  %v11825_v33 = vld [vmem:[#allocation186_spill] sm:$0xff] }
 0x5a6   : > { %7929 = vmatpush1.bf16.msra.mxu0 %v11815_v0  ;;  %v11826_v0 = vld [vmem:[#allocation187_spill] sm:$0xff] }
 0x5a7   : > { %7931 = vmatprep.subr.bf16.mxu0 %v11816_v29 }
 0x5aa   : > { %7933 = vmatpush1.bf16.msra.mxu0 %v11817_v32  ;;  %v11827_v32 = vld [vmem:[#allocation188_spill] sm:$0xff] }
 0x5ab   : > { %7935 = vmatprep.subr.bf16.mxu0 %v11818_v47 }
 0x5ae   : > { %7937 = vmatpush1.bf16.msra.mxu0 %v11819_v46 }
 0x5af   : > { %7939 = vmatprep.subr.bf16.mxu0 %v11820_v62  ;;  %v11829_v62 = vld [vmem:[#allocation189_spill] sm:$0xff] }
 0x5b2   : > { %7941 = vmatpush1.bf16.msra.mxu0 %v11821_v61 }
 0x5b3   : > { %7943 = vmatprep.subr.bf16.mxu0 %v11822_v57  ;;  %v2688_v57 = vld [vmem:[#allocation4 + $0x8] sm:$0xff] }
 0x5b6   : > { %7945 = vmatpush1.bf16.msra.mxu0 %v11823_v43 }
 0x5b7   : > { %7947 = vmatprep.subr.bf16.mxu0 %v11824_v56  ;;  %v11831_v56 = vld [vmem:[#allocation191_spill] sm:$0xff] }
 0x5ba   : > { %7949 = vmatpush1.bf16.msra.mxu0 %v11825_v33  ;;  %v10207_v33 = vpop.permute.xlu0 %4191 }
 0x5bb   : > { %7951 = vmatprep.subr.bf16.mxu0 %v11826_v0  ;;  %v6895_v0 = vpack.c.bf16 %v2688_v57, %v2687_v15  ;;  %11832 = vst [vmem:[#allocation28_spill] sm:$0xff] %v10207_v33  ;;  %v2691_v15 = vld [vmem:[#allocation4 + $0x20] sm:$0xff]  ;;  %v11836_v57 = vld [vmem:[#allocation194_spill] sm:$0xff]  ;;  %v5001_v33 = vmul.f32 %v4999_v21, %v9986_v3 }
 0x5bc   : > { %v2868_v21 = vld [vmem:[#allocation4 + $0x80] sm:$0xff] }
 0x5bd   : > { %v5915_v29 = vpop.f32.mrb[10].mxu1 }
 0x5be   : > { %7953 = vmatpush1.bf16.msra.mxu0 %v11827_v32  ;;  %v5916_v47 = vpop.f32.mrb[11].mxu1 }
 0x5bf   : > { %v5917_v46 = vadd.f32 %v5916_v47, %v5915_v29  ;;  %7955 = vmatprep.subr.bf16.mxu0 %v11829_v62  ;;  %v2690_v47 = vld [vmem:[#allocation4 + $0x18] sm:$0xff]  ;;  %v11833_v29 = vld [vmem:[#allocation192_spill] sm:$0xff] }
 0x5c1   : > { %v2678_v61 = vmax.f32 %v5882_v53, %v5917_v46  ;;  %v11834_v53 = vld [vmem:[#allocation193_spill] sm:$0xff] }
 0x5c2   : > { %7957 = vmatpush1.bf16.msra.mxu0 %v11830_v31  ;;  %v2692_v46 = vld [vmem:[#allocation4 + $0x28] sm:$0xff]  ;;  %v11841_v31 = vld [vmem:[#allocation199_spill] sm:$0xff] }
 0x5c3   : > { %v10204_v43 = vmax.f32 %v2677_v5, %v2678_v61  ;;  %7959 = vmatprep.subr.bf16.mxu0 %v11831_v56  ;;  %v6898_v5 = vpack.c.bf16 %v2690_v47, %v2689_v6  ;;  %v11835_v61 = vmov 0.0|0.0   ;;  %v2693_v6 = vld [vmem:[#allocation4 + $0x30] sm:$0xff]  ;;  %v2694_v47 = vld [vmem:[#allocation4 + $0x38] sm:$0xff] }
 0x5c4   : > { %v6904_v56 = vpack.c.bf16 %v2694_v47, %v2693_v6  ;;  %v2873_v47 = vld [vmem:[#allocation4 + $0xa8] sm:$0xff] }
 0x5c5   : > { %v2702_v32 = vmul.f32 %v9958_v23, %v10204_v43  ;;  %v10218_v23 = vpop.permute.xlu0 %5080 }
 0x5c6   : > { %7961 = vmatpush1.bf16.msra.mxu0 %v11833_v29  ;;  %v11837_v29 = vld [vmem:[#allocation195_spill] sm:$0xff] }
 0x5c7   : > { %6019 = vmatmul.mubr.msk.f32.vlgmr.msra.gmra.mrb[12].mxu1 %vm2712_vm3, %v2702_v32  ;;  %7963 = vmatprep.subr.bf16.mxu0 %v11834_v53  ;;  %v6901_v32 = vpack.c.bf16 %v2692_v46, %v2691_v15  ;;  %v11838_v53 = vld [vmem:[#allocation196_spill] sm:$0xff]  ;;  %v2686_v15 = vmul.f32 %v9962_v9, %v10204_v43  ;;  %v2870_v46 = vld [vmem:[#allocation4 + $0x90] sm:$0xff] }
 0x5c8   : > { %6896 = vmatpush3.bf16.msra.mxu1 %v6895_v0  ;;  %6037 = vmatprep.mubr.msk.f32.mxu1 %vm8514_vm2, %v11770_v12  ;;  %v5084_v0 = vmul.f32 %v10218_v23, %v9988_v37  ;;  %v11844_v9 = vld [vmem:[#allocation202_spill] sm:$0xff] }
 0x5c9   : > { %6897 = vmatprep.subr.bf16.mxu1 %v11835_v61 }
 0x5ca   : > { %7965 = vmatpush1.bf16.msra.mxu0 %v11836_v57  ;;  %v11839_v57 = vld [vmem:[#allocation197_spill] sm:$0xff] }
 0x5cb   : > { %7967 = vmatprep.subr.bf16.mxu0 %v11837_v29  ;;  %v11840_v29 = vld [vmem:[#allocation198_spill] sm:$0xff] }
 0x5cc   : > { %6899 = vmatpush3.bf16.msra.mxu1 %v6898_v5  ;;  %v2869_v5 = vld [vmem:[#allocation4 + $0x88] sm:$0xff] }
 0x5cd   : > { %5068 = vmatmul.mubr.f32.vlgmr.msra.gmra.mrb[2].mxu0 %v5001_v33  ;;  %6900 = vmatprep.subr.bf16.mxu1 %v11835_v61  ;;  %v6907_v33 = vpack.c.bf16 %v2869_v5, %v2868_v21  ;;  %v11845_v21 = vld [vmem:[#allocation203_spill] sm:$0xff] }
 0x5ce   : > { %7969 = vmatpush1.bf16.msra.mxu0 %v11838_v53  ;;  %5149 = vmatprep.mubr.f32.mxu0 %v5084_v0  ;;  %v2871_v0 = vld [vmem:[#allocation4 + $0x98] sm:$0xff] }
 0x5cf   : > { %7971 = vmatprep.subr.bf16.mxu0 %v11839_v57  ;;  %v11842_v57 = vld [vmem:[#allocation200_spill] sm:$0xff]  ;;  %v6910_v6 = vpack.c.bf16 %v2871_v0, %v2870_v46 }
 0x5d0   : > { %6902 = vmatpush3.bf16.msra.mxu1 %v6901_v32  ;;  %v11843_v32 = vld [vmem:[#allocation201_spill] sm:$0xff]  ;;  %v2959_v0 = vld [vmem:[#allocation4 + $0xc0] sm:$0xff] }
 0x5d1   : > { %6903 = vmatprep.subr.bf16.mxu1 %v11835_v61 }
 0x5d2   : > { %7973 = vmatpush1.bf16.msra.mxu0 %v11840_v29  ;;  %v11848_v29 = vld [vmem:[#allocation206_spill] sm:$0xff] }
 0x5d3   : > { %7975 = vmatprep.subr.bf16.mxu0 %v11841_v31  ;;  %v2960_v31 = vld [vmem:[#allocation4 + $0xc8] sm:$0xff] }
 0x5d4   : > { %6905 = vmatpush3.bf16.msra.mxu1 %v6904_v56  ;;  %v2872_v56 = vld [vmem:[#allocation4 + $0xa0] sm:$0xff] }
 0x5d5   : > { %6906 = vmatprep.subr.bf16.mxu1 %v11835_v61  ;;  %v6913_v5 = vpack.c.bf16 %v2873_v47, %v2872_v56  ;;  %v2866_v56 = vmul.f32 %v9960_v48, %v10204_v43  ;;  %v2961_v47 = vld [vmem:[#allocation4 + $0xd0] sm:$0xff] }
 0x5d6   : > { %7977 = vmatpush1.bf16.msra.mxu0 %v11842_v57  ;;  %v2875_v57 = vld [vmem:[#allocation4 + $0xb8] sm:$0xff] }
 0x5d7   : > { %6038 = vmatmul.mubr.msk.f32.vlgmr.msra.gmra.mrb[14].mxu1 %vm2712_vm3, %v2686_v15  ;;  %7979 = vmatprep.subr.bf16.mxu0 %v11843_v32  ;;  %v2874_v15 = vld [vmem:[#allocation4 + $0xb0] sm:$0xff]  ;;  %v11846_v32 = vld [vmem:[#allocation204_spill] sm:$0xff] }
 0x5d8   : > { %6908 = vmatpush3.bf16.msra.mxu1 %v6907_v33  ;;  %6056 = vmatprep.mubr.msk.f32.mxu1 %vm8514_vm2, %v11770_v12  ;;  %v11847_v33 = vld [vmem:[#allocation205_spill] sm:$0xff]  ;;  %v6916_v46 = vpack.c.bf16 %v2875_v57, %v2874_v15  ;;  %v11852_v48 = vld [vmem:[#allocation210_spill] sm:$0xff] }
 0x5d9   : > { %6909 = vmatprep.subr.bf16.mxu1 %v11835_v61  ;;  %v11851_v57 = vld [vmem:[#allocation209_spill] sm:$0xff] }
 0x5da   : > { %7981 = vmatpush1.bf16.msra.mxu0 %v11844_v9  ;;  %v11849_v9 = vld [vmem:[#allocation207_spill] sm:$0xff]  ;;  %v2964_v15 = vld [vmem:[#allocation4 + $0xe8] sm:$0xff] }
 0x5db   : > { %7983 = vmatprep.subr.bf16.mxu0 %v11845_v21 }
 0x5dc   : > { %6911 = vmatpush3.bf16.msra.mxu1 %v6910_v6  ;;  %v6919_v6 = vpack.c.bf16 %v2960_v31, %v2959_v0  ;;  %v2963_v31 = vld [vmem:[#allocation4 + $0xe0] sm:$0xff] }
 0x5dd   : > { %6912 = vmatprep.subr.bf16.mxu1 %v11835_v61  ;;  %v6925_v0 = vpack.c.bf16 %v2964_v15, %v2963_v31  ;;  %v2957_v31 = vmul.f32 %v9966_v60, %v10204_v43  ;;  %v3052_v15 = vld [vmem:[#allocation4 + $0x110] sm:$0xff] }
 0x5de   : > { %7985 = vmatpush1.bf16.msra.mxu0 %v11846_v32  ;;  %v2962_v32 = vld [vmem:[#allocation4 + $0xd8] sm:$0xff] }
 0x5df   : > { %7987 = vmatprep.subr.bf16.mxu0 %v11847_v33  ;;  %v11850_v33 = vld [vmem:[#allocation208_spill] sm:$0xff]  ;;  %v11860_v60 = vld [vmem:[#allocation218_spill] sm:$0xff] }
 0x5e0   : > { %6914 = vmatpush3.bf16.msra.mxu1 %v6913_v5  ;;  %v6922_v5 = vpack.c.bf16 %v2962_v32, %v2961_v47  ;;  %v11855_v32 = vld [vmem:[#allocation213_spill] sm:$0xff]  ;;  %v3050_v47 = vld [vmem:[#allocation4 + $0x100] sm:$0xff] }
 0x5e1   : > { %6915 = vmatprep.subr.bf16.mxu1 %v11835_v61 }
 0x5e2   : > { %7989 = vmatpush1.bf16.msra.mxu0 %v11848_v29  ;;  %v11856_v29 = vld [vmem:[#allocation214_spill] sm:$0xff] }
 0x5e3   : > { %7991 = vmatprep.subr.bf16.mxu0 %v11849_v9  ;;  %v3051_v9 = vld [vmem:[#allocation4 + $0x108] sm:$0xff] }
 0x5e4   : > { %6917 = vmatpush3.bf16.msra.mxu1 %v6916_v46  ;;  %v11853_v46 = vld [vmem:[#allocation211_spill] sm:$0xff] }
 0x5e5   : > { %6918 = vmatprep.subr.bf16.mxu1 %v11835_v61 }
 0x5e6   : > { %7993 = vmatpush1.bf16.msra.mxu0 %v11850_v33  ;;  %v2966_v33 = vld [vmem:[#allocation4 + $0xf8] sm:$0xff] }
 0x5e7   : > { %6057 = vmatmul.mubr.msk.f32.vlgmr.msra.gmra.mrb[16].mxu1 %vm2712_vm3, %v2866_v56  ;;  %7995 = vmatprep.subr.bf16.mxu0 %v11851_v57  ;;  %v2965_v56 = vld [vmem:[#allocation4 + $0xf0] sm:$0xff]  ;;  %v11854_v57 = vld [vmem:[#allocation212_spill] sm:$0xff] }
 0x5e8   : > { %6920 = vmatpush3.bf16.msra.mxu1 %v6919_v6  ;;  %6075 = vmatprep.mubr.msk.f32.mxu1 %vm8514_vm2, %v11770_v12  ;;  %v6928_v6 = vpack.c.bf16 %v2966_v33, %v2965_v56  ;;  %v11859_v33 = vld [vmem:[#allocation217_spill] sm:$0xff] }
 0x5e9   : > { %6921 = vmatprep.subr.bf16.mxu1 %v11835_v61  ;;  %v3055_v56 = vld [vmem:[#allocation4 + $0x128] sm:$0xff] }
 0x5ea   : > { %7997 = vmatpush1.bf16.msra.mxu0 %v11852_v48  ;;  %v11857_v48 = vld [vmem:[#allocation215_spill] sm:$0xff] }
 0x5eb   : > { %7999 = vmatprep.subr.bf16.mxu0 %v11853_v46 }
 0x5ec   : > { %6923 = vmatpush3.bf16.msra.mxu1 %v6922_v5  ;;  %v6931_v5 = vpack.c.bf16 %v3051_v9, %v3050_v47  ;;  %v3054_v9 = vld [vmem:[#allocation4 + $0x120] sm:$0xff] }
 0x5ed   : > { %6924 = vmatprep.subr.bf16.mxu1 %v11835_v61  ;;  %v6937_v47 = vpack.c.bf16 %v3055_v56, %v3054_v9 }
 0x5ee   : > { %8001 = vmatpush1.bf16.msra.mxu0 %v11854_v57  ;;  %v3053_v57 = vld [vmem:[#allocation4 + $0x118] sm:$0xff] }
 0x5ef   : > { %8003 = vmatprep.subr.bf16.mxu0 %v11855_v32  ;;  %v11858_v32 = vld [vmem:[#allocation216_spill] sm:$0xff] }
 0x5f0   : > { %6926 = vmatpush3.bf16.msra.mxu1 %v6925_v0  ;;  %v6934_v0 = vpack.c.bf16 %v3053_v57, %v3052_v15  ;;  %v10277_v57 = vpop.permute.xlu1 %4284 }
 0x5f1   : > { %6927 = vmatprep.subr.bf16.mxu1 %v11835_v61 }
 0x5f2   : > { %8005 = vmatpush1.bf16.msra.mxu0 %v11856_v29  ;;  %v11864_v29 = vld [vmem:[#allocation222_spill] sm:$0xff] }
 0x5f3   : > { %8007 = vmatprep.subr.bf16.mxu0 %v11857_v48  ;;  %v3141_v48 = vld [vmem:[#allocation4 + $0x140] sm:$0xff] }
 0x5f4   : > { %6929 = vmatpush3.bf16.msra.mxu1 %v6928_v6  ;;  %v11861_v6 = vld [vmem:[#allocation219_spill] sm:$0xff]  ;;  %v10283_v56 = vpop.permute.xlu1 %4289 }
 0x5f5   : > { %6930 = vmatprep.subr.bf16.mxu1 %v11835_v61  ;;  %11866 = vst [vmem:[#allocation29_spill] sm:$0xff] %v10283_v56  ;;  %v5083_v56 = vmul.f32 %v10218_v23, %v9986_v3  ;;  %v3232_v23 = vld [vmem:[#allocation4 + $0x180] sm:$0xff] }
 0x5f6   : > { %8009 = vmatpush1.bf16.msra.mxu0 %v11858_v32  ;;  %v3057_v32 = vld [vmem:[#allocation4 + $0x138] sm:$0xff] }
 0x5f7   : > { %6076 = vmatmul.mubr.msk.f32.vlgmr.msra.gmra.mrb[18].mxu1 %vm2712_vm3, %v2957_v31  ;;  %8011 = vmatprep.subr.bf16.mxu0 %v11859_v33  ;;  %v3056_v31 = vld [vmem:[#allocation4 + $0x130] sm:$0xff]  ;;  %v11862_v33 = vld [vmem:[#allocation220_spill] sm:$0xff] }
 0x5f8   : > { %6932 = vmatpush3.bf16.msra.mxu1 %v6931_v5  ;;  %6094 = vmatprep.mubr.msk.f32.mxu1 %vm8514_vm2, %v11770_v12  ;;  %v11863_v5 = vld [vmem:[#allocation221_spill] sm:$0xff]  ;;  %v6940_v15 = vpack.c.bf16 %v3057_v32, %v3056_v31  ;;  %v11867_v32 = vld [vmem:[#allocation224_spill] sm:$0xff] }
 0x5f9   : > { %6933 = vmatprep.subr.bf16.mxu1 %v11835_v61  ;;  %v11868_v31 = vld [vmem:[#allocation225_spill] sm:$0xff] }
 0x5fa   : > { %8013 = vmatpush1.bf16.msra.mxu0 %v11860_v60  ;;  %v3142_v60 = vld [vmem:[#allocation4 + $0x148] sm:$0xff] }
 0x5fb   : > { %8015 = vmatprep.subr.bf16.mxu0 %v11861_v6  ;;  %v6943_v9 = vpack.c.bf16 %v3142_v60, %v3141_v48  ;;  %v3145_v48 = vld [vmem:[#allocation4 + $0x160] sm:$0xff]  ;;  %v3146_v60 = vld [vmem:[#allocation4 + $0x168] sm:$0xff] }
 0x5fc   : > { %6935 = vmatpush3.bf16.msra.mxu1 %v6934_v0  ;;  %v11865_v0 = vld [vmem:[#allocation223_spill] sm:$0xff] }
 0x5fd   : > { %6936 = vmatprep.subr.bf16.mxu1 %v11835_v61  ;;  %v11874_v6 = vld [vmem:[#allocation231_spill] sm:$0xff] }
 0x5fe   : > { %8017 = vmatpush1.bf16.msra.mxu0 %v11862_v33  ;;  %v3048_v33 = vmul.f32 %v9964_v2, %v10204_v43  ;;  %v11869_v2 = vld [vmem:[#allocation226_spill] sm:$0xff] }
 0x5ff   : > { %8019 = vmatprep.subr.bf16.mxu0 %v11863_v5  ;;  %v3143_v5 = vld [vmem:[#allocation4 + $0x150] sm:$0xff] }
 0x600   : > { %6938 = vmatpush3.bf16.msra.mxu1 %v6937_v47  ;;  %v3144_v47 = vld [vmem:[#allocation4 + $0x158] sm:$0xff] }
 0x601   : > { %6939 = vmatprep.subr.bf16.mxu1 %v11835_v61 }
 0x602   : > { %8021 = vmatpush1.bf16.msra.mxu0 %v11864_v29  ;;  %v6946_v29 = vpack.c.bf16 %v3144_v47, %v3143_v5  ;;  %v6949_v5 = vpack.c.bf16 %v3146_v60, %v3145_v48  ;;  %v3148_v47 = vld [vmem:[#allocation4 + $0x178] sm:$0xff]  ;;  %v3139_v48 = vmul.f32 %v9970_v40, %v10204_v43  ;;  %v3234_v60 = vld [vmem:[#allocation4 + $0x190] sm:$0xff] }
 0x603   : > { %8023 = vmatprep.subr.bf16.mxu0 %v11865_v0  ;;  %v11877_v40 = vld [vmem:[#allocation234_spill] sm:$0xff] }
 0x604   : > { %6941 = vmatpush3.bf16.msra.mxu1 %v6940_v15  ;;  %v10295_v15 = vpop.permute.xlu1 %5162 }
 0x605   : > { %6942 = vmatprep.subr.bf16.mxu1 %v11835_v61 }
 0x606   : > { %8025 = vmatpush1.bf16.msra.mxu0 %v11867_v32  ;;  %v11870_v32 = vld [vmem:[#allocation227_spill] sm:$0xff] }
 0x607   : > { %6095 = vmatmul.mubr.msk.f32.vlgmr.msra.gmra.mrb[20].mxu1 %vm2712_vm3, %v3048_v33  ;;  %8027 = vmatprep.subr.bf16.mxu0 %v11868_v31  ;;  %v5166_v33 = vmul.f32 %v10295_v15, %v9988_v37  ;;  %v11871_v31 = vld [vmem:[#allocation228_spill] sm:$0xff] }
 0x608   : > { %6944 = vmatpush3.bf16.msra.mxu1 %v6943_v9  ;;  %6113 = vmatprep.mubr.msk.f32.mxu1 %vm8514_vm2, %v11770_v12  ;;  %v3147_v9 = vld [vmem:[#allocation4 + $0x170] sm:$0xff] }
 0x609   : > { %6945 = vmatprep.subr.bf16.mxu1 %v11835_v61  ;;  %v6952_v0 = vpack.c.bf16 %v3148_v47, %v3147_v9  ;;  %v3237_v47 = vld [vmem:[#allocation4 + $0x1a8] sm:$0xff] }
 0x60a   : > { %8029 = vmatpush1.bf16.msra.mxu0 %v11869_v2  ;;  %v11872_v2 = vld [vmem:[#allocation229_spill] sm:$0xff] }
 0x60b   : > { %8031 = vmatprep.subr.bf16.mxu0 %v11870_v32  ;;  %v11873_v32 = vld [vmem:[#allocation230_spill] sm:$0xff] }
 0x60c   : > { %6947 = vmatpush3.bf16.msra.mxu1 %v6946_v29  ;;  %v3233_v29 = vld [vmem:[#allocation4 + $0x188] sm:$0xff] }
 0x60d   : > { %5150 = vmatmul.mubr.f32.vlgmr.msra.gmra.mrb[2].mxu0 %v5083_v56  ;;  %6948 = vmatprep.subr.bf16.mxu1 %v11835_v61  ;;  %v6955_v56 = vpack.c.bf16 %v3233_v29, %v3232_v23  ;;  %v11878_v23 = vld [vmem:[#allocation235_spill] sm:$0xff] }
 0x60e   : > { %8033 = vmatpush1.bf16.msra.mxu0 %v11871_v31  ;;  %5231 = vmatprep.mubr.f32.mxu0 %v5166_v33  ;;  %v3235_v33 = vld [vmem:[#allocation4 + $0x198] sm:$0xff] }
 0x60f   : > { %8035 = vmatprep.subr.bf16.mxu0 %v11872_v2  ;;  %v11875_v2 = vld [vmem:[#allocation232_spill] sm:$0xff]  ;;  %v6958_v9 = vpack.c.bf16 %v3235_v33, %v3234_v60 }
 0x610   : > { %6950 = vmatpush3.bf16.msra.mxu1 %v6949_v5  ;;  %v11876_v5 = vld [vmem:[#allocation233_spill] sm:$0xff]  ;;  %v3323_v33 = vld [vmem:[#allocation4 + $0x1c0] sm:$0xff] }
 0x611   : > { %6951 = vmatprep.subr.bf16.mxu1 %v11835_v61 }
 0x612   : > { %8037 = vmatpush1.bf16.msra.mxu0 %v11873_v32  ;;  %v11881_v32 = vld [vmem:[#allocation238_spill] sm:$0xff] }
 0x613   : > { %8039 = vmatprep.subr.bf16.mxu0 %v11874_v6  ;;  %v3324_v6 = vld [vmem:[#allocation4 + $0x1c8] sm:$0xff] }
 0x614   : > { %6953 = vmatpush3.bf16.msra.mxu1 %v6952_v0  ;;  %v3236_v0 = vld [vmem:[#allocation4 + $0x1a0] sm:$0xff] }
 0x615   : > { %6954 = vmatprep.subr.bf16.mxu1 %v11835_v61  ;;  %v6961_v29 = vpack.c.bf16 %v3237_v47, %v3236_v0  ;;  %v3230_v0 = vmul.f32 %v9968_v7, %v10204_v43  ;;  %v3325_v47 = vld [vmem:[#allocation4 + $0x1d0] sm:$0xff] }
 0x616   : > { %8041 = vmatpush1.bf16.msra.mxu0 %v11875_v2  ;;  %v3239_v2 = vld [vmem:[#allocation4 + $0x1b8] sm:$0xff] }
 0x617   : > { %6114 = vmatmul.mubr.msk.f32.vlgmr.msra.gmra.mrb[22].mxu1 %vm2712_vm3, %v3139_v48  ;;  %8043 = vmatprep.subr.bf16.mxu0 %v11876_v5  ;;  %v3238_v48 = vld [vmem:[#allocation4 + $0x1b0] sm:$0xff]  ;;  %v11879_v5 = vld [vmem:[#allocation236_spill] sm:$0xff] }
 0x618   : > { %6956 = vmatpush3.bf16.msra.mxu1 %v6955_v56  ;;  %6132 = vmatprep.mubr.msk.f32.mxu1 %vm8514_vm2, %v11770_v12  ;;  %v11880_v56 = vld [vmem:[#allocation237_spill] sm:$0xff]  ;;  %v6964_v60 = vpack.c.bf16 %v3239_v2, %v3238_v48  ;;  %v11885_v7 = vld [vmem:[#allocation242_spill] sm:$0xff] }
 0x619   : > { %6957 = vmatprep.subr.bf16.mxu1 %v11835_v61  ;;  %v11884_v2 = vld [vmem:[#allocation241_spill] sm:$0xff] }
 0x61a   : > { %8045 = vmatpush1.bf16.msra.mxu0 %v11877_v40  ;;  %v11882_v40 = vld [vmem:[#allocation239_spill] sm:$0xff]  ;;  %v3328_v48 = vld [vmem:[#allocation4 + $0x1e8] sm:$0xff] }
 0x61b   : > { %8047 = vmatprep.subr.bf16.mxu0 %v11878_v23 }
 0x61c   : > { %6959 = vmatpush3.bf16.msra.mxu1 %v6958_v9  ;;  %v6967_v9 = vpack.c.bf16 %v3324_v6, %v3323_v33  ;;  %v3327_v6 = vld [vmem:[#allocation4 + $0x1e0] sm:$0xff] }
 0x61d   : > { %6960 = vmatprep.subr.bf16.mxu1 %v11835_v61  ;;  %v6973_v33 = vpack.c.bf16 %v3328_v48, %v3327_v6  ;;  %v3321_v6 = vmul.f32 %v9974_v38, %v10204_v43  ;;  %v3416_v48 = vld [vmem:[#allocation4 + $0x210] sm:$0xff] }
 0x61e   : > { %8049 = vmatpush1.bf16.msra.mxu0 %v11879_v5  ;;  %v3326_v5 = vld [vmem:[#allocation4 + $0x1d8] sm:$0xff] }
 0x61f   : > { %8051 = vmatprep.subr.bf16.mxu0 %v11880_v56  ;;  %v11883_v56 = vld [vmem:[#allocation240_spill] sm:$0xff]  ;;  %v11893_v38 = vld [vmem:[#allocation250_spill] sm:$0xff] }
 0x620   : > { %6962 = vmatpush3.bf16.msra.mxu1 %v6961_v29  ;;  %v6970_v29 = vpack.c.bf16 %v3326_v5, %v3325_v47  ;;  %v11888_v5 = vld [vmem:[#allocation245_spill] sm:$0xff]  ;;  %v3414_v47 = vld [vmem:[#allocation4 + $0x200] sm:$0xff] }
 0x621   : > { %6963 = vmatprep.subr.bf16.mxu1 %v11835_v61 }
 0x622   : > { %8053 = vmatpush1.bf16.msra.mxu0 %v11881_v32  ;;  %v11889_v32 = vld [vmem:[#allocation246_spill] sm:$0xff] }
 0x623   : > { %8055 = vmatprep.subr.bf16.mxu0 %v11882_v40  ;;  %v3415_v40 = vld [vmem:[#allocation4 + $0x208] sm:$0xff] }
 0x624   : > { %6965 = vmatpush3.bf16.msra.mxu1 %v6964_v60  ;;  %v11886_v60 = vld [vmem:[#allocation243_spill] sm:$0xff] }
 0x625   : > { %6966 = vmatprep.subr.bf16.mxu1 %v11835_v61 }
 0x626   : > { %8057 = vmatpush1.bf16.msra.mxu0 %v11883_v56  ;;  %v3330_v56 = vld [vmem:[#allocation4 + $0x1f8] sm:$0xff] }
 0x627   : > { %6133 = vmatmul.mubr.msk.f32.vlgmr.msra.gmra.mrb[24].mxu1 %vm2712_vm3, %v3230_v0  ;;  %8059 = vmatprep.subr.bf16.mxu0 %v11884_v2  ;;  %v3329_v0 = vld [vmem:[#allocation4 + $0x1f0] sm:$0xff]  ;;  %v11887_v2 = vld [vmem:[#allocation244_spill] sm:$0xff] }
 0x628   : > { %6968 = vmatpush3.bf16.msra.mxu1 %v6967_v9  ;;  %6151 = vmatprep.mubr.msk.f32.mxu1 %vm8514_vm2, %v11770_v12  ;;  %v6976_v9 = vpack.c.bf16 %v3330_v56, %v3329_v0  ;;  %v11892_v56 = vld [vmem:[#allocation249_spill] sm:$0xff] }
 0x629   : > { %6969 = vmatprep.subr.bf16.mxu1 %v11835_v61  ;;  %v3419_v0 = vld [vmem:[#allocation4 + $0x228] sm:$0xff] }
 0x62a   : > { %8061 = vmatpush1.bf16.msra.mxu0 %v11885_v7  ;;  %v11890_v7 = vld [vmem:[#allocation247_spill] sm:$0xff] }
 0x62b   : > { %8063 = vmatprep.subr.bf16.mxu0 %v11886_v60 }
 0x62c   : > { %6971 = vmatpush3.bf16.msra.mxu1 %v6970_v29  ;;  %v6979_v29 = vpack.c.bf16 %v3415_v40, %v3414_v47  ;;  %v3418_v40 = vld [vmem:[#allocation4 + $0x220] sm:$0xff] }
 0x62d   : > { %6972 = vmatprep.subr.bf16.mxu1 %v11835_v61  ;;  %v6985_v47 = vpack.c.bf16 %v3419_v0, %v3418_v40  ;;  %v3412_v40 = vmul.f32 %v9972_v18, %v10204_v43  ;;  %v11900_v0 = vld [vmem:[#allocation256_spill] sm:$0xff]  ;;  %v11904_v18 = vld [vmem:[#allocation261_spill] sm:$0xff]  ;;  %v11905_v43 = vld [vmem:[#allocation262_spill] sm:$0xff] }
 0x62e   : > { %8065 = vmatpush1.bf16.msra.mxu0 %v11887_v2  ;;  %v3417_v2 = vld [vmem:[#allocation4 + $0x218] sm:$0xff] }
 0x62f   : > { %8067 = vmatprep.subr.bf16.mxu0 %v11888_v5  ;;  %v11891_v5 = vld [vmem:[#allocation248_spill] sm:$0xff] }
 0x630   : > { %6974 = vmatpush3.bf16.msra.mxu1 %v6973_v33  ;;  %v6982_v33 = vpack.c.bf16 %v3417_v2, %v3416_v48  ;;  %v10355_v2 = vpop.permute.xlu0 %4382 }
 0x631   : > { %6975 = vmatprep.subr.bf16.mxu1 %v11835_v61 }
 0x632   : > { %8069 = vmatpush1.bf16.msra.mxu0 %v11889_v32 }
 0x633   : > { %8071 = vmatprep.subr.bf16.mxu0 %v11890_v7  ;;  %v11897_v7 = vld [vmem:[#allocation254_spill] sm:$0xff] }
 0x634   : > { %6977 = vmatpush3.bf16.msra.mxu1 %v6976_v9  ;;  %v11894_v9 = vld [vmem:[#allocation251_spill] sm:$0xff] }
 0x635   : > { %6978 = vmatprep.subr.bf16.mxu1 %v11835_v61 }
 0x636   : > { %8073 = vmatpush1.bf16.msra.mxu0 %v11891_v5  ;;  %v3421_v5 = vld [vmem:[#allocation4 + $0x238] sm:$0xff] }
 0x637   : > { %6152 = vmatmul.mubr.msk.f32.vlgmr.msra.gmra.mrb[26].mxu1 %vm2712_vm3, %v3321_v6  ;;  %8075 = vmatprep.subr.bf16.mxu0 %v11892_v56  ;;  %v3420_v6 = vld [vmem:[#allocation4 + $0x230] sm:$0xff]  ;;  %v11895_v56 = vld [vmem:[#allocation252_spill] sm:$0xff] }
 0x638   : > { %6980 = vmatpush3.bf16.msra.mxu1 %v6979_v29  ;;  %6170 = vmatprep.mubr.msk.f32.mxu1 %vm8514_vm2, %v11770_v12  ;;  %v11896_v29 = vld [vmem:[#allocation253_spill] sm:$0xff]  ;;  %v6988_v48 = vpack.c.bf16 %v3421_v5, %v3420_v6  ;;  %v11902_v6 = vld [vmem:[#allocation259_spill] sm:$0xff] }
 0x639   : > { %6981 = vmatprep.subr.bf16.mxu1 %v11835_v61 }
 0x63a   : > { %8077 = vmatpush1.bf16.msra.mxu0 %v11893_v38  ;;  %v11898_v38 = vld [vmem:[#allocation255_spill] sm:$0xff] }
 0x63b   : > { %8079 = vmatprep.subr.bf16.mxu0 %v11894_v9 }
 0x63c   : > { %6983 = vmatpush3.bf16.msra.mxu1 %v6982_v33  ;;  %v10361_v33 = vpop.permute.xlu0 %4387 }
 0x63d   : > { %6984 = vmatprep.subr.bf16.mxu1 %v11835_v61  ;;  %11899 = vst [vmem:[#allocation189_spill] sm:$0xff] %v10361_v33  ;;  %v11903_v33 = vld [vmem:[#allocation260_spill] sm:$0xff] }
 0x63e   : > { %8081 = vmatpush1.bf16.msra.mxu0 %v11895_v56 }
 0x63f   : > { %8083 = vmatprep.subr.bf16.mxu0 %v11896_v29 }
 0x640   : > { %6986 = vmatpush3.bf16.msra.mxu1 %v6985_v47  ;;  %v11901_v47 = vld [vmem:[#allocation258_spill] sm:$0xff]  ;;  %v5245_v5 = vpop.permute.xlu0 %5244 }
 0x641   : > { %6987 = vmatprep.subr.bf16.mxu1 %v11835_v61  ;;  %v5165_v61 = vmul.f32 %v10295_v15, %v9986_v3  ;;  %v11910_v15 = vld [vmem:[#allocation267_spill] sm:$0xff] }
 0x642   : > { %8085 = vmatpush1.bf16.msra.mxu0 %v11897_v7 }
 0x643   : > { %8087 = vmatprep.subr.bf16.mxu0 %v11898_v38 }
 0x644   : > { %6989 = vmatpush3.bf16.msra.mxu1 %v6988_v48  ;;  %v5248_v48 = vmul.f32 %v5245_v5, %v9988_v37  ;;  %v11912_v37 = vld [vmem:[#allocation269_spill] sm:$0xff] }
 0x646   : > { %8089 = vmatpush1.bf16.msra.mxu0 %v11900_v0  ;;  %v11909_v0 = vld [vmem:[#allocation266_spill] sm:$0xff] }
 0x647   : > { %6171 = vmatmul.mubr.msk.f32.vlgmr.msra.gmra.mrb[28].mxu1 %vm2712_vm3, %v3412_v40  ;;  %8091 = vmatprep.subr.bf16.mxu0 %v9812_v26  ;;  %v11906_v40 = vld [vmem:[#allocation263_spill] sm:$0xff]  ;;  %v11907_v26 = vld [vmem:[#allocation264_spill] sm:$0xff] }
 0x64a   : > { %8093 = vmatpush1.bf16.msra.mxu0 %v11901_v47  ;;  %v11908_v47 = vld [vmem:[#allocation265_spill] sm:$0xff] }
 0x64b   : > { %8095 = vmatprep.subr.bf16.mxu0 %v11902_v6  ;;  %v11911_v6 = vld [vmem:[#allocation268_spill] sm:$0xff] }
 0x64d   : > { %5232 = vmatmul.mubr.f32.vlgmr.msra.gmra.mrb[2].mxu0 %v5165_v61  ;;  %v11913_v61 = vld [vmem:[#allocation270_spill] sm:$0xff] }
 0x64e   : > { %8097 = vmatpush1.bf16.msra.mxu0 %v11903_v33  ;;  %5313 = vmatprep.mubr.f32.mxu0 %v5248_v48  ;;  %v11914_v48 = vld [vmem:[#allocation271_spill] sm:$0xff] }
 0x64f   : > { %8099 = vmatprep.subr.bf16.mxu0 %v11904_v18  ;;  %v11915_v18 = vld [vmem:[#allocation272_spill] sm:$0xff] }
 0x652   : > { %8101 = vmatpush1.bf16.msra.mxu0 %v11905_v43  ;;  %v11916_v43 = vld [vmem:[#allocation273_spill] sm:$0xff] }
 0x653   : > { %8103 = vmatprep.subr.bf16.mxu0 %v11906_v40  ;;  %v11917_v40 = vld [vmem:[#allocation274_spill] sm:$0xff] }
 0x656   : > { %8105 = vmatpush1.bf16.msra.mxu0 %v11907_v26  ;;  %v11918_v26 = vld [vmem:[#allocation275_spill] sm:$0xff] }
 0x657   : > { %8107 = vmatprep.subr.bf16.mxu0 %v11908_v47  ;;  %v11919_v47 = vld [vmem:[#allocation276_spill] sm:$0xff] }
 0x65a   : > { %8109 = vmatpush1.bf16.msra.mxu0 %v11909_v0  ;;  %v11920_v0 = vld [vmem:[#allocation277_spill] sm:$0xff] }
 0x65b   : > { %8111 = vmatprep.subr.bf16.mxu0 %v11910_v15  ;;  %v11921_v15 = vld [vmem:[#allocation278_spill] sm:$0xff] }
 0x65e   : > { %8113 = vmatpush1.bf16.msra.mxu0 %v11911_v6  ;;  %v11922_v6 = vld [vmem:[#allocation279_spill] sm:$0xff] }
 0x65f   : > { %8115 = vmatprep.subr.bf16.mxu0 %v11912_v37  ;;  %v11923_v37 = vld [vmem:[#allocation280_spill] sm:$0xff] }
 0x662   : > { %8117 = vmatpush1.bf16.msra.mxu0 %v11913_v61  ;;  %v11924_v61 = vld [vmem:[#allocation281_spill] sm:$0xff] }
 0x663   : > { %8119 = vmatprep.subr.bf16.mxu0 %v11914_v48  ;;  %v11925_v48 = vld [vmem:[#allocation282_spill] sm:$0xff] }
 0x666   : > { %8121 = vmatpush1.bf16.msra.mxu0 %v11915_v18  ;;  %v11926_v18 = vld [vmem:[#allocation283_spill] sm:$0xff] }
 0x667   : > { %8123 = vmatprep.subr.bf16.mxu0 %v11916_v43  ;;  %v11927_v43 = vld [vmem:[#allocation284_spill] sm:$0xff] }
 0x66a   : > { %8125 = vmatpush1.bf16.msra.mxu0 %v11917_v40 }
 0x66b   : > { %8127 = vmatprep.subr.bf16.mxu0 %v11918_v26 }
 0x66e   : > { %8129 = vmatpush1.bf16.msra.mxu0 %v11919_v47 }
 0x66f   : > { %8131 = vmatprep.subr.bf16.mxu0 %v11920_v0 }
 0x672   : > { %8133 = vmatpush1.bf16.msra.mxu0 %v11921_v15 }
 0x673   : > { %8135 = vmatprep.subr.bf16.mxu0 %v11922_v6 }
 0x676   : > { %8137 = vmatpush1.bf16.msra.mxu0 %v11923_v37 }
 0x677   : > { %8139 = vmatprep.subr.bf16.mxu0 %v11924_v61  ;;  %v5247_v61 = vmul.f32 %v5245_v5, %v9986_v3 }
 0x67a   : > { %8141 = vmatpush1.bf16.msra.mxu0 %v11925_v48 }
 0x67b   : > { %8143 = vmatprep.subr.bf16.mxu0 %v11926_v18 }
 0x67e   : > { %8145 = vmatpush1.bf16.msra.mxu0 %v11927_v43  ;;  %v3503_v43 = vld [vmem:[%s11928_s6] sm:$0xff] }
 0x67f   : > { %8147 = vmatprep.subr.bf16.mxu0 %v9899_v10  ;;  %6175 = vmatprep.mubr.msk.f32.mxu1 %vm3517_vm4, %v3503_v43 }
 0x682   : > { %8149 = vmatpush1.bf16.msra.mxu0 %v9902_v8 }
 0x683   : > { %8151 = vmatprep.subr.bf16.mxu0 %v9905_v36 }
 0x686   : > { %8153 = vmatpush1.bf16.msra.mxu0 %v9908_v39 }
 0x687   : > { %8155 = vmatprep.subr.bf16.mxu0 %v9911_v63 }
 0x68a   : > { %8157 = vmatpush1.bf16.msra.mxu0 %v9914_v42 }
 0x68d   : > { %5314 = vmatmul.mubr.f32.vlgmr.msra.gmra.mrb[2].mxu0 %v5247_v61 }
 0x69a   : > { %v2782_v48 = vpop.f32.mrb[12].mxu1 }
 0x69b   : > { %v6020_v37 = vpop.f32.mrb[13].mxu1 }
 0x6aa   : > { %v2855_v8 = vpop.f32.mrb[14].mxu1 }
 0x6ab   : > { %v2856_v36 = vadd.f32 %v2855_v8, %v2782_v48  ;;  %v6039_v10 = vpop.f32.mrb[15].mxu1  ;;  %v3604_v48 = vld [vmem:[#allocation7 + $0x18] sm:$0xff] }
 0x6ac   : > { %v3602_v10 = vld [vmem:[#allocation7 + $0x8] sm:$0xff] }
 0x6ba   : > { %v2945_v39 = vpop.f32.mrb[16].mxu1 }
 0x6bb   : > { %v2949_v18 = vadd.f32 %v2945_v39, %v2856_v36  ;;  %v6058_v63 = vpop.f32.mrb[17].mxu1 }
 0x6bc   : > { %v3601_v63 = vld [vmem:[#allocation7] sm:$0xff] }
 0x6ca   : > { %v3036_v6 = vpop.f32.mrb[18].mxu1 }
 0x6cb   : > { %v3040_v42 = vadd.f32 %v3036_v6, %v2949_v18  ;;  %v6077_v15 = vpop.f32.mrb[19].mxu1  ;;  %v3603_v6 = vld [vmem:[#allocation7 + $0x10] sm:$0xff]  ;;  %v3606_v18 = vld [vmem:[#allocation7 + $0x28] sm:$0xff] }
 0x6cc   : > { %v3608_v15 = vld [vmem:[#allocation7 + $0x38] sm:$0xff] }
 0x6da   : > { %v3127_v3 = vpop.f32.mrb[20].mxu1 }
 0x6db   : > { %v3131_v5 = vadd.f32 %v3127_v3, %v3040_v42  ;;  %v6096_v61 = vpop.f32.mrb[21].mxu1  ;;  %v6990_v3 = vpack.c.bf16 %v3604_v48, %v3602_v10  ;;  %v3614_v48 = vld [vmem:[#allocation7 + $0x68] sm:$0xff] }
 0x6dc   : > { %v3609_v61 = vld [vmem:[#allocation7 + $0x40] sm:$0xff] }
 0x6ea   : > { %v3218_v37 = vpop.f32.mrb[22].mxu1 }
 0x6eb   : > { %v3222_v0 = vadd.f32 %v3218_v37, %v3131_v5  ;;  %v6115_v47 = vpop.f32.mrb[23].mxu1  ;;  %v3611_v37 = vld [vmem:[#allocation7 + $0x50] sm:$0xff] }
 0x6ec   : > { %v3610_v47 = vld [vmem:[#allocation7 + $0x48] sm:$0xff] }
 0x6fa   : > { %v3309_v26 = vpop.f32.mrb[24].mxu1 }
 0x6fb   : > { %v3313_v40 = vadd.f32 %v3309_v26, %v3222_v0  ;;  %v6134_v33 = vpop.f32.mrb[25].mxu1  ;;  %v3504_v26 = vld [vmem:[%s11928_s6 + $0x8] sm:$0xff]  ;;  %v3607_v0 = vld [vmem:[#allocation7 + $0x30] sm:$0xff] }
 0x6fc   : > { %v6992_v33 = vpack.c.bf16 %v3603_v6, %v3601_v63  ;;  %v3613_v63 = vld [vmem:[#allocation7 + $0x60] sm:$0xff]  ;;  %v3615_v6 = vld [vmem:[#allocation7 + $0x70] sm:$0xff] }
 0x70a   : > { %v3400_v38 = vpop.f32.mrb[26].mxu1 }
 0x70b   : > { %v3404_v43 = vadd.f32 %v3400_v38, %v3313_v40  ;;  %v6153_v7 = vpop.f32.mrb[27].mxu1  ;;  %v6994_v38 = vpack.c.bf16 %v3608_v15, %v3606_v18  ;;  %v3612_v40 = vld [vmem:[#allocation7 + $0x58] sm:$0xff]  ;;  %v7004_v18 = vpack.c.bf16 %v3615_v6, %v3613_v63  ;;  %v11950_v63 = vld [vmem:[#allocation76_spill] sm:$0xff] }
 0x70c   : > { %v3605_v7 = vld [vmem:[#allocation7 + $0x20] sm:$0xff] }
 0x70d   : > { %v6996_v5 = vpack.c.bf16 %v3607_v0, %v3605_v7  ;;  %v11944_v7 = vld [vmem:[#allocation65_spill] sm:$0xff]  ;;  %v11945_v0 = vld [vmem:[#allocation66_spill] sm:$0xff]  ;;  %v11951_v6 = vld [vmem:[#allocation292_spill] sm:$0xff] }
 0x71a   : > { %v3491_v8 = vpop.f32.mrb[28].mxu1 }
 0x71b   : > { %v3495_v36 = vadd.f32 %v3491_v8, %v3404_v43  ;;  %v6172_v39 = vpop.f32.mrb[29].mxu1  ;;  %v7000_v43 = vpack.c.bf16 %v3611_v37, %v3609_v61  ;;  %v11949_v37 = vld [vmem:[#allocation291_spill] sm:$0xff] }
 0x71d   : > { %v3502_v42 = vadd.f32 %v9978_v45, %v3495_v36  ;;  %v6998_v45 = vpack.c.bf16 %v3612_v40, %v3610_v47  ;;  %v3616_v36 = vld [vmem:[#allocation7 + $0x78] sm:$0xff]  ;;  %v11947_v40 = vld [vmem:[#allocation68_spill] sm:$0xff] }
 0x71e   : > { %v7002_v39 = vpack.c.bf16 %v3616_v36, %v3614_v48  ;;  %v11946_v47 = vld [vmem:[#allocation67_spill] sm:$0xff] }
 0x71f   : > { %6173 = vmatprep.subr.mxu1 %v3502_v42 }
 0x720   : > { %6174 = vmatpush3.msra.mxu1 %v3502_v42 }
 0x721   : > { %6176 = vmatmul.mubr.msk.f32.vlgmr.msra.gmra.mrb[30].mxu1 %vm3517_vm4, %v3504_v26  ;;  %6991 = vmatprep.subr.bf16.mxu1 %v6990_v3 }
 0x722   : > { %6993 = vmatpush1.bf16.msra.mxu1 %v6992_v33  ;;  %3687 = vmatprep.mubr.f32.mxu1 %v11770_v12 }
 0x723   : > { %6995 = vmatprep.subr.bf16.mxu1 %v6994_v38 }
 0x726   : > { %6997 = vmatpush1.bf16.msra.mxu1 %v6996_v5  ;;  %v11948_v5 = vld [vmem:[#allocation69_spill] sm:$0xff] }
 0x727   : > { %6999 = vmatprep.subr.bf16.mxu1 %v6998_v45 }
 0x72a   : > { %7001 = vmatpush1.bf16.msra.mxu1 %v7000_v43 }
 0x72b   : > { %7003 = vmatprep.subr.bf16.mxu1 %v7002_v39 }
 0x72e   : > { %7005 = vmatpush1.bf16.msra.mxu1 %v7004_v18 }
 0x72f   : > { %7007 = vmatprep.subr.bf16.mxu1 %v8937_v22  ;;  %v11929_v22 = vld [vmem:[#allocation46_spill] sm:$0xff] }
 0x760   : > { %v10415_v8 = vpop.f32.mrb[2].mxu0 }
 0x761   : > { %v10417_v10 = vpop.f32.mrb[3].mxu0 }
 0x7f4   : > { %v6177_v15 = vpop.f32.mrb[30].mxu1 }
 0x7f5   : > { %v3590_v42 = vpop.f32.mrb[31].mxu1  ;;  %v3596_v26 = vadd.f32 %v6177_v15, %v9982_v59  ;;  %v11943_v59 = vld [vmem:[#allocation64_spill] sm:$0xff]  ;;  %v11952_v15 = vld [vmem:[#allocation77_spill] sm:$0xff] }
 0x7f6   : > { %v3591_v3 = vadd.f32 %v3590_v42, %v9976_v13  ;;  %v11942_v13 = vld [vmem:[#allocation63_spill] sm:$0xff] }
 0x7f7   : > { %v3600_v38 = vmax.f32 %v3596_v26, 0.0  ;;  %v11953_v26 = vld [vmem:[#allocation80_spill] sm:$0xff] }
 0x7f8   : > { %v3599_v33 = vmax.f32 %v3591_v3, 0.0 }
 0x7fa   : > { %5745 = vmatmul.mubr.msk.f32.vlgmr.msra.gmra.mrb[32].mxu1 %vm2712_vm3, %v3599_v33  ;;  %v11954_v33 = vld [vmem:[#allocation81_spill] sm:$0xff] }
 0x7fb   : > { %3693 = vmatprep.mubr.f32.mxu1 %v11770_v12  ;;  %7009 = vmatpush1.bf16.msra.mxu1 %v8945_v28  ;;  %v11930_v28 = vld [vmem:[#allocation48_spill] sm:$0xff] }
 0x7fc   : > { %7011 = vmatprep.subr.bf16.mxu1 %v8950_v35  ;;  %v11931_v35 = vld [vmem:[#allocation50_spill] sm:$0xff] }
 0x7fe   : > { %5746 = vmatmul.mubr.msk.f32.gmra.mrb[34].mxu1 %vm2712_vm3, %v3600_v38  ;;  %v11955_v38 = vld [vmem:[#allocation84_spill] sm:$0xff] }
 0x7ff   : > { %7013 = vmatpush1.bf16.msra.mxu1 %v8957_v44  ;;  %v11932_v44 = vld [vmem:[#allocation52_spill] sm:$0xff] }
 0x800   : > { %7015 = vmatprep.subr.bf16.mxu1 %v8963_v50  ;;  %v11933_v50 = vld [vmem:[#allocation54_spill] sm:$0xff] }
 0x803   : > { %7017 = vmatpush1.bf16.msra.mxu1 %v8975_v1  ;;  %v11934_v1 = vld [vmem:[#allocation55_spill] sm:$0xff] }
 0x804   : > { %7019 = vmatprep.subr.bf16.mxu1 %v8981_v4  ;;  %v11935_v4 = vld [vmem:[#allocation56_spill] sm:$0xff] }
 0x807   : > { %7021 = vmatpush1.bf16.msra.mxu1 %v8993_v20  ;;  %v11936_v20 = vld [vmem:[#allocation57_spill] sm:$0xff] }
 0x808   : > { %7023 = vmatprep.subr.bf16.mxu1 %v8999_v27  ;;  %v11937_v27 = vld [vmem:[#allocation58_spill] sm:$0xff] }
 0x80b   : > { %7025 = vmatpush1.bf16.msra.mxu1 %v9011_v49  ;;  %v11938_v49 = vld [vmem:[#allocation59_spill] sm:$0xff] }
 0x80c   : > { %7027 = vmatprep.subr.bf16.mxu1 %v9017_v54  ;;  %v11939_v54 = vld [vmem:[#allocation60_spill] sm:$0xff] }
 0x80f   : > { %7029 = vmatpush1.bf16.msra.mxu1 %v9029_v11  ;;  %v11940_v11 = vld [vmem:[#allocation61_spill] sm:$0xff] }
 0x810   : > { %7031 = vmatprep.subr.bf16.mxu1 %v9035_v16  ;;  %v11941_v16 = vld [vmem:[#allocation62_spill] sm:$0xff] }
 0x813   : > { %7033 = vmatpush1.bf16.msra.mxu1 %v11929_v22  ;;  %v11956_v22 = vld [vmem:[#allocation85_spill] sm:$0xff] }
 0x814   : > { %7035 = vmatprep.subr.bf16.mxu1 %v11930_v28  ;;  %v11957_v28 = vld [vmem:[#allocation88_spill] sm:$0xff] }
 0x817   : > { %7037 = vmatpush1.bf16.msra.mxu1 %v11931_v35  ;;  %v11958_v35 = vld [vmem:[#allocation89_spill] sm:$0xff] }
 0x818   : > { %7039 = vmatprep.subr.bf16.mxu1 %v11932_v44  ;;  %v11959_v44 = vld [vmem:[#allocation92_spill] sm:$0xff] }
 0x81b   : > { %7041 = vmatpush1.bf16.msra.mxu1 %v11933_v50  ;;  %v11960_v50 = vld [vmem:[#allocation93_spill] sm:$0xff] }
 0x81c   : > { %7043 = vmatprep.subr.bf16.mxu1 %v11934_v1  ;;  %v11961_v1 = vld [vmem:[#allocation96_spill] sm:$0xff] }
 0x81f   : > { %7045 = vmatpush1.bf16.msra.mxu1 %v11935_v4  ;;  %v11962_v4 = vld [vmem:[#allocation97_spill] sm:$0xff] }
 0x820   : > { %7047 = vmatprep.subr.bf16.mxu1 %v11936_v20  ;;  %v11963_v20 = vld [vmem:[#allocation100_spill] sm:$0xff] }
 0x823   : > { %7049 = vmatpush1.bf16.msra.mxu1 %v11937_v27  ;;  %v11964_v27 = vld [vmem:[#allocation101_spill] sm:$0xff] }
 0x824   : > { %7051 = vmatprep.subr.bf16.mxu1 %v11938_v49  ;;  %v11965_v49 = vld [vmem:[#allocation104_spill] sm:$0xff] }
 0x827   : > { %7053 = vmatpush1.bf16.msra.mxu1 %v11939_v54  ;;  %v11966_v54 = vld [vmem:[#allocation105_spill] sm:$0xff] }
 0x828   : > { %7055 = vmatprep.subr.bf16.mxu1 %v11940_v11  ;;  %v11967_v11 = vld [vmem:[#allocation108_spill] sm:$0xff] }
 0x82b   : > { %7057 = vmatpush1.bf16.msra.mxu1 %v11941_v16  ;;  %v11968_v16 = vld [vmem:[#allocation109_spill] sm:$0xff] }
 0x82c   : > { %7059 = vmatprep.subr.bf16.mxu1 %v11942_v13  ;;  %v11969_v13 = vld [vmem:[#allocation112_spill] sm:$0xff] }
 0x82f   : > { %7061 = vmatpush1.bf16.msra.mxu1 %v11943_v59  ;;  %v11970_v59 = vld [vmem:[#allocation113_spill] sm:$0xff] }
 0x830   : > { %7063 = vmatprep.subr.bf16.mxu1 %v11944_v7  ;;  %v11971_v7 = vld [vmem:[#allocation117_spill] sm:$0xff] }
 0x833   : > { %7065 = vmatpush1.bf16.msra.mxu1 %v11945_v0  ;;  %v11972_v0 = vld [vmem:[#allocation121_spill] sm:$0xff] }
 0x834   : > { %7067 = vmatprep.subr.bf16.mxu1 %v11946_v47  ;;  %v11973_v47 = vld [vmem:[#allocation124_spill] sm:$0xff] }
 0x837   : > { %7069 = vmatpush1.bf16.msra.mxu1 %v11947_v40  ;;  %v11974_v40 = vld [vmem:[#allocation125_spill] sm:$0xff] }
 0x838   : > { %7071 = vmatprep.subr.bf16.mxu1 %v11948_v5  ;;  %v11975_v5 = vld [vmem:[#allocation131_spill] sm:$0xff] }
 0x8cd   : > { %v10457_v45 = vpop.f32.mrb[32].mxu1 }
 0x8ce   : > { %v10459_v61 = vpop.f32.mrb[33].mxu1  ;;  %v3729_v48 = vmul.f32 %v11949_v37, %v10457_v45 }
 0x8cf   : > { %v3730_v43 = vmul.f32 %v11949_v37, %v10459_v61  ;;  %v3713_v3 = vmul.f32 %v10026_v51, %v10459_v61  ;;  %v11976_v37 = vld [vmem:[#allocation132_spill] sm:$0xff] }
 0x8d1   : > { %v10465_v36 = vpop.f32.mrb[34].mxu1  ;;  %3797 = vmatprep.mubr.f32.mxu1 %v3730_v43  ;;  %v11977_v43 = vld [vmem:[#allocation135_spill] sm:$0xff] }
 0x8d2   : > { %v10467_v39 = vpop.f32.mrb[35].mxu1  ;;  %3798 = vmatmul.mubr.f32.vlgmr.msra.gmra.mrb[36].mxu1 %v3729_v48  ;;  %v3731_v42 = vmul.f32 %v11951_v6, %v10465_v36  ;;  %v11979_v48 = vld [vmem:[#allocation116_spill] sm:$0xff] }
 0x8d3   : > { %7073 = vmatpush1.bf16.msra.mxu1 %v11950_v63  ;;  %v3732_v18 = vmul.f32 %v11951_v6, %v10467_v39  ;;  %v3715_v63 = vmul.f32 %v11979_v48, %v10467_v39  ;;  %v11980_v6 = vld [vmem:[#allocation18_spill] sm:$0xff] }
 0x8d4   : > { %7075 = vmatprep.subr.bf16.mxu1 %v11952_v15  ;;  %v11982_v15 = vld [vmem:[#allocation20_spill] sm:$0xff] }
 0x8d5   : > { %3803 = vmatprep.mubr.f32.mxu1 %v3732_v18  ;;  %v3901_v18 = vmul.f32 %v10071_v52, %v10459_v61 }
 0x8d6   : > { %3804 = vmatmul.mubr.f32.gmra.mrb[38].mxu1 %v3731_v42  ;;  %v11984_v42 = vld [vmem:[#allocation22_spill] sm:$0xff] }
 0x8d7   : > { %7077 = vmatpush1.bf16.msra.mxu1 %v11953_v26  ;;  %3874 = vmatprep.mubr.f32.mxu1 %v3713_v3  ;;  %v11985_v3 = vld [vmem:[#allocation23_spill] sm:$0xff]  ;;  %v11986_v26 = vld [vmem:[#allocation30_spill] sm:$0xff] }
 0x8d8   : > { %7079 = vmatprep.subr.bf16.mxu1 %v11954_v33  ;;  %v11987_v33 = vld [vmem:[#allocation31_spill] sm:$0xff] }
 0x8db   : > { %7081 = vmatpush1.bf16.msra.mxu1 %v11955_v38  ;;  %v11988_v38 = vld [vmem:[#allocation32_spill] sm:$0xff] }
 0x8dc   : > { %7083 = vmatprep.subr.bf16.mxu1 %v11956_v22  ;;  %v11989_v22 = vld [vmem:[#allocation33_spill] sm:$0xff] }
 0x8df   : > { %7085 = vmatpush1.bf16.msra.mxu1 %v11957_v28  ;;  %v11990_v28 = vld [vmem:[#allocation34_spill] sm:$0xff] }
 0x8e0   : > { %7087 = vmatprep.subr.bf16.mxu1 %v11958_v35  ;;  %v11997_v35 = vld [vmem:[#allocation41_spill] sm:$0xff] }
 0x8e3   : > { %7089 = vmatpush1.bf16.msra.mxu1 %v11959_v44  ;;  %v11998_v44 = vld [vmem:[#allocation42_spill] sm:$0xff] }
 0x8e4   : > { %7091 = vmatprep.subr.bf16.mxu1 %v11960_v50  ;;  %v11999_v50 = vld [vmem:[#allocation43_spill] sm:$0xff] }
 0x8e7   : > { %7093 = vmatpush1.bf16.msra.mxu1 %v11961_v1  ;;  %v12000_v1 = vld [vmem:[#allocation44_spill] sm:$0xff] }
 0x8e8   : > { %7095 = vmatprep.subr.bf16.mxu1 %v11962_v4  ;;  %v12001_v4 = vld [vmem:[#allocation45_spill] sm:$0xff] }
 0x8eb   : > { %7097 = vmatpush1.bf16.msra.mxu1 %v11963_v20  ;;  %v12002_v20 = vld [vmem:[#allocation47_spill] sm:$0xff] }
 0x8ec   : > { %7099 = vmatprep.subr.bf16.mxu1 %v11964_v27  ;;  %v12003_v27 = vld [vmem:[#allocation49_spill] sm:$0xff] }
 0x8ef   : > { %7101 = vmatpush1.bf16.msra.mxu1 %v11965_v49  ;;  %v12004_v49 = vld [vmem:[#allocation51_spill] sm:$0xff] }
 0x8f0   : > { %7103 = vmatprep.subr.bf16.mxu1 %v11966_v54  ;;  %v3900_v54 = vmul.f32 %v10071_v52, %v10457_v45  ;;  %v12011_v52 = vld [vmem:[#allocation73_spill] sm:$0xff] }
 0x8f3   : > { %7105 = vmatpush1.bf16.msra.mxu1 %v11967_v11  ;;  %v12005_v11 = vld [vmem:[#allocation53_spill] sm:$0xff] }
 0x8f4   : > { %7107 = vmatprep.subr.bf16.mxu1 %v11968_v16  ;;  %v12006_v16 = vld [vmem:[#allocation120_spill] sm:$0xff] }
 0x8f7   : > { %7109 = vmatpush1.bf16.msra.mxu1 %v11969_v13  ;;  %v3903_v13 = vmul.f32 %v12006_v16, %v10467_v39 }
 0x8f8   : > { %7111 = vmatprep.subr.bf16.mxu1 %v11970_v59  ;;  %v12007_v59 = vld [vmem:[#allocation70_spill] sm:$0xff] }
 0x8fb   : > { %7113 = vmatpush1.bf16.msra.mxu1 %v11697_v58  ;;  %v3712_v58 = vmul.f32 %v10026_v51, %v10457_v45  ;;  %v11983_v51 = vld [vmem:[#allocation21_spill] sm:$0xff] }
 0x8fc   : > { %7115 = vmatprep.subr.bf16.mxu1 %v11971_v7  ;;  %v3902_v7 = vmul.f32 %v12006_v16, %v10465_v36 }
 0x8ff   : > { %7117 = vmatpush1.bf16.msra.mxu1 %v11699_v30  ;;  %v11978_v30 = vld [vmem:[#allocation17_spill] sm:$0xff] }
 0x900   : > { %7119 = vmatprep.subr.bf16.mxu1 %v11972_v0  ;;  %v12008_v0 = vld [vmem:[#allocation71_spill] sm:$0xff] }
 0x903   : > { %7121 = vmatpush1.bf16.msra.mxu1 %v11973_v47  ;;  %v12009_v47 = vld [vmem:[#allocation128_spill] sm:$0xff] }
 0x904   : > { %7123 = vmatprep.subr.bf16.mxu1 %v11974_v40  ;;  %v3999_v40 = vmul.f32 %v12009_v47, %v10459_v61 }
 0x907   : > { %7125 = vmatpush1.bf16.msra.mxu1 %v11702_v41  ;;  %v11981_v41 = vld [vmem:[#allocation19_spill] sm:$0xff] }
 0x908   : > { %7127 = vmatprep.subr.bf16.mxu1 %v9406_v55  ;;  %v3714_v55 = vmul.f32 %v11979_v48, %v10465_v36  ;;  %v12016_v48 = vld [vmem:[#allocation82_spill] sm:$0xff] }
 0x90b   : > { %7129 = vmatpush1.bf16.msra.mxu1 %v11975_v5  ;;  %v12010_v5 = vld [vmem:[#allocation72_spill] sm:$0xff] }
 0x90c   : > { %7131 = vmatprep.subr.bf16.mxu1 %v11976_v37  ;;  %v12012_v37 = vld [vmem:[#allocation74_spill] sm:$0xff] }
 0x90f   : > { %7133 = vmatpush1.bf16.msra.mxu1 %v11977_v43  ;;  %v12013_v43 = vld [vmem:[#allocation75_spill] sm:$0xff] }
 0x910   : > { %7135 = vmatprep.subr.bf16.mxu1 %v11978_v30  ;;  %v12015_v30 = vld [vmem:[#allocation79_spill] sm:$0xff] }
 0x912   : > { %3875 = vmatmul.mubr.f32.vlgmr.msra.gmra.mrb[36].mxu1 %v3712_v58  ;;  %v12014_v58 = vld [vmem:[#allocation78_spill] sm:$0xff] }
 0x913   : > { %3880 = vmatprep.mubr.f32.mxu1 %v3715_v63  ;;  %7137 = vmatpush1.bf16.msra.mxu1 %v11980_v6  ;;  %v12017_v63 = vld [vmem:[#allocation83_spill] sm:$0xff]  ;;  %v12018_v6 = vld [vmem:[#allocation86_spill] sm:$0xff] }
 0x914   : > { %7139 = vmatprep.subr.bf16.mxu1 %v11981_v41  ;;  %v12020_v41 = vld [vmem:[#allocation90_spill] sm:$0xff] }
 0x916   : > { %3881 = vmatmul.mubr.f32.gmra.mrb[38].mxu1 %v3714_v55  ;;  %v12019_v55 = vld [vmem:[#allocation87_spill] sm:$0xff] }
 0x917   : > { %7141 = vmatpush1.bf16.msra.mxu1 %v11982_v15  ;;  %3968 = vmatprep.mubr.f32.mxu1 %v3901_v18  ;;  %v12021_v18 = vld [vmem:[#allocation91_spill] sm:$0xff]  ;;  %v12022_v15 = vld [vmem:[#allocation94_spill] sm:$0xff] }
 0x918   : > { %7143 = vmatprep.subr.bf16.mxu1 %v11983_v51  ;;  %v12023_v51 = vld [vmem:[#allocation95_spill] sm:$0xff] }
 0x91b   : > { %7145 = vmatpush1.bf16.msra.mxu1 %v11984_v42  ;;  %v12024_v42 = vld [vmem:[#allocation98_spill] sm:$0xff] }
 0x91c   : > { %7147 = vmatprep.subr.bf16.mxu1 %v11985_v3  ;;  %v12025_v3 = vld [vmem:[#allocation99_spill] sm:$0xff] }
 0x91f   : > { %7149 = vmatpush1.bf16.msra.mxu1 %v11711_v34  ;;  %v11991_v34 = vld [vmem:[#allocation35_spill] sm:$0xff] }
 0x920   : > { %7151 = vmatprep.subr.bf16.mxu1 %v11712_v14  ;;  %v11992_v14 = vld [vmem:[#allocation36_spill] sm:$0xff] }
 0x923   : > { %7153 = vmatpush1.bf16.msra.mxu1 %v11713_v25  ;;  %v11993_v25 = vld [vmem:[#allocation37_spill] sm:$0xff] }
 0x924   : > { %7155 = vmatprep.subr.bf16.mxu1 %v11714_v24  ;;  %v11994_v24 = vld [vmem:[#allocation38_spill] sm:$0xff] }
 0x927   : > { %7157 = vmatpush1.bf16.msra.mxu1 %v11715_v17  ;;  %v11995_v17 = vld [vmem:[#allocation39_spill] sm:$0xff] }
 0x928   : > { %7159 = vmatprep.subr.bf16.mxu1 %v11716_v19  ;;  %v11996_v19 = vld [vmem:[#allocation40_spill] sm:$0xff] }
 0x92b   : > { %7161 = vmatpush1.bf16.msra.mxu1 %v11986_v26  ;;  %v12026_v26 = vld [vmem:[#allocation102_spill] sm:$0xff] }
 0x92c   : > { %7163 = vmatprep.subr.bf16.mxu1 %v11987_v33  ;;  %v12027_v33 = vld [vmem:[#allocation103_spill] sm:$0xff] }
 0x92f   : > { %7165 = vmatpush1.bf16.msra.mxu1 %v11988_v38  ;;  %v12028_v38 = vld [vmem:[#allocation106_spill] sm:$0xff] }
 0x930   : > { %7167 = vmatprep.subr.bf16.mxu1 %v11989_v22  ;;  %v12029_v22 = vld [vmem:[#allocation107_spill] sm:$0xff] }
 0x933   : > { %7169 = vmatpush1.bf16.msra.mxu1 %v11990_v28  ;;  %v12030_v28 = vld [vmem:[#allocation110_spill] sm:$0xff] }
 0x934   : > { %7171 = vmatprep.subr.bf16.mxu1 %v11991_v34  ;;  %v12031_v34 = vld [vmem:[#allocation111_spill] sm:$0xff] }
 0x937   : > { %7173 = vmatpush1.bf16.msra.mxu1 %v11992_v14  ;;  %v12032_v14 = vld [vmem:[#allocation114_spill] sm:$0xff] }
 0x938   : > { %7175 = vmatprep.subr.bf16.mxu1 %v11993_v25  ;;  %v12033_v25 = vld [vmem:[#allocation115_spill] sm:$0xff] }
 0x93b   : > { %7177 = vmatpush1.bf16.msra.mxu1 %v11994_v24  ;;  %v12034_v24 = vld [vmem:[#allocation118_spill] sm:$0xff] }
 0x93c   : > { %7179 = vmatprep.subr.bf16.mxu1 %v11995_v17  ;;  %v12035_v17 = vld [vmem:[#allocation119_spill] sm:$0xff] }
 0x93f   : > { %7181 = vmatpush1.bf16.msra.mxu1 %v11996_v19  ;;  %v12036_v19 = vld [vmem:[#allocation122_spill] sm:$0xff] }
 0x940   : > { %7183 = vmatprep.subr.bf16.mxu1 %v11997_v35  ;;  %v12037_v35 = vld [vmem:[#allocation123_spill] sm:$0xff] }
 0x943   : > { %7185 = vmatpush1.bf16.msra.mxu1 %v11998_v44  ;;  %v12038_v44 = vld [vmem:[#allocation126_spill] sm:$0xff] }
 0x944   : > { %7187 = vmatprep.subr.bf16.mxu1 %v11999_v50  ;;  %v3998_v50 = vmul.f32 %v12009_v47, %v10457_v45  ;;  %v12048_v47 = vld [vmem:[#allocation138_spill] sm:$0xff] }
 0x947   : > { %7189 = vmatpush1.bf16.msra.mxu1 %v12000_v1  ;;  %v12039_v1 = vld [vmem:[#allocation127_spill] sm:$0xff] }
 0x948   : > { %7191 = vmatprep.subr.bf16.mxu1 %v12001_v4  ;;  %v12040_v4 = vld [vmem:[#allocation24_spill] sm:$0xff] }
 0x94b   : > { %7193 = vmatpush1.bf16.msra.mxu1 %v12002_v20  ;;  %v4001_v20 = vmul.f32 %v12040_v4, %v10467_v39 }
 0x94c   : > { %7195 = vmatprep.subr.bf16.mxu1 %v12003_v27  ;;  %v12041_v27 = vld [vmem:[#allocation129_spill] sm:$0xff] }
 0x94f   : > { %7197 = vmatpush1.bf16.msra.mxu1 %v12004_v49  ;;  %v4000_v49 = vmul.f32 %v12040_v4, %v10465_v36 }
 0x950   : > { %7199 = vmatprep.subr.bf16.mxu1 %v12005_v11  ;;  %v12043_v11 = vld [vmem:[#allocation25_spill] sm:$0xff] }
 0x951   : > { %v4097_v16 = vmul.f32 %v12043_v11, %v10459_v61 }
 0x952   : > { %3969 = vmatmul.mubr.f32.vlgmr.msra.gmra.mrb[36].mxu1 %v3900_v54  ;;  %v12042_v54 = vld [vmem:[#allocation130_spill] sm:$0xff] }
 0x953   : > { %3974 = vmatprep.mubr.f32.mxu1 %v3903_v13  ;;  %7201 = vmatpush1.bf16.msra.mxu1 %v12007_v59  ;;  %v12044_v13 = vld [vmem:[#allocation133_spill] sm:$0xff]  ;;  %v12045_v59 = vld [vmem:[#allocation134_spill] sm:$0xff] }
 0x954   : > { %7203 = vmatprep.subr.bf16.mxu1 %v12008_v0  ;;  %v12047_v0 = vld [vmem:[#allocation137_spill] sm:$0xff] }
 0x956   : > { %3975 = vmatmul.mubr.f32.gmra.mrb[38].mxu1 %v3902_v7  ;;  %v12046_v7 = vld [vmem:[#allocation136_spill] sm:$0xff] }
 0x957   : > { %7205 = vmatpush1.bf16.msra.mxu1 %v12010_v5  ;;  %4066 = vmatprep.mubr.f32.mxu1 %v3999_v40  ;;  %v12049_v40 = vld [vmem:[#allocation139_spill] sm:$0xff]  ;;  %v12050_v5 = vld [vmem:[#allocation140_spill] sm:$0xff] }
 0x958   : > { %7207 = vmatprep.subr.bf16.mxu1 %v12011_v52  ;;  %v12051_v52 = vld [vmem:[#allocation141_spill] sm:$0xff] }
 0x95b   : > { %7209 = vmatpush1.bf16.msra.mxu1 %v12012_v37  ;;  %v12052_v37 = vld [vmem:[#allocation142_spill] sm:$0xff] }
 0x95c   : > { %7211 = vmatprep.subr.bf16.mxu1 %v12013_v43  ;;  %v12053_v43 = vld [vmem:[#allocation143_spill] sm:$0xff] }
 0x95f   : > { %7213 = vmatpush1.bf16.msra.mxu1 %v12014_v58  ;;  %v12054_v58 = vld [vmem:[#allocation144_spill] sm:$0xff] }
 0x960   : > { %7215 = vmatprep.subr.bf16.mxu1 %v12015_v30  ;;  %v12055_v30 = vld [vmem:[#allocation145_spill] sm:$0xff] }
 0x963   : > { %7217 = vmatpush1.bf16.msra.mxu1 %v12016_v48  ;;  %v12056_v48 = vld [vmem:[#allocation146_spill] sm:$0xff] }
 0x964   : > { %7219 = vmatprep.subr.bf16.mxu1 %v12017_v63  ;;  %v12057_v63 = vld [vmem:[#allocation147_spill] sm:$0xff] }
 0x967   : > { %7221 = vmatpush1.bf16.msra.mxu1 %v12018_v6  ;;  %v12058_v6 = vld [vmem:[#allocation148_spill] sm:$0xff] }
 0x968   : > { %7223 = vmatprep.subr.bf16.mxu1 %v12019_v55  ;;  %v12059_v55 = vld [vmem:[#allocation149_spill] sm:$0xff] }
 0x96b   : > { %7225 = vmatpush1.bf16.msra.mxu1 %v12020_v41  ;;  %v12060_v41 = vld [vmem:[#allocation150_spill] sm:$0xff] }
 0x96c   : > { %7227 = vmatprep.subr.bf16.mxu1 %v12021_v18  ;;  %v12061_v18 = vld [vmem:[#allocation151_spill] sm:$0xff] }
 0x96f   : > { %7229 = vmatpush1.bf16.msra.mxu1 %v12022_v15  ;;  %v12062_v15 = vld [vmem:[#allocation152_spill] sm:$0xff] }
 0x970   : > { %7231 = vmatprep.subr.bf16.mxu1 %v12023_v51  ;;  %v12063_v51 = vld [vmem:[#allocation153_spill] sm:$0xff] }
 0x973   : > { %7233 = vmatpush1.bf16.msra.mxu1 %v12024_v42  ;;  %v12064_v42 = vld [vmem:[#allocation154_spill] sm:$0xff] }
 0x974   : > { %7235 = vmatprep.subr.bf16.mxu1 %v12025_v3  ;;  %v12065_v3 = vld [vmem:[#allocation155_spill] sm:$0xff] }
 0x977   : > { %7237 = vmatpush1.bf16.msra.mxu1 %v12026_v26  ;;  %v12066_v26 = vld [vmem:[#allocation156_spill] sm:$0xff] }
 0x978   : > { %7239 = vmatprep.subr.bf16.mxu1 %v12027_v33  ;;  %v12067_v33 = vld [vmem:[#allocation157_spill] sm:$0xff] }
 0x97b   : > { %7241 = vmatpush1.bf16.msra.mxu1 %v12028_v38  ;;  %v12068_v38 = vld [vmem:[#allocation158_spill] sm:$0xff] }
 0x97c   : > { %7243 = vmatprep.subr.bf16.mxu1 %v12029_v22  ;;  %v12069_v22 = vld [vmem:[#allocation159_spill] sm:$0xff] }
 0x97f   : > { %7245 = vmatpush1.bf16.msra.mxu1 %v12030_v28  ;;  %v12070_v28 = vld [vmem:[#allocation160_spill] sm:$0xff] }
 0x980   : > { %7247 = vmatprep.subr.bf16.mxu1 %v12031_v34  ;;  %v12071_v34 = vld [vmem:[#allocation161_spill] sm:$0xff] }
 0x983   : > { %7249 = vmatpush1.bf16.msra.mxu1 %v12032_v14  ;;  %v12072_v14 = vld [vmem:[#allocation162_spill] sm:$0xff] }
 0x984   : > { %7251 = vmatprep.subr.bf16.mxu1 %v12033_v25  ;;  %v4096_v25 = vmul.f32 %v12043_v11, %v10457_v45  ;;  %v12082_v11 = vld [vmem:[#allocation170_spill] sm:$0xff] }
 0x987   : > { %7253 = vmatpush1.bf16.msra.mxu1 %v12034_v24  ;;  %v12073_v24 = vld [vmem:[#allocation163_spill] sm:$0xff] }
 0x988   : > { %7255 = vmatprep.subr.bf16.mxu1 %v12035_v17  ;;  %v12074_v17 = vld [vmem:[#allocation26_spill] sm:$0xff] }
 0x98b   : > { %7257 = vmatpush1.bf16.msra.mxu1 %v12036_v19  ;;  %v4099_v19 = vmul.f32 %v12074_v17, %v10467_v39 }
 0x98c   : > { %7259 = vmatprep.subr.bf16.mxu1 %v12037_v35  ;;  %v12075_v35 = vld [vmem:[#allocation164_spill] sm:$0xff] }
 0x98f   : > { %7261 = vmatpush1.bf16.msra.mxu1 %v12038_v44  ;;  %v4098_v44 = vmul.f32 %v12074_v17, %v10465_v36  ;;  %v12112_v17 = vld [vmem:[#allocation201_spill] sm:$0xff] }
 0x990   : > { %7263 = vmatprep.subr.bf16.mxu1 %v12039_v1  ;;  %v12077_v1 = vld [vmem:[#allocation27_spill] sm:$0xff] }
 0x991   : > { %v4195_v4 = vmul.f32 %v12077_v1, %v10459_v61 }
 0x992   : > { %4067 = vmatmul.mubr.f32.vlgmr.msra.gmra.mrb[36].mxu1 %v3998_v50  ;;  %v12076_v50 = vld [vmem:[#allocation165_spill] sm:$0xff] }
 0x993   : > { %4072 = vmatprep.mubr.f32.mxu1 %v4001_v20  ;;  %7265 = vmatpush1.bf16.msra.mxu1 %v12041_v27  ;;  %v12078_v20 = vld [vmem:[#allocation166_spill] sm:$0xff]  ;;  %v12079_v27 = vld [vmem:[#allocation167_spill] sm:$0xff] }
 0x994   : > { %7267 = vmatprep.subr.bf16.mxu1 %v12042_v54  ;;  %v12081_v54 = vld [vmem:[#allocation169_spill] sm:$0xff] }
 0x996   : > { %4073 = vmatmul.mubr.f32.gmra.mrb[38].mxu1 %v4000_v49  ;;  %v12080_v49 = vld [vmem:[#allocation168_spill] sm:$0xff] }
 0x997   : > { %7269 = vmatpush1.bf16.msra.mxu1 %v12044_v13  ;;  %4164 = vmatprep.mubr.f32.mxu1 %v4097_v16  ;;  %v12083_v16 = vld [vmem:[#allocation171_spill] sm:$0xff]  ;;  %v12084_v13 = vld [vmem:[#allocation172_spill] sm:$0xff] }
 0x998   : > { %7271 = vmatprep.subr.bf16.mxu1 %v12045_v59  ;;  %v12085_v59 = vld [vmem:[#allocation173_spill] sm:$0xff] }
 0x99b   : > { %7273 = vmatpush1.bf16.msra.mxu1 %v12046_v7  ;;  %v12086_v7 = vld [vmem:[#allocation174_spill] sm:$0xff] }
 0x99c   : > { %7275 = vmatprep.subr.bf16.mxu1 %v12047_v0  ;;  %v12087_v0 = vld [vmem:[#allocation175_spill] sm:$0xff] }
 0x99f   : > { %7277 = vmatpush1.bf16.msra.mxu1 %v12048_v47  ;;  %v12088_v47 = vld [vmem:[#allocation176_spill] sm:$0xff] }
 0x9a0   : > { %7279 = vmatprep.subr.bf16.mxu1 %v12049_v40  ;;  %v12089_v40 = vld [vmem:[#allocation177_spill] sm:$0xff] }
 0x9a3   : > { %7281 = vmatpush1.bf16.msra.mxu1 %v12050_v5  ;;  %v12090_v5 = vld [vmem:[#allocation178_spill] sm:$0xff] }
 0x9a4   : > { %7283 = vmatprep.subr.bf16.mxu1 %v12051_v52  ;;  %v12091_v52 = vld [vmem:[#allocation179_spill] sm:$0xff] }
 0x9a7   : > { %7285 = vmatpush1.bf16.msra.mxu1 %v12052_v37  ;;  %v12092_v37 = vld [vmem:[#allocation180_spill] sm:$0xff] }
 0x9a8   : > { %7287 = vmatprep.subr.bf16.mxu1 %v12053_v43  ;;  %v12093_v43 = vld [vmem:[#allocation181_spill] sm:$0xff] }
 0x9ab   : > { %7289 = vmatpush1.bf16.msra.mxu1 %v12054_v58  ;;  %v12094_v58 = vld [vmem:[#allocation182_spill] sm:$0xff] }
 0x9ac   : > { %7291 = vmatprep.subr.bf16.mxu1 %v12055_v30  ;;  %v12095_v30 = vld [vmem:[#allocation183_spill] sm:$0xff] }
 0x9af   : > { %7293 = vmatpush1.bf16.msra.mxu1 %v12056_v48  ;;  %v12096_v48 = vld [vmem:[#allocation184_spill] sm:$0xff] }
 0x9b0   : > { %7295 = vmatprep.subr.bf16.mxu1 %v12057_v63  ;;  %v12097_v63 = vld [vmem:[#allocation185_spill] sm:$0xff] }
 0x9b3   : > { %7297 = vmatpush1.bf16.msra.mxu1 %v12058_v6  ;;  %v12098_v6 = vld [vmem:[#allocation186_spill] sm:$0xff] }
 0x9b4   : > { %7299 = vmatprep.subr.bf16.mxu1 %v12059_v55  ;;  %v12099_v55 = vld [vmem:[#allocation187_spill] sm:$0xff] }
 0x9b7   : > { %7301 = vmatpush1.bf16.msra.mxu1 %v12060_v41  ;;  %v12100_v41 = vld [vmem:[#allocation188_spill] sm:$0xff] }
 0x9b8   : > { %7303 = vmatprep.subr.bf16.mxu1 %v12061_v18  ;;  %v12101_v18 = vld [vmem:[#allocation190_spill] sm:$0xff] }
 0x9bb   : > { %7305 = vmatpush1.bf16.msra.mxu1 %v12062_v15  ;;  %v12102_v15 = vld [vmem:[#allocation191_spill] sm:$0xff] }
 0x9bc   : > { %7307 = vmatprep.subr.bf16.mxu1 %v12063_v51  ;;  %v12103_v51 = vld [vmem:[#allocation192_spill] sm:$0xff] }
 0x9bf   : > { %7309 = vmatpush1.bf16.msra.mxu1 %v12064_v42  ;;  %v12104_v42 = vld [vmem:[#allocation193_spill] sm:$0xff] }
 0x9c0   : > { %7311 = vmatprep.subr.bf16.mxu1 %v12065_v3  ;;  %v12105_v3 = vld [vmem:[#allocation194_spill] sm:$0xff] }
 0x9c3   : > { %7313 = vmatpush1.bf16.msra.mxu1 %v12066_v26  ;;  %v4194_v26 = vmul.f32 %v12077_v1, %v10457_v45  ;;  %v12118_v1 = vld [vmem:[#allocation208_spill] sm:$0xff] }
 0x9c4   : > { %7315 = vmatprep.subr.bf16.mxu1 %v12067_v33  ;;  %v12106_v33 = vld [vmem:[#allocation195_spill] sm:$0xff] }
 0x9c7   : > { %7317 = vmatpush1.bf16.msra.mxu1 %v12068_v38  ;;  %v12107_v38 = vld [vmem:[#allocation28_spill] sm:$0xff] }
 0x9c8   : > { %7319 = vmatprep.subr.bf16.mxu1 %v12069_v22  ;;  %v4197_v22 = vmul.f32 %v12107_v38, %v10467_v39 }
 0x9cb   : > { %7321 = vmatpush1.bf16.msra.mxu1 %v12070_v28  ;;  %v12108_v28 = vld [vmem:[#allocation197_spill] sm:$0xff] }
 0x9cc   : > { %7323 = vmatprep.subr.bf16.mxu1 %v12071_v34  ;;  %v4293_v34 = vmul.f32 %v10277_v57, %v10459_v61 }
 0x9cf   : > { %7325 = vmatpush1.bf16.msra.mxu1 %v12072_v14  ;;  %v12109_v14 = vld [vmem:[#allocation198_spill] sm:$0xff] }
 0x9d0   : > { %7327 = vmatprep.subr.bf16.mxu1 %v12073_v24  ;;  %v12111_v24 = vld [vmem:[#allocation200_spill] sm:$0xff] }
 0x9d2   : > { %4165 = vmatmul.mubr.f32.vlgmr.msra.gmra.mrb[36].mxu1 %v4096_v25  ;;  %v12110_v25 = vld [vmem:[#allocation199_spill] sm:$0xff] }
 0x9d3   : > { %4170 = vmatprep.mubr.f32.mxu1 %v4099_v19  ;;  %7329 = vmatpush1.bf16.msra.mxu1 %v12075_v35  ;;  %v12113_v19 = vld [vmem:[#allocation202_spill] sm:$0xff]  ;;  %v12115_v35 = vld [vmem:[#allocation205_spill] sm:$0xff] }
 0x9d4   : > { %7331 = vmatprep.subr.bf16.mxu1 %v12076_v50  ;;  %v12117_v50 = vld [vmem:[#allocation207_spill] sm:$0xff] }
 0x9d6   : > { %4171 = vmatmul.mubr.f32.gmra.mrb[38].mxu1 %v4098_v44  ;;  %v12116_v44 = vld [vmem:[#allocation206_spill] sm:$0xff] }
 0x9d7   : > { %7333 = vmatpush1.bf16.msra.mxu1 %v12078_v20  ;;  %4262 = vmatprep.mubr.f32.mxu1 %v4195_v4  ;;  %v12119_v4 = vld [vmem:[#allocation209_spill] sm:$0xff]  ;;  %v12120_v20 = vld [vmem:[#allocation210_spill] sm:$0xff] }
 0x9d8   : > { %7335 = vmatprep.subr.bf16.mxu1 %v12079_v27  ;;  %v12121_v27 = vld [vmem:[#allocation212_spill] sm:$0xff] }
 0x9db   : > { %7337 = vmatpush1.bf16.msra.mxu1 %v12080_v49  ;;  %v12122_v49 = vld [vmem:[#allocation213_spill] sm:$0xff] }
 0x9dc   : > { %7339 = vmatprep.subr.bf16.mxu1 %v12081_v54  ;;  %v12124_v54 = vld [vmem:[#allocation215_spill] sm:$0xff] }
 0x9df   : > { %7341 = vmatpush1.bf16.msra.mxu1 %v12082_v11  ;;  %v12125_v11 = vld [vmem:[#allocation216_spill] sm:$0xff] }
 0x9e0   : > { %7343 = vmatprep.subr.bf16.mxu1 %v12083_v16  ;;  %v12126_v16 = vld [vmem:[#allocation217_spill] sm:$0xff] }
 0x9e3   : > { %7345 = vmatpush1.bf16.msra.mxu1 %v12084_v13  ;;  %v12127_v13 = vld [vmem:[#allocation218_spill] sm:$0xff] }
 0x9e4   : > { %7347 = vmatprep.subr.bf16.mxu1 %v12085_v59  ;;  %v12128_v59 = vld [vmem:[#allocation219_spill] sm:$0xff] }
 0x9e7   : > { %7349 = vmatpush1.bf16.msra.mxu1 %v12086_v7  ;;  %v12129_v7 = vld [vmem:[#allocation220_spill] sm:$0xff] }
 0x9e8   : > { %7351 = vmatprep.subr.bf16.mxu1 %v12087_v0  ;;  %v12130_v0 = vld [vmem:[#allocation221_spill] sm:$0xff] }
 0x9eb   : > { %7353 = vmatpush1.bf16.msra.mxu1 %v12088_v47  ;;  %v12132_v47 = vld [vmem:[#allocation223_spill] sm:$0xff] }
 0x9ec   : > { %7355 = vmatprep.subr.bf16.mxu1 %v12089_v40  ;;  %v12133_v40 = vld [vmem:[#allocation224_spill] sm:$0xff] }
 0x9ef   : > { %7357 = vmatpush1.bf16.msra.mxu1 %v12090_v5  ;;  %v12134_v5 = vld [vmem:[#allocation225_spill] sm:$0xff] }
 0x9f0   : > { %7359 = vmatprep.subr.bf16.mxu1 %v12091_v52  ;;  %v12135_v52 = vld [vmem:[#allocation226_spill] sm:$0xff] }
 0x9f3   : > { %7361 = vmatpush1.bf16.msra.mxu1 %v12092_v37  ;;  %v4292_v37 = vmul.f32 %v10277_v57, %v10457_v45  ;;  %v12140_v57 = vld [vmem:[#allocation231_spill] sm:$0xff] }
 0x9f4   : > { %7363 = vmatprep.subr.bf16.mxu1 %v12093_v43  ;;  %v12136_v43 = vld [vmem:[#allocation227_spill] sm:$0xff] }
 0x9f7   : > { %7365 = vmatpush1.bf16.msra.mxu1 %v12094_v58  ;;  %v12137_v58 = vld [vmem:[#allocation29_spill] sm:$0xff] }
 0x9f8   : > { %7367 = vmatprep.subr.bf16.mxu1 %v12095_v30  ;;  %v4295_v30 = vmul.f32 %v12137_v58, %v10467_v39 }
 0x9fb   : > { %7369 = vmatpush1.bf16.msra.mxu1 %v12096_v48  ;;  %v4294_v48 = vmul.f32 %v12137_v58, %v10465_v36  ;;  %v12187_v58 = vld [vmem:[#allocation283_spill] sm:$0xff] }
 0x9fc   : > { %7371 = vmatprep.subr.bf16.mxu1 %v12097_v63  ;;  %v12138_v63 = vld [vmem:[#allocation229_spill] sm:$0xff] }
 0x9ff   : > { %7373 = vmatpush1.bf16.msra.mxu1 %v12098_v6  ;;  %v4391_v6 = vmul.f32 %v10355_v2, %v10459_v61 }
 0xa00   : > { %7375 = vmatprep.subr.bf16.mxu1 %v12099_v55  ;;  %v12139_v55 = vld [vmem:[#allocation230_spill] sm:$0xff] }
 0xa03   : > { %7377 = vmatpush1.bf16.msra.mxu1 %v12100_v41  ;;  %v12141_v41 = vld [vmem:[#allocation232_spill] sm:$0xff] }
 0xa04   : > { %7379 = vmatprep.subr.bf16.mxu1 %v11829_v62  ;;  %v4196_v62 = vmul.f32 %v12107_v38, %v10465_v36  ;;  %v12150_v38 = vld [vmem:[#allocation242_spill] sm:$0xff] }
 0xa07   : > { %7381 = vmatpush1.bf16.msra.mxu1 %v12101_v18  ;;  %v12142_v18 = vld [vmem:[#allocation233_spill] sm:$0xff] }
 0xa08   : > { %7383 = vmatprep.subr.bf16.mxu1 %v12102_v15  ;;  %v12143_v15 = vld [vmem:[#allocation234_spill] sm:$0xff] }
 0xa0b   : > { %7385 = vmatpush1.bf16.msra.mxu1 %v12103_v51  ;;  %v12145_v51 = vld [vmem:[#allocation237_spill] sm:$0xff] }
 0xa0c   : > { %7387 = vmatprep.subr.bf16.mxu1 %v12104_v42  ;;  %v12146_v42 = vld [vmem:[#allocation238_spill] sm:$0xff] }
 0xa0f   : > { %7389 = vmatpush1.bf16.msra.mxu1 %v12105_v3  ;;  %v12147_v3 = vld [vmem:[#allocation239_spill] sm:$0xff] }
 0xa10   : > { %7391 = vmatprep.subr.bf16.mxu1 %v12106_v33  ;;  %v12149_v33 = vld [vmem:[#allocation241_spill] sm:$0xff] }
 0xa12   : > { %4263 = vmatmul.mubr.f32.vlgmr.msra.gmra.mrb[36].mxu1 %v4194_v26  ;;  %v12148_v26 = vld [vmem:[#allocation240_spill] sm:$0xff] }
 0xa13   : > { %4268 = vmatprep.mubr.f32.mxu1 %v4197_v22  ;;  %7393 = vmatpush1.bf16.msra.mxu1 %v11838_v53  ;;  %v12114_v53 = vld [vmem:[#allocation204_spill] sm:$0xff] }
 0xa14   : > { %7395 = vmatprep.subr.bf16.mxu1 %v12108_v28  ;;  %v12151_v22 = vld [vmem:[#allocation244_spill] sm:$0xff] }
 0xa15   : > { %v12154_v28 = vld [vmem:[#allocation248_spill] sm:$0xff] }
 0xa16   : > { %4269 = vmatmul.mubr.f32.gmra.mrb[38].mxu1 %v4196_v62  ;;  %v12152_v62 = vld [vmem:[#allocation245_spill] sm:$0xff] }
 0xa17   : > { %7397 = vmatpush1.bf16.msra.mxu1 %v12109_v14  ;;  %4360 = vmatprep.mubr.f32.mxu1 %v4293_v34  ;;  %v12155_v34 = vld [vmem:[#allocation249_spill] sm:$0xff]  ;;  %v12156_v14 = vld [vmem:[#allocation250_spill] sm:$0xff] }
 0xa18   : > { %7399 = vmatprep.subr.bf16.mxu1 %v12110_v25  ;;  %v12158_v25 = vld [vmem:[#allocation255_spill] sm:$0xff] }
 0xa1b   : > { %7401 = vmatpush1.bf16.msra.mxu1 %v12111_v24  ;;  %v12159_v24 = vld [vmem:[#allocation256_spill] sm:$0xff] }
 0xa1c   : > { %7403 = vmatprep.subr.bf16.mxu1 %v12112_v17  ;;  %v12161_v17 = vld [vmem:[#allocation258_spill] sm:$0xff] }
 0xa1f   : > { %7405 = vmatpush1.bf16.msra.mxu1 %v12113_v19  ;;  %v4390_v19 = vmul.f32 %v10355_v2, %v10457_v45  ;;  %v12167_v2 = vld [vmem:[#allocation263_spill] sm:$0xff] }
 0xa20   : > { %7407 = vmatprep.subr.bf16.mxu1 %v11845_v21  ;;  %v12123_v21 = vld [vmem:[#allocation214_spill] sm:$0xff] }
 0xa23   : > { %7409 = vmatpush1.bf16.msra.mxu1 %v12114_v53  ;;  %v12162_v53 = vld [vmem:[#allocation259_spill] sm:$0xff] }
 0xa24   : > { %7411 = vmatprep.subr.bf16.mxu1 %v12115_v35  ;;  %v4481_v35 = vpop.permute.xlu1 %4480 }
 0xa27   : > { %7413 = vmatpush1.bf16.msra.mxu1 %v12116_v44 }
 0xa28   : > { %7415 = vmatprep.subr.bf16.mxu1 %v12117_v50  ;;  %v12165_v50 = vld [vmem:[#allocation261_spill] sm:$0xff] }
 0xa2b   : > { %7417 = vmatpush1.bf16.msra.mxu1 %v12118_v1  ;;  %v4489_v1 = vmul.f32 %v4481_v35, %v10459_v61  ;;  %v12175_v61 = vld [vmem:[#allocation271_spill] sm:$0xff] }
 0xa2c   : > { %7419 = vmatprep.subr.bf16.mxu1 %v12119_v4  ;;  %v12166_v4 = vld [vmem:[#allocation262_spill] sm:$0xff] }
 0xa2f   : > { %7421 = vmatpush1.bf16.msra.mxu1 %v12120_v20  ;;  %v12168_v20 = vld [vmem:[#allocation264_spill] sm:$0xff] }
 0xa30   : > { %7423 = vmatprep.subr.bf16.mxu1 %v11853_v46  ;;  %v12131_v46 = vld [vmem:[#allocation222_spill] sm:$0xff] }
 0xa33   : > { %7425 = vmatpush1.bf16.msra.mxu1 %v12121_v27  ;;  %v12169_v27 = vld [vmem:[#allocation265_spill] sm:$0xff] }
 0xa34   : > { %7427 = vmatprep.subr.bf16.mxu1 %v12122_v49  ;;  %v12170_v49 = vld [vmem:[#allocation266_spill] sm:$0xff] }
 0xa37   : > { %7429 = vmatpush1.bf16.msra.mxu1 %v12123_v21  ;;  %v12171_v21 = vld [vmem:[#allocation267_spill] sm:$0xff] }
 0xa38   : > { %7431 = vmatprep.subr.bf16.mxu1 %v12124_v54  ;;  %v12172_v54 = vld [vmem:[#allocation268_spill] sm:$0xff] }
 0xa3b   : > { %7433 = vmatpush1.bf16.msra.mxu1 %v12125_v11  ;;  %v12173_v11 = vld [vmem:[#allocation269_spill] sm:$0xff] }
 0xa3c   : > { %7435 = vmatprep.subr.bf16.mxu1 %v12126_v16  ;;  %v12174_v16 = vld [vmem:[#allocation270_spill] sm:$0xff] }
 0xa3f   : > { %7437 = vmatpush1.bf16.msra.mxu1 %v12127_v13  ;;  %v12176_v13 = vld [vmem:[#allocation272_spill] sm:$0xff] }
 0xa40   : > { %7439 = vmatprep.subr.bf16.mxu1 %v12128_v59  ;;  %v12177_v59 = vld [vmem:[#allocation273_spill] sm:$0xff] }
 0xa43   : > { %7441 = vmatpush1.bf16.msra.mxu1 %v12129_v7  ;;  %v12178_v7 = vld [vmem:[#allocation274_spill] sm:$0xff] }
 0xa44   : > { %7443 = vmatprep.subr.bf16.mxu1 %v12130_v0  ;;  %v12179_v0 = vld [vmem:[#allocation275_spill] sm:$0xff] }
 0xa47   : > { %7445 = vmatpush1.bf16.msra.mxu1 %v12131_v46  ;;  %v12180_v46 = vld [vmem:[#allocation276_spill] sm:$0xff] }
 0xa48   : > { %7447 = vmatprep.subr.bf16.mxu1 %v12132_v47  ;;  %v12181_v47 = vld [vmem:[#allocation277_spill] sm:$0xff] }
 0xa4b   : > { %7449 = vmatpush1.bf16.msra.mxu1 %v12133_v40  ;;  %v12182_v40 = vld [vmem:[#allocation278_spill] sm:$0xff] }
 0xa4c   : > { %7451 = vmatprep.subr.bf16.mxu1 %v12134_v5  ;;  %v12183_v5 = vld [vmem:[#allocation279_spill] sm:$0xff] }
 0xa4f   : > { %7453 = vmatpush1.bf16.msra.mxu1 %v12135_v52  ;;  %v12184_v52 = vld [vmem:[#allocation280_spill] sm:$0xff] }
 0xa50   : > { %7455 = vmatprep.subr.bf16.mxu1 %v12136_v43  ;;  %v12186_v43 = vld [vmem:[#allocation282_spill] sm:$0xff] }
 0xa52   : > { %4361 = vmatmul.mubr.f32.vlgmr.msra.gmra.mrb[36].mxu1 %v4292_v37  ;;  %v12185_v37 = vld [vmem:[#allocation281_spill] sm:$0xff] }
 0xa53   : > { %4366 = vmatprep.mubr.f32.mxu1 %v4295_v30  ;;  %7457 = vmatpush1.bf16.msra.mxu1 %v11871_v31  ;;  %v12144_v31 = vld [vmem:[#allocation236_spill] sm:$0xff] }
 0xa54   : > { %7459 = vmatprep.subr.bf16.mxu1 %v12138_v63  ;;  %v12188_v30 = vld [vmem:[#allocation284_spill] sm:$0xff]  ;;  %v12190_v63 = vld [vmem:[#allocation286_spill] sm:$0xff] }
 0xa56   : > { %4367 = vmatmul.mubr.f32.gmra.mrb[38].mxu1 %v4294_v48  ;;  %v12189_v48 = vld [vmem:[#allocation285_spill] sm:$0xff] }
 0xa57   : > { %7461 = vmatpush1.bf16.msra.mxu1 %v12139_v55  ;;  %4458 = vmatprep.mubr.f32.mxu1 %v4391_v6  ;;  %v12191_v6 = vld [vmem:[#allocation287_spill] sm:$0xff]  ;;  %v12192_v55 = vld [vmem:[#allocation288_spill] sm:$0xff] }
 0xa58   : > { %7463 = vmatprep.subr.bf16.mxu1 %v12140_v57  ;;  %v12193_v57 = vld [vmem:[#allocation289_spill] sm:$0xff] }
 0xa5b   : > { %7465 = vmatpush1.bf16.msra.mxu1 %v12141_v41  ;;  %v5326_v41 = vpop.permute.xlu0 %5325 }
 0xa5c   : > { %7467 = vmatprep.subr.bf16.mxu1 %v12142_v18  ;;  %v5329_v18 = vadd.f32 %v5326_v41, %v10417_v10  ;;  %v5331_v10 = vld [vmem:[%s12195_s21] sm:$0xff] }
 0xa5f   : > { %7469 = vmatpush1.bf16.msra.mxu1 %v12143_v15  ;;  %v12194_v15 = vld [vmem:[#allocation290_spill] sm:$0xff] }
 0xa60   : > { %7471 = vmatprep.subr.bf16.mxu1 %v11878_v23  ;;  %v12153_v23 = vld [vmem:[#allocation247_spill] sm:$0xff] }
 0xa63   : > { %7473 = vmatpush1.bf16.msra.mxu1 %v12144_v31  ;;  %v4486_v31 = vpop.permute.xlu1 %4485 }
 0xa64   : > { %7475 = vmatprep.subr.bf16.mxu1 %v12145_v51  ;;  %v4488_v51 = vmul.f32 %v4481_v35, %v10457_v45 }
 0xa67   : > { %7477 = vmatpush1.bf16.msra.mxu1 %v12146_v42  ;;  %v5328_v42 = vadd.f32 %v5326_v41, %v10415_v8 }
 0xa68   : > { %7479 = vmatprep.subr.bf16.mxu1 %v12147_v3  ;;  %v4491_v3 = vmul.f32 %v4486_v31, %v10467_v39 }
 0xa6b   : > { %7481 = vmatpush1.bf16.msra.mxu1 %v12148_v26  ;;  %v4490_v26 = vmul.f32 %v4486_v31, %v10465_v36 }
 0xa6c   : > { %7483 = vmatprep.subr.bf16.mxu1 %v12149_v33  ;;  %v4578_v33 = vpop.permute.xlu1 %4577 }
 0xa6f   : > { %7485 = vmatpush1.bf16.msra.mxu1 %v12150_v38 }
 0xa70   : > { %7487 = vmatprep.subr.bf16.mxu1 %v11886_v60  ;;  %v12157_v60 = vld [vmem:[#allocation254_spill] sm:$0xff] }
 0xa73   : > { %7489 = vmatpush1.bf16.msra.mxu1 %v12151_v22 }
 0xa74   : > { %7491 = vmatprep.subr.bf16.mxu1 %v12152_v62 }
 0xa77   : > { %7493 = vmatpush1.bf16.msra.mxu1 %v11889_v32  ;;  %v12160_v32 = vld [vmem:[#allocation257_spill] sm:$0xff] }
 0xa78   : > { %7495 = vmatprep.subr.bf16.mxu1 %v12153_v23 }
 0xa7b   : > { %7497 = vmatpush1.bf16.msra.mxu1 %v12154_v28 }
 0xa7c   : > { %7499 = vmatprep.subr.bf16.mxu1 %v12155_v34 }
 0xa7f   : > { %7501 = vmatpush1.bf16.msra.mxu1 %v12156_v14 }
 0xa80   : > { %7503 = vmatprep.subr.bf16.mxu1 %v11894_v9  ;;  %v12163_v9 = vld [vmem:[#allocation189_spill] sm:$0xff] }
 0xa81   : > { %v4392_v44 = vmul.f32 %v12163_v9, %v10465_v36 }
 0xa83   : > { %7505 = vmatpush1.bf16.msra.mxu1 %v11895_v56  ;;  %v4393_v56 = vmul.f32 %v12163_v9, %v10467_v39  ;;  %v4583_v39 = vpop.permute.xlu0 %4582 }
 0xa84   : > { %7507 = vmatprep.subr.bf16.mxu1 %v11896_v29  ;;  %v12164_v29 = vld [vmem:[#allocation260_spill] sm:$0xff] }
 0xa87   : > { %7509 = vmatpush1.bf16.msra.mxu1 %v12157_v60  ;;  %v5330_v60 = vld [vmem:[#allocation9] sm:$0xff] }
 0xa88   : > { %7511 = vmatprep.subr.bf16.mxu1 %v12158_v25  ;;  %v5485_v25 = vpop.permute.xlu1 %5484 }
 0xa8b   : > { %7513 = vmatpush1.bf16.msra.mxu1 %v12159_v24 }
 0xa8c   : > { %7515 = vmatprep.subr.bf16.mxu1 %v12160_v32 }
 0xa8f   : > { %7517 = vmatpush1.bf16.msra.mxu1 %v12161_v17 }
 0xa90   : > { %7519 = vmatprep.subr.bf16.mxu1 %v12162_v53 }
 0xa92   : > { %4459 = vmatmul.mubr.f32.vlgmr.msra.gmra.mrb[36].mxu1 %v4390_v19 }
 0xa93   : > { %4464 = vmatprep.mubr.f32.mxu1 %v4393_v56  ;;  %7521 = vmatpush1.bf16.msra.mxu1 %v12164_v29  ;;  %v5491_v56 = vld [vmem:[#allocation10] sm:$0xf]  ;;  %v5496_v29 = vpop.permute.xlu0 %5495 }
 0xa94   : > { %7523 = vmatprep.subr.bf16.mxu1 %v12165_v50 }
 0xa96   : > { %4465 = vmatmul.mubr.f32.gmra.mrb[38].mxu1 %v4392_v44 }
 0xa97   : > { %7525 = vmatpush1.bf16.msra.mxu1 %v12166_v4  ;;  %4556 = vmatprep.mubr.f32.mxu1 %v4489_v1 }
 0xa98   : > { %7527 = vmatprep.subr.bf16.mxu1 %v12167_v2 }
 0xa9b   : > { %7529 = vmatpush1.bf16.msra.mxu1 %v12168_v20 }
 0xa9c   : > { %7531 = vmatprep.subr.bf16.mxu1 %v12169_v27 }
 0xa9f   : > { %7533 = vmatpush1.bf16.msra.mxu1 %v12170_v49 }
 0xaa0   : > { %7535 = vmatprep.subr.bf16.mxu1 %v12171_v21 }
 0xaa3   : > { %7537 = vmatpush1.bf16.msra.mxu1 %v12172_v54 }
 0xaa4   : > { %7539 = vmatprep.subr.bf16.mxu1 %v12173_v11 }
 0xaa7   : > { %7541 = vmatpush1.bf16.msra.mxu1 %v12174_v16 }
 0xaa8   : > { %7543 = vmatprep.subr.bf16.mxu1 %v12175_v61 }
 0xaab   : > { %7545 = vmatpush1.bf16.msra.mxu1 %v12176_v13 }
 0xaac   : > { %7547 = vmatprep.subr.bf16.mxu1 %v12177_v59 }
 0xaaf   : > { %7549 = vmatpush1.bf16.msra.mxu1 %v12178_v7 }
 0xab0   : > { %7551 = vmatprep.subr.bf16.mxu1 %v12179_v0 }
 0xab3   : > { %7553 = vmatpush1.bf16.msra.mxu1 %v12180_v46 }
 0xab4   : > { %7555 = vmatprep.subr.bf16.mxu1 %v12181_v47 }
 0xab7   : > { %7557 = vmatpush1.bf16.msra.mxu1 %v12182_v40 }
 0xab8   : > { %7559 = vmatprep.subr.bf16.mxu1 %v12183_v5 }
 0xabb   : > { %7561 = vmatpush1.bf16.msra.mxu1 %v12184_v52 }
 0xabc   : > { %7563 = vmatprep.subr.bf16.mxu1 %v12185_v37 }
 0xabf   : > { %7565 = vmatpush1.bf16.msra.mxu1 %v12186_v43 }
 0xac0   : > { %7567 = vmatprep.subr.bf16.mxu1 %v12187_v58 }
 0xac3   : > { %7569 = vmatpush1.bf16.msra.mxu1 %v12188_v30 }
 0xac4   : > { %7571 = vmatprep.subr.bf16.mxu1 %v12189_v48 }
 0xac7   : > { %7573 = vmatpush1.bf16.msra.mxu1 %v12190_v63 }
 0xac8   : > { %7575 = vmatprep.subr.bf16.mxu1 %v12191_v6 }
 0xacb   : > { %7577 = vmatpush1.bf16.msra.mxu1 %v12192_v55 }
 0xacc   : > { %7579 = vmatprep.subr.bf16.mxu1 %v12193_v57 }
 0xacf   : > { %7581 = vmatpush1.bf16.msra.mxu1 %v12194_v15 }
 0xad0   : > { %5335 = vmatprep.subr.mxu1 %v5329_v18 }
 0xad2   : > { %4557 = vmatmul.mubr.f32.vlgmr.msra.gmra.mrb[36].mxu1 %v4488_v51 }
 0xad3   : > { %4562 = vmatprep.mubr.f32.mxu1 %v4491_v3  ;;  %5336 = vmatpush1.msra.mxu1 %v5328_v42 }
 0xad6   : > { %4563 = vmatmul.mubr.f32.gmra.mrb[38].mxu1 %v4490_v26 }
 0xad7   : > { %5399 = vmatprep.mubr.f32.mxu1 %v11770_v12 }
 0xada   : > { %5771 = vmatmul.mubr.msk.f32.vlgmr.msra.gmra.mrb[40].mxu1 %vm3517_vm4, %v5331_v10 }
 0xadb   : > { %5474 = vmatprep.mubr.f32.mxu1 %v11770_v12 }
 0xba5   : > { %v4558_v45 = vpop.f32.mrb[36].mxu1 }
 0xba6   : > { %v4560_v8 = vpop.f32.mrb[37].mxu1  ;;  %v4585_v22 = vadd.f32 %v4578_v33, %v4558_v45 }
 0xba7   : > { %v4586_v36 = vadd.f32 %v4578_v33, %v4560_v8 }
 0xba9   : > { %v4564_v38 = vpop.f32.mrb[38].mxu1 }
 0xbaa   : > { %v4587_v62 = vadd.f32 %v4583_v39, %v4564_v38  ;;  %v4566_v23 = vpop.f32.mrb[39].mxu1 }
 0xbab   : > { %v4588_v28 = vadd.f32 %v4583_v39, %v4566_v23 }
 0xbac   : > { %v8160_v34 = vpack.c.bf16 %v4587_v62, %v4585_v22 }
 0xbad   : > { %v8158_v14 = vpack.c.bf16 %v4588_v28, %v4586_v36 }
 0xbaf   : > { %8159 = vmatprep.subr.bf16.mxu1 %v8158_v14 }
 0xbb0   : > { %8161 = vmatpush1.bf16.msra.mxu1 %v8160_v34 }
 0xbb3   : > { %5772 = vmatmul.mubr.msk.f32.vlgmr.msra.gmra.mrb[40].mxu1 %vm5406_vm5, %v5330_v60 }
 0xbb4   : > { %5565 = vmatprep.mubr.f32.mxu1 %v11770_v12 }
 0xc86   : > { %v5476_v24 = vpop.f32.mrb[40].mxu1 }
 0xc87   : > { %v5487_v32 = vadd.f32 %v5485_v25, %v5476_v24  ;;  %v5478_v17 = vpop.f32.mrb[41].mxu1 }
 0xc88   : > { %v5488_v19 = vadd.f32 %v5485_v25, %v5478_v17 }
 0xc89   : > { %v5489_v9 = vmax.f32 %v5487_v32, 0.0 }
 0xc8a   : > { %v5490_v53 = vmax.f32 %v5488_v19, 0.0 }
 0xc8c   : > { %5501 = vmatprep.subr.mxu1 %v5490_v53 }
 0xc8d   : > { %5502 = vmatpush1.msra.mxu1 %v5489_v9 }
 0xc8e   : > { %5773 = vmatmul.mubr.msk.f32.vlgmr.msra.gmra.mrb[42].mxu1 %vm3517_vm4, %v5491_v56 }
 0xd61   : > { %v5567_v35 = vpop.f32.mrb[42].mxu1 }
 0xd62   : > { %v5568_v44 = vadd.f32 %v5567_v35, %v5496_v29  ;;  %v5569_v50 = vpop.f32.mrb[43].mxu1 }
 0xd63   : > { %v5570_v1 = vadd.f32 %v5569_v50, %v5496_v29 }
 0xd64   : > { %v5572_v4 = vmax.f32 %v5568_v44, 0.0 }
 0xd65   : > { %v5573_v12 = vmax.f32 %v5570_v1, 0.0 }
 0xd67   : > { %v5576_v2 = vcombine.low %v5572_v4, %v5573_v12 }
 0xd69   : > { %5578 = vst [vmem:[%s767_s26] sm:$0xff] %v5576_v2 }
 0xd6a PF: > { %s12197_s7 = sld [smem:[#allocation16_spill]] }
 0xd70   : > { %s36_s3 = sadd.s32 1, %s12197_s7  }
 0xd71   : > { %p33_p9 = scmp.ge.s32.totalorder %s36_s3, 4  }
 0xd73   :  { %35 = sbr.rel (!%p33_p9) target bundleno = 17 (0x11), region = 214 }
 0xd7a   :  { %5600 = vsyncpa [#allocation3], 1 }
 0xd7b   :  { %5602 = vsyncpa [#allocation3 + $0x1], 1 }
 0xd7c   :  { %5603 = vsyncpa [#allocation5], 1 }
 0xd7d   :  { %5604 = vsyncpa [#allocation8], 1 }
 0xd7e   :  { %5605 = vsyncpa [#allocation11], 1 }

</bundles_post_ra>
